<compile_context>
chip_gen: v7x
topology: tpu7x:2x2x1
jax: 0.10.0
libtpu: 0.0.40
codegen_flags: <defaults>
</compile_context>

<pallas_src>
import functools

import jax
import jax.numpy as jnp
from jax import lax
from jax.experimental import pallas as pl
from jax.experimental.pallas import tpu as pltpu

# ----------------------------- problem constants ----------------------------- #
KSIZE = 5                       # conv kernel size
CIN1, COUT1 = 3, 6              # conv1: 3 -> 6
CIN2, COUT2 = 6, 16             # conv2: 6 -> 16
FC1_IN, FC1_OUT = 400, 120      # fc1: 16*5*5 -> 120
FC2_OUT, FC3_OUT = 84, 10       # fc2: 120 -> 84, fc3: 84 -> 10

LANES = 128                     # lane padding for every matmul output
P1_W = 14                       # pooled1 spatial extent (28 -> 14 after 2x2 pool)
C2_W = 10                       # conv2 valid output extent (14 -> 10)
P2_W = 5                        # pooled2 spatial extent (10 -> 5)
P1_PLANE = P1_W * P1_W          # 196 pooled1 positions per sample
P2_STRIDE = 32                  # per-sample row stride of the pooled2 scratch
K1 = KSIZE * KSIZE * CIN1       # 75  conv1 im2col contraction depth (-> 128)
K2 = KSIZE * KSIZE * 8          # 200 conv2 staged contraction depth (-> 256)


def _round_up(x, m):
    return (x + m - 1) // m * m


# ------------------------------ the fused kernel ------------------------------ #

def _convnet_kernel(lhs1_ref, w1_ref, b1_ref, w2_ref, b2_ref,
                    fw1_ref, fb1_ref, fw2_ref, fb2_ref, fw3_ref, fb3_ref,
                    out_ref,
                    acc1_ref, p1_ref, lhs2_ref, acc2_ref, p2_ref, flhs_ref,
                    *, nb):
    f32 = jnp.float32
    bf16 = jnp.bfloat16

    m1 = nb * P1_PLANE                                     # valid pooled1 rows in this block
    m1r = _round_up(m1, 8)
    m2 = (nb - 1) * P1_PLANE + (C2_W - 1) * P1_W + C2_W    # conv2 rows (implicit GEMM)
    m2r = _round_up(m2, 8)

    # ---- stage 1: conv1 as ONE K=128 matmul over the 4 row-stacked pooling phases ------
    acc1_ref[...] = jnp.dot(lhs1_ref[...], w1_ref[...], preferred_element_type=f32)

    # 2x2 max-pool = elementwise max over the 4 phase row blocks; bias + ReLU applied once;
    # keep only the 6 (->8) real channels and store pooled1 as bf16 (conv2 LHS dtype).
    ph0 = acc1_ref[pl.ds(0 * m1r, m1r), pl.ds(0, 8)]
    ph1 = acc1_ref[pl.ds(1 * m1r, m1r), pl.ds(0, 8)]
    ph2 = acc1_ref[pl.ds(2 * m1r, m1r), pl.ds(0, 8)]
    ph3 = acc1_ref[pl.ds(3 * m1r, m1r), pl.ds(0, 8)]
    pooled1 = jnp.maximum(jnp.maximum(ph0, ph1), jnp.maximum(ph2, ph3))
    b1 = b1_ref[pl.ds(0, 1), pl.ds(0, 8)]
    p1_ref[pl.ds(0, m1r), :] = jnp.maximum(pooled1 + b1, 0.0).astype(bf16)
    p1_ref[pl.ds(m1r, 8), :] = jnp.zeros((8, 8), bf16)     # keep pad rows finite

    # ---- stage 2: conv2 as ONE K=200->256 matmul over a lane-packed staged LHS ---------
    lhs2_ref[...] = jnp.zeros_like(lhs2_ref)               # zero pad lanes 200..255 & tails
    for idx in range(KSIZE * KSIZE):                       # tap (kh, kw) -> lanes [idx*8, +8)
        kh, kw = idx // KSIZE, idx % KSIZE
        shift = kh * P1_W + kw
        lhs2_ref[pl.ds(0, m2r), pl.ds(idx * 8, 8)] = p1_ref[pl.ds(shift, m2r), :]
    acc2_ref[...] = jnp.dot(lhs2_ref[...], w2_ref[...], preferred_element_type=f32)

    # ---- pool2: vectorized 2x2 max with stride-2 row slices, bias hoisted, ReLU ---------
    b2 = jnp.broadcast_to(b2_ref[...], (P2_W, LANES))
    for n in range(nb):
        for h in range(P2_W):
            r0 = n * P1_PLANE + (2 * h) * P1_W             # conv2 row y = 2h
            r1 = r0 + P1_W                                 # conv2 row y = 2h + 1
            m00 = acc2_ref[pl.ds(r0, P2_W, stride=2), :]   # x = 0, 2, 4, 6, 8
            m01 = acc2_ref[pl.ds(r0 + 1, P2_W, stride=2), :]
            m10 = acc2_ref[pl.ds(r1, P2_W, stride=2), :]
            m11 = acc2_ref[pl.ds(r1 + 1, P2_W, stride=2), :]
            mx = jnp.maximum(jnp.maximum(m00, m01), jnp.maximum(m10, m11))
            p2_ref[pl.ds(n * P2_STRIDE + h * P2_W, P2_W), :] = jnp.maximum(mx + b2, 0.0)

    # ---- fc1/fc2/fc3: gather pooled2 into a compact (rows, 400->512) LHS, then three
    #      batched lane-dense matmuls and a single unmasked output store ------------------
    flhs_ref[...] = jnp.zeros_like(flhs_ref)
    for idx in range(KSIZE * KSIZE):                       # idx = h*5 + w -> lanes [idx*16, +16)
        flhs_ref[pl.ds(0, nb), pl.ds(idx * 16, 16)] = (
            p2_ref[pl.ds(idx, nb, stride=P2_STRIDE), pl.ds(0, 16)])

    h1 = jnp.maximum(jnp.dot(flhs_ref[...], fw1_ref[...], preferred_element_type=f32)
                     + fb1_ref[...], 0.0)
    h2 = jnp.maximum(jnp.dot(h1, fw2_ref[...], preferred_element_type=f32)
                     + fb2_ref[...], 0.0)
    out_ref[...] = jnp.dot(h2, fw3_ref[...], preferred_element_type=f32) + fb3_ref[...]


# ------------------------------ wrapper-side packing ------------------------------ #

def _pack_conv1_weight(w1):
    """(6,3,5,5) -> (128,128) bf16, row = (kh*5+kw)*3 + c, col = out channel."""
    wt = jnp.transpose(w1, (2, 3, 1, 0)).reshape(K1, COUT1)
    return jnp.pad(wt, ((0, LANES - K1), (0, LANES - COUT1))).astype(jnp.bfloat16)


def _pack_conv2_weight(w2):
    """(16,6,5,5) -> (256,128) bf16, row = (kh*5+kw)*8 + c, col = out channel."""
    wt = jnp.transpose(w2, (2, 3, 1, 0))                       # (5,5,6,16)
    wt = jnp.pad(wt, ((0, 0), (0, 0), (0, 8 - CIN2), (0, 0)))  # pad channels 6 -> 8
    wt = wt.reshape(K2, COUT2)
    return jnp.pad(wt, ((0, 256 - K2), (0, LANES - COUT2))).astype(jnp.bfloat16)


def _pack_fc1_weight(fw1):
    """(120,400) with PyTorch flatten index c*25+h*5+w -> (512,128) f32, row = (h*5+w)*16+c."""
    wt = fw1.reshape(FC1_OUT, COUT2, P2_W, P2_W)               # (o, c, h, w)
    wt = jnp.transpose(wt, (2, 3, 1, 0)).reshape(P2_W * P2_W * COUT2, FC1_OUT)
    return jnp.pad(wt, ((0, 512 - P2_W * P2_W * COUT2), (0, LANES - FC1_OUT)))


def _pack_fc_weight(fw):
    """(out, in) -> (128,128) f32, transposed + zero padded (zero rows keep pad lanes inert)."""
    o, i = fw.shape
    return jnp.pad(fw.T, ((0, LANES - i), (0, LANES - o)))


def _pad_bias(b):
    return jnp.pad(b, (0, LANES - b.shape[0])).reshape(1, LANES)


def _conv1_im2col(x, nblk, nb, m1r):
    """NCHW (N,3,32,32) -> (nblk * 4*m1r, 128) bf16 im2col LHS, one row block per 2x2-pool
    parity phase; within a phase: row = n_local*196 + i*14 + j, lane = (kh*5+kw)*3 + c."""
    n = x.shape[0]
    xh = jnp.transpose(x, (0, 2, 3, 1)).astype(jnp.float32)    # NHWC
    phases = []
    for dh in (0, 1):
        for dw in (0, 1):
            taps = []
            for kh in range(KSIZE):
                for kw in range(KSIZE):
                    taps.append(xh[:, dh + kh: dh + kh + 2 * P1_W: 2,
                                   dw + kw: dw + kw + 2 * P1_W: 2, :])   # (N,14,14,3)
            ph = jnp.stack(taps, axis=3).reshape(n, P1_PLANE, K1)
            ph = ph.reshape(nblk, nb * P1_PLANE, K1)
            ph = jnp.pad(ph, ((0, 0), (0, m1r - nb * P1_PLANE), (0, LANES - K1)))
            phases.append(ph)
    lhs1 = jnp.concatenate(phases, axis=1)                     # (nblk, 4*m1r, 128)
    return lhs1.reshape(nblk * 4 * m1r, LANES).astype(jnp.bfloat16)


def convnet_forward(x, params, *, block_batch=1):
    """x: (N,3,32,32) f32 NCHW -> (N,10) logits.  Whole network in one Pallas kernel; batch is
    split over a leading "parallel" grid axis (block_batch samples per program -> megacore on
    v7x).  Per-block VMEM is ~1.5 MB + ~0.9 MB/sample; raise block_batch only with headroom."""
    n = x.shape[0]
    assert n % block_batch == 0, "batch must be divisible by block_batch"
    nb = block_batch
    nblk = n // nb

    m1 = nb * P1_PLANE
    m1r = _round_up(m1, 8)
    l1 = 4 * m1r
    m2 = (nb - 1) * P1_PLANE + (C2_W - 1) * P1_W + C2_W
    m2r = _round_up(m2, 8)
    fr = _round_up(nb, 8)

    lhs1 = _conv1_im2col(x, nblk, nb, m1r)
    operands = (
        lhs1,
        _pack_conv1_weight(params["w1"]), _pad_bias(params["b1"]),
        _pack_conv2_weight(params["w2"]), _pad_bias(params["b2"]),
        _pack_fc1_weight(params["fw1"]), _pad_bias(params["fb1"]),
        _pack_fc_weight(params["fw2"]), _pad_bias(params["fb2"]),
        _pack_fc_weight(params["fw3"]), _pad_bias(params["fb3"]),
    )

    def _const_spec(shape):
        nd = len(shape)
        return pl.BlockSpec(shape, lambda b: (0,) * nd)

    in_specs = ([pl.BlockSpec((l1, LANES), lambda b: (b, 0))]
                + [_const_spec(op.shape) for op in operands[1:]])

    out = pl.pallas_call(
        functools.partial(_convnet_kernel, nb=nb),
        out_shape=jax.ShapeDtypeStruct((nblk * fr, LANES), jnp.float32),
        grid=(nblk,),
        in_specs=in_specs,
        out_specs=pl.BlockSpec((fr, LANES), lambda b: (b, 0)),
        scratch_shapes=[
            pltpu.VMEM((l1, LANES), jnp.float32),             # conv1 output (4 phases stacked)
            pltpu.VMEM((m1r + 8, 8), jnp.bfloat16),           # pooled1 (bf16, channels in lanes)
            pltpu.VMEM((m2r, 256), jnp.bfloat16),             # conv2 staged im2col LHS (K=256)
            pltpu.VMEM((m2r, LANES), jnp.float32),            # conv2 output
            pltpu.VMEM((nb * P2_STRIDE, LANES), jnp.float32),  # pooled2 (per-sample stride 32)
            pltpu.VMEM((fr, 512), jnp.float32),               # fc1 LHS (batch, 400 -> 512)
        ],
        compiler_params=pltpu.CompilerParams(
            dimension_semantics=("parallel",),
            vmem_limit_bytes=32 * 1024 * 1024,
        ),
    )(*operands)

    return out.reshape(nblk, fr, LANES)[:, :nb, :FC3_OUT].reshape(n, FC3_OUT)


# --------------------------- pure-JAX reference (f32) --------------------------- #

def reference_forward(x, p):
    def conv(x, w, b):
        y = lax.conv_general_dilated(x, w, (1, 1), "VALID",
                                     dimension_numbers=("NCHW", "OIHW", "NCHW"))
        return jax.nn.relu(y + b[None, :, None, None])

    def pool(x):
        n, c, h, w = x.shape
        return x.reshape(n, c, h // 2, 2, w // 2, 2).max(axis=(3, 5))

    x = pool(conv(x, p["w1"], p["b1"]))
    x = pool(conv(x, p["w2"], p["b2"]))
    x = x.reshape(x.shape[0], -1)
    x = jax.nn.relu(x @ p["fw1"].T + p["fb1"])
    x = jax.nn.relu(x @ p["fw2"].T + p["fb2"])
    return x @ p["fw3"].T + p["fb3"]


# ---------------------------------- main ---------------------------------------- #

if __name__ == "__main__":
    key = jax.random.PRNGKey(0)
    ks = jax.random.split(key, 11)

    # Deterministic synthetic parameters (shapes from ConvNet.__init__).
    params = {
        "w1": 0.10 * jax.random.normal(ks[0], (6, 3, 5, 5), jnp.float32),
        "b1": 0.10 * jax.random.normal(ks[1], (6,), jnp.float32),
        "w2": 0.10 * jax.random.normal(ks[2], (16, 6, 5, 5), jnp.float32),
        "b2": 0.10 * jax.random.normal(ks[3], (16,), jnp.float32),
        "fw1": 0.05 * jax.random.normal(ks[4], (120, 400), jnp.float32),
        "fb1": 0.05 * jax.random.normal(ks[5], (120,), jnp.float32),
        "fw2": 0.05 * jax.random.normal(ks[6], (84, 120), jnp.float32),
        "fb2": 0.05 * jax.random.normal(ks[7], (84,), jnp.float32),
        "fw3": 0.05 * jax.random.normal(ks[8], (10, 84), jnp.float32),
        "fb3": 0.05 * jax.random.normal(ks[9], (10,), jnp.float32),
    }

    # CIFAR-like input: the view(-1, 16*5*5) implies a 3x32x32 spatial input.
    x = jax.random.normal(ks[10], (2, 3, 32, 32), jnp.float32)

    fwd = jax.jit(convnet_forward)
    out = jax.block_until_ready(fwd(x, params))
    assert out.shape == (2, 10), out.shape

    ref = reference_forward(x, params)
    max_err = float(jnp.max(jnp.abs(out - ref)))
    # bf16 MXU operands (f32 accumulation) => relaxed tolerance vs. the f32 reference.
    assert jnp.allclose(out, ref, atol=3e-2, rtol=3e-2), max_err

    print("KERNEL_OK")
</pallas_src>

<mosaic_0001>
module attributes {stable_mosaic.version = 11 : i64} {
  func.func @_convnet_kernel(%arg0: i32, %arg1: memref<800x128xbf16, #tpu.memory_space<vmem>>, %arg2: memref<128x128xbf16, #tpu.memory_space<vmem>>, %arg3: memref<1x128xf32, #tpu.memory_space<vmem>>, %arg4: memref<256x128xbf16, #tpu.memory_space<vmem>>, %arg5: memref<1x128xf32, #tpu.memory_space<vmem>>, %arg6: memref<512x128xf32, #tpu.memory_space<vmem>>, %arg7: memref<1x128xf32, #tpu.memory_space<vmem>>, %arg8: memref<128x128xf32, #tpu.memory_space<vmem>>, %arg9: memref<1x128xf32, #tpu.memory_space<vmem>>, %arg10: memref<128x128xf32, #tpu.memory_space<vmem>>, %arg11: memref<1x128xf32, #tpu.memory_space<vmem>>, %arg12: memref<8x128xf32, #tpu.memory_space<vmem>>, %arg13: memref<800x128xf32, #tpu.memory_space<vmem>>, %arg14: memref<208x8xbf16, #tpu.memory_space<vmem>>, %arg15: memref<136x256xbf16, #tpu.memory_space<vmem>>, %arg16: memref<136x128xf32, #tpu.memory_space<vmem>>, %arg17: memref<32x128xf32, #tpu.memory_space<vmem>>, %arg18: memref<8x512xf32, #tpu.memory_space<vmem>>) attributes {dimension_semantics = [#tpu.dimension_semantics<parallel>], iteration_bounds = array<i64: 2>, scalar_prefetch = 0 : i64, scratch_operands = 6 : i64, tpu.core_type = #tpu.core_type<tc>, window_params = [{transform_indices = @transform_0, window_bounds = array<i64: 800, 128>}, {pipeline_mode = #tpu.pipeline_mode<synchronous>, transform_indices = @transform_1, window_bounds = array<i64: 128, 128>}, {pipeline_mode = #tpu.pipeline_mode<synchronous>, transform_indices = @transform_2, window_bounds = array<i64: 1, 128>}, {pipeline_mode = #tpu.pipeline_mode<synchronous>, transform_indices = @transform_3, window_bounds = array<i64: 256, 128>}, {pipeline_mode = #tpu.pipeline_mode<synchronous>, transform_indices = @transform_4, window_bounds = array<i64: 1, 128>}, {pipeline_mode = #tpu.pipeline_mode<synchronous>, transform_indices = @transform_5, window_bounds = array<i64: 512, 128>}, {pipeline_mode = #tpu.pipeline_mode<synchronous>, transform_indices = @transform_6, window_bounds = array<i64: 1, 128>}, {pipeline_mode = #tpu.pipeline_mode<synchronous>, transform_indices = @transform_7, window_bounds = array<i64: 128, 128>}, {pipeline_mode = #tpu.pipeline_mode<synchronous>, transform_indices = @transform_8, window_bounds = array<i64: 1, 128>}, {pipeline_mode = #tpu.pipeline_mode<synchronous>, transform_indices = @transform_9, window_bounds = array<i64: 128, 128>}, {pipeline_mode = #tpu.pipeline_mode<synchronous>, transform_indices = @transform_10, window_bounds = array<i64: 1, 128>}, {transform_indices = @transform_11, window_bounds = array<i64: 8, 128>}]} {
    %c0 = arith.constant 0 : index
    %c0_0 = arith.constant 0 : index
    %0 = vector.load %arg1[%c0, %c0_0] : memref<800x128xbf16, #tpu.memory_space<vmem>>, vector<800x128xbf16>
    %c0_1 = arith.constant 0 : index
    %c0_2 = arith.constant 0 : index
    %1 = vector.load %arg2[%c0_1, %c0_2] : memref<128x128xbf16, #tpu.memory_space<vmem>>, vector<128x128xbf16>
    %cst = arith.constant dense<0.000000e+00> : vector<800x128xf32>
    %2 = tpu.matmul %0, %1, %cst {dimension_numbers = #tpu.dot_dimension_numbers<[1], [0], [0], [1], [0, 0, 1, 1], [], []>} : vector<800x128xbf16>, vector<128x128xbf16>, vector<800x128xf32> -> vector<800x128xf32>
    %c0_3 = arith.constant 0 : index
    %c0_4 = arith.constant 0 : index
    %3 = vector.load %arg13[%c0_3, %c0_4] : memref<800x128xf32, #tpu.memory_space<vmem>>, vector<800x128xf32>
    tpu.vector_store %arg13[%c0_3, %c0_4], %2 {strides = array<i32>} : memref<800x128xf32, #tpu.memory_space<vmem>>, vector<800x128xf32>,
    %c0_5 = arith.constant 0 : index
    %c0_6 = arith.constant 0 : index
    %4 = vector.load %arg13[%c0_5, %c0_6] : memref<800x128xf32, #tpu.memory_space<vmem>>, vector<200x8xf32>
    %c200 = arith.constant 200 : index
    %c0_7 = arith.constant 0 : index
    %5 = vector.load %arg13[%c200, %c0_7] : memref<800x128xf32, #tpu.memory_space<vmem>>, vector<200x8xf32>
    %c400 = arith.constant 400 : index
    %c0_8 = arith.constant 0 : index
    %6 = vector.load %arg13[%c400, %c0_8] : memref<800x128xf32, #tpu.memory_space<vmem>>, vector<200x8xf32>
    %c600 = arith.constant 600 : index
    %c0_9 = arith.constant 0 : index
    %7 = vector.load %arg13[%c600, %c0_9] : memref<800x128xf32, #tpu.memory_space<vmem>>, vector<200x8xf32>
    %8 = arith.maximumf %4, %5 : vector<200x8xf32>
    %9 = arith.maximumf %6, %7 : vector<200x8xf32>
    %10 = arith.maximumf %8, %9 : vector<200x8xf32>
    %c0_10 = arith.constant 0 : index
    %c0_11 = arith.constant 0 : index
    %11 = vector.load %arg3[%c0_10, %c0_11] : memref<1x128xf32, #tpu.memory_space<vmem>>, vector<1x8xf32>
    %12 = vector.broadcast %11 : vector<1x8xf32> to vector<200x8xf32>
    %13 = arith.addf %10, %12 : vector<200x8xf32>
    %cst_12 = arith.constant 0.000000e+00 : f32
    %14 = vector.broadcast %cst_12 : f32 to vector<200x8xf32>
    %15 = arith.maximumf %13, %14 : vector<200x8xf32>
    %16 = arith.truncf %15 : vector<200x8xf32> to vector<200x8xbf16>
    %c0_13 = arith.constant 0 : index
    %c0_14 = arith.constant 0 : index
    %17 = vector.load %arg14[%c0_13, %c0_14] : memref<208x8xbf16, #tpu.memory_space<vmem>>, vector<200x8xbf16>
    tpu.vector_store %arg14[%c0_13, %c0_14], %16 {strides = array<i32>} : memref<208x8xbf16, #tpu.memory_space<vmem>>, vector<200x8xbf16>,
    %cst_15 = arith.constant 0.000000e+00 : bf16
    %18 = vector.broadcast %cst_15 : bf16 to vector<8x8xbf16>
    %c200_16 = arith.constant 200 : index
    %c0_17 = arith.constant 0 : index
    %19 = vector.load %arg14[%c200_16, %c0_17] : memref<208x8xbf16, #tpu.memory_space<vmem>>, vector<8x8xbf16>
    tpu.vector_store %arg14[%c200_16, %c0_17], %18 {strides = array<i32>} : memref<208x8xbf16, #tpu.memory_space<vmem>>, vector<8x8xbf16>,
    %cst_18 = arith.constant 0.000000e+00 : bf16
    %20 = vector.broadcast %cst_18 : bf16 to vector<136x256xbf16>
    %c0_19 = arith.constant 0 : index
    %c0_20 = arith.constant 0 : index
    %21 = vector.load %arg15[%c0_19, %c0_20] : memref<136x256xbf16, #tpu.memory_space<vmem>>, vector<136x256xbf16>
    tpu.vector_store %arg15[%c0_19, %c0_20], %20 {strides = array<i32>} : memref<136x256xbf16, #tpu.memory_space<vmem>>, vector<136x256xbf16>,
    %c0_21 = arith.constant 0 : index
    %c0_22 = arith.constant 0 : index
    %22 = vector.load %arg14[%c0_21, %c0_22] : memref<208x8xbf16, #tpu.memory_space<vmem>>, vector<136x8xbf16>
    %c0_23 = arith.constant 0 : index
    %c0_24 = arith.constant 0 : index
    %23 = vector.load %arg15[%c0_23, %c0_24] : memref<136x256xbf16, #tpu.memory_space<vmem>>, vector<136x8xbf16>
    tpu.vector_store %arg15[%c0_23, %c0_24], %22 {strides = array<i32>} : memref<136x256xbf16, #tpu.memory_space<vmem>>, vector<136x8xbf16>,
    %c1 = arith.constant 1 : index
    %c0_25 = arith.constant 0 : index
    %24 = vector.load %arg14[%c1, %c0_25] : memref<208x8xbf16, #tpu.memory_space<vmem>>, vector<136x8xbf16>
    %c0_26 = arith.constant 0 : index
    %c8 = arith.constant 8 : index
    %25 = vector.load %arg15[%c0_26, %c8] : memref<136x256xbf16, #tpu.memory_space<vmem>>, vector<136x8xbf16>
    tpu.vector_store %arg15[%c0_26, %c8], %24 {strides = array<i32>} : memref<136x256xbf16, #tpu.memory_space<vmem>>, vector<136x8xbf16>,
    %c2 = arith.constant 2 : index
    %c0_27 = arith.constant 0 : index
    %26 = vector.load %arg14[%c2, %c0_27] : memref<208x8xbf16, #tpu.memory_space<vmem>>, vector<136x8xbf16>
    %c0_28 = arith.constant 0 : index
    %c16 = arith.constant 16 : index
    %27 = vector.load %arg15[%c0_28, %c16] : memref<136x256xbf16, #tpu.memory_space<vmem>>, vector<136x8xbf16>
    tpu.vector_store %arg15[%c0_28, %c16], %26 {strides = array<i32>} : memref<136x256xbf16, #tpu.memory_space<vmem>>, vector<136x8xbf16>,
    %c3 = arith.constant 3 : index
    %c0_29 = arith.constant 0 : index
    %28 = vector.load %arg14[%c3, %c0_29] : memref<208x8xbf16, #tpu.memory_space<vmem>>, vector<136x8xbf16>
    %c0_30 = arith.constant 0 : index
    %c24 = arith.constant 24 : index
    %29 = vector.load %arg15[%c0_30, %c24] : memref<136x256xbf16, #tpu.memory_space<vmem>>, vector<136x8xbf16>
    tpu.vector_store %arg15[%c0_30, %c24], %28 {strides = array<i32>} : memref<136x256xbf16, #tpu.memory_space<vmem>>, vector<136x8xbf16>,
    %c4 = arith.constant 4 : index
    %c0_31 = arith.constant 0 : index
    %30 = vector.load %arg14[%c4, %c0_31] : memref<208x8xbf16, #tpu.memory_space<vmem>>, vector<136x8xbf16>
    %c0_32 = arith.constant 0 : index
    %c32 = arith.constant 32 : index
    %31 = vector.load %arg15[%c0_32, %c32] : memref<136x256xbf16, #tpu.memory_space<vmem>>, vector<136x8xbf16>
    tpu.vector_store %arg15[%c0_32, %c32], %30 {strides = array<i32>} : memref<136x256xbf16, #tpu.memory_space<vmem>>, vector<136x8xbf16>,
    %c14 = arith.constant 14 : index
    %c0_33 = arith.constant 0 : index
    %32 = vector.load %arg14[%c14, %c0_33] : memref<208x8xbf16, #tpu.memory_space<vmem>>, vector<136x8xbf16>
    %c0_34 = arith.constant 0 : index
    %c40 = arith.constant 40 : index
    %33 = vector.load %arg15[%c0_34, %c40] : memref<136x256xbf16, #tpu.memory_space<vmem>>, vector<136x8xbf16>
    tpu.vector_store %arg15[%c0_34, %c40], %32 {strides = array<i32>} : memref<136x256xbf16, #tpu.memory_space<vmem>>, vector<136x8xbf16>,
    %c15 = arith.constant 15 : index
    %c0_35 = arith.constant 0 : index
    %34 = vector.load %arg14[%c15, %c0_35] : memref<208x8xbf16, #tpu.memory_space<vmem>>, vector<136x8xbf16>
    %c0_36 = arith.constant 0 : index
    %c48 = arith.constant 48 : index
    %35 = vector.load %arg15[%c0_36, %c48] : memref<136x256xbf16, #tpu.memory_space<vmem>>, vector<136x8xbf16>
    tpu.vector_store %arg15[%c0_36, %c48], %34 {strides = array<i32>} : memref<136x256xbf16, #tpu.memory_space<vmem>>, vector<136x8xbf16>,
    %c16_37 = arith.constant 16 : index
    %c0_38 = arith.constant 0 : index
    %36 = vector.load %arg14[%c16_37, %c0_38] : memref<208x8xbf16, #tpu.memory_space<vmem>>, vector<136x8xbf16>
    %c0_39 = arith.constant 0 : index
    %c56 = arith.constant 56 : index
    %37 = vector.load %arg15[%c0_39, %c56] : memref<136x256xbf16, #tpu.memory_space<vmem>>, vector<136x8xbf16>
    tpu.vector_store %arg15[%c0_39, %c56], %36 {strides = array<i32>} : memref<136x256xbf16, #tpu.memory_space<vmem>>, vector<136x8xbf16>,
    %c17 = arith.constant 17 : index
    %c0_40 = arith.constant 0 : index
    %38 = vector.load %arg14[%c17, %c0_40] : memref<208x8xbf16, #tpu.memory_space<vmem>>, vector<136x8xbf16>
    %c0_41 = arith.constant 0 : index
    %c64 = arith.constant 64 : index
    %39 = vector.load %arg15[%c0_41, %c64] : memref<136x256xbf16, #tpu.memory_space<vmem>>, vector<136x8xbf16>
    tpu.vector_store %arg15[%c0_41, %c64], %38 {strides = array<i32>} : memref<136x256xbf16, #tpu.memory_space<vmem>>, vector<136x8xbf16>,
    %c18 = arith.constant 18 : index
    %c0_42 = arith.constant 0 : index
    %40 = vector.load %arg14[%c18, %c0_42] : memref<208x8xbf16, #tpu.memory_space<vmem>>, vector<136x8xbf16>
    %c0_43 = arith.constant 0 : index
    %c72 = arith.constant 72 : index
    %41 = vector.load %arg15[%c0_43, %c72] : memref<136x256xbf16, #tpu.memory_space<vmem>>, vector<136x8xbf16>
    tpu.vector_store %arg15[%c0_43, %c72], %40 {strides = array<i32>} : memref<136x256xbf16, #tpu.memory_space<vmem>>, vector<136x8xbf16>,
    %c28 = arith.constant 28 : index
    %c0_44 = arith.constant 0 : index
    %42 = vector.load %arg14[%c28, %c0_44] : memref<208x8xbf16, #tpu.memory_space<vmem>>, vector<136x8xbf16>
    %c0_45 = arith.constant 0 : index
    %c80 = arith.constant 80 : index
    %43 = vector.load %arg15[%c0_45, %c80] : memref<136x256xbf16, #tpu.memory_space<vmem>>, vector<136x8xbf16>
    tpu.vector_store %arg15[%c0_45, %c80], %42 {strides = array<i32>} : memref<136x256xbf16, #tpu.memory_space<vmem>>, vector<136x8xbf16>,
    %c29 = arith.constant 29 : index
    %c0_46 = arith.constant 0 : index
    %44 = vector.load %arg14[%c29, %c0_46] : memref<208x8xbf16, #tpu.memory_space<vmem>>, vector<136x8xbf16>
    %c0_47 = arith.constant 0 : index
    %c88 = arith.constant 88 : index
    %45 = vector.load %arg15[%c0_47, %c88] : memref<136x256xbf16, #tpu.memory_space<vmem>>, vector<136x8xbf16>
    tpu.vector_store %arg15[%c0_47, %c88], %44 {strides = array<i32>} : memref<136x256xbf16, #tpu.memory_space<vmem>>, vector<136x8xbf16>,
    %c30 = arith.constant 30 : index
    %c0_48 = arith.constant 0 : index
    %46 = vector.load %arg14[%c30, %c0_48] : memref<208x8xbf16, #tpu.memory_space<vmem>>, vector<136x8xbf16>
    %c0_49 = arith.constant 0 : index
    %c96 = arith.constant 96 : index
    %47 = vector.load %arg15[%c0_49, %c96] : memref<136x256xbf16, #tpu.memory_space<vmem>>, vector<136x8xbf16>
    tpu.vector_store %arg15[%c0_49, %c96], %46 {strides = array<i32>} : memref<136x256xbf16, #tpu.memory_space<vmem>>, vector<136x8xbf16>,
    %c31 = arith.constant 31 : index
    %c0_50 = arith.constant 0 : index
    %48 = vector.load %arg14[%c31, %c0_50] : memref<208x8xbf16, #tpu.memory_space<vmem>>, vector<136x8xbf16>
    %c0_51 = arith.constant 0 : index
    %c104 = arith.constant 104 : index
    %49 = vector.load %arg15[%c0_51, %c104] : memref<136x256xbf16, #tpu.memory_space<vmem>>, vector<136x8xbf16>
    tpu.vector_store %arg15[%c0_51, %c104], %48 {strides = array<i32>} : memref<136x256xbf16, #tpu.memory_space<vmem>>, vector<136x8xbf16>,
    %c32_52 = arith.constant 32 : index
    %c0_53 = arith.constant 0 : index
    %50 = vector.load %arg14[%c32_52, %c0_53] : memref<208x8xbf16, #tpu.memory_space<vmem>>, vector<136x8xbf16>
    %c0_54 = arith.constant 0 : index
    %c112 = arith.constant 112 : index
    %51 = vector.load %arg15[%c0_54, %c112] : memref<136x256xbf16, #tpu.memory_space<vmem>>, vector<136x8xbf16>
    tpu.vector_store %arg15[%c0_54, %c112], %50 {strides = array<i32>} : memref<136x256xbf16, #tpu.memory_space<vmem>>, vector<136x8xbf16>,
    %c42 = arith.constant 42 : index
    %c0_55 = arith.constant 0 : index
    %52 = vector.load %arg14[%c42, %c0_55] : memref<208x8xbf16, #tpu.memory_space<vmem>>, vector<136x8xbf16>
    %c0_56 = arith.constant 0 : index
    %c120 = arith.constant 120 : index
    %53 = vector.load %arg15[%c0_56, %c120] : memref<136x256xbf16, #tpu.memory_space<vmem>>, vector<136x8xbf16>
    tpu.vector_store %arg15[%c0_56, %c120], %52 {strides = array<i32>} : memref<136x256xbf16, #tpu.memory_space<vmem>>, vector<136x8xbf16>,
    %c43 = arith.constant 43 : index
    %c0_57 = arith.constant 0 : index
    %54 = vector.load %arg14[%c43, %c0_57] : memref<208x8xbf16, #tpu.memory_space<vmem>>, vector<136x8xbf16>
    %c0_58 = arith.constant 0 : index
    %c128 = arith.constant 128 : index
    %55 = vector.load %arg15[%c0_58, %c128] : memref<136x256xbf16, #tpu.memory_space<vmem>>, vector<136x8xbf16>
    tpu.vector_store %arg15[%c0_58, %c128], %54 {strides = array<i32>} : memref<136x256xbf16, #tpu.memory_space<vmem>>, vector<136x8xbf16>,
    %c44 = arith.constant 44 : index
    %c0_59 = arith.constant 0 : index
    %56 = vector.load %arg14[%c44, %c0_59] : memref<208x8xbf16, #tpu.memory_space<vmem>>, vector<136x8xbf16>
    %c0_60 = arith.constant 0 : index
    %c136 = arith.constant 136 : index
    %57 = vector.load %arg15[%c0_60, %c136] : memref<136x256xbf16, #tpu.memory_space<vmem>>, vector<136x8xbf16>
    tpu.vector_store %arg15[%c0_60, %c136], %56 {strides = array<i32>} : memref<136x256xbf16, #tpu.memory_space<vmem>>, vector<136x8xbf16>,
    %c45 = arith.constant 45 : index
    %c0_61 = arith.constant 0 : index
    %58 = vector.load %arg14[%c45, %c0_61] : memref<208x8xbf16, #tpu.memory_space<vmem>>, vector<136x8xbf16>
    %c0_62 = arith.constant 0 : index
    %c144 = arith.constant 144 : index
    %59 = vector.load %arg15[%c0_62, %c144] : memref<136x256xbf16, #tpu.memory_space<vmem>>, vector<136x8xbf16>
    tpu.vector_store %arg15[%c0_62, %c144], %58 {strides = array<i32>} : memref<136x256xbf16, #tpu.memory_space<vmem>>, vector<136x8xbf16>,
    %c46 = arith.constant 46 : index
    %c0_63 = arith.constant 0 : index
    %60 = vector.load %arg14[%c46, %c0_63] : memref<208x8xbf16, #tpu.memory_space<vmem>>, vector<136x8xbf16>
    %c0_64 = arith.constant 0 : index
    %c152 = arith.constant 152 : index
    %61 = vector.load %arg15[%c0_64, %c152] : memref<136x256xbf16, #tpu.memory_space<vmem>>, vector<136x8xbf16>
    tpu.vector_store %arg15[%c0_64, %c152], %60 {strides = array<i32>} : memref<136x256xbf16, #tpu.memory_space<vmem>>, vector<136x8xbf16>,
    %c56_65 = arith.constant 56 : index
    %c0_66 = arith.constant 0 : index
    %62 = vector.load %arg14[%c56_65, %c0_66] : memref<208x8xbf16, #tpu.memory_space<vmem>>, vector<136x8xbf16>
    %c0_67 = arith.constant 0 : index
    %c160 = arith.constant 160 : index
    %63 = vector.load %arg15[%c0_67, %c160] : memref<136x256xbf16, #tpu.memory_space<vmem>>, vector<136x8xbf16>
    tpu.vector_store %arg15[%c0_67, %c160], %62 {strides = array<i32>} : memref<136x256xbf16, #tpu.memory_space<vmem>>, vector<136x8xbf16>,
    %c57 = arith.constant 57 : index
    %c0_68 = arith.constant 0 : index
    %64 = vector.load %arg14[%c57, %c0_68] : memref<208x8xbf16, #tpu.memory_space<vmem>>, vector<136x8xbf16>
    %c0_69 = arith.constant 0 : index
    %c168 = arith.constant 168 : index
    %65 = vector.load %arg15[%c0_69, %c168] : memref<136x256xbf16, #tpu.memory_space<vmem>>, vector<136x8xbf16>
    tpu.vector_store %arg15[%c0_69, %c168], %64 {strides = array<i32>} : memref<136x256xbf16, #tpu.memory_space<vmem>>, vector<136x8xbf16>,
    %c58 = arith.constant 58 : index
    %c0_70 = arith.constant 0 : index
    %66 = vector.load %arg14[%c58, %c0_70] : memref<208x8xbf16, #tpu.memory_space<vmem>>, vector<136x8xbf16>
    %c0_71 = arith.constant 0 : index
    %c176 = arith.constant 176 : index
    %67 = vector.load %arg15[%c0_71, %c176] : memref<136x256xbf16, #tpu.memory_space<vmem>>, vector<136x8xbf16>
    tpu.vector_store %arg15[%c0_71, %c176], %66 {strides = array<i32>} : memref<136x256xbf16, #tpu.memory_space<vmem>>, vector<136x8xbf16>,
    %c59 = arith.constant 59 : index
    %c0_72 = arith.constant 0 : index
    %68 = vector.load %arg14[%c59, %c0_72] : memref<208x8xbf16, #tpu.memory_space<vmem>>, vector<136x8xbf16>
    %c0_73 = arith.constant 0 : index
    %c184 = arith.constant 184 : index
    %69 = vector.load %arg15[%c0_73, %c184] : memref<136x256xbf16, #tpu.memory_space<vmem>>, vector<136x8xbf16>
    tpu.vector_store %arg15[%c0_73, %c184], %68 {strides = array<i32>} : memref<136x256xbf16, #tpu.memory_space<vmem>>, vector<136x8xbf16>,
    %c60 = arith.constant 60 : index
    %c0_74 = arith.constant 0 : index
    %70 = vector.load %arg14[%c60, %c0_74] : memref<208x8xbf16, #tpu.memory_space<vmem>>, vector<136x8xbf16>
    %c0_75 = arith.constant 0 : index
    %c192 = arith.constant 192 : index
    %71 = vector.load %arg15[%c0_75, %c192] : memref<136x256xbf16, #tpu.memory_space<vmem>>, vector<136x8xbf16>
    tpu.vector_store %arg15[%c0_75, %c192], %70 {strides = array<i32>} : memref<136x256xbf16, #tpu.memory_space<vmem>>, vector<136x8xbf16>,
    %c0_76 = arith.constant 0 : index
    %c0_77 = arith.constant 0 : index
    %72 = vector.load %arg15[%c0_76, %c0_77] : memref<136x256xbf16, #tpu.memory_space<vmem>>, vector<136x256xbf16>
    %c0_78 = arith.constant 0 : index
    %c0_79 = arith.constant 0 : index
    %73 = vector.load %arg4[%c0_78, %c0_79] : memref<256x128xbf16, #tpu.memory_space<vmem>>, vector<256x128xbf16>
    %cst_80 = arith.constant dense<0.000000e+00> : vector<136x128xf32>
    %74 = tpu.matmul %72, %73, %cst_80 {dimension_numbers = #tpu.dot_dimension_numbers<[1], [0], [0], [1], [0, 0, 1, 1], [], []>} : vector<136x256xbf16>, vector<256x128xbf16>, vector<136x128xf32> -> vector<136x128xf32>
    %c0_81 = arith.constant 0 : index
    %c0_82 = arith.constant 0 : index
    %75 = vector.load %arg16[%c0_81, %c0_82] : memref<136x128xf32, #tpu.memory_space<vmem>>, vector<136x128xf32>
    tpu.vector_store %arg16[%c0_81, %c0_82], %74 {strides = array<i32>} : memref<136x128xf32, #tpu.memory_space<vmem>>, vector<136x128xf32>,
    %c0_83 = arith.constant 0 : index
    %c0_84 = arith.constant 0 : index
    %76 = vector.load %arg5[%c0_83, %c0_84] : memref<1x128xf32, #tpu.memory_space<vmem>>, vector<1x128xf32>
    %77 = vector.shape_cast %76 : vector<1x128xf32> to vector<1x128xf32>
    %78 = vector.broadcast %77 : vector<1x128xf32> to vector<5x128xf32>
    %c0_85 = arith.constant 0 : index
    %c0_86 = arith.constant 0 : index
    %79 = tpu.strided_load %arg16[%c0_85, %c0_86] {strides = array<i32: 2, 1>} : memref<136x128xf32, #tpu.memory_space<vmem>>, vector<5x128xf32>
    %c1_87 = arith.constant 1 : index
    %c0_88 = arith.constant 0 : index
    %80 = tpu.strided_load %arg16[%c1_87, %c0_88] {strides = array<i32: 2, 1>} : memref<136x128xf32, #tpu.memory_space<vmem>>, vector<5x128xf32>
    %c14_89 = arith.constant 14 : index
    %c0_90 = arith.constant 0 : index
    %81 = tpu.strided_load %arg16[%c14_89, %c0_90] {strides = array<i32: 2, 1>} : memref<136x128xf32, #tpu.memory_space<vmem>>, vector<5x128xf32>
    %c15_91 = arith.constant 15 : index
    %c0_92 = arith.constant 0 : index
    %82 = tpu.strided_load %arg16[%c15_91, %c0_92] {strides = array<i32: 2, 1>} : memref<136x128xf32, #tpu.memory_space<vmem>>, vector<5x128xf32>
    %83 = arith.maximumf %79, %80 : vector<5x128xf32>
    %84 = arith.maximumf %81, %82 : vector<5x128xf32>
    %85 = arith.maximumf %83, %84 : vector<5x128xf32>
    %86 = arith.addf %85, %78 : vector<5x128xf32>
    %cst_93 = arith.constant 0.000000e+00 : f32
    %87 = vector.broadcast %cst_93 : f32 to vector<5x128xf32>
    %88 = arith.maximumf %86, %87 : vector<5x128xf32>
    %c0_94 = arith.constant 0 : index
    %c0_95 = arith.constant 0 : index
    %89 = vector.load %arg17[%c0_94, %c0_95] : memref<32x128xf32, #tpu.memory_space<vmem>>, vector<5x128xf32>
    tpu.vector_store %arg17[%c0_94, %c0_95], %88 {strides = array<i32>} : memref<32x128xf32, #tpu.memory_space<vmem>>, vector<5x128xf32>,
    %c28_96 = arith.constant 28 : index
    %c0_97 = arith.constant 0 : index
    %90 = tpu.strided_load %arg16[%c28_96, %c0_97] {strides = array<i32: 2, 1>} : memref<136x128xf32, #tpu.memory_space<vmem>>, vector<5x128xf32>
    %c29_98 = arith.constant 29 : index
    %c0_99 = arith.constant 0 : index
    %91 = tpu.strided_load %arg16[%c29_98, %c0_99] {strides = array<i32: 2, 1>} : memref<136x128xf32, #tpu.memory_space<vmem>>, vector<5x128xf32>
    %c42_100 = arith.constant 42 : index
    %c0_101 = arith.constant 0 : index
    %92 = tpu.strided_load %arg16[%c42_100, %c0_101] {strides = array<i32: 2, 1>} : memref<136x128xf32, #tpu.memory_space<vmem>>, vector<5x128xf32>
    %c43_102 = arith.constant 43 : index
    %c0_103 = arith.constant 0 : index
    %93 = tpu.strided_load %arg16[%c43_102, %c0_103] {strides = array<i32: 2, 1>} : memref<136x128xf32, #tpu.memory_space<vmem>>, vector<5x128xf32>
    %94 = arith.maximumf %90, %91 : vector<5x128xf32>
    %95 = arith.maximumf %92, %93 : vector<5x128xf32>
    %96 = arith.maximumf %94, %95 : vector<5x128xf32>
    %97 = arith.addf %96, %78 : vector<5x128xf32>
    %cst_104 = arith.constant 0.000000e+00 : f32
    %98 = vector.broadcast %cst_104 : f32 to vector<5x128xf32>
    %99 = arith.maximumf %97, %98 : vector<5x128xf32>
    %c5 = arith.constant 5 : index
    %c0_105 = arith.constant 0 : index
    %100 = vector.load %arg17[%c5, %c0_105] : memref<32x128xf32, #tpu.memory_space<vmem>>, vector<5x128xf32>
    tpu.vector_store %arg17[%c5, %c0_105], %99 {strides = array<i32>} : memref<32x128xf32, #tpu.memory_space<vmem>>, vector<5x128xf32>,
    %c56_106 = arith.constant 56 : index
    %c0_107 = arith.constant 0 : index
    %101 = tpu.strided_load %arg16[%c56_106, %c0_107] {strides = array<i32: 2, 1>} : memref<136x128xf32, #tpu.memory_space<vmem>>, vector<5x128xf32>
    %c57_108 = arith.constant 57 : index
    %c0_109 = arith.constant 0 : index
    %102 = tpu.strided_load %arg16[%c57_108, %c0_109] {strides = array<i32: 2, 1>} : memref<136x128xf32, #tpu.memory_space<vmem>>, vector<5x128xf32>
    %c70 = arith.constant 70 : index
    %c0_110 = arith.constant 0 : index
    %103 = tpu.strided_load %arg16[%c70, %c0_110] {strides = array<i32: 2, 1>} : memref<136x128xf32, #tpu.memory_space<vmem>>, vector<5x128xf32>
    %c71 = arith.constant 71 : index
    %c0_111 = arith.constant 0 : index
    %104 = tpu.strided_load %arg16[%c71, %c0_111] {strides = array<i32: 2, 1>} : memref<136x128xf32, #tpu.memory_space<vmem>>, vector<5x128xf32>
    %105 = arith.maximumf %101, %102 : vector<5x128xf32>
    %106 = arith.maximumf %103, %104 : vector<5x128xf32>
    %107 = arith.maximumf %105, %106 : vector<5x128xf32>
    %108 = arith.addf %107, %78 : vector<5x128xf32>
    %cst_112 = arith.constant 0.000000e+00 : f32
    %109 = vector.broadcast %cst_112 : f32 to vector<5x128xf32>
    %110 = arith.maximumf %108, %109 : vector<5x128xf32>
    %c10 = arith.constant 10 : index
    %c0_113 = arith.constant 0 : index
    %111 = vector.load %arg17[%c10, %c0_113] : memref<32x128xf32, #tpu.memory_space<vmem>>, vector<5x128xf32>
    tpu.vector_store %arg17[%c10, %c0_113], %110 {strides = array<i32>} : memref<32x128xf32, #tpu.memory_space<vmem>>, vector<5x128xf32>,
    %c84 = arith.constant 84 : index
    %c0_114 = arith.constant 0 : index
    %112 = tpu.strided_load %arg16[%c84, %c0_114] {strides = array<i32: 2, 1>} : memref<136x128xf32, #tpu.memory_space<vmem>>, vector<5x128xf32>
    %c85 = arith.constant 85 : index
    %c0_115 = arith.constant 0 : index
    %113 = tpu.strided_load %arg16[%c85, %c0_115] {strides = array<i32: 2, 1>} : memref<136x128xf32, #tpu.memory_space<vmem>>, vector<5x128xf32>
    %c98 = arith.constant 98 : index
    %c0_116 = arith.constant 0 : index
    %114 = tpu.strided_load %arg16[%c98, %c0_116] {strides = array<i32: 2, 1>} : memref<136x128xf32, #tpu.memory_space<vmem>>, vector<5x128xf32>
    %c99 = arith.constant 99 : index
    %c0_117 = arith.constant 0 : index
    %115 = tpu.strided_load %arg16[%c99, %c0_117] {strides = array<i32: 2, 1>} : memref<136x128xf32, #tpu.memory_space<vmem>>, vector<5x128xf32>
    %116 = arith.maximumf %112, %113 : vector<5x128xf32>
    %117 = arith.maximumf %114, %115 : vector<5x128xf32>
    %118 = arith.maximumf %116, %117 : vector<5x128xf32>
    %119 = arith.addf %118, %78 : vector<5x128xf32>
    %cst_118 = arith.constant 0.000000e+00 : f32
    %120 = vector.broadcast %cst_118 : f32 to vector<5x128xf32>
    %121 = arith.maximumf %119, %120 : vector<5x128xf32>
    %c15_119 = arith.constant 15 : index
    %c0_120 = arith.constant 0 : index
    %122 = vector.load %arg17[%c15_119, %c0_120] : memref<32x128xf32, #tpu.memory_space<vmem>>, vector<5x128xf32>
    tpu.vector_store %arg17[%c15_119, %c0_120], %121 {strides = array<i32>} : memref<32x128xf32, #tpu.memory_space<vmem>>, vector<5x128xf32>,
    %c112_121 = arith.constant 112 : index
    %c0_122 = arith.constant 0 : index
    %123 = tpu.strided_load %arg16[%c112_121, %c0_122] {strides = array<i32: 2, 1>} : memref<136x128xf32, #tpu.memory_space<vmem>>, vector<5x128xf32>
    %c113 = arith.constant 113 : index
    %c0_123 = arith.constant 0 : index
    %124 = tpu.strided_load %arg16[%c113, %c0_123] {strides = array<i32: 2, 1>} : memref<136x128xf32, #tpu.memory_space<vmem>>, vector<5x128xf32>
    %c126 = arith.constant 126 : index
    %c0_124 = arith.constant 0 : index
    %125 = tpu.strided_load %arg16[%c126, %c0_124] {strides = array<i32: 2, 1>} : memref<136x128xf32, #tpu.memory_space<vmem>>, vector<5x128xf32>
    %c127 = arith.constant 127 : index
    %c0_125 = arith.constant 0 : index
    %126 = tpu.strided_load %arg16[%c127, %c0_125] {strides = array<i32: 2, 1>} : memref<136x128xf32, #tpu.memory_space<vmem>>, vector<5x128xf32>
    %127 = arith.maximumf %123, %124 : vector<5x128xf32>
    %128 = arith.maximumf %125, %126 : vector<5x128xf32>
    %129 = arith.maximumf %127, %128 : vector<5x128xf32>
    %130 = arith.addf %129, %78 : vector<5x128xf32>
    %cst_126 = arith.constant 0.000000e+00 : f32
    %131 = vector.broadcast %cst_126 : f32 to vector<5x128xf32>
    %132 = arith.maximumf %130, %131 : vector<5x128xf32>
    %c20 = arith.constant 20 : index
    %c0_127 = arith.constant 0 : index
    %133 = vector.load %arg17[%c20, %c0_127] : memref<32x128xf32, #tpu.memory_space<vmem>>, vector<5x128xf32>
    tpu.vector_store %arg17[%c20, %c0_127], %132 {strides = array<i32>} : memref<32x128xf32, #tpu.memory_space<vmem>>, vector<5x128xf32>,
    %cst_128 = arith.constant 0.000000e+00 : f32
    %134 = vector.broadcast %cst_128 : f32 to vector<8x512xf32>
    %c0_129 = arith.constant 0 : index
    %c0_130 = arith.constant 0 : index
    %135 = vector.load %arg18[%c0_129, %c0_130] : memref<8x512xf32, #tpu.memory_space<vmem>>, vector<8x512xf32>
    tpu.vector_store %arg18[%c0_129, %c0_130], %134 {strides = array<i32>} : memref<8x512xf32, #tpu.memory_space<vmem>>, vector<8x512xf32>,
    %c0_131 = arith.constant 0 : index
    %c0_132 = arith.constant 0 : index
    %136 = tpu.strided_load %arg17[%c0_131, %c0_132] {strides = array<i32: 32, 1>} : memref<32x128xf32, #tpu.memory_space<vmem>>, vector<1x16xf32>
    %c0_133 = arith.constant 0 : index
    %c0_134 = arith.constant 0 : index
    %137 = vector.load %arg18[%c0_133, %c0_134] : memref<8x512xf32, #tpu.memory_space<vmem>>, vector<1x16xf32>
    tpu.vector_store %arg18[%c0_133, %c0_134], %136 {strides = array<i32>} : memref<8x512xf32, #tpu.memory_space<vmem>>, vector<1x16xf32>,
    %c1_135 = arith.constant 1 : index
    %c0_136 = arith.constant 0 : index
    %138 = tpu.strided_load %arg17[%c1_135, %c0_136] {strides = array<i32: 32, 1>} : memref<32x128xf32, #tpu.memory_space<vmem>>, vector<1x16xf32>
    %c0_137 = arith.constant 0 : index
    %c16_138 = arith.constant 16 : index
    %139 = vector.load %arg18[%c0_137, %c16_138] : memref<8x512xf32, #tpu.memory_space<vmem>>, vector<1x16xf32>
    tpu.vector_store %arg18[%c0_137, %c16_138], %138 {strides = array<i32>} : memref<8x512xf32, #tpu.memory_space<vmem>>, vector<1x16xf32>,
    %c2_139 = arith.constant 2 : index
    %c0_140 = arith.constant 0 : index
    %140 = tpu.strided_load %arg17[%c2_139, %c0_140] {strides = array<i32: 32, 1>} : memref<32x128xf32, #tpu.memory_space<vmem>>, vector<1x16xf32>
    %c0_141 = arith.constant 0 : index
    %c32_142 = arith.constant 32 : index
    %141 = vector.load %arg18[%c0_141, %c32_142] : memref<8x512xf32, #tpu.memory_space<vmem>>, vector<1x16xf32>
    tpu.vector_store %arg18[%c0_141, %c32_142], %140 {strides = array<i32>} : memref<8x512xf32, #tpu.memory_space<vmem>>, vector<1x16xf32>,
    %c3_143 = arith.constant 3 : index
    %c0_144 = arith.constant 0 : index
    %142 = tpu.strided_load %arg17[%c3_143, %c0_144] {strides = array<i32: 32, 1>} : memref<32x128xf32, #tpu.memory_space<vmem>>, vector<1x16xf32>
    %c0_145 = arith.constant 0 : index
    %c48_146 = arith.constant 48 : index
    %143 = vector.load %arg18[%c0_145, %c48_146] : memref<8x512xf32, #tpu.memory_space<vmem>>, vector<1x16xf32>
    tpu.vector_store %arg18[%c0_145, %c48_146], %142 {strides = array<i32>} : memref<8x512xf32, #tpu.memory_space<vmem>>, vector<1x16xf32>,
    %c4_147 = arith.constant 4 : index
    %c0_148 = arith.constant 0 : index
    %144 = tpu.strided_load %arg17[%c4_147, %c0_148] {strides = array<i32: 32, 1>} : memref<32x128xf32, #tpu.memory_space<vmem>>, vector<1x16xf32>
    %c0_149 = arith.constant 0 : index
    %c64_150 = arith.constant 64 : index
    %145 = vector.load %arg18[%c0_149, %c64_150] : memref<8x512xf32, #tpu.memory_space<vmem>>, vector<1x16xf32>
    tpu.vector_store %arg18[%c0_149, %c64_150], %144 {strides = array<i32>} : memref<8x512xf32, #tpu.memory_space<vmem>>, vector<1x16xf32>,
    %c5_151 = arith.constant 5 : index
    %c0_152 = arith.constant 0 : index
    %146 = tpu.strided_load %arg17[%c5_151, %c0_152] {strides = array<i32: 32, 1>} : memref<32x128xf32, #tpu.memory_space<vmem>>, vector<1x16xf32>
    %c0_153 = arith.constant 0 : index
    %c80_154 = arith.constant 80 : index
    %147 = vector.load %arg18[%c0_153, %c80_154] : memref<8x512xf32, #tpu.memory_space<vmem>>, vector<1x16xf32>
    tpu.vector_store %arg18[%c0_153, %c80_154], %146 {strides = array<i32>} : memref<8x512xf32, #tpu.memory_space<vmem>>, vector<1x16xf32>,
    %c6 = arith.constant 6 : index
    %c0_155 = arith.constant 0 : index
    %148 = tpu.strided_load %arg17[%c6, %c0_155] {strides = array<i32: 32, 1>} : memref<32x128xf32, #tpu.memory_space<vmem>>, vector<1x16xf32>
    %c0_156 = arith.constant 0 : index
    %c96_157 = arith.constant 96 : index
    %149 = vector.load %arg18[%c0_156, %c96_157] : memref<8x512xf32, #tpu.memory_space<vmem>>, vector<1x16xf32>
    tpu.vector_store %arg18[%c0_156, %c96_157], %148 {strides = array<i32>} : memref<8x512xf32, #tpu.memory_space<vmem>>, vector<1x16xf32>,
    %c7 = arith.constant 7 : index
    %c0_158 = arith.constant 0 : index
    %150 = tpu.strided_load %arg17[%c7, %c0_158] {strides = array<i32: 32, 1>} : memref<32x128xf32, #tpu.memory_space<vmem>>, vector<1x16xf32>
    %c0_159 = arith.constant 0 : index
    %c112_160 = arith.constant 112 : index
    %151 = vector.load %arg18[%c0_159, %c112_160] : memref<8x512xf32, #tpu.memory_space<vmem>>, vector<1x16xf32>
    tpu.vector_store %arg18[%c0_159, %c112_160], %150 {strides = array<i32>} : memref<8x512xf32, #tpu.memory_space<vmem>>, vector<1x16xf32>,
    %c8_161 = arith.constant 8 : index
    %c0_162 = arith.constant 0 : index
    %152 = tpu.strided_load %arg17[%c8_161, %c0_162] {strides = array<i32: 32, 1>} : memref<32x128xf32, #tpu.memory_space<vmem>>, vector<1x16xf32>
    %c0_163 = arith.constant 0 : index
    %c128_164 = arith.constant 128 : index
    %153 = vector.load %arg18[%c0_163, %c128_164] : memref<8x512xf32, #tpu.memory_space<vmem>>, vector<1x16xf32>
    tpu.vector_store %arg18[%c0_163, %c128_164], %152 {strides = array<i32>} : memref<8x512xf32, #tpu.memory_space<vmem>>, vector<1x16xf32>,
    %c9 = arith.constant 9 : index
    %c0_165 = arith.constant 0 : index
    %154 = tpu.strided_load %arg17[%c9, %c0_165] {strides = array<i32: 32, 1>} : memref<32x128xf32, #tpu.memory_space<vmem>>, vector<1x16xf32>
    %c0_166 = arith.constant 0 : index
    %c144_167 = arith.constant 144 : index
    %155 = vector.load %arg18[%c0_166, %c144_167] : memref<8x512xf32, #tpu.memory_space<vmem>>, vector<1x16xf32>
    tpu.vector_store %arg18[%c0_166, %c144_167], %154 {strides = array<i32>} : memref<8x512xf32, #tpu.memory_space<vmem>>, vector<1x16xf32>,
    %c10_168 = arith.constant 10 : index
    %c0_169 = arith.constant 0 : index
    %156 = tpu.strided_load %arg17[%c10_168, %c0_169] {strides = array<i32: 32, 1>} : memref<32x128xf32, #tpu.memory_space<vmem>>, vector<1x16xf32>
    %c0_170 = arith.constant 0 : index
    %c160_171 = arith.constant 160 : index
    %157 = vector.load %arg18[%c0_170, %c160_171] : memref<8x512xf32, #tpu.memory_space<vmem>>, vector<1x16xf32>
    tpu.vector_store %arg18[%c0_170, %c160_171], %156 {strides = array<i32>} : memref<8x512xf32, #tpu.memory_space<vmem>>, vector<1x16xf32>,
    %c11 = arith.constant 11 : index
    %c0_172 = arith.constant 0 : index
    %158 = tpu.strided_load %arg17[%c11, %c0_172] {strides = array<i32: 32, 1>} : memref<32x128xf32, #tpu.memory_space<vmem>>, vector<1x16xf32>
    %c0_173 = arith.constant 0 : index
    %c176_174 = arith.constant 176 : index
    %159 = vector.load %arg18[%c0_173, %c176_174] : memref<8x512xf32, #tpu.memory_space<vmem>>, vector<1x16xf32>
    tpu.vector_store %arg18[%c0_173, %c176_174], %158 {strides = array<i32>} : memref<8x512xf32, #tpu.memory_space<vmem>>, vector<1x16xf32>,
    %c12 = arith.constant 12 : index
    %c0_175 = arith.constant 0 : index
    %160 = tpu.strided_load %arg17[%c12, %c0_175] {strides = array<i32: 32, 1>} : memref<32x128xf32, #tpu.memory_space<vmem>>, vector<1x16xf32>
    %c0_176 = arith.constant 0 : index
    %c192_177 = arith.constant 192 : index
    %161 = vector.load %arg18[%c0_176, %c192_177] : memref<8x512xf32, #tpu.memory_space<vmem>>, vector<1x16xf32>
    tpu.vector_store %arg18[%c0_176, %c192_177], %160 {strides = array<i32>} : memref<8x512xf32, #tpu.memory_space<vmem>>, vector<1x16xf32>,
    %c13 = arith.constant 13 : index
    %c0_178 = arith.constant 0 : index
    %162 = tpu.strided_load %arg17[%c13, %c0_178] {strides = array<i32: 32, 1>} : memref<32x128xf32, #tpu.memory_space<vmem>>, vector<1x16xf32>
    %c0_179 = arith.constant 0 : index
    %c208 = arith.constant 208 : index
    %163 = vector.load %arg18[%c0_179, %c208] : memref<8x512xf32, #tpu.memory_space<vmem>>, vector<1x16xf32>
    tpu.vector_store %arg18[%c0_179, %c208], %162 {strides = array<i32>} : memref<8x512xf32, #tpu.memory_space<vmem>>, vector<1x16xf32>,
    %c14_180 = arith.constant 14 : index
    %c0_181 = arith.constant 0 : index
    %164 = tpu.strided_load %arg17[%c14_180, %c0_181] {strides = array<i32: 32, 1>} : memref<32x128xf32, #tpu.memory_space<vmem>>, vector<1x16xf32>
    %c0_182 = arith.constant 0 : index
    %c224 = arith.constant 224 : index
    %165 = vector.load %arg18[%c0_182, %c224] : memref<8x512xf32, #tpu.memory_space<vmem>>, vector<1x16xf32>
    tpu.vector_store %arg18[%c0_182, %c224], %164 {strides = array<i32>} : memref<8x512xf32, #tpu.memory_space<vmem>>, vector<1x16xf32>,
    %c15_183 = arith.constant 15 : index
    %c0_184 = arith.constant 0 : index
    %166 = tpu.strided_load %arg17[%c15_183, %c0_184] {strides = array<i32: 32, 1>} : memref<32x128xf32, #tpu.memory_space<vmem>>, vector<1x16xf32>
    %c0_185 = arith.constant 0 : index
    %c240 = arith.constant 240 : index
    %167 = vector.load %arg18[%c0_185, %c240] : memref<8x512xf32, #tpu.memory_space<vmem>>, vector<1x16xf32>
    tpu.vector_store %arg18[%c0_185, %c240], %166 {strides = array<i32>} : memref<8x512xf32, #tpu.memory_space<vmem>>, vector<1x16xf32>,
    %c16_186 = arith.constant 16 : index
    %c0_187 = arith.constant 0 : index
    %168 = tpu.strided_load %arg17[%c16_186, %c0_187] {strides = array<i32: 32, 1>} : memref<32x128xf32, #tpu.memory_space<vmem>>, vector<1x16xf32>
    %c0_188 = arith.constant 0 : index
    %c256 = arith.constant 256 : index
    %169 = vector.load %arg18[%c0_188, %c256] : memref<8x512xf32, #tpu.memory_space<vmem>>, vector<1x16xf32>
    tpu.vector_store %arg18[%c0_188, %c256], %168 {strides = array<i32>} : memref<8x512xf32, #tpu.memory_space<vmem>>, vector<1x16xf32>,
    %c17_189 = arith.constant 17 : index
    %c0_190 = arith.constant 0 : index
    %170 = tpu.strided_load %arg17[%c17_189, %c0_190] {strides = array<i32: 32, 1>} : memref<32x128xf32, #tpu.memory_space<vmem>>, vector<1x16xf32>
    %c0_191 = arith.constant 0 : index
    %c272 = arith.constant 272 : index
    %171 = vector.load %arg18[%c0_191, %c272] : memref<8x512xf32, #tpu.memory_space<vmem>>, vector<1x16xf32>
    tpu.vector_store %arg18[%c0_191, %c272], %170 {strides = array<i32>} : memref<8x512xf32, #tpu.memory_space<vmem>>, vector<1x16xf32>,
    %c18_192 = arith.constant 18 : index
    %c0_193 = arith.constant 0 : index
    %172 = tpu.strided_load %arg17[%c18_192, %c0_193] {strides = array<i32: 32, 1>} : memref<32x128xf32, #tpu.memory_space<vmem>>, vector<1x16xf32>
    %c0_194 = arith.constant 0 : index
    %c288 = arith.constant 288 : index
    %173 = vector.load %arg18[%c0_194, %c288] : memref<8x512xf32, #tpu.memory_space<vmem>>, vector<1x16xf32>
    tpu.vector_store %arg18[%c0_194, %c288], %172 {strides = array<i32>} : memref<8x512xf32, #tpu.memory_space<vmem>>, vector<1x16xf32>,
    %c19 = arith.constant 19 : index
    %c0_195 = arith.constant 0 : index
    %174 = tpu.strided_load %arg17[%c19, %c0_195] {strides = array<i32: 32, 1>} : memref<32x128xf32, #tpu.memory_space<vmem>>, vector<1x16xf32>
    %c0_196 = arith.constant 0 : index
    %c304 = arith.constant 304 : index
    %175 = vector.load %arg18[%c0_196, %c304] : memref<8x512xf32, #tpu.memory_space<vmem>>, vector<1x16xf32>
    tpu.vector_store %arg18[%c0_196, %c304], %174 {strides = array<i32>} : memref<8x512xf32, #tpu.memory_space<vmem>>, vector<1x16xf32>,
    %c20_197 = arith.constant 20 : index
    %c0_198 = arith.constant 0 : index
    %176 = tpu.strided_load %arg17[%c20_197, %c0_198] {strides = array<i32: 32, 1>} : memref<32x128xf32, #tpu.memory_space<vmem>>, vector<1x16xf32>
    %c0_199 = arith.constant 0 : index
    %c320 = arith.constant 320 : index
    %177 = vector.load %arg18[%c0_199, %c320] : memref<8x512xf32, #tpu.memory_space<vmem>>, vector<1x16xf32>
    tpu.vector_store %arg18[%c0_199, %c320], %176 {strides = array<i32>} : memref<8x512xf32, #tpu.memory_space<vmem>>, vector<1x16xf32>,
    %c21 = arith.constant 21 : index
    %c0_200 = arith.constant 0 : index
    %178 = tpu.strided_load %arg17[%c21, %c0_200] {strides = array<i32: 32, 1>} : memref<32x128xf32, #tpu.memory_space<vmem>>, vector<1x16xf32>
    %c0_201 = arith.constant 0 : index
    %c336 = arith.constant 336 : index
    %179 = vector.load %arg18[%c0_201, %c336] : memref<8x512xf32, #tpu.memory_space<vmem>>, vector<1x16xf32>
    tpu.vector_store %arg18[%c0_201, %c336], %178 {strides = array<i32>} : memref<8x512xf32, #tpu.memory_space<vmem>>, vector<1x16xf32>,
    %c22 = arith.constant 22 : index
    %c0_202 = arith.constant 0 : index
    %180 = tpu.strided_load %arg17[%c22, %c0_202] {strides = array<i32: 32, 1>} : memref<32x128xf32, #tpu.memory_space<vmem>>, vector<1x16xf32>
    %c0_203 = arith.constant 0 : index
    %c352 = arith.constant 352 : index
    %181 = vector.load %arg18[%c0_203, %c352] : memref<8x512xf32, #tpu.memory_space<vmem>>, vector<1x16xf32>
    tpu.vector_store %arg18[%c0_203, %c352], %180 {strides = array<i32>} : memref<8x512xf32, #tpu.memory_space<vmem>>, vector<1x16xf32>,
    %c23 = arith.constant 23 : index
    %c0_204 = arith.constant 0 : index
    %182 = tpu.strided_load %arg17[%c23, %c0_204] {strides = array<i32: 32, 1>} : memref<32x128xf32, #tpu.memory_space<vmem>>, vector<1x16xf32>
    %c0_205 = arith.constant 0 : index
    %c368 = arith.constant 368 : index
    %183 = vector.load %arg18[%c0_205, %c368] : memref<8x512xf32, #tpu.memory_space<vmem>>, vector<1x16xf32>
    tpu.vector_store %arg18[%c0_205, %c368], %182 {strides = array<i32>} : memref<8x512xf32, #tpu.memory_space<vmem>>, vector<1x16xf32>,
    %c24_206 = arith.constant 24 : index
    %c0_207 = arith.constant 0 : index
    %184 = tpu.strided_load %arg17[%c24_206, %c0_207] {strides = array<i32: 32, 1>} : memref<32x128xf32, #tpu.memory_space<vmem>>, vector<1x16xf32>
    %c0_208 = arith.constant 0 : index
    %c384 = arith.constant 384 : index
    %185 = vector.load %arg18[%c0_208, %c384] : memref<8x512xf32, #tpu.memory_space<vmem>>, vector<1x16xf32>
    tpu.vector_store %arg18[%c0_208, %c384], %184 {strides = array<i32>} : memref<8x512xf32, #tpu.memory_space<vmem>>, vector<1x16xf32>,
    %c0_209 = arith.constant 0 : index
    %c0_210 = arith.constant 0 : index
    %186 = vector.load %arg18[%c0_209, %c0_210] : memref<8x512xf32, #tpu.memory_space<vmem>>, vector<8x512xf32>
    %c0_211 = arith.constant 0 : index
    %c0_212 = arith.constant 0 : index
    %187 = vector.load %arg6[%c0_211, %c0_212] : memref<512x128xf32, #tpu.memory_space<vmem>>, vector<512x128xf32>
    %cst_213 = arith.constant dense<0.000000e+00> : vector<8x128xf32>
    %188 = tpu.matmul %186, %187, %cst_213 {dimension_numbers = #tpu.dot_dimension_numbers<[1], [0], [0], [1], [0, 0, 1, 1], [], []>} : vector<8x512xf32>, vector<512x128xf32>, vector<8x128xf32> -> vector<8x128xf32>
    %c0_214 = arith.constant 0 : index
    %c0_215 = arith.constant 0 : index
    %189 = vector.load %arg7[%c0_214, %c0_215] : memref<1x128xf32, #tpu.memory_space<vmem>>, vector<1x128xf32>
    %190 = vector.broadcast %189 : vector<1x128xf32> to vector<8x128xf32>
    %191 = arith.addf %188, %190 : vector<8x128xf32>
    %cst_216 = arith.constant 0.000000e+00 : f32
    %192 = vector.broadcast %cst_216 : f32 to vector<8x128xf32>
    %193 = arith.maximumf %191, %192 : vector<8x128xf32>
    %c0_217 = arith.constant 0 : index
    %c0_218 = arith.constant 0 : index
    %194 = vector.load %arg8[%c0_217, %c0_218] : memref<128x128xf32, #tpu.memory_space<vmem>>, vector<128x128xf32>
    %cst_219 = arith.constant dense<0.000000e+00> : vector<8x128xf32>
    %195 = tpu.matmul %193, %194, %cst_219 {dimension_numbers = #tpu.dot_dimension_numbers<[1], [0], [0], [1], [0, 0, 1, 1], [], []>} : vector<8x128xf32>, vector<128x128xf32>, vector<8x128xf32> -> vector<8x128xf32>
    %c0_220 = arith.constant 0 : index
    %c0_221 = arith.constant 0 : index
    %196 = vector.load %arg9[%c0_220, %c0_221] : memref<1x128xf32, #tpu.memory_space<vmem>>, vector<1x128xf32>
    %197 = vector.broadcast %196 : vector<1x128xf32> to vector<8x128xf32>
    %198 = arith.addf %195, %197 : vector<8x128xf32>
    %cst_222 = arith.constant 0.000000e+00 : f32
    %199 = vector.broadcast %cst_222 : f32 to vector<8x128xf32>
    %200 = arith.maximumf %198, %199 : vector<8x128xf32>
    %c0_223 = arith.constant 0 : index
    %c0_224 = arith.constant 0 : index
    %201 = vector.load %arg10[%c0_223, %c0_224] : memref<128x128xf32, #tpu.memory_space<vmem>>, vector<128x128xf32>
    %cst_225 = arith.constant dense<0.000000e+00> : vector<8x128xf32>
    %202 = tpu.matmul %200, %201, %cst_225 {dimension_numbers = #tpu.dot_dimension_numbers<[1], [0], [0], [1], [0, 0, 1, 1], [], []>} : vector<8x128xf32>, vector<128x128xf32>, vector<8x128xf32> -> vector<8x128xf32>
    %c0_226 = arith.constant 0 : index
    %c0_227 = arith.constant 0 : index
    %203 = vector.load %arg11[%c0_226, %c0_227] : memref<1x128xf32, #tpu.memory_space<vmem>>, vector<1x128xf32>
    %204 = vector.broadcast %203 : vector<1x128xf32> to vector<8x128xf32>
    %205 = arith.addf %202, %204 : vector<8x128xf32>
    %c0_228 = arith.constant 0 : index
    %c0_229 = arith.constant 0 : index
    %206 = vector.load %arg12[%c0_228, %c0_229] : memref<8x128xf32, #tpu.memory_space<vmem>>, vector<8x128xf32>
    tpu.vector_store %arg12[%c0_228, %c0_229], %205 {strides = array<i32>} : memref<8x128xf32, #tpu.memory_space<vmem>>, vector<8x128xf32>,
    return
  }
  func.func @transform_0(%arg0: i32) -> (i32, i32) {
    %c0_i32 = arith.constant 0 : i32
    %c0_i32_0 = arith.constant 0 : i32
    return %arg0, %c0_i32 : i32, i32
  }
  func.func @transform_1(%arg0: i32) -> (i32, i32) {
    %c0_i32 = arith.constant 0 : i32
    %c0_i32_0 = arith.constant 0 : i32
    %c0_i32_1 = arith.constant 0 : i32
    return %c0_i32, %c0_i32_0 : i32, i32
  }
  func.func @transform_2(%arg0: i32) -> (i32, i32) {
    %c0_i32 = arith.constant 0 : i32
    %c0_i32_0 = arith.constant 0 : i32
    %c0_i32_1 = arith.constant 0 : i32
    return %c0_i32, %c0_i32_0 : i32, i32
  }
  func.func @transform_3(%arg0: i32) -> (i32, i32) {
    %c0_i32 = arith.constant 0 : i32
    %c0_i32_0 = arith.constant 0 : i32
    %c0_i32_1 = arith.constant 0 : i32
    return %c0_i32, %c0_i32_0 : i32, i32
  }
  func.func @transform_4(%arg0: i32) -> (i32, i32) {
    %c0_i32 = arith.constant 0 : i32
    %c0_i32_0 = arith.constant 0 : i32
    %c0_i32_1 = arith.constant 0 : i32
    return %c0_i32, %c0_i32_0 : i32, i32
  }
  func.func @transform_5(%arg0: i32) -> (i32, i32) {
    %c0_i32 = arith.constant 0 : i32
    %c0_i32_0 = arith.constant 0 : i32
    %c0_i32_1 = arith.constant 0 : i32
    return %c0_i32, %c0_i32_0 : i32, i32
  }
  func.func @transform_6(%arg0: i32) -> (i32, i32) {
    %c0_i32 = arith.constant 0 : i32
    %c0_i32_0 = arith.constant 0 : i32
    %c0_i32_1 = arith.constant 0 : i32
    return %c0_i32, %c0_i32_0 : i32, i32
  }
  func.func @transform_7(%arg0: i32) -> (i32, i32) {
    %c0_i32 = arith.constant 0 : i32
    %c0_i32_0 = arith.constant 0 : i32
    %c0_i32_1 = arith.constant 0 : i32
    return %c0_i32, %c0_i32_0 : i32, i32
  }
  func.func @transform_8(%arg0: i32) -> (i32, i32) {
    %c0_i32 = arith.constant 0 : i32
    %c0_i32_0 = arith.constant 0 : i32
    %c0_i32_1 = arith.constant 0 : i32
    return %c0_i32, %c0_i32_0 : i32, i32
  }
  func.func @transform_9(%arg0: i32) -> (i32, i32) {
    %c0_i32 = arith.constant 0 : i32
    %c0_i32_0 = arith.constant 0 : i32
    %c0_i32_1 = arith.constant 0 : i32
    return %c0_i32, %c0_i32_0 : i32, i32
  }
  func.func @transform_10(%arg0: i32) -> (i32, i32) {
    %c0_i32 = arith.constant 0 : i32
    %c0_i32_0 = arith.constant 0 : i32
    %c0_i32_1 = arith.constant 0 : i32
    return %c0_i32, %c0_i32_0 : i32, i32
  }
  func.func @transform_11(%arg0: i32) -> (i32, i32) {
    %c0_i32 = arith.constant 0 : i32
    %c0_i32_0 = arith.constant 0 : i32
    return %arg0, %c0_i32 : i32, i32
  }
}

</mosaic_0001>

<bundles_post_ra>
// kernel: convnet_forward.1
= control target key start
LH: loop header
LB: loop body
LE: loop exit
PB: predicated region body
PF: predicated region fallthrough
CT: control target
= control target key end

     0   :  { %s9456_s17 = smov 0   ;;  %s13488_s0 = inlined_call_operand.vmem [shape: bf16[1600,128], index: 0, kind: input, shape index: {}]   ;;  %s13489_s1 = inlined_call_operand.vmem [shape: bf16[128,128], index: 1, kind: input, shape index: {}]   ;;  %s13490_s2 = inlined_call_operand.vmem [shape: f32[1,128], index: 2, kind: input, shape index: {}]   ;;  %s13491_s3 = inlined_call_operand.vmem [shape: bf16[256,128], index: 3, kind: input, shape index: {}]   ;;  %s13492_s4 = inlined_call_operand.vmem [shape: f32[1,128], index: 4, kind: input, shape index: {}]   ;;  %s13493_s5 = inlined_call_operand.vmem [shape: f32[512,128], index: 5, kind: input, shape index: {}]   ;;  %s13494_s6 = inlined_call_operand.vmem [shape: f32[1,128], index: 6, kind: input, shape index: {}]   ;;  %s13495_s7 = inlined_call_operand.vmem [shape: f32[128,128], index: 7, kind: input, shape index: {}]   ;;  %s13496_s8 = inlined_call_operand.vmem [shape: f32[1,128], index: 8, kind: input, shape index: {}]   ;;  %s13497_s9 = inlined_call_operand.vmem [shape: f32[128,128], index: 9, kind: input, shape index: {}]   ;;  %s13498_s10 = inlined_call_operand.vmem [shape: f32[1,128], index: 10, kind: input, shape index: {}]   ;;  %s13499_s11 = inlined_call_operand.vmem [shape: f32[16,128], index: 11, kind: output, shape index: {}]  }
   0x1 LB: > { %s9462_s18 = sadd.s32 4294967295, %s9375_s17   ;;  %p8062_p0 = scmp.ge.s32.totalorder %s9375_s17, 1  ;;  %s9375_s17 = sphi %s9456_s17, %s21_s17  }
   0x2   : > { %p338_p1 = scmp.lt.s32.totalorder %s9375_s17, 3 }
   0x4   : > { %p339_p2 = pnand %p8062_p0, %p338_p1 }
   0x6   : > { %342 = sbr.rel (%p339_p2) target bundleno = 2374 (0x946), region = 64 }
   0xd   : > { %v9180_v0 = vld [vmem:[%s13489_s1] sm:$0xff]   ;;  %s377_s21 = smul.u32 100, %s9462_s18  ;;  %v9181_v1 = vld [vmem:[%s13489_s1 + $0x8] sm:$0xff]   ;;  %v9182_v2 = vld [vmem:[%s13489_s1 + $0x10] sm:$0xff]   ;;  %vm1630_vm0 = vcmask 64512   ;;  %vm2104_vm1 = vcmask 1042432  }
   0xe   : > { %8855 = vmatprep.subr.bf16.mxu0 %v9180_v0  ;;  %v9183_v3 = vld [vmem:[%s13489_s1 + $0x18] sm:$0xff]   ;;  %v9184_v5 = vld [vmem:[%s13489_s1 + $0x20] sm:$0xff]   ;;  %v9185_v6 = vld [vmem:[%s13489_s1 + $0x28] sm:$0xff]   ;;  %vm2105_vm2 = vcmask 1046532   ;;  %vm2586_vm3 = vcmask 1041408   ;;  %vm2587_vm4 = vcmask 1045508  }
   0xf   : > { %p378_p3 = scmp.lt.s32.totalorder %s377_s21, 199  ;;  %8856 = vmatpush3.bf16.msra.mxu0 %v9180_v0  ;;  %v9186_v7 = vld [vmem:[%s13489_s1 + $0x30] sm:$0xff]   ;;  %v9187_v8 = vld [vmem:[%s13489_s1 + $0x38] sm:$0xff]   ;;  %vm2766_vm5 = vcmask 1040384   ;;  %vm2767_vm6 = vcmask 1044484   ;;  %vm9809_vm7 = vmor %vm2104_vm1, %vm2105_vm2  ;;  %s9378_s25 = smov 56  }
  0x10   : > { %8857 = vmatprep.subr.bf16.mxu0 %v9181_v1  ;;  %vm9827_vm8 = vmor %vm2586_vm3, %vm2587_vm4  ;;  %s9380_s27 = smov 32   ;;  %s9381_s28 = smov 40   ;;  %vm2282_vm10 = vsmask.f32 2304  ;;  %vm2283_vm11 = vsmask.f32 6416 }
  0x11   : > { %s14246_s21 = smov (!%p378_p3, %s377_s21), 199  ;;  %vm9834_vm9 = vmor %vm2766_vm5, %vm2767_vm6  ;;  %s9382_s29 = smov 72   ;;  %vm1643_vm12 = vcmask 60416   ;;  %vm2946_vm13 = vsmask.f32 256 }
  0x12   : > { %s8063_s26 = sshll.u32 %s14246_s21, 2  ;;  %vm2947_vm14 = vsmask.f32 4368  ;;  %s13569_s30 = smov 112   ;;  %vm9972_vm15 = vmor %vm2282_vm10, %vm2283_vm11  ;;  %vm1804_vm2 = vsmask.f32 3328 }
  0x13   : > { %8858 = vmatpush3.bf16.msra.mxu0 %v9181_v1  ;;  %s9482_s12 = scalar_lea.vmem %s13488_s0, %s8063_s26  ;;  %s9379_s26 = smov 16   ;;  %vm9998_vm1 = vmor %vm2946_vm13, %vm2947_vm14  ;;  %vm1805_vm3 = vsmask.f32 7440  ;;  %vm4001_vm4 = vsmask.f32 1280  ;;  %vm13557_vm10 = vcmask 126016  }
  0x14   : > { %8859 = vmatprep.subr.bf16.mxu0 %v9182_v2  ;;  %v9188_v4 = vld [vmem:[%s9482_s12] sm:$0xff]   ;;  %v9189_v9 = vld [vmem:[%s9482_s12 + $0x8] sm:$0xff]   ;;  %v9190_v10 = vld [vmem:[%s9482_s12 + $0x10] sm:$0xff]   ;;  %s9385_s13 = smov 48   ;;  %s9386_s14 = smov 8   ;;  %vm13556_vm11 = vcmask 191616  }
  0x15   : > { %8871 = vmatprep.mubr.bf16.mxu0 %v9188_v4  ;;  %v9191_v11 = vld [vmem:[%s9482_s12 + $0x18] sm:$0xff]   ;;  %v9192_v12 = vld [vmem:[%s9482_s12 + $0x20] sm:$0xff]   ;;  %v9193_v13 = vld [vmem:[%s9482_s12 + $0x28] sm:$0xff]   ;;  %s9387_s15 = smov 64   ;;  %s9388_s16 = smov 80   ;;  %vm13555_vm13 = vcmask 257216  }
  0x16   : > { %v9194_v14 = vld [vmem:[%s9482_s12 + $0x30] sm:$0xff]   ;;  %v9195_v15 = vld [vmem:[%s9482_s12 + $0x38] sm:$0xff]   ;;  %v9196_v16 = vld [vmem:[%s9482_s12 + $0x40] sm:$0xff]   ;;  %s13664_s19 = smov 96   ;;  %s9390_s20 = smov 120   ;;  %vm13545_vm14 = vcmask 322816  }
  0x17   : > { %8860 = vmatpush3.bf16.msra.mxu0 %v9182_v2  ;;  %v9197_v17 = vld [vmem:[%s9482_s12 + $0x48] sm:$0xff]   ;;  %v9198_v18 = vld [vmem:[%s9482_s12 + $0x50] sm:$0xff]   ;;  %v9199_v19 = vld [vmem:[%s9482_s12 + $0x58] sm:$0xff]   ;;  %s9391_s21 = smov 104   ;;  %vm4002_vm5 = vsmask.f32 5392 }
  0x18   : > { %8861 = vmatprep.subr.bf16.mxu0 %v9183_v3  ;;  %v9200_v20 = vld [vmem:[%s9482_s12 + $0x60] sm:$0xff]   ;;  %v9201_v21 = vld [vmem:[%s9482_s12 + $0x68] sm:$0xff]   ;;  %v9202_v22 = vld [vmem:[%s9482_s12 + $0x70] sm:$0xff]   ;;  %s9392_s22 = smov 88   ;;  %p383_p4 = scmp.lt.s32.totalorder %s9462_s18, 1 }
  0x19   : > { %v9203_v23 = vld [vmem:[%s9482_s12 + $0x78] sm:$0xff]   ;;  %v9204_v24 = vld [vmem:[%s9482_s12 + $0x80] sm:$0xff]   ;;  %v9205_v25 = vld [vmem:[%s9482_s12 + $0x88] sm:$0xff]  }
  0x1a   : > { %v9206_v26 = vld [vmem:[%s9482_s12 + $0x90] sm:$0xff]   ;;  %v9207_v27 = vld [vmem:[%s9482_s12 + $0x98] sm:$0xff]   ;;  %v9208_v28 = vld [vmem:[%s9482_s12 + $0xa0] sm:$0xff]   ;;  %s14248_s18 = smov (!%p383_p4, %s9462_s18), 1 }
  0x1b   : > { %8862 = vmatpush3.bf16.msra.mxu0 %v9183_v3  ;;  %v9209_v29 = vld [vmem:[%s9482_s12 + $0xa8] sm:$0xff]   ;;  %v9210_v30 = vld [vmem:[%s9482_s12 + $0xb0] sm:$0xff]   ;;  %v9211_v31 = vld [vmem:[%s9482_s12 + $0xb8] sm:$0xff]  }
  0x1c   : > { %8863 = vmatprep.subr.bf16.mxu0 %v9184_v5  ;;  %v9212_v32 = vld [vmem:[%s9482_s12 + $0xc0] sm:$0xff]   ;;  %v9213_v33 = vld [vmem:[%s9482_s12 + $0xc8] sm:$0xff]   ;;  %v9214_v34 = vld [vmem:[%s9482_s12 + $0xd0] sm:$0xff]  }
  0x1d   : > { %v9215_v35 = vld [vmem:[%s9482_s12 + $0xd8] sm:$0xff]   ;;  %v9216_v36 = vld [vmem:[%s9482_s12 + $0xe0] sm:$0xff]   ;;  %v9217_v37 = vld [vmem:[%s9482_s12 + $0xe8] sm:$0xff]  }
  0x1e   : > { %v9218_v38 = vld [vmem:[%s9482_s12 + $0xf0] sm:$0xff]   ;;  %v9219_v39 = vld [vmem:[%s9482_s12 + $0xf8] sm:$0xff]   ;;  %v9220_v40 = vld [vmem:[%s9482_s12 + $0x100] sm:$0xff]  }
  0x1f   : > { %8864 = vmatpush3.bf16.msra.mxu0 %v9184_v5  ;;  %v9221_v41 = vld [vmem:[%s9482_s12 + $0x108] sm:$0xff]   ;;  %v9222_v42 = vld [vmem:[%s9482_s12 + $0x110] sm:$0xff]   ;;  %v9223_v43 = vld [vmem:[%s9482_s12 + $0x118] sm:$0xff]  }
  0x20   : > { %8865 = vmatprep.subr.bf16.mxu0 %v9185_v6  ;;  %v9224_v44 = vld [vmem:[%s9482_s12 + $0x120] sm:$0xff]   ;;  %v9225_v45 = vld [vmem:[%s9482_s12 + $0x128] sm:$0xff]   ;;  %v9226_v46 = vld [vmem:[%s9482_s12 + $0x130] sm:$0xff]  }
  0x21   : > { %v9227_v47 = vld [vmem:[%s9482_s12 + $0x138] sm:$0xff]   ;;  %v9228_v48 = vld [vmem:[%s9482_s12 + $0x140] sm:$0xff]   ;;  %v9229_v49 = vld [vmem:[%s9482_s12 + $0x148] sm:$0xff]  }
  0x22   : > { %v9230_v50 = vld [vmem:[%s9482_s12 + $0x150] sm:$0xff]   ;;  %v9231_v51 = vld [vmem:[%s9482_s12 + $0x158] sm:$0xff]   ;;  %v9232_v52 = vld [vmem:[%s9482_s12 + $0x160] sm:$0xff]  }
  0x23   : > { %8866 = vmatpush3.bf16.msra.mxu0 %v9185_v6  ;;  %v9233_v53 = vld [vmem:[%s9482_s12 + $0x168] sm:$0xff]   ;;  %v9234_v54 = vld [vmem:[%s9482_s12 + $0x170] sm:$0xff]   ;;  %v9235_v55 = vld [vmem:[%s9482_s12 + $0x178] sm:$0xff]  }
  0x24   : > { %8867 = vmatprep.subr.bf16.mxu0 %v9186_v7  ;;  %v9236_v56 = vld [vmem:[%s9482_s12 + $0x180] sm:$0xff]   ;;  %v9237_v57 = vld [vmem:[%s9482_s12 + $0x188] sm:$0xff]   ;;  %s13571_s12 = smov 24   ;;  %vm10262_vm6 = vmor %vm4001_vm4, %vm4002_vm5  ;;  %vm13529_vm4 = vcmask 519616   ;;  %vm13574_vm5 = vcmask 585216  }
  0x27   : > { %8868 = vmatpush3.bf16.msra.mxu0 %v9186_v7 }
  0x28   : > { %8869 = vmatprep.subr.bf16.mxu0 %v9187_v8 }
  0x2b   : > { %8870 = vmatpush3.bf16.msra.mxu0 %v9187_v8 }
  0x2e   : > { %8872 = vmatmul.mubr.bf16.vlgmr.msra.gmra.mrb[0].mxu0 %v9189_v9 }
  0x2f   : > { %8875 = vmatprep.mubr.bf16.mxu0 %v9190_v10 }
  0x36   : > { %8876 = vmatmul.mubr.bf16.gmra.mrb[4].mxu0 %v9191_v11 }
  0x37   : > { %8879 = vmatprep.mubr.bf16.mxu0 %v9192_v12 }
  0x3e   : > { %8880 = vmatmul.mubr.bf16.gmra.mrb[8].mxu0 %v9193_v13 }
  0x3f   : > { %8883 = vmatprep.mubr.bf16.mxu0 %v9194_v14 }
  0x46   : > { %8884 = vmatmul.mubr.bf16.gmra.mrb[12].mxu0 %v9195_v15 }
  0x47   : > { %8887 = vmatprep.mubr.bf16.mxu0 %v9196_v16 }
  0x4e   : > { %8888 = vmatmul.mubr.bf16.gmra.mrb[16].mxu0 %v9197_v17 }
  0x4f   : > { %8891 = vmatprep.mubr.bf16.mxu0 %v9198_v18 }
  0x56   : > { %8892 = vmatmul.mubr.bf16.gmra.mrb[20].mxu0 %v9199_v19 }
  0x57   : > { %8895 = vmatprep.mubr.bf16.mxu0 %v9200_v20 }
  0x5e   : > { %8896 = vmatmul.mubr.bf16.gmra.mrb[24].mxu0 %v9201_v21 }
  0x5f   : > { %8899 = vmatprep.mubr.bf16.mxu0 %v9202_v22 }
  0x66   : > { %8900 = vmatmul.mubr.bf16.gmra.mrb[28].mxu0 %v9203_v23 }
  0x67   : > { %8903 = vmatprep.mubr.bf16.mxu0 %v9204_v24  ;;  %v9377_v24 = vmov 0  }
  0x68   : > { %1647 = vst [vmem:[#allocation4] sm:$0xff] %v9377_v24  ;;  %1648 = vst [vmem:[#allocation4 + $0x8] sm:$0xff] %v9377_v24 }
  0x69   : > { %1649 = vst [vmem:[#allocation4 + $0x10] sm:$0xff] %v9377_v24  ;;  %1650 = vst [vmem:[#allocation4 + $0x18] sm:$0xff] %v9377_v24 }
  0x6a   : > { %1651 = vst [vmem:[#allocation4 + $0x20] sm:$0xff] %v9377_v24  ;;  %1652 = vst [vmem:[#allocation4 + $0x28] sm:$0xff] %v9377_v24 }
  0x6b   : > { %1653 = vst [vmem:[#allocation4 + $0x30] sm:$0xff] %v9377_v24  ;;  %1654 = vst [vmem:[#allocation4 + $0x38] sm:$0xff] %v9377_v24 }
  0x6c   : > { %1655 = vst [vmem:[#allocation4 + $0x40] sm:$0xff] %v9377_v24  ;;  %1656 = vst [vmem:[#allocation4 + $0x48] sm:$0xff] %v9377_v24 }
  0x6d   : > { %1657 = vst [vmem:[#allocation4 + $0x50] sm:$0xff] %v9377_v24  ;;  %1658 = vst [vmem:[#allocation4 + $0x58] sm:$0xff] %v9377_v24 }
  0x6e   : > { %8904 = vmatmul.mubr.bf16.gmra.mrb[32].mxu0 %v9205_v25  ;;  %1659 = vst [vmem:[#allocation4 + $0x60] sm:$0xff] %v9377_v24  ;;  %1660 = vst [vmem:[#allocation4 + $0x68] sm:$0xff] %v9377_v24 }
  0x6f   : > { %8907 = vmatprep.mubr.bf16.mxu0 %v9206_v26  ;;  %1661 = vst [vmem:[#allocation4 + $0x70] sm:$0xff] %v9377_v24  ;;  %1662 = vst [vmem:[#allocation4 + $0x78] sm:$0xff] %v9377_v24 }
  0x70   : > { %1663 = vst [vmem:[#allocation4 + $0x80] sm:$0xff] %v9377_v24 }
  0x76   : > { %8908 = vmatmul.mubr.bf16.gmra.mrb[36].mxu0 %v9207_v27 }
  0x77   : > { %8911 = vmatprep.mubr.bf16.mxu0 %v9208_v28 }
  0x7e   : > { %8912 = vmatmul.mubr.bf16.gmra.mrb[40].mxu0 %v9209_v29 }
  0x7f   : > { %8915 = vmatprep.mubr.bf16.mxu0 %v9210_v30 }
  0x86   : > { %8916 = vmatmul.mubr.bf16.gmra.mrb[44].mxu0 %v9211_v31 }
  0x87   : > { %8919 = vmatprep.mubr.bf16.mxu0 %v9212_v32 }
  0x8e   : > { %8920 = vmatmul.mubr.bf16.gmra.mrb[48].mxu0 %v9213_v33 }
  0x8f   : > { %8923 = vmatprep.mubr.bf16.mxu0 %v9214_v34 }
  0x96   : > { %8924 = vmatmul.mubr.bf16.gmra.mrb[52].mxu0 %v9215_v35 }
  0x97   : > { %8927 = vmatprep.mubr.bf16.mxu0 %v9216_v36 }
  0x9e   : > { %8928 = vmatmul.mubr.bf16.gmra.mrb[56].mxu0 %v9217_v37 }
  0x9f   : > { %8931 = vmatprep.mubr.bf16.mxu0 %v9218_v38 }
  0xa6   : > { %8932 = vmatmul.mubr.bf16.gmra.mrb[60].mxu0 %v9219_v39 }
  0xa7   : > { %8935 = vmatprep.mubr.bf16.mxu0 %v9220_v40 }
  0xae   : > { %8936 = vmatmul.mubr.bf16.gmra.mrb[64].mxu0 %v9221_v41 }
  0xaf   : > { %8939 = vmatprep.mubr.bf16.mxu0 %v9222_v42 }
  0xb6   : > { %8940 = vmatmul.mubr.bf16.gmra.mrb[68].mxu0 %v9223_v43 }
  0xb7   : > { %8943 = vmatprep.mubr.bf16.mxu0 %v9224_v44 }
  0xbe   : > { %8944 = vmatmul.mubr.bf16.gmra.mrb[72].mxu0 %v9225_v45 }
  0xbf   : > { %8947 = vmatprep.mubr.bf16.mxu0 %v9226_v46 }
  0xc6   : > { %8948 = vmatmul.mubr.bf16.gmra.mrb[76].mxu0 %v9227_v47 }
  0xc7   : > { %8951 = vmatprep.mubr.bf16.mxu0 %v9228_v48 }
  0xce   : > { %8952 = vmatmul.mubr.bf16.gmra.mrb[80].mxu0 %v9229_v49 }
  0xcf   : > { %8955 = vmatprep.mubr.bf16.mxu0 %v9230_v50 }
  0xd6   : > { %8956 = vmatmul.mubr.bf16.gmra.mrb[84].mxu0 %v9231_v51 }
  0xd7   : > { %8959 = vmatprep.mubr.bf16.mxu0 %v9232_v52 }
  0xde   : > { %8960 = vmatmul.mubr.bf16.gmra.mrb[88].mxu0 %v9233_v53 }
  0xdf   : > { %8963 = vmatprep.mubr.bf16.mxu0 %v9234_v54 }
  0xe6   : > { %8964 = vmatmul.mubr.bf16.gmra.mrb[92].mxu0 %v9235_v55 }
  0xe7   : > { %8967 = vmatprep.mubr.bf16.mxu0 %v9236_v56 }
  0xee   : > { %8968 = vmatmul.mubr.bf16.gmra.mrb[96].mxu0 %v9237_v57 }
 0x101   : > { %v9546_v58 = vpop.f32.mrb[0].mxu0 }
 0x102   : > { %v9548_v59 = vpop.f32.mrb[1].mxu0 }
 0x103   : > { %v9550_v60 = vpop.f32.mrb[2].mxu0 }
 0x104   : > { %v9552_v61 = vpop.f32.mrb[3].mxu0 }
 0x109   : > { %v9554_v62 = vpop.f32.mrb[4].mxu0 }
 0x10a   : > { %v9556_v63 = vpop.f32.mrb[5].mxu0 }
 0x10b   : > { %v9558_v0 = vpop.f32.mrb[6].mxu0 }
 0x10c   : > { %v9560_v1 = vpop.f32.mrb[7].mxu0 }
 0x111   : > { %v9562_v2 = vpop.f32.mrb[8].mxu0 }
 0x112   : > { %v9564_v3 = vpop.f32.mrb[9].mxu0 }
 0x113   : > { %v9566_v4 = vpop.f32.mrb[10].mxu0 }
 0x114   : > { %v9568_v5 = vpop.f32.mrb[11].mxu0 }
 0x119   : > { %v9570_v6 = vpop.f32.mrb[12].mxu0 }
 0x11a   : > { %v9572_v7 = vpop.f32.mrb[13].mxu0 }
 0x11b   : > { %v9574_v8 = vpop.f32.mrb[14].mxu0 }
 0x11c   : > { %v9576_v9 = vpop.f32.mrb[15].mxu0 }
 0x121   : > { %v9578_v10 = vpop.f32.mrb[16].mxu0 }
 0x122   : > { %13665 = vst [vmem:[#allocation8_spill] sm:$0xff] %v9578_v10  ;;  %v9580_v11 = vpop.f32.mrb[17].mxu0 }
 0x123   : > { %v9582_v12 = vpop.f32.mrb[18].mxu0 }
 0x124   : > { %13666 = vst [vmem:[#allocation9_spill] sm:$0xff] %v9582_v12  ;;  %v9584_v13 = vpop.f32.mrb[19].mxu0 }
 0x125   : > { %13667 = vst [vmem:[#allocation10_spill] sm:$0xff] %v9584_v13 }
 0x129   : > { %v9586_v14 = vpop.f32.mrb[20].mxu0 }
 0x12a   : > { %13668 = vst [vmem:[#allocation11_spill] sm:$0xff] %v9586_v14  ;;  %v9588_v15 = vpop.f32.mrb[21].mxu0 }
 0x12b   : > { %13669 = vst [vmem:[#allocation12_spill] sm:$0xff] %v9588_v15  ;;  %v9590_v16 = vpop.f32.mrb[22].mxu0 }
 0x12c   : > { %13670 = vst [vmem:[#allocation13_spill] sm:$0xff] %v9590_v16  ;;  %v9592_v17 = vpop.f32.mrb[23].mxu0 }
 0x12d   : > { %13671 = vst [vmem:[#allocation14_spill] sm:$0xff] %v9592_v17 }
 0x131   : > { %v9594_v18 = vpop.f32.mrb[24].mxu0 }
 0x132   : > { %v9598_v20 = vpop.f32.mrb[25].mxu0 }
 0x133   : > { %13672 = vst [vmem:[#allocation15_spill] sm:$0xff] %v9598_v20  ;;  %v9600_v21 = vpop.f32.mrb[26].mxu0 }
 0x134   : > { %v9604_v23 = vpop.f32.mrb[27].mxu0 }
 0x135   : > { %v13689_v13 = vmax.f32 %v9548_v59, %v9604_v23  ;;  %v13691_v59 = vmax.f32 %v9552_v61, %v9594_v18 }
 0x139   : > { %v9608_v25 = vpop.f32.mrb[28].mxu0 }
 0x13a   : > { %v9612_v27 = vpop.f32.mrb[29].mxu0 }
 0x13b   : > { %v9616_v29 = vpop.f32.mrb[30].mxu0 }
 0x13c   : > { %v9620_v31 = vpop.f32.mrb[31].mxu0 }
 0x13d   : > { %v13692_v23 = vmax.f32 %v9556_v63, %v9620_v31 }
 0x141   : > { %v9624_v33 = vpop.f32.mrb[32].mxu0 }
 0x142   : > { %v9628_v35 = vpop.f32.mrb[33].mxu0 }
 0x143   : > { %v9632_v37 = vpop.f32.mrb[34].mxu0 }
 0x144   : > { %v9636_v39 = vpop.f32.mrb[35].mxu0 }
 0x149   : > { %v9640_v41 = vpop.f32.mrb[36].mxu0 }
 0x14a   : > { %v9644_v43 = vpop.f32.mrb[37].mxu0 }
 0x14b   : > { %v9648_v45 = vpop.f32.mrb[38].mxu0 }
 0x14c   : > { %v9652_v47 = vpop.f32.mrb[39].mxu0 }
 0x151   : > { %v9656_v49 = vpop.f32.mrb[40].mxu0 }
 0x152   : > { %13673 = vst [vmem:[#allocation16_spill] sm:$0xff] %v9656_v49  ;;  %v9660_v51 = vpop.f32.mrb[41].mxu0 }
 0x153   : > { %v9664_v53 = vpop.f32.mrb[42].mxu0 }
 0x154   : > { %13674 = vst [vmem:[#allocation17_spill] sm:$0xff] %v9664_v53  ;;  %v9668_v55 = vpop.f32.mrb[43].mxu0 }
 0x159   : > { %v9672_v57 = vpop.f32.mrb[44].mxu0 }
 0x15a   : > { %13675 = vst [vmem:[#allocation18_spill] sm:$0xff] %v9672_v57  ;;  %v9676_v46 = vpop.f32.mrb[45].mxu0 }
 0x15b   : > { %13676 = vst [vmem:[#allocation19_spill] sm:$0xff] %v9676_v46  ;;  %v9680_v52 = vpop.f32.mrb[46].mxu0 }
 0x15c   : > { %13677 = vst [vmem:[#allocation20_spill] sm:$0xff] %v9680_v52  ;;  %v9684_v38 = vpop.f32.mrb[47].mxu0 }
 0x15d   : > { %13678 = vst [vmem:[#allocation21_spill] sm:$0xff] %v9684_v38 }
 0x161   : > { %v8921_v48 = vpop.f32.mrb[48].mxu0 }
 0x162   : > { %v9688_v34 = vpop.f32.mrb[49].mxu0 }
 0x163   : > { %13679 = vst [vmem:[#allocation22_spill] sm:$0xff] %v9688_v34  ;;  %v8922_v44 = vpop.f32.mrb[50].mxu0 }
 0x164   : > { %v9692_v30 = vpop.f32.mrb[51].mxu0 }
 0x165   : > { %13680 = vst [vmem:[#allocation23_spill] sm:$0xff] %v9692_v30 }
 0x169   : > { %v8925_v40 = vpop.f32.mrb[52].mxu0 }
 0x16a   : > { %v1094_v26 = vpop.f32.mrb[53].mxu0 }
 0x16b   : > { %v9696_v54 = vpop.f32.mrb[54].mxu0 }
 0x16c   : > { %v1097_v36 = vpop.f32.mrb[55].mxu0 }
 0x171   : > { %v9698_v22 = vpop.f32.mrb[56].mxu0 }
 0x172   : > { %v9700_v56 = vpop.f32.mrb[57].mxu0 }
 0x173   : > { %v9702_v32 = vpop.f32.mrb[58].mxu0 }
 0x174   : > { %v9704_v19 = vpop.f32.mrb[59].mxu0 }
 0x179   : > { %v9706_v50 = vpop.f32.mrb[60].mxu0 }
 0x17a   : > { %v9708_v28 = vpop.f32.mrb[61].mxu0 }
 0x17b   : > { %v9710_v42 = vpop.f32.mrb[62].mxu0 }
 0x17c   : > { %v9712_v52 = vpop.f32.mrb[63].mxu0 }
 0x181   : > { %v9714_v14 = vpop.f32.mrb[64].mxu0 }
 0x182   : > { %v9716_v30 = vpop.f32.mrb[65].mxu0 }
 0x183   : > { %v9718_v20 = vpop.f32.mrb[66].mxu0 }
 0x184   : > { %13681 = vst [vmem:[#allocation24_spill] sm:$0xff] %v9718_v20  ;;  %v9720_v57 = vpop.f32.mrb[67].mxu0 }
 0x189   : > { %v9722_v17 = vpop.f32.mrb[68].mxu0 }
 0x18a   : > { %13682 = vst [vmem:[#allocation25_spill] sm:$0xff] %v9722_v17  ;;  %v9724_v34 = vpop.f32.mrb[69].mxu0 }
 0x18b   : > { %13683 = vst [vmem:[#allocation26_spill] sm:$0xff] %v9724_v34  ;;  %v9726_v16 = vpop.f32.mrb[70].mxu0  ;;  %v9742_v34 = vld [vmem:[%s13490_s2] ss:$0 sm:$0xff] }
 0x18c   : > { %13684 = vst [vmem:[#allocation27_spill] sm:$0xff] %v9726_v16  ;;  %v9728_v53 = vpop.f32.mrb[71].mxu0 }
 0x18d   : > { %13685 = vst [vmem:[#allocation28_spill] sm:$0xff] %v9728_v53 }
 0x191   : > { %v9730_v24 = vpop.f32.mrb[72].mxu0 }
 0x192   : > { %13686 = vst [vmem:[#allocation29_spill] sm:$0xff] %v9730_v24  ;;  %v9732_v10 = vpop.f32.mrb[73].mxu0 }
 0x193   : > { %13687 = vst [vmem:[#allocation30_spill] sm:$0xff] %v9732_v10  ;;  %v8946_v38 = vpop.f32.mrb[74].mxu0  ;;  %v13690_v10 = vmax.f32 %v9550_v60, %v9612_v27  ;;  %v13693_v60 = vmax.f32 %v9546_v58, %v9600_v21 }
 0x194   : > { %v1510_v15 = vmax.f32 %v8921_v48, %v8946_v38  ;;  %v9734_v49 = vpop.f32.mrb[75].mxu0 }
 0x195   : > { %13688 = vst [vmem:[#allocation31_spill] sm:$0xff] %v9734_v49 }
 0x196   : > { %v1535_v46 = vmax.f32 %v13689_v13, %v1510_v15 }
 0x198   : > { %v1567_v53 = vadd.f32 %v9742_v34, %v1535_v46 }
 0x199   : > { %v8949_v12 = vpop.f32.mrb[76].mxu0 }
 0x19a   : > { %v1513_v16 = vmax.f32 %v1097_v36, %v8949_v12  ;;  %v1190_v17 = vpop.f32.mrb[77].mxu0 }
 0x19b   : > { %v1511_v20 = vmax.f32 %v8922_v44, %v1190_v17  ;;  %v8950_v24 = vpop.f32.mrb[78].mxu0 }
 0x19c   : > { %v1538_v38 = vmax.f32 %v13690_v10, %v1513_v16  ;;  %v1514_v48 = vmax.f32 %v8925_v40, %v8950_v24  ;;  %v1193_v49 = vpop.f32.mrb[79].mxu0  ;;  %v1592_v16 = vmax.f32 %v1567_v53, 0.0 }
 0x19d   : > { %v1536_v13 = vmax.f32 %v13691_v59, %v1511_v20  ;;  %v1512_v15 = vmax.f32 %v1094_v26, %v1193_v49  ;;  %v13694_v49 = vmax.f32 %v9558_v0, %v9628_v35  ;;  %v13697_v35 = vmax.f32 %v9554_v62, %v9616_v29 }
 0x19e   : > { %v1539_v12 = vmax.f32 %v13692_v23, %v1514_v48  ;;  %v1570_v17 = vadd.f32 %v9742_v34, %v1538_v38 }
 0x19f   : > { %v1568_v36 = vadd.f32 %v9742_v34, %v1536_v13  ;;  %v1537_v10 = vmax.f32 %v13693_v60, %v1512_v15 }
 0x1a0   : > { %v1595_v20 = vmax.f32 %v1570_v17, 0.0  ;;  %v1571_v24 = vadd.f32 %v9742_v34, %v1539_v12 }
 0x1a1   : > { %v1593_v27 = vmax.f32 %v1568_v36, 0.0  ;;  %v1569_v40 = vadd.f32 %v9742_v34, %v1537_v10  ;;  %v8953_v44 = vpop.f32.mrb[80].mxu0 }
 0x1a2   : > { %v1517_v61 = vmax.f32 %v9704_v19, %v8953_v44  ;;  %v1206_v18 = vpop.f32.mrb[81].mxu0  ;;  %v13695_v19 = vmax.f32 %v9560_v1, %v9608_v25  ;;  %v1596_v1 = vmax.f32 %v1571_v24, 0.0 }
 0x1a3   : > { %v1617_v63 = vpack.c.bf16 %v1593_v27, %v1592_v16  ;;  %v1594_v26 = vmax.f32 %v1569_v40, 0.0  ;;  %v1515_v31 = vmax.f32 %v9696_v54, %v1206_v18  ;;  %v8954_v46 = vpop.f32.mrb[82].mxu0  ;;  %v13696_v54 = vmax.f32 %v9564_v3, %v9636_v39 }
 0x1a4   : > { %v1542_v58 = vmax.f32 %v13694_v49, %v1517_v61  ;;  %v1518_v21 = vmax.f32 %v9698_v22, %v8954_v46  ;;  %v1209_v53 = vpop.f32.mrb[83].mxu0  ;;  %v13698_v16 = vmax.f32 %v9566_v4, %v9644_v43  ;;  %v13700_v4 = vmax.f32 %v9572_v7, %v9652_v47 }
 0x1a5   : > { %1631 = vst.msk [vmem:[#allocation3] sm:$0xff] %vm1630_vm0, %v1617_v63  ;;  %v1618_v38 = vpack.c.bf16 %v1595_v20, %v1594_v26  ;;  %v1540_v48 = vmax.f32 %v13695_v19, %v1515_v31  ;;  %v1516_v59 = vmax.f32 %v9700_v56, %v1209_v53  ;;  %v13699_v20 = vmax.f32 %v9568_v5, %v9624_v33 }
 0x1a6   : > { %v1543_v13 = vmax.f32 %v13696_v54, %v1518_v21  ;;  %v1574_v0 = vadd.f32 %v9742_v34, %v1542_v58  ;;  %v13701_v5 = vmax.f32 %v9562_v2, %v9632_v37 }
 0x1a7   : > { %1632 = vst.msk [vmem:[#allocation3 + $0x8] sm:$0xff] %vm1630_vm0, %v1618_v38  ;;  %v1572_v22 = vadd.f32 %v9742_v34, %v1540_v48  ;;  %v1541_v15 = vmax.f32 %v13697_v35, %v1516_v59 }
 0x1a8   : > { %v1575_v23 = vadd.f32 %v9742_v34, %v1543_v13  ;;  %v1599_v17 = vmax.f32 %v1574_v0, 0.0 }
 0x1a9   : > { %v1597_v25 = vmax.f32 %v1572_v22, 0.0  ;;  %v1573_v56 = vadd.f32 %v9742_v34, %v1541_v15  ;;  %v8957_v3 = vpop.f32.mrb[84].mxu0 }
 0x1aa   : > { %v1521_v39 = vmax.f32 %v9712_v52, %v8957_v3  ;;  %v1222_v12 = vpop.f32.mrb[85].mxu0  ;;  %v1600_v10 = vmax.f32 %v1575_v23, 0.0 }
 0x1ab   : > { %v1619_v36 = vpack.c.bf16 %v1597_v25, %v1596_v1  ;;  %v1598_v62 = vmax.f32 %v1573_v56, 0.0  ;;  %v1519_v29 = vmax.f32 %v9702_v32, %v1222_v12  ;;  %v8958_v60 = vpop.f32.mrb[86].mxu0 }
 0x1ac   : > { %v1546_v27 = vmax.f32 %v13698_v16, %v1521_v39  ;;  %v1522_v40 = vmax.f32 %v9706_v50, %v8958_v60  ;;  %v1225_v44 = vpop.f32.mrb[87].mxu0  ;;  %v2050_v61 = vld [vmem:[#allocation3] sm:$0xfe]  ;;  %v13709_v16 = vmax.f32 %v9576_v9, %v9640_v41 }
 0x1ad   : > { %v2532_v52 = vld [vmem:[#allocation3] sm:$0xfc]  ;;  %1633 = vst.msk [vmem:[#allocation3 + $0x10] sm:$0xff] %vm1630_vm0, %v1619_v36  ;;  %v1620_v18 = vpack.c.bf16 %v1599_v17, %v1598_v62  ;;  %v1544_v63 = vmax.f32 %v13699_v20, %v1519_v29  ;;  %v1520_v32 = vmax.f32 %v9708_v28, %v1225_v44  ;;  %v8159_v26 = vcombine.low %v2050_v61, %v2050_v61 }
 0x1ae   : > { %v1578_v31 = vadd.f32 %v9742_v34, %v1546_v27  ;;  %v1547_v43 = vmax.f32 %v13700_v4, %v1522_v40  ;;  %v3175_v50 = vld [vmem:[#allocation3 + $0x8] sm:$0xff]  ;;  %v8160_v46 = vcombine.high %v2050_v61, %v2050_v61  ;;  %v8196_v49 = vcombine.low %v2532_v52, %v2532_v52  ;;  %v9244_v58 = vld [vmem:[#allocation3 + $0x4] ss:$0 sps:$4 sm:$0x88]  }
 0x1af   : > { %1634 = vst.msk [vmem:[#allocation3 + $0x18] sm:$0xff] %vm1630_vm0, %v1620_v18  ;;  %v1576_v21 = vadd.f32 %v9742_v34, %v1544_v63  ;;  %v1545_v33 = vmax.f32 %v13701_v5, %v1520_v32  ;;  %v9803_v28 = vcombine.high %v3175_v50, %v3175_v50  ;;  %v9805_v53 = vcombine.low %v3175_v50, %v3175_v50  ;;  %v3593_v12 = vld [vmem:[#allocation3 + $0x8] sm:$0xfe] }
 0x1b0   : > { %v1603_v47 = vmax.f32 %v1578_v31, 0.0  ;;  %v9814_v24 = vadd.f32 %v9742_v34, %v1547_v43  ;;  %v8177_v38 = vrot.slane %v8159_v26, 9  ;;  %v2109_v19 = vrot.slane %v8160_v46, 5 }
 0x1b1   : > { %v1601_v48 = vmax.f32 %v1576_v21, 0.0  ;;  %v1577_v2 = vadd.f32 %v9742_v34, %v1545_v33  ;;  %3229 = vrot.lane.b32.xlu1 %v9803_v28, %s9378_s25  ;;  %3227 = vrot.lane.b32.xlu0 %v9805_v53, %s9378_s25  ;;  %v8961_v37 = vpop.f32.mrb[88].mxu0  ;;  %v8197_v59 = vcombine.high %v2532_v52, %v2532_v52  ;;  %v8214_v54 = vrot.slane %v8196_v49, 10 }
 0x1b2   : > { %v1604_v13 = vmax.f32 %v9814_v24, 0.0  ;;  %v1525_v0 = vmax.f32 %v9720_v57, %v8961_v37  ;;  %v1238_v22 = vpop.f32.mrb[89].mxu0  ;;  %v2110_v35 = vsel %vm9809_vm7, %v8177_v38, %v2109_v19  ;;  %v8233_v23 = vrot.slane %v9244_v58, 11 }
 0x1b3   : > { %v1621_v1 = vpack.c.bf16 %v1601_v48, %v1600_v10  ;;  %v1602_v25 = vmax.f32 %v1577_v2, 0.0  ;;  %v1523_v56 = vmax.f32 %v9710_v42, %v1238_v22  ;;  %v8962_v3 = vpop.f32.mrb[90].mxu0  ;;  %v2591_v39 = vrot.slane %v8197_v59, 6  ;;  %v13714_v48 = vld [vmem:[#allocation9_spill] sm:$0xff]  ;;  %v13715_v2 = vld [vmem:[#allocation19_spill] sm:$0xff] }
 0x1b4   : > { %v13708_v17 = vmax.f32 %v9574_v8, %v9660_v51  ;;  %v1526_v62 = vmax.f32 %v9714_v14, %v8962_v3  ;;  %v1241_v29 = vpop.f32.mrb[91].mxu0  ;;  %v2771_v60 = vrot.slane %v9805_v53, 7  ;;  %v2111_v10 = vrot.slane %v2109_v19, 4 }
 0x1b5   : > { %1635 = vst.msk [vmem:[#allocation3 + $0x20] sm:$0xff] %vm1630_vm0, %v1621_v1  ;;  %v1622_v42 = vpack.c.bf16 %v1603_v47, %v1602_v25  ;;  %v1548_v27 = vmax.f32 %v13709_v16, %v1523_v56  ;;  %v1524_v40 = vmax.f32 %v9716_v30, %v1241_v29  ;;  %2159 = vrot.lane.b32.xlu1 %v2110_v35, %s9379_s26  ;;  %v2112_v30 = vrot.slane %v9805_v53, 5  ;;  %v13713_v47 = vld [vmem:[#allocation24_spill] sm:$0xff]  ;;  %v13718_v1 = vld [vmem:[#allocation10_spill] sm:$0xff] }
 0x1b6   : > { %v1550_v36 = vmax.f32 %v13708_v17, %v1525_v0  ;;  %v2592_v8 = vsel %vm9827_vm8, %v8214_v54, %v2591_v39  ;;  %v13710_v51 = vmax.f32 %v9580_v11, %v9668_v55  ;;  %v2772_v9 = vsel %vm9834_vm9, %v8233_v23, %v2771_v60  ;;  %v13717_v54 = vld [vmem:[#allocation25_spill] sm:$0xff]  ;;  %v13719_v25 = vld [vmem:[#allocation16_spill] sm:$0xff] }
 0x1b7   : > { %2641 = vrot.lane.b32.xlu0 %v2592_v8, %s9380_s27  ;;  %1636 = vst.msk [vmem:[#allocation3 + $0x28] sm:$0xff] %vm1630_vm0, %v1622_v42  ;;  %v1580_v41 = vadd.f32 %v9742_v34, %v1548_v27  ;;  %v13711_v61 = vmax.f32 %v9570_v6, %v9648_v45  ;;  %v8288_v18 = vcombine.low %v3593_v12, %v3593_v12  ;;  %v2593_v32 = vrot.slane %v2591_v39, 4  ;;  %v13712_v45 = vld [vmem:[#allocation28_spill] sm:$0xff]  ;;  %v13721_v39 = vld [vmem:[#allocation26_spill] sm:$0xff] }
 0x1b8   : > { %v1582_v14 = vadd.f32 %v9742_v34, %v1550_v36  ;;  %v1551_v44 = vmax.f32 %v13710_v51, %v1526_v62  ;;  %v8289_v20 = vcombine.high %v3593_v12, %v3593_v12  ;;  %v2113_v63 = vsel %vm9809_vm7, %v2111_v10, %v2112_v30  ;;  %v4710_v36 = vld [vmem:[#allocation3 + $0x10] sm:$0xff]  ;;  %v13722_v29 = vld [vmem:[#allocation12_spill] sm:$0xff]  ;;  %v13723_v10 = vld [vmem:[#allocation21_spill] sm:$0xff] }
 0x1b9   : > { %v1549_v52 = vmax.f32 %v13711_v61, %v1524_v40  ;;  %v1605_v26 = vmax.f32 %v1580_v41, 0.0  ;;  %2161 = vrot.lane.b32.xlu1 %v2113_v63, %s9379_s26  ;;  %v8965_v4 = vpop.f32.mrb[92].mxu0  ;;  %v8306_v43 = vrot.slane %v8288_v18, 9  ;;  %v2594_v58 = vrot.slane %v9805_v53, 6  ;;  %v13725_v8 = vld [vmem:[#allocation8_spill] sm:$0xff] }
 0x1ba   : > { %v1607_v11 = vmax.f32 %v1582_v14, 0.0  ;;  %v9865_v55 = vadd.f32 %v9742_v34, %v1551_v44  ;;  %v9871_v50 = vrot.slane %v8289_v20, 5  ;;  %v1529_v46 = vmax.f32 %v13712_v45, %v8965_v4  ;;  %v1254_v49 = vpop.f32.mrb[93].mxu0  ;;  %v13726_v14 = vld [vmem:[#allocation17_spill] sm:$0xff]  ;;  %v13728_v4 = vld [vmem:[#allocation31_spill] sm:$0xff] }
 0x1bb   : > { %v1581_v31 = vadd.f32 %v9742_v34, %v1549_v52  ;;  %2821 = vrot.lane.b32.xlu0 %v2772_v9, %s9381_s28  ;;  %v2114_v21 = vrot.slane %v2112_v30, 4  ;;  %v1623_v5 = vpack.c.bf16 %v1605_v26, %v1604_v13  ;;  %v1527_v24 = vmax.f32 %v13713_v47, %v1254_v49  ;;  %v8966_v38 = vpop.f32.mrb[94].mxu0  ;;  %v9910_v41 = vld [vmem:[#allocation3] sm:$0xfe] }
 0x1bc   : > { %v1608_v6 = vmax.f32 %v9865_v55, 0.0  ;;  %v3650_v19 = vsel %vm9809_vm7, %v8306_v43, %v9871_v50  ;;  %v13716_v37 = vmax.f32 %v13714_v48, %v13715_v2  ;;  %v1530_v0 = vmax.f32 %v13717_v54, %v8966_v38  ;;  %v1257_v22 = vpop.f32.mrb[95].mxu0  ;;  %v13730_v38 = vld [vmem:[#allocation13_spill] sm:$0xff] }
 0x1bd   : > { %v1606_v33 = vmax.f32 %v1581_v31, 0.0  ;;  %v2595_v35 = vsel %vm9827_vm8, %v2593_v32, %v2594_v58  ;;  %v2115_v13 = vrot.slane %v9803_v28, 5  ;;  %1637 = vst.msk [vmem:[#allocation3 + $0x30] sm:$0xff] %vm1630_vm0, %v1623_v5  ;;  %v13720_v56 = vmax.f32 %v13718_v1, %v13719_v25  ;;  %v13729_v5 = vld [vmem:[#allocation27_spill] sm:$0xff] }
 0x1be   : > { %v1554_v59 = vmax.f32 %v13716_v37, %v1529_v46  ;;  %v1528_v12 = vmax.f32 %v13721_v39, %v1257_v22  ;;  %2643 = vrot.lane.b32.xlu1 %v2595_v35, %s9380_s27  ;;  %v2773_v17 = vrot.slane %v2771_v60, 4  ;;  %v13724_v42 = vmax.f32 %v13722_v29, %v13723_v10  ;;  %v13733_v37 = vld [vmem:[#allocation29_spill] sm:$0xff] }
 0x1bf   : > { %v1624_v23 = vpack.c.bf16 %v1607_v11, %v1606_v33  ;;  %v1552_v3 = vmax.f32 %v13720_v56, %v1527_v24  ;;  %3699 = vrot.lane.b32.xlu0 %v3650_v19, %s9382_s29  ;;  %v2116_v27 = vsel %vm9809_vm7, %v2114_v21, %v2115_v13  ;;  %v2774_v40 = vrot.slane %v9803_v28, 7  ;;  %v13731_v19 = vld [vmem:[#allocation22_spill] sm:$0xff] }
 0x1c0   : > { %v1586_v62 = vadd.f32 %v9742_v34, %v1554_v59  ;;  %v1555_v16 = vmax.f32 %v13724_v42, %v1530_v0  ;;  %v13727_v51 = vmax.f32 %v13725_v8, %v13726_v14  ;;  %v2596_v9 = vrot.slane %v2594_v58, 4  ;;  %v13737_v56 = vld [vmem:[#allocation30_spill] sm:$0xff] }
 0x1c1   : > { %1638 = vst.msk [vmem:[#allocation3 + $0x38] sm:$0xff] %vm1630_vm0, %v1624_v23  ;;  %v1584_v60 = vadd.f32 %v9742_v34, %v1552_v3  ;;  %v2597_v30 = vrot.slane %v9803_v28, 6  ;;  %v2775_v18 = vsel %vm9834_vm9, %v2773_v17, %v2774_v40  ;;  %v9917_v20 = vcombine.high %v4710_v36, %v4710_v36  ;;  %v8969_v63 = vpop.f32.mrb[96].mxu0  ;;  %v13735_v23 = vld [vmem:[#allocation18_spill] sm:$0xff]  ;;  %v13739_v17 = vld [vmem:[#allocation23_spill] sm:$0xff] }
 0x1c2   : > { %v1553_v44 = vmax.f32 %v13727_v51, %v1528_v12  ;;  %v1611_v61 = vmax.f32 %v1586_v62, 0.0  ;;  %v1587_v52 = vadd.f32 %v9742_v34, %v1555_v16  ;;  %2823 = vrot.lane.b32.xlu1 %v2775_v18, %s9381_s28  ;;  %v9925_v26 = vcombine.low %v4710_v36, %v4710_v36  ;;  %v1270_v45 = vpop.f32.mrb[97].mxu0  ;;  %v13738_v12 = vld [vmem:[#allocation15_spill] sm:$0xff] }
 0x1c3   : > { %v1609_v11 = vmax.f32 %v1584_v60, 0.0  ;;  %v2598_v32 = vsel %vm9827_vm8, %v2596_v9, %v2597_v30  ;;  %2163 = vrot.lane.b32.xlu0 %v2116_v27, %s9379_s26  ;;  %v1533_v43 = vmax.f32 %v13728_v4, %v8969_v63  ;;  %v8179_v46 = vcombine.high %v9910_v41, %v9910_v41  ;;  %v8970_v47 = vpop.f32.mrb[98].mxu0  ;;  %v13741_v16 = vld [vmem:[#allocation11_spill] sm:$0xff]  ;;  %v13742_v27 = vld [vmem:[#allocation20_spill] sm:$0xff] }
 0x1c4   : > { %v1585_v55 = vadd.f32 %v9742_v34, %v1553_v44  ;;  %v1612_v31 = vmax.f32 %v1587_v52, 0.0  ;;  %v9932_v49 = vshrl.u32 %v9805_v53, 16  ;;  %v1531_v33 = vmax.f32 %v13729_v5, %v1270_v45  ;;  %v1273_v54 = vpop.f32.mrb[99].mxu0  ;;  %v1750_v52 = vld [vmem:[#allocation3] sm:$0xff] }
 0x1c5   : > { %v1625_v58 = vpack.c.bf16 %v1609_v11, %v1608_v6  ;;  %v9936_v24 = vshll.u32 %v9805_v53, 16  ;;  %v13732_v48 = vmax.f32 %v13730_v38, %v13731_v19  ;;  %v1534_v59 = vmax.f32 %v13733_v37, %v8970_v47  ;;  %v13734_v6 = vld [vmem:[#allocation14_spill] sm:$0xff] }
 0x1c6   : > { %v1610_v21 = vmax.f32 %v1585_v55, 0.0  ;;  %v2295_v0 = vshrl.u32 %v8179_v46, 16  ;;  %v2298_v22 = vshll.u32 %v8179_v46, 16  ;;  %v13736_v1 = vmax.f32 %v13734_v6, %v13735_v23  ;;  %4764 = vrot.lane.b32.xlu1 %v9917_v20, %s13569_s30 }
 0x1c7   : > { %v1558_v2 = vmax.f32 %v13732_v48, %v1533_v43  ;;  %1639 = vst.msk [vmem:[#allocation3 + $0x40] sm:$0xff] %vm1630_vm0, %v1625_v58  ;;  %v1532_v3 = vmax.f32 %v13737_v56, %v1273_v54  ;;  %v2307_v53 = vrot.slane %v9932_v49, 5  ;;  %v13740_v36 = vmax.f32 %v13738_v12, %v13739_v17  ;;  %2645 = vrot.lane.b32.xlu0 %v2598_v32, %s9380_s27 }
 0x1c8   : > { %v1626_v35 = vpack.c.bf16 %v1611_v61, %v1610_v21  ;;  %v1556_v25 = vmax.f32 %v13736_v1, %v1531_v33  ;;  %v2297_v29 = vrot.slane %v2295_v0, 5  ;;  %v2300_v10 = vrot.slane %v2298_v22, 6 }
 0x1c9   : > { %v1590_v39 = vadd.f32 %v9742_v34, %v1558_v2  ;;  %v1559_v62 = vmax.f32 %v13740_v36, %v1534_v59  ;;  %v13743_v60 = vmax.f32 %v13741_v16, %v13742_v27  ;;  %v2310_v14 = vrot.slane %v9936_v24, 6  ;;  %v9254_v27 = vld [vmem:[#allocation3 + $0x4] ss:$0 sps:$4 sm:$0x88]  }
 0x1ca   : > { %1640 = vst.msk [vmem:[#allocation3 + $0x48] sm:$0xff] %vm1630_vm0, %v1626_v35  ;;  %v1588_v42 = vadd.f32 %v9742_v34, %v1556_v25  ;;  %v9962_v9 = vor.u32 %v2300_v10, %v2297_v29  ;;  %v9965_v61 = vshrl.u32 %v9803_v28, 16  ;;  %3233 = vrot.lane.b32.xlu1 %v9917_v20, %s9378_s25  ;;  %v2957_v32 = vrot.slane %v9932_v49, 7  ;;  %v4711_v25 = vld [vmem:[#allocation3 + $0x18] sm:$0xff] }
 0x1cb   : > { %v1557_v8 = vmax.f32 %v13743_v60, %v1532_v3  ;;  %v1615_v51 = vmax.f32 %v1590_v39, 0.0  ;;  %v1591_v44 = vadd.f32 %v9742_v34, %v1559_v62  ;;  %v9976_v63 = vor.u32 %v2310_v14, %v2307_v53  ;;  %4762 = vrot.lane.b32.xlu0 %v9925_v26, %s13569_s30 }
 0x1cc   : > { %v1613_v18 = vmax.f32 %v1588_v42, 0.0  ;;  %v2303_v43 = vrot.slane %v9962_v9, 4  ;;  %v9984_v45 = vshll.u32 %v9803_v28, 16  ;;  %v2962_v21 = vrot.slane %v2957_v32, 4 }
 0x1cd   : > { %v1589_v11 = vadd.f32 %v9742_v34, %v1557_v8  ;;  %v1616_v4 = vmax.f32 %v1591_v44, 0.0  ;;  %v2966_v34 = vrot.slane %v9965_v61, 7  ;;  %v8141_v5 = vcombine.low %v1750_v52, %v1750_v52 }
 0x1ce   : > { %v1627_v46 = vpack.c.bf16 %v1613_v18, %v1612_v31  ;;  %v2312_v47 = vsel %vm9972_vm15, %v2303_v43, %v9976_v63  ;;  %v8142_v19 = vcombine.high %v1750_v52, %v1750_v52  ;;  %v13746_v31 = vmov 0 }
 0x1cf   : > { %v1614_v58 = vmax.f32 %v1589_v11, 0.0  ;;  %v1629_v33 = vpack.c.bf16 %v1616_v4, %v1616_v4  ;;  %v2969_v38 = vor.u32 %v9984_v45, %v2966_v34  ;;  %2465 = vrot.lane.b32.xlu1 %v2312_v47, %s13571_s12  ;;  %v13747_v31 = vsel %vm9998_vm1, 4294967295, %v13746_v31  ;;  %1733 = vst.msk [vmem:[#allocation4] sm:$0xf] %vm1643_vm12, %v8141_v5  ;;  %3231 = vrot.lane.b32.xlu0 %v9925_v26, %s9378_s25 }
 0x1d0   : > { %1641 = vst.msk [vmem:[#allocation3 + $0x50] sm:$0xff] %vm1630_vm0, %v1627_v46  ;;  %13748 = vst [vmem:[#allocation28_spill] sm:$0xff] %v13747_v31  ;;  %v1808_v2 = vshrl.u32 %v8141_v5, 16  ;;  %v1811_v37 = vshll.u32 %v8141_v5, 16  ;;  %v1817_v59 = vshll.u32 %v8142_v19, 16  ;;  %v1821_v54 = vshrl.u32 %v8142_v19, 16 }
 0x1d1   : > { %v1628_v48 = vpack.c.bf16 %v1615_v51, %v1614_v58  ;;  %1644 = vst.msk [vmem:[#allocation3 + $0x60] sm:$0xf] %vm1643_vm12, %v1629_v33  ;;  %1734 = vst.msk [vmem:[#allocation4 + $0x8] sm:$0xf] %vm1643_vm12, %v8142_v19  ;;  %v8178_v35 = vcombine.low %v9910_v41, %v9910_v41  ;;  %v2970_v6 = vsel %vm9998_vm1, %v2962_v21, %v2969_v38  ;;  %v1829_v16 = vrot.slane %v9936_v24, 5 }
 0x1d2   : > { %v1810_v0 = vrot.slane %v1808_v2, 4  ;;  %v1813_v22 = vrot.slane %v1811_v37, 5  ;;  %v1819_v23 = vrot.slane %v1817_v59, 5  ;;  %v1823_v1 = vrot.slane %v1821_v54, 4  ;;  %v9255_v5 = vld [vmem:[#allocation3 + $0x1c] ss:$0 sps:$4 sm:$0xff]  }
 0x1d3   : > { %1642 = vst.msk [vmem:[#allocation3 + $0x58] sm:$0xff] %vm1630_vm0, %v1628_v48  ;;  %3108 = vrot.lane.b32.xlu1 %v2970_v6, %s9385_s13  ;;  %v2286_v3 = vshrl.u32 %v8178_v35, 16  ;;  %v2289_v53 = vshll.u32 %v8178_v35, 16  ;;  %vm10014_vm0 = vmor %vm1804_vm2, %vm1805_vm3  ;;  %v10018_v41 = vcombine.high %v4711_v25, %v4711_v25  ;;  %v10027_v60 = vrot.slane %v9925_v26, 5 }
 0x1d4   : > { %v1814_v56 = vor.u32 %v1813_v22, %v1810_v0  ;;  %v1824_v12 = vor.u32 %v1823_v1, %v1819_v23  ;;  %v3651_v51 = vrot.slane %v9871_v50, 4  ;;  %v2950_v44 = vshrl.u32 %v9254_v27, 16 }
 0x1d5   : > { %v2288_v36 = vrot.slane %v2286_v3, 5  ;;  %v2291_v62 = vrot.slane %v2289_v53, 6  ;;  %v2960_v11 = vor.u32 %v2957_v32, %v9936_v24  ;;  %v2117_v4 = vrot.slane %v2115_v13, 4 }
 0x1d6   : > { %v1815_v17 = vrot.slane %v1814_v56, 4  ;;  %v1825_v10 = vrot.slane %v1824_v12, 4  ;;  %v3653_v52 = vsel %vm9809_vm7, %v3651_v51, %v10027_v60  ;;  %v3362_v50 = vrot.slane %v9984_v45, 5 }
 0x1d7   : > { %4768 = vrot.lane.b32.xlu1 %v10018_v41, %s13569_s30  ;;  %v2292_v42 = vor.u32 %v2291_v62, %v2288_v36  ;;  %v3366_v43 = vrot.slane %v9965_v61, 4  ;;  %v8252_v46 = vrot.slane %v2950_v44, 11  ;;  %v2600_v58 = vrot.slane %v9925_v26, 6 }
 0x1d8   : > { %v1820_v29 = vsel %vm10014_vm0, %v1815_v17, %v1819_v23  ;;  %v1830_v8 = vsel %vm10014_vm0, %v1825_v10, %v1829_v16  ;;  %v10055_v24 = vshll.u32 %v9925_v26, 16  ;;  %v2599_v13 = vrot.slane %v2597_v30, 4  ;;  %v9257_v23 = vld [vmem:[#allocation3 + $0xc] ss:$0 sps:$4 sm:$0xcc]  }
 0x1d9   : > { %1981 = vrot.lane.b32.xlu0 %v1820_v29, %s9386_s14  ;;  %v2293_v14 = vrot.slane %v2292_v42, 4  ;;  %v2961_v32 = vsel %vm9998_vm1, %v8252_v46, %v2960_v11  ;;  %v3367_v21 = vor.u32 %v3366_v43, %v3362_v50  ;;  %v3353_v38 = vrot.slane %v9932_v49, 4  ;;  %v9258_v10 = vld [vmem:[#allocation3 + $0xc] ss:$0 sps:$4 sm:$0x88]  }
 0x1da   : > { %v2601_v33 = vsel %vm9827_vm8, %v2599_v13, %v2600_v58  ;;  %v13525_v47 = vrot.slane %v10055_v24, 5  ;;  %v8384_v48 = vcombine.low %v4711_v25, %v4711_v25  ;;  %v3828_v37 = vrot.slane %v2600_v58, 4  ;;  %v9260_v46 = vld [vmem:[#allocation3 + $0x14] ss:$0 sps:$4 sm:$0x88]  }
 0x1db   : > { %3237 = vrot.lane.b32.xlu1 %v10018_v41, %s9378_s25  ;;  %v2302_v18 = vsel %vm9972_vm15, %v2293_v14, %v9962_v9  ;;  %v2119_v9 = vsel %vm9809_vm7, %v2117_v4, %v10027_v60  ;;  %v3368_v19 = vrot.slane %v3367_v21, 4  ;;  %v3357_v2 = vor.u32 %v3353_v38, %v1829_v16 }
 0x1dc   : > { %v4309_v59 = vrot.slane %v9925_v26, 7  ;;  %v3829_v54 = vrot.slane %v9917_v20, 6  ;;  %v4312_v6 = vrot.slane %v9917_v20, 7  ;;  %v3655_v25 = vrot.slane %v9917_v20, 5 }
 0x1dd   : > { %1983 = vrot.lane.b32.xlu0 %v1830_v8, %s9386_s14  ;;  %v3373_v30 = vsel %vm10014_vm0, %v3368_v19, %v13525_v47  ;;  %v3358_v49 = vrot.slane %v3357_v2, 4  ;;  %v8325_v56 = vrot.slane %v9257_v23, 10  ;;  %v2317_v3 = vrot.slane %v9965_v61, 5 }
 0x1de   : > { %v10081_v0 = vsel %vm9827_vm8, %v3828_v37, %v3829_v54  ;;  %v4311_v22 = vrot.slane %v4309_v59, 4  ;;  %v2320_v53 = vrot.slane %v9984_v45, 6  ;;  %v3657_v12 = vrot.slane %v3655_v25, 4 }
 0x1df   : > { %3701 = vrot.lane.b32.xlu1 %v3653_v52, %s9382_s29  ;;  %v3363_v35 = vsel %vm10014_vm0, %v3358_v49, %v3362_v50  ;;  %v10100_v17 = vrot.slane %v8384_v48, 5  ;;  %v3827_v36 = vsel %vm9827_vm8, %v8325_v56, %v2600_v58  ;;  %v2313_v62 = vrot.slane %v9976_v63, 4  ;;  %v9259_v52 = vld [vmem:[#allocation3 + $0x14] ss:$0 sps:$4 sm:$0xcc]  }
 0x1e0   : > { %v4313_v1 = vsel %vm9834_vm9, %v4311_v22, %v4312_v6  ;;  %v2321_v29 = vor.u32 %v2320_v53, %v2317_v3  ;;  %v8362_v16 = vrot.slane %v9258_v10, 11  ;;  %v5334_v27 = vrot.slane %v8384_v48, 6  ;;  %v9262_v10 = vld [vmem:[#allocation3 + $0xc] ss:$0 sps:$4 sm:$0xcc]  }
 0x1e1   : > { %2463 = vrot.lane.b32.xlu0 %v2302_v18, %s13571_s12  ;;  %v3659_v45 = vsel %vm9809_vm7, %v3657_v12, %v10100_v17  ;;  %v2605_v8 = vrot.slane %v3829_v54, 4  ;;  %v2776_v14 = vrot.slane %v2774_v40, 4  ;;  %v10120_v51 = vshll.u32 %v8384_v48, 16 }
 0x1e2   : > { %v2322_v42 = vsel %vm9972_vm15, %v2313_v62, %v2321_v29  ;;  %v4310_v63 = vsel %vm9834_vm9, %v8362_v16, %v4309_v59  ;;  %v10122_v44 = vshrl.u32 %v8384_v48, 16  ;;  %v10128_v11 = vrot.slane %v8384_v48, 7 }
 0x1e3   : > { %2165 = vrot.lane.b32.xlu1 %v2119_v9, %s9379_s26  ;;  %v10126_v18 = vsel %vm9827_vm8, %v2605_v8, %v5334_v27  ;;  %v5336_v4 = vrot.slane %v5334_v27, 4  ;;  %v10131_v50 = vshrl.u32 %v9925_v26, 16  ;;  %v3392_v43 = vrot.slane %v10120_v51, 5 }
 0x1e4   : > { %v3396_v28 = vrot.slane %v10122_v44, 4  ;;  %v2778_v40 = vsel %vm9834_vm9, %v2776_v14, %v4309_v59  ;;  %v13517_v9 = vrot.slane %v10018_v41, 6  ;;  %v8454_v26 = vrot.slane %v9259_v52, 10 }
 0x1e5   : > { %3106 = vrot.lane.b32.xlu0 %v2961_v32, %s9385_s13  ;;  %v5814_v32 = vrot.slane %v10128_v11, 4  ;;  %v2327_v21 = vrot.slane %v10131_v50, 5  ;;  %v13516_v19 = vrot.slane %v10018_v41, 7  ;;  %v4492_v37 = vrot.slane %v10131_v50, 7 }
 0x1e6   : > { %v10143_v58 = vor.u32 %v3396_v28, %v3392_v43  ;;  %v10150_v13 = vsel %vm9827_vm8, %v5336_v4, %v13517_v9  ;;  %v5335_v38 = vsel %vm9827_vm8, %v8454_v26, %v5334_v27  ;;  %v2323_v22 = vrot.slane %v2321_v29, 4  ;;  %v1665_v29 = vld [vmem:[#allocation3 + $0x8] sm:$0xff]  ;;  %v3947_v27 = vld [vmem:[#allocation3 + $0x18] sm:$0xff] }
 0x1e7   : > { %2647 = vrot.lane.b32.xlu1 %v2601_v33, %s9380_s27  ;;  %v10155_v33 = vshrl.u32 %v9917_v20, 16  ;;  %v10167_v2 = vsel %vm9834_vm9, %v5814_v32, %v13516_v19  ;;  %v3654_v12 = vrot.slane %v10027_v60, 4  ;;  %v4891_v60 = vrot.slane %v10100_v17, 4  ;;  %v9272_v32 = vld [vmem:[#allocation3 + $0x14] ss:$0 sps:$4 sm:$0xee]  }
 0x1e8   : > { %v13518_v16 = vrot.slane %v10018_v41, 5  ;;  %v4005_v8 = vshrl.u32 %v9262_v10, 16  ;;  %v4314_v52 = vrot.slane %v4312_v6, 4  ;;  %v4008_v4 = vshll.u32 %v9262_v10, 16 }
 0x1e9   : > { %5982 = vrot.lane.b32.xlu0 %v9255_v5, %s9380_s27  ;;  %v2330_v5 = vrot.slane %v10055_v24, 6  ;;  %v4501_v49 = vrot.slane %v10155_v33, 7  ;;  %v3656_v62 = vsel %vm9809_vm7, %v3654_v12, %v3655_v25  ;;  %v10223_v28 = vcombine.low %v3947_v27, %v3947_v27 }
 0x1ea   : > { %v10212_v25 = vsel %vm9809_vm7, %v4891_v60, %v13518_v16  ;;  %v10232_v26 = vcombine.high %v3947_v27, %v3947_v27  ;;  %v13751_v10 = vmov 0  ;;  %vm13542_vm2 = vcmask 388416  }
 0x1eb   : > { %3526 = vrot.lane.b32.xlu1 %v3373_v30, %s9387_s15  ;;  %v10170_v59 = vor.u32 %v2330_v5, %v2327_v21  ;;  %v13522_v6 = vshrl.u32 %v10223_v28, 16  ;;  %v4316_v21 = vsel %vm9834_vm9, %v4314_v52, %v10128_v11  ;;  %v13752_v10 = vsel %vm10262_vm6, 4294967295, %v13751_v10 }
 0x1ec   : > { %13753 = vst [vmem:[#allocation24_spill] sm:$0xff] %v13752_v10  ;;  %vm13530_vm3 = vcmask 454016  }
 0x1ed   : > { %4766 = vrot.lane.b32.xlu0 %v8384_v48, %s13569_s30  ;;  %v2332_v56 = vsel %vm9972_vm15, %v2323_v22, %v10170_v59  ;;  %v5065_v22 = vshrl.u32 %v9272_v32, 16 }
 0x1ef   : > { %1987 = vrot.lane.b32.xlu1 %v3373_v30, %s9386_s14  ;;  %v9261_v30 = vld [vmem:[#allocation3 + $0x14] ss:$0 sps:$4 sm:$0xee]   ;;  %v5067_v12 = vrot.slane %v5065_v22, 5 }
 0x1f0   : > { %v8417_v23 = vrot.slane %v9261_v30, 9  ;;  %v4019_v30 = vrot.slane %v10055_v24, 7 }
 0x1f1   : > { %3235 = vrot.lane.b32.xlu0 %v8384_v48, %s9378_s25  ;;  %v8491_v48 = vrot.slane %v9260_v46, 11  ;;  %v4007_v46 = vrot.slane %v4005_v8, 6 }
 0x1f2   : > { %v4890_v53 = vsel %vm9809_vm7, %v8417_v23, %v10100_v17  ;;  %v8126_v17 = vcombine.low %v1665_v29, %v1665_v29 }
 0x1f3   : > { %3878 = vrot.lane.b32.xlu1 %v10081_v0, %s9388_s16  ;;  %v5813_v54 = vsel %vm9834_vm9, %v8491_v48, %v10128_v11  ;;  %v4016_v48 = vrot.slane %v10131_v50, 6  ;;  %v5068_v11 = vshll.u32 %v9272_v32, 16 }
 0x1f4   : > { %1735 = vst.msk [vmem:[#allocation4 + $0x10] sm:$0xf] %vm1643_vm12, %v8126_v17 }
 0x1f5   : > { %3524 = vrot.lane.b32.xlu0 %v3363_v35, %s9387_s15 }
 0x1f7   : > { %4361 = vrot.lane.b32.xlu1 %v4313_v1, %s13664_s19 }
 0x1f9   : > { %1985 = vrot.lane.b32.xlu0 %v3363_v35, %s9386_s14  ;;  %v10180_v35 = vshll.u32 %v9917_v20, 16  ;;  %v4010_v20 = vrot.slane %v4008_v4, 7 }
 0x1fb   : > { %2827 = vrot.lane.b32.xlu1 %v4313_v1, %s9381_s28  ;;  %v4497_v1 = vrot.slane %v4492_v37, 4  ;;  %v4504_v3 = vor.u32 %v10180_v35, %v4501_v49  ;;  %v4011_v23 = vor.u32 %v4010_v20, %v4007_v46 }
 0x1fd   : > { %3876 = vrot.lane.b32.xlu0 %v3827_v36, %s9388_s16  ;;  %v4505_v36 = vsel %vm9998_vm1, %v4497_v1, %v4504_v3  ;;  %v5076_v1 = vrot.slane %v13522_v6, 5  ;;  %v5523_v6 = vrot.slane %v10120_v51, 7 }
 0x1ff   : > { %3705 = vrot.lane.b32.xlu1 %v3659_v45, %s9382_s29 }
 0x201   : > { %2467 = vrot.lane.b32.xlu0 %v2322_v42, %s13571_s12  ;;  %v8127_v42 = vcombine.high %v1665_v29, %v1665_v29  ;;  %v4020_v29 = vor.u32 %v4019_v30, %v4016_v48  ;;  %v4495_v48 = vor.u32 %v4492_v37, %v10055_v24 }
 0x203   : > { %2169 = vrot.lane.b32.xlu1 %v3659_v45, %s9379_s26  ;;  %v4510_v45 = vrot.slane %v10122_v44, 7  ;;  %1736 = vst.msk [vmem:[#allocation4 + $0x18] sm:$0xf] %vm1643_vm12, %v8127_v42 }
 0x205   : > { %4359 = vrot.lane.b32.xlu0 %v4310_v63, %s13664_s19  ;;  %v4506_v63 = vrot.slane %v4501_v49, 4  ;;  %v4513_v14 = vor.u32 %v4510_v45, %v10120_v51  ;;  %v13524_v49 = vshrl.u32 %v10232_v26, 16  ;;  %v4515_v19 = vrot.slane %v4510_v45, 4 }
 0x207   : > { %2651 = vrot.lane.b32.xlu1 %v10126_v18, %s9380_s27  ;;  %v5086_v17 = vrot.slane %v13524_v49, 5 }
 0x209   : > { %2825 = vrot.lane.b32.xlu0 %v2778_v40, %s9381_s28  ;;  %v10228_v40 = vsel %vm9998_vm1, %v4506_v63, %v4513_v14  ;;  %v4012_v63 = vrot.slane %v4011_v23, 4  ;;  %v3386_v23 = vrot.slane %v10155_v33, 4 }
 0x20b   : > { %5386 = vrot.lane.b32.xlu1 %v10150_v13, %s9386_s14 }
 0x20d   : > { %5384 = vrot.lane.b32.xlu0 %v5335_v38, %s9386_s14 }
 0x20f   : > { %5864 = vrot.lane.b32.xlu1 %v10167_v2, %s13571_s12 }
 0x211   : > { %5862 = vrot.lane.b32.xlu0 %v5813_v54, %s13571_s12  ;;  %v13523_v54 = vshll.u32 %v10232_v26, 16 }
 0x213   : > { %2469 = vrot.lane.b32.xlu1 %v2332_v56, %s13571_s12  ;;  %v5089_v8 = vrot.slane %v13523_v54, 6 }
 0x215   : > { %4939 = vrot.lane.b32.xlu0 %v4890_v53, %s9390_s20  ;;  %v5931_v53 = vld [vmem:[#allocation3 + $0x20] sm:$0xff]  ;;  %v10277_v32 = vor.u32 %v5089_v8, %v5086_v17 }
 0x216   : > { %v10273_v14 = vcombine.low %v5931_v53, %v5931_v53  ;;  %v10294_v22 = vcombine.high %v5931_v53, %v5931_v53  ;;  %v4026_v53 = vrot.slane %v10155_v33, 6 }
 0x217   : > { %4643 = vrot.lane.b32.xlu1 %v4505_v36, %s9391_s21 }
 0x218   : > { %13754 = vst [vmem:[#allocation9_spill] sm:$0xff] %v10273_v14 }
 0x219   : > { %3703 = vrot.lane.b32.xlu0 %v3656_v62, %s9382_s29 }
 0x21b   : > { %3112 = vrot.lane.b32.xlu1 %v4505_v36, %s9385_s13  ;;  %v5070_v36 = vrot.slane %v5068_v11, 6  ;;  %v13519_v11 = vrot.slane %v10180_v35, 5 }
 0x21d   : > { %2167 = vrot.lane.b32.xlu0 %v3656_v62, %s9379_s26  ;;  %v5071_v27 = vor.u32 %v5070_v36, %v5067_v12  ;;  %v4029_v12 = vrot.slane %v10180_v35, 7  ;;  %v2971_v36 = vrot.slane %v2966_v34, 4 }
 0x21f   : > { %4941 = vrot.lane.b32.xlu1 %v10212_v25, %s9390_s20  ;;  %v5072_v46 = vrot.slane %v5071_v27, 4  ;;  %v3387_v27 = vor.u32 %v3386_v23, %v13519_v11  ;;  %v2979_v8 = vsel %vm9998_vm1, %v2971_v36, %v4495_v48 }
 0x221   : > { %3880 = vrot.lane.b32.xlu0 %v10126_v18, %s9388_s16  ;;  %v13521_v18 = vshll.u32 %v10223_v28, 16 }
 0x223   : > { %3882 = vrot.lane.b32.xlu1 %v10150_v13, %s9388_s16  ;;  %v10241_v5 = vpop.permute.xlu1 %3229  ;;  %v10243_v38 = vpop.permute.xlu0 %3227  ;;  %v5079_v56 = vrot.slane %v13521_v18, 6 }
 0x225   : > { %2649 = vrot.lane.b32.xlu0 %v10081_v0, %s9380_s27  ;;  %v9263_v0 = vld [vmem:[#allocation3 + $0xc] ss:$0 sps:$4 sm:$0x88]   ;;  %v5080_v60 = vor.u32 %v5079_v56, %v5076_v1 }
 0x226   : > { %v4485_v42 = vshrl.u32 %v9263_v0, 16 }
 0x227   : > { %4365 = vrot.lane.b32.xlu1 %v10167_v2, %s13664_s19  ;;  %v10256_v3 = vpop.permute.xlu1 %2159  ;;  %v5082_v52 = vrot.slane %v5080_v60, 4 }
 0x228   : > { %v8381_v0 = vrot.slane %v4485_v42, 11  ;;  %v4022_v42 = vrot.slane %v4020_v29, 4 }
 0x229   : > { %4363 = vrot.lane.b32.xlu0 %v4316_v21, %s13664_s19  ;;  %v10258_v62 = vpop.permute.xlu0 %2641  ;;  %v5091_v30 = vsel %vm9972_vm15, %v5082_v52, %v10277_v32 }
 0x22a   : > { %5260 = vst.msk [vmem:[#allocation4 + $0xc] sm:$0xf] %vm1643_vm12, %v5091_v30  ;;  %v4496_v56 = vsel %vm9998_vm1, %v8381_v0, %v4495_v48  ;;  %v10337_v48 = vshrl.u32 %v10018_v41, 16 }
 0x22b   : > { %2831 = vrot.lane.b32.xlu1 %v10167_v2, %s9381_s28  ;;  %v10275_v4 = vpop.permute.xlu1 %2161  ;;  %v4021_v2 = vsel %vm10262_vm6, %v4012_v63, %v4020_v29  ;;  %v10323_v63 = vor.u32 %v4029_v12, %v4026_v53  ;;  %v3388_v29 = vrot.slane %v3387_v27, 4  ;;  %v2350_v53 = vrot.slane %v10120_v51, 6  ;;  %v6051_v12 = vld [vmem:[#allocation3 + $0x20] sm:$0xff] }
 0x22c   : > { %v13520_v36 = vrot.slane %v10337_v48, 7  ;;  %v8369_v49 = vcombine.high %v6051_v12, %v6051_v12 }
 0x22d   : > { %2829 = vrot.lane.b32.xlu0 %v4316_v21, %s9381_s28  ;;  %v10281_v20 = vpop.permute.xlu0 %2821  ;;  %v5081_v21 = vsel %vm9972_vm15, %v5072_v46, %v5080_v60  ;;  %v4031_v34 = vsel %vm10262_vm6, %v4022_v42, %v10323_v63  ;;  %v2337_v46 = vrot.slane %v10155_v33, 5  ;;  %v3393_v0 = vsel %vm10014_vm0, %v3388_v29, %v3392_v43 }
 0x22e   : > { %5259 = vst.msk [vmem:[#allocation4 + $0x4] sm:$0xf] %vm1643_vm12, %v5081_v21  ;;  %v9266_v21 = vld [vmem:[#allocation3 + $0x14] ss:$0 sps:$4 sm:$0xcc]   ;;  %v10360_v43 = vshll.u32 %v10018_v41, 16 }
 0x22f   : > { %5984 = vrot.lane.b32.xlu1 %v10273_v14, %s9380_s27  ;;  %v5509_v42 = vshrl.u32 %v9266_v21, 16  ;;  %v5512_v27 = vshll.u32 %v9266_v21, 16 }
 0x230   : > { %v10298_v37 = vpop.permute.xlu1 %2643 }
 0x231   : > { %4182 = vrot.lane.b32.xlu0 %v4021_v2, %s9392_s22  ;;  %v10302_v1 = vpop.permute.xlu0 %3699  ;;  %v2340_v2 = vrot.slane %v10180_v35, 6  ;;  %v5511_v9 = vrot.slane %v5509_v42, 6  ;;  %v5514_v16 = vrot.slane %v5512_v27, 7 }
 0x233   : > { %4772 = vrot.lane.b32.xlu1 %v10294_v22, %s13569_s30  ;;  %v10349_v33 = vor.u32 %v2340_v2, %v2337_v46  ;;  %v5932_v2 = vld [vmem:[#allocation3 + $0x28] sm:$0xff]  ;;  %v5515_v27 = vor.u32 %v5514_v16, %v5511_v9 }
 0x234   : > { %v10313_v60 = vpop.permute.xlu1 %2823  ;;  %v10402_v54 = vcombine.high %v5932_v2, %v5932_v2 }
 0x235   : > { %4641 = vrot.lane.b32.xlu0 %v4496_v56, %s9391_s21  ;;  %v10317_v17 = vpop.permute.xlu0 %2163  ;;  %v2347_v56 = vrot.slane %v10122_v44, 5  ;;  %v2343_v29 = vrot.slane %v10349_v33, 4  ;;  %v5516_v16 = vrot.slane %v5515_v27, 4 }
 0x236   : > { %13755 = vst [vmem:[#allocation19_spill] sm:$0xff] %v10402_v54  ;;  %v13527_v27 = vrot.slane %v10402_v54, 5 }
 0x237   : > { %3241 = vrot.lane.b32.xlu1 %v10294_v22, %s9378_s25  ;;  %v10363_v46 = vor.u32 %v2350_v53, %v2347_v56  ;;  %v10375_v56 = vld [vmem:[#allocation3 + $0x10] sm:$0xff] }
 0x238   : > { %v10326_v61 = vpop.permute.xlu1 %4764  ;;  %v8129_v42 = vcombine.high %v10375_v56, %v10375_v56 }
 0x239   : > { %3110 = vrot.lane.b32.xlu0 %v2979_v8, %s9385_s13  ;;  %v10331_v52 = vpop.permute.xlu0 %2645  ;;  %v2352_v45 = vsel %vm9972_vm15, %v2343_v29, %v10363_v46 }
 0x23a   : > { %1738 = vst.msk [vmem:[#allocation4 + $0x28] sm:$0xf] %vm1643_vm12, %v8129_v42 }
 0x23b   : > { %4184 = vrot.lane.b32.xlu1 %v4031_v34, %s9392_s22  ;;  %v8510_v34 = vcombine.low %v6051_v12, %v6051_v12 }
 0x23c   : > { %v10341_v30 = vpop.permute.xlu1 %3233 }
 0x23d   : > { %3707 = vrot.lane.b32.xlu0 %v10212_v25, %s9382_s29  ;;  %v10347_v23 = vpop.permute.xlu0 %4762  ;;  %v10381_v11 = vshll.u32 %v8510_v34, 16 }
 0x23f   : > { %3530 = vrot.lane.b32.xlu1 %v3393_v0, %s9387_s15 }
 0x241   : > { %2171 = vrot.lane.b32.xlu0 %v10212_v25, %s9379_s26  ;;  %v10357_v8 = vpop.permute.xlu1 %2465  ;;  %v4522_v25 = vor.u32 %v10360_v43, %v13520_v36  ;;  %v10373_v21 = vpop.permute.xlu0 %3231  ;;  %v5520_v36 = vrot.slane %v10122_v44, 6  ;;  %v3376_v44 = vrot.slane %v10131_v50, 4 }
 0x243   : > { %1991 = vrot.lane.b32.xlu1 %v3393_v0, %s9386_s14  ;;  %v10379_v0 = vcombine.low %v5932_v2, %v5932_v2 }
 0x245   : > { %2653 = vrot.lane.b32.xlu0 %v10150_v13, %s9380_s27  ;;  %v10377_v53 = vpop.permute.xlu1 %3108  ;;  %v4523_v13 = vsel %vm9998_vm1, %v4515_v19, %v4522_v25  ;;  %v13526_v29 = vrot.slane %v10379_v0, 5  ;;  %v2370_v19 = vrot.slane %v10381_v11, 6 }
 0x247   : > { %2473 = vrot.lane.b32.xlu1 %v2352_v45, %s13571_s12  ;;  %v10398_v45 = vshrl.u32 %v8510_v34, 16  ;;  %v10413_v34 = vshrl.u32 %v8369_v49, 16  ;;  %v10421_v50 = vrot.slane %v13526_v29, 4 }
 0x249   : > { %5986 = vrot.lane.b32.xlu0 %v10294_v22, %s9380_s27  ;;  %v10394_v18 = vpop.permute.xlu1 %4768  ;;  %v2367_v9 = vrot.slane %v10398_v45, 5  ;;  %v4528_v51 = vrot.slane %v10398_v45, 7  ;;  %13756 = vst [vmem:[#allocation25_spill] sm:$0xff] %v10413_v34  ;;  %13757 = vst [vmem:[#allocation10_spill] sm:$0xff] %v10421_v50  ;;  %v13528_v47 = vrot.slane %v10413_v34, 7 }
 0x24b   : > { %v1982_v25 = vpop.permute.xlu0 %1981  ;;  %4647 = vrot.lane.b32.xlu1 %v4523_v13, %s9391_s21  ;;  %v10417_v2 = vor.u32 %v2370_v19, %v2367_v9  ;;  %v10431_v19 = vor.u32 %v5523_v6, %v5520_v36  ;;  %v13758_v9 = vrot.slane %v10055_v24, 5  ;;  %v10448_v24 = vsel %vm9809_vm7, %v10421_v50, %v13527_v27 }
 0x24c   : > { %2033 = vst.msk [vmem:[#allocation4] sm:$0xf] %vm13557_vm10, %v1982_v25  ;;  %v4533_v25 = vrot.slane %v4528_v51, 4  ;;  %v8128_v36 = vcombine.low %v10375_v56, %v10375_v56  ;;  %v13760_v27 = vshll.u32 %v10232_v26, 16 }
 0x24d   : > { %4770 = vrot.lane.b32.xlu0 %v10273_v14, %s13569_s30  ;;  %2211 = vst.msk [vmem:[#allocation4] sm:$0xf] %vm13556_vm11, %v10256_v3  ;;  %v10415_v12 = vpop.permute.xlu1 %3237  ;;  %v10426_v3 = vshll.u32 %v8369_v49, 16  ;;  %v3377_v29 = vor.u32 %v3376_v44, %v13758_v9  ;;  %v2333_v49 = vrot.slane %v10170_v59, 4  ;;  %v5533_v59 = vrot.slane %v10360_v43, 7 }
 0x24e   : > { %v13759_v44 = vshrl.u32 %v10232_v26, 16  ;;  %v5525_v56 = vsel %vm10262_vm6, %v5516_v16, %v10431_v19  ;;  %1737 = vst.msk [vmem:[#allocation4 + $0x20] sm:$0xf] %vm1643_vm12, %v8128_v36  ;;  %v13761_v26 = vshrl.u32 %v10223_v28, 16 }
 0x24f   : > { %v1984_v42 = vpop.permute.xlu0 %1983  ;;  %3116 = vrot.lane.b32.xlu1 %v4523_v13, %s9385_s13 }
 0x250   : > { %2034 = vst.msk [vmem:[#allocation4 + $0x8] sm:$0xf] %vm13557_vm10, %v1984_v42  ;;  %v4540_v42 = vor.u32 %v10426_v3, %v13528_v47  ;;  %v4046_v9 = vrot.slane %v13759_v44, 6  ;;  %v4036_v16 = vrot.slane %v13761_v26, 6 }
 0x251   : > { %2212 = vst.msk [vmem:[#allocation4 + $0x8] sm:$0xf] %vm13556_vm11, %v10275_v4  ;;  %3239 = vrot.lane.b32.xlu0 %v10273_v14, %s9378_s25  ;;  %v10452_v6 = vpop.permute.xlu1 %3701  ;;  %v5530_v4 = vrot.slane %v10337_v48, 6 }
 0x252   : > { %2516 = vst.msk [vmem:[#allocation4 + $0x8] sm:$0xf] %vm13555_vm13, %v10357_v8  ;;  %v4049_v8 = vrot.slane %v13760_v27, 7  ;;  %v10466_v47 = vsel %vm9998_vm1, %v4533_v25, %v4540_v42  ;;  %v2342_v27 = vsel %vm9972_vm15, %v2333_v49, %v10349_v33  ;;  %v5540_v33 = vrot.slane %v10398_v45, 6 }
 0x253   : > { %2694 = vst.msk [vmem:[#allocation4 + $0x8] sm:$0xf] %vm13545_vm14, %v10298_v37  ;;  %v2464_v13 = vpop.permute.xlu0 %2463  ;;  %v3378_v37 = vrot.slane %v3377_v29, 4  ;;  %5988 = vrot.lane.b32.xlu1 %v10379_v0, %s9380_s27  ;;  %v5534_v42 = vor.u32 %v5533_v59, %v5530_v4  ;;  %v6602_v49 = vrot.slane %v10413_v34, 5  ;;  %v6605_v4 = vrot.slane %v10426_v3, 6 }
 0x254   : > { %2515 = vst.msk [vmem:[#allocation4] sm:$0xf] %vm13555_vm13, %v2464_v13  ;;  %v4050_v13 = vor.u32 %v4049_v8, %v4046_v9 }
 0x255   : > { %2874 = vst.msk [vmem:[#allocation4 + $0x8] sm:$0xf] %vm13542_vm2, %v10313_v60  ;;  %5686 = vrot.lane.b32.xlu0 %v5525_v56, %s9379_s26  ;;  %v13762_v60 = vshll.u32 %v10223_v28, 16  ;;  %v2166_v25 = vpop.permute.xlu1 %2165  ;;  %v5543_v28 = vrot.slane %v10381_v11, 7  ;;  %v5536_v9 = vrot.slane %v5534_v42, 4  ;;  %v10520_v26 = vor.u32 %v6605_v4, %v6602_v49 }
 0x256   : > { %2693 = vst.msk [vmem:[#allocation4] sm:$0xf] %vm13545_vm14, %v10258_v62  ;;  %v4032_v62 = vrot.slane %v10323_v63, 4  ;;  %v4052_v56 = vrot.slane %v4050_v13, 4  ;;  %v5553_v4 = vrot.slane %v10426_v3, 7 }
 0x257   : > { %3159 = vst.msk [vmem:[#allocation4 + $0x8] sm:$0xf] %vm13530_vm3, %v10377_v53  ;;  %v4039_v29 = vrot.slane %v13762_v60, 7  ;;  %v5526_v53 = vrot.slane %v10431_v19, 4  ;;  %v3107_v36 = vpop.permute.xlu0 %3106  ;;  %4776 = vrot.lane.b32.xlu1 %v10402_v54, %s13569_s30  ;;  %v5544_v8 = vor.u32 %v5543_v28, %v5540_v33  ;;  %v6128_v33 = vrot.slane %v10426_v3, 5 }
 0x258   : > { %2873 = vst.msk [vmem:[#allocation4] sm:$0xf] %vm13542_vm2, %v10281_v20  ;;  %v13763_v20 = vrot.slane %v10180_v35, 5  ;;  %v6122_v35 = vrot.slane %v10398_v45, 4 }
 0x259   : > { %3280 = vst.msk [vmem:[#allocation4 + $0x8] sm:$0xf] %vm13529_vm4, %v10241_v5  ;;  %v13531_v5 = vrot.slane %v10381_v11, 5  ;;  %v4040_v63 = vor.u32 %v4039_v29, %v4036_v16  ;;  %v10508_v19 = vpop.permute.xlu1 %2647  ;;  %v10525_v16 = vor.u32 %v10381_v11, %v4528_v51  ;;  %v10530_v29 = vsel %vm10262_vm6, %v5536_v9, %v5544_v8 }
 0x25a   : > { %3158 = vst.msk [vmem:[#allocation4] sm:$0xf] %vm13530_vm3, %v3107_v36  ;;  %v3383_v44 = vsel %vm10014_vm0, %v3378_v37, %v13763_v20  ;;  %v6598_v37 = vrot.slane %v10417_v2, 4  ;;  %v5550_v36 = vrot.slane %v10413_v34, 6  ;;  %v10536_v45 = vsel %vm10262_vm6, %v4052_v56, %v5544_v8 }
 0x25b   : > { %3528 = vrot.lane.b32.xlu0 %v3383_v44, %s9387_s15  ;;  %3279 = vst.msk [vmem:[#allocation4] sm:$0xf] %vm13529_vm4, %v10243_v38  ;;  %v10513_v59 = vpop.permute.xlu0 %5982  ;;  %3245 = vrot.lane.b32.xlu1 %v10402_v54, %s9378_s25  ;;  %v6123_v38 = vor.u32 %v6122_v35, %v13531_v5  ;;  %13764 = vst [vmem:[#allocation16_spill] sm:$0xff] %v10525_v16  ;;  %v4042_v60 = vrot.slane %v4040_v63, 4  ;;  %vm13559_vm4 = vcmask 650816   ;;  %v5535_v35 = vsel %vm10262_vm6, %v5526_v53, %v5534_v42 }
 0x25c   : > { %13765 = vst [vmem:[#allocation26_spill] sm:$0xff] %v10536_v45  ;;  %v10541_v51 = vsel %vm9972_vm15, %v6598_v37, %v10520_v26  ;;  %v5546_v49 = vrot.slane %v5544_v8, 4  ;;  %v10557_v56 = vor.u32 %v5553_v4, %v5550_v36  ;;  %v10565_v53 = vrot.slane %v10273_v14, 5 }
 0x25d   : > { %v3527_v28 = vpop.permute.xlu1 %3526  ;;  %v6124_v20 = vrot.slane %v6123_v38, 4  ;;  %v4051_v3 = vsel %vm10262_vm6, %v4042_v60, %v4050_v13  ;;  %vm13558_vm3 = vcmask 716416   ;;  %v13767_v42 = vrot.slane %v10018_v41, 5  ;;  %5262 = vst.msk [vmem:[#allocation4 + $0x1c] sm:$0xf] %vm1643_vm12, %v10541_v51 }
 0x25e   : > { %3577 = vst.msk [vmem:[#allocation4 + $0x8] sm:$0xf] %vm13574_vm5, %v3527_v28  ;;  %13766 = vst [vmem:[#allocation12_spill] sm:$0xff] %v10557_v56  ;;  %v5092_v28 = vrot.slane %v10277_v32, 4  ;;  %v6408_v4 = vrot.slane %v10565_v53, 4  ;;  %v3402_v5 = vrot.slane %v10360_v43, 5 }
 0x25f   : > { %1989 = vrot.lane.b32.xlu0 %v3383_v44, %s9386_s14  ;;  %v10543_v44 = vpop.permute.xlu0 %4766  ;;  %5688 = vrot.lane.b32.xlu1 %v5535_v35, %s9379_s26  ;;  %3752 = vst.msk [vmem:[#allocation4 + $0x8] sm:$0xf] %vm13559_vm4, %v10452_v6  ;;  %v10554_v9 = vsel %vm10014_vm0, %v6124_v20, %v6128_v33  ;;  %v10570_v6 = vsel %vm10262_vm6, %v5546_v49, %v10557_v56  ;;  %v3663_v13 = vrot.slane %v13767_v42, 4  ;;  %v6132_v49 = vrot.slane %v10413_v34, 4 }
 0x260   : > { %v5101_v32 = vsel %vm9972_vm15, %v5092_v28, %v10417_v2 }
 0x261   : > { %v1988_v37 = vpop.permute.xlu1 %1987  ;;  %v10583_v36 = vsel %vm9809_vm7, %v3663_v13, %v10565_v53  ;;  %5261 = vst.msk [vmem:[#allocation4 + $0x14] sm:$0xf] %vm1643_vm12, %v5101_v32 }
 0x262   : > { %2036 = vst.msk [vmem:[#allocation4 + $0x18] sm:$0xf] %vm13557_vm10, %v1988_v37  ;;  %v10622_v37 = vor.u32 %v6132_v49, %v6128_v33 }
 0x263   : > { %2471 = vrot.lane.b32.xlu0 %v2342_v27, %s13571_s12  ;;  %v10559_v38 = vpop.permute.xlu0 %3235  ;;  %v4041_v27 = vsel %vm10262_vm6, %v4032_v62, %v4040_v63  ;;  %2214 = vst.msk [vmem:[#allocation4 + $0x18] sm:$0xf] %vm13556_vm11, %v2166_v25  ;;  %4188 = vrot.lane.b32.xlu1 %v4051_v3, %s9392_s22  ;;  %v2612_v62 = vrot.slane %v10273_v14, 6  ;;  %v13533_v3 = vrot.slane %v10294_v22, 5 }
 0x264   : > { %13769 = vst [vmem:[#allocation21_spill] sm:$0xff] %v10622_v37 }
 0x265   : > { %v3879_v8 = vpop.permute.xlu1 %3878 }
 0x266   : > { %3929 = vst.msk [vmem:[#allocation4 + $0x8] sm:$0xf] %vm13558_vm3, %v3879_v8  ;;  %v10633_v8 = vsel %vm9809_vm7, %v6408_v4, %v13533_v3 }
 0x267   : > { %4186 = vrot.lane.b32.xlu0 %v4041_v27, %s9392_s22  ;;  %v3525_v60 = vpop.permute.xlu0 %3524  ;;  %3709 = vrot.lane.b32.xlu1 %v10583_v36, %s9382_s29  ;;  %v1667_v27 = vld [vmem:[#allocation3 + $0x18] sm:$0xff] }
 0x268   : > { %3576 = vst.msk [vmem:[#allocation4] sm:$0xf] %vm13574_vm5, %v3525_v60  ;;  %v6886_v60 = vrot.slane %v2612_v62, 4  ;;  %v8131_v33 = vcombine.high %v1667_v27, %v1667_v27 }
 0x269   : > { %3751 = vst.msk [vmem:[#allocation4] sm:$0xf] %vm13559_vm4, %v10302_v1  ;;  %v10592_v25 = vpop.permute.xlu1 %4361  ;;  %v13768_v1 = vrot.slane %v10018_v41, 6  ;;  %vm13787_vm4 = vcmask 519616  }
 0x26a   : > { %1740 = vst.msk [vmem:[#allocation4 + $0x38] sm:$0xf] %vm1643_vm12, %v8131_v33 }
 0x26b   : > { %4645 = vrot.lane.b32.xlu0 %v10228_v40, %s9391_s21  ;;  %v1986_v63 = vpop.permute.xlu0 %1985  ;;  %2173 = vrot.lane.b32.xlu1 %v10583_v36, %s9379_s26  ;;  %v2611_v20 = vrot.slane %v13768_v1, 4  ;;  %v9271_v1 = vld [vmem:[#allocation3 + $0x1c] ss:$0 sps:$4 sm:$0xee]  }
 0x26c   : > { %2035 = vst.msk [vmem:[#allocation4 + $0x10] sm:$0xf] %vm13557_vm10, %v1986_v63  ;;  %v13532_v63 = vrot.slane %v10294_v22, 6 }
 0x26d   : > { %2213 = vst.msk [vmem:[#allocation4 + $0x10] sm:$0xf] %vm13556_vm11, %v10317_v17  ;;  %v10610_v35 = vpop.permute.xlu1 %2827  ;;  %vm13644_vm11 = vcmask 978816  }
 0x26e   : > { %v10652_v49 = vsel %vm9827_vm8, %v6886_v60, %v13532_v63 }
 0x26f   : > { %3114 = vrot.lane.b32.xlu0 %v10228_v40, %s9385_s13  ;;  %v3877_v17 = vpop.permute.xlu0 %3876  ;;  %v10616_v40 = vsel %vm9827_vm8, %v2611_v20, %v2612_v62  ;;  %v8130_v20 = vcombine.low %v1667_v27, %v1667_v27  ;;  %v9273_v27 = vld [vmem:[#allocation3 + $0x1c] ss:$0 sps:$4 sm:$0xcc]  }
 0x270   : > { %3928 = vst.msk [vmem:[#allocation4] sm:$0xf] %vm13558_vm3, %v3877_v17  ;;  %2655 = vrot.lane.b32.xlu1 %v10616_v40, %s9380_s27  ;;  %v8545_v17 = vrot.slane %v9271_v1, 9  ;;  %v3406_v1 = vrot.slane %v10337_v48, 4  ;;  %v8582_v63 = vrot.slane %v9273_v27, 10  ;;  %vm13786_vm3 = vcmask 454016  }
 0x271   : > { %v10627_v42 = vpop.permute.xlu1 %3705  ;;  %1739 = vst.msk [vmem:[#allocation4 + $0x30] sm:$0xf] %vm1643_vm12, %v8130_v20  ;;  %v13536_v20 = vrot.slane %v10294_v22, 7 }
 0x272   : > { %v6407_v60 = vsel %vm9809_vm7, %v8545_v17, %v10565_v53  ;;  %v3410_v17 = vshll.u32 %v10273_v14, 16  ;;  %v3407_v27 = vor.u32 %v3406_v1, %v3402_v5 }
 0x273   : > { %5990 = vrot.lane.b32.xlu0 %v10402_v54, %s9380_s27  ;;  %v2468_v13 = vpop.permute.xlu0 %2467 }
 0x274   : > { %2517 = vst.msk [vmem:[#allocation4 + $0x10] sm:$0xf] %vm13555_vm13, %v2468_v13  ;;  %6458 = vrot.lane.b32.xlu1 %v10633_v8, %s9385_s13 }
 0x275   : > { %2695 = vst.msk [vmem:[#allocation4 + $0x10] sm:$0xf] %vm13545_vm14, %v10331_v52  ;;  %v10643_v28 = vpop.permute.xlu1 %2169  ;;  %v5818_v52 = vrot.slane %v10273_v14, 7 }
 0x277   : > { %4774 = vrot.lane.b32.xlu0 %v10379_v0, %s13569_s30  ;;  %v10646_v32 = vpop.permute.xlu0 %4359  ;;  %v5820_v33 = vrot.slane %v5818_v52, 4  ;;  %s13844_s30 = smov 24  }
 0x278   : > { %6936 = vrot.lane.b32.xlu1 %v10652_v49, %s9387_s15 }
 0x279   : > { %v10660_v4 = vpop.permute.xlu1 %2651  ;;  %v10677_v53 = vsel %vm9834_vm9, %v5820_v33, %v13536_v20  ;;  %v10690_v33 = vrot.slane %v3410_v17, 5 }
 0x27b   : > { %3243 = vrot.lane.b32.xlu0 %v10379_v0, %s9378_s25  ;;  %v2826_v13 = vpop.permute.xlu0 %2825  ;;  %13770 = vst [vmem:[#allocation8_spill] sm:$0xff] %v10690_v33 }
 0x27c   : > { %2875 = vst.msk [vmem:[#allocation4 + $0x10] sm:$0xf] %vm13542_vm2, %v2826_v13  ;;  %5390 = vrot.lane.b32.xlu1 %v10652_v49, %s9386_s14  ;;  %v6885_v13 = vsel %vm9827_vm8, %v8582_v63, %v2612_v62  ;;  %v13771_v63 = vrot.slane %v10018_v41, 7 }
 0x27d   : > { %v5387_v3 = vpop.permute.xlu1 %5386 }
 0x27e   : > { %5436 = vst.msk [vmem:[#allocation4 + $0xc] sm:$0xf] %vm13557_vm10, %v5387_v3 }
 0x27f   : > { %6456 = vrot.lane.b32.xlu0 %v6407_v60, %s9385_s13  ;;  %v5385_v34 = vpop.permute.xlu0 %5384  ;;  %v4255_v60 = vld [vmem:[#allocation3 + $0x28] sm:$0xff] }
 0x280   : > { %5435 = vst.msk [vmem:[#allocation4 + $0x4] sm:$0xf] %vm13557_vm10, %v5385_v34  ;;  %5868 = vrot.lane.b32.xlu1 %v10677_v53, %s13571_s12  ;;  %v3408_v34 = vrot.slane %v3407_v27, 4  ;;  %v10696_v62 = vcombine.low %v4255_v60, %v4255_v60  ;;  %v10700_v20 = vcombine.high %v4255_v60, %v4255_v60  ;;  %vm13562_vm10 = vcmask 1044416  }
 0x281   : > { %v10686_v3 = vpop.permute.xlu1 %5864 }
 0x282   : > { %v3413_v17 = vsel %vm10014_vm0, %v3408_v34, %v10690_v33  ;;  %v10720_v41 = vshrl.u32 %v10696_v62, 16  ;;  %v10723_v27 = vshll.u32 %v10696_v62, 16 }
 0x283   : > { %6934 = vrot.lane.b32.xlu0 %v6885_v13, %s9387_s15  ;;  %v10688_v56 = vpop.permute.xlu0 %5862  ;;  %v5817_v13 = vrot.slane %v13771_v63, 4  ;;  %v5112_v63 = vrot.slane %v10520_v26, 4 }
 0x284   : > { %4945 = vrot.lane.b32.xlu1 %v10633_v8, %s9390_s20  ;;  %13772 = vst [vmem:[#allocation17_spill] sm:$0xff] %v10720_v41 }
 0x285   : > { %v2470_v1 = vpop.permute.xlu1 %2469  ;;  %v10710_v37 = vsel %vm9834_vm9, %v5817_v13, %v5818_v52  ;;  %v10728_v52 = vshrl.u32 %v10700_v20, 16  ;;  %v5119_v13 = vrot.slane %v10723_v27, 6 }
 0x286   : > { %2518 = vst.msk [vmem:[#allocation4 + $0x18] sm:$0xf] %vm13555_vm13, %v2470_v1  ;;  %v3398_v1 = vrot.slane %v10143_v58, 4  ;;  %vm4692_vm13 = vcmask 913216  }
 0x287   : > { %5388 = vrot.lane.b32.xlu0 %v10616_v40, %s9386_s14  ;;  %v10702_v14 = vpop.permute.xlu0 %4939  ;;  %2696 = vst.msk [vmem:[#allocation4 + $0x18] sm:$0xf] %vm13545_vm14, %v10508_v19  ;;  %13773 = vst [vmem:[#allocation31_spill] sm:$0xff] %v10728_v52  ;;  %v10731_v19 = vshll.u32 %v10700_v20, 16  ;;  %v5126_v33 = vrot.slane %v10728_v52, 5  ;;  %vm13778_vm14 = vcmask 519616  }
 0x288   : > { %3534 = vrot.lane.b32.xlu1 %v3413_v17, %s9387_s15  ;;  %2876 = vst.msk [vmem:[#allocation4 + $0x18] sm:$0xf] %vm13542_vm2, %v10610_v35  ;;  %v5116_v35 = vrot.slane %v10720_v41, 5  ;;  %vm13776_vm2 = vcmask 454016   ;;  %v13781_v52 = vrot.slane %v10379_v0, 5 }
 0x289   : > { %v10725_v60 = vpop.permute.xlu1 %4643  ;;  %13774 = vst [vmem:[#allocation27_spill] sm:$0xff] %v10731_v19  ;;  %v5129_v50 = vrot.slane %v10731_v19, 6  ;;  %v3403_v19 = vsel %vm10014_vm0, %v3398_v1, %v3402_v5 }
 0x28a   : > { %v10744_v31 = vor.u32 %v5119_v13, %v5116_v35  ;;  %v13780_v13 = vrot.slane %v10294_v22, 5 }
 0x28b   : > { %5866 = vrot.lane.b32.xlu0 %v10710_v37, %s13571_s12  ;;  %v10733_v34 = vpop.permute.xlu0 %3703 }
 0x28c   : > { %1995 = vrot.lane.b32.xlu1 %v3413_v17, %s9386_s14  ;;  %13775 = vst [vmem:[#allocation13_spill] sm:$0xff] %v10744_v31  ;;  %v10752_v26 = vsel %vm9972_vm15, %v5112_v63, %v10744_v31  ;;  %v13546_v58 = vrot.slane %v10744_v31, 4  ;;  %v10755_v17 = vor.u32 %v5129_v50, %v5126_v33  ;;  %v2360_v33 = vrot.slane %v10360_v43, 6  ;;  %v9274_v63 = vld [vmem:[#allocation3 + $0x1c] ss:$0 sps:$4 sm:$0xff]  }
 0x28d   : > { %v3113_v16 = vpop.permute.xlu1 %3112  ;;  %13777 = vst [vmem:[#allocation22_spill] sm:$0xff] %v10752_v26  ;;  %5263 = vst.msk [vmem:[#allocation4 + $0x24] sm:$0xf] %vm1643_vm12, %v10752_v26  ;;  %v3669_v1 = vrot.slane %v13780_v13, 4  ;;  %v6110_v43 = vshll.u32 %v9274_v63, 16 }
 0x28e   : > { %3161 = vst.msk [vmem:[#allocation4 + $0x18] sm:$0xf] %vm13776_vm2, %v3113_v16  ;;  %v10771_v50 = vsel %vm9972_vm15, %v13546_v58, %v10755_v17  ;;  %v2353_v58 = vrot.slane %v10363_v46, 4  ;;  %vm4410_vm2 = vcmask 847616  }
 0x28f   : > { %4943 = vrot.lane.b32.xlu0 %v10583_v36, %s9390_s20  ;;  %v10746_v45 = vpop.permute.xlu0 %2167  ;;  %3282 = vst.msk [vmem:[#allocation4 + $0x18] sm:$0xf] %vm13778_vm14, %v10341_v30  ;;  %13779 = vst [vmem:[#allocation29_spill] sm:$0xff] %v10771_v50  ;;  %v2357_v36 = vrot.slane %v10337_v48, 5  ;;  %v10805_v13 = vsel %vm9809_vm7, %v3669_v1, %v13781_v52  ;;  %v2618_v52 = vrot.slane %v10379_v0, 6  ;;  %vm4233_vm14 = vcmask 782016  }
 0x290   : > { %3886 = vrot.lane.b32.xlu1 %v10652_v49, %s9388_s16  ;;  %5264 = vst.msk [vmem:[#allocation4 + $0x2c] sm:$0xf] %vm1643_vm12, %v10771_v50  ;;  %v6107_v50 = vshrl.u32 %v9274_v63, 16  ;;  %v13782_v63 = vrot.slane %v10294_v22, 6 }
 0x291   : > { %v10773_v16 = vpop.permute.xlu1 %4941 }
 0x292   : > { %v2617_v41 = vrot.slane %v13782_v63, 4  ;;  %v10841_v63 = vrot.slane %v2618_v52, 4 }
 0x293   : > { %3532 = vrot.lane.b32.xlu0 %v3403_v19, %s9387_s15  ;;  %v10777_v30 = vpop.permute.xlu0 %3880 }
 0x294   : > { %4369 = vrot.lane.b32.xlu1 %v10677_v53, %s13664_s19 }
 0x295   : > { %v10782_v5 = vpop.permute.xlu1 %3882 }
 0x297   : > { %1993 = vrot.lane.b32.xlu0 %v3403_v19, %s9386_s14  ;;  %v10786_v35 = vpop.permute.xlu0 %2649  ;;  %v10795_v19 = vor.u32 %v2360_v33, %v2357_v36  ;;  %v6112_v36 = vrot.slane %v6110_v43, 5  ;;  %v10828_v43 = vsel %vm9827_vm8, %v2617_v41, %v2618_v52 }
 0x298   : > { %2835 = vrot.lane.b32.xlu1 %v10677_v53, %s9381_s28  ;;  %v6109_v53 = vrot.slane %v6107_v50, 4 }
 0x299   : > { %v10797_v31 = vpop.permute.xlu1 %4365  ;;  %v2362_v46 = vsel %vm9972_vm15, %v2353_v58, %v10795_v19 }
 0x29a   : > { %v6113_v1 = vor.u32 %v6112_v36, %v6109_v53  ;;  %v10839_v36 = vld [vmem:[#allocation3 + $0x20] sm:$0xff] }
 0x29b   : > { %3884 = vrot.lane.b32.xlu0 %v10616_v40, %s9388_s16  ;;  %v10799_v26 = vpop.permute.xlu0 %4363  ;;  %v8133_v52 = vcombine.high %v10839_v36, %v10839_v36 }
 0x29c   : > { %3713 = vrot.lane.b32.xlu1 %v10805_v13, %s9382_s29 }
 0x29d   : > { %v10813_v40 = vpop.permute.xlu1 %2831  ;;  %1742 = vst.msk [vmem:[#allocation4 + $0x48] sm:$0xf] %vm1643_vm12, %v8133_v52 }
 0x29f   : > { %2475 = vrot.lane.b32.xlu0 %v2362_v46, %s13571_s12  ;;  %v10815_v33 = vpop.permute.xlu0 %2829  ;;  %v6114_v46 = vrot.slane %v6113_v1, 4 }
 0x2a0   : > { %2177 = vrot.lane.b32.xlu1 %v10805_v13, %s9379_s26 }
 0x2a1   : > { %v10824_v58 = vpop.permute.xlu1 %5984 }
 0x2a3   : > { %4367 = vrot.lane.b32.xlu0 %v10710_v37, %s13664_s19  ;;  %v4183_v50 = vpop.permute.xlu0 %4182 }
 0x2a4   : > { %4234 = vst.msk [vmem:[#allocation4] sm:$0xf] %vm4233_vm14, %v4183_v50  ;;  %2659 = vrot.lane.b32.xlu1 %v10828_v43, %s9380_s27  ;;  %v13784_v50 = vrot.slane %v10381_v11, 5 }
 0x2a5   : > { %4411 = vst.msk [vmem:[#allocation4] sm:$0xf] %vm4410_vm2, %v10646_v32  ;;  %v10837_v53 = vpop.permute.xlu1 %4772  ;;  %v13561_v32 = vrot.slane %v10402_v54, 6 }
 0x2a6   : > { %13783 = vst [vmem:[#allocation14_spill] sm:$0xff] %v10837_v53 }
 0x2a7   : > { %2833 = vrot.lane.b32.xlu0 %v10710_v37, %s9381_s28  ;;  %v4642_v41 = vpop.permute.xlu0 %4641  ;;  %v6119_v37 = vsel %vm10014_vm0, %v6114_v46, %v13784_v50  ;;  %v10865_v46 = vsel %vm9827_vm8, %v10841_v63, %v13561_v32 }
 0x2a8   : > { %4693 = vst.msk [vmem:[#allocation4] sm:$0xf] %vm4692_vm13, %v4642_v41  ;;  %6462 = vrot.lane.b32.xlu1 %v10448_v24, %s9385_s13 }
 0x2a9   : > { %4814 = vst.msk [vmem:[#allocation4] sm:$0xf] %vm13644_vm11, %v10347_v23  ;;  %v10858_v11 = vpop.permute.xlu1 %3241  ;;  %v5824_v23 = vrot.slane %v10379_v0, 7 }
 0x2aa   : > { %4991 = vst.msk [vmem:[#allocation4] sm:$0xf] %vm13562_vm10, %v10702_v14  ;;  %13785 = vst [vmem:[#allocation18_spill] sm:$0xff] %v10858_v11 }
 0x2ab   : > { %6280 = vrot.lane.b32.xlu0 %v6119_v37, %s9381_s28  ;;  %v3111_v1 = vpop.permute.xlu0 %3110  ;;  %v5826_v50 = vrot.slane %v5824_v23, 4  ;;  %v6054_v37 = vld [vmem:[#allocation3 + $0x38] sm:$0xff] }
 0x2ac   : > { %3160 = vst.msk [vmem:[#allocation4 + $0x10] sm:$0xf] %vm13786_vm3, %v3111_v1  ;;  %6940 = vrot.lane.b32.xlu1 %v10865_v46, %s9387_s15  ;;  %vm13788_vm3 = vcmask 650816   ;;  %v10911_v1 = vcombine.low %v6054_v37, %v6054_v37 }
 0x2ad   : > { %3281 = vst.msk [vmem:[#allocation4 + $0x10] sm:$0xf] %vm13787_vm4, %v10373_v21  ;;  %v4185_v14 = vpop.permute.xlu1 %4184  ;;  %v13560_v21 = vrot.slane %v10402_v54, 7  ;;  %vm13790_vm4 = vcmask 716416  }
 0x2ae   : > { %4235 = vst.msk [vmem:[#allocation4 + $0x8] sm:$0xf] %vm4233_vm14, %v4185_v14  ;;  %13791 = vst [vmem:[#allocation30_spill] sm:$0xff] %v10911_v1 }
 0x2af   : > { %6460 = vrot.lane.b32.xlu0 %v10805_v13, %s9385_s13  ;;  %v10876_v41 = vpop.permute.xlu0 %3707  ;;  %4412 = vst.msk [vmem:[#allocation4 + $0x8] sm:$0xf] %vm4410_vm2, %v10592_v25  ;;  %v5828_v25 = vsel %vm9834_vm9, %v5826_v50, %v13560_v21 }
 0x2b0   : > { %5394 = vrot.lane.b32.xlu1 %v10865_v46, %s9386_s14  ;;  %4694 = vst.msk [vmem:[#allocation4 + $0x8] sm:$0xf] %vm4692_vm13, %v10725_v60  ;;  %v13789_v60 = vrot.slane %v10294_v22, 7 }
 0x2b1   : > { %4815 = vst.msk [vmem:[#allocation4 + $0x8] sm:$0xf] %vm13644_vm11, %v10326_v61  ;;  %v3531_v0 = vpop.permute.xlu1 %3530 }
 0x2b2   : > { %4992 = vst.msk [vmem:[#allocation4 + $0x8] sm:$0xf] %vm13562_vm10, %v10773_v16  ;;  %v10903_v61 = vrot.slane %v13789_v60, 4  ;;  %v2363_v16 = vrot.slane %v10795_v19, 4  ;;  %v6180_v19 = vshrl.u32 %v10911_v1, 16  ;;  %vm13800_vm10 = vcmask 388416  }
 0x2b3   : > { %6938 = vrot.lane.b32.xlu0 %v10828_v43, %s9387_s15  ;;  %v10890_v52 = vpop.permute.xlu0 %2171  ;;  %3579 = vst.msk [vmem:[#allocation4 + $0x18] sm:$0xf] %vm13574_vm5, %v3531_v0  ;;  %v6176_v0 = vshll.u32 %v10911_v1, 16 }
 0x2b4   : > { %3754 = vst.msk [vmem:[#allocation4 + $0x18] sm:$0xf] %vm13788_vm3, %v10627_v42  ;;  %5872 = vrot.lane.b32.xlu1 %v5828_v25, %s13571_s12  ;;  %vm13793_vm3 = vcmask 126016   ;;  %v2372_v42 = vsel %vm9972_vm15, %v2363_v16, %v10417_v2  ;;  %v5825_v25 = vsel %vm9834_vm9, %v10903_v61, %v5824_v23  ;;  %v6652_v32 = vrot.slane %v6180_v19, 5 }
 0x2b5   : > { %3931 = vst.msk [vmem:[#allocation4 + $0x18] sm:$0xf] %vm13790_vm4, %v10782_v5  ;;  %v1992_v14 = vpop.permute.xlu1 %1991  ;;  %vm13794_vm4 = vcmask 191616   ;;  %v10926_v5 = vcombine.high %v6054_v37, %v6054_v37  ;;  %v10930_v60 = vrot.slane %v6176_v0, 5  ;;  %v5603_v11 = vrot.slane %v6176_v0, 7 }
 0x2b6   : > { %2038 = vst.msk [vmem:[#allocation4 + $0x28] sm:$0xf] %vm13793_vm3, %v1992_v14  ;;  %v6182_v14 = vrot.slane %v6180_v19, 4  ;;  %vm13798_vm3 = vcmask 257216  }
 0x2b7   : > { %5392 = vrot.lane.b32.xlu0 %v10828_v43, %s9386_s14  ;;  %v10913_v50 = vpop.permute.xlu0 %2653  ;;  %2216 = vst.msk [vmem:[#allocation4 + $0x28] sm:$0xf] %vm13794_vm4, %v10643_v28  ;;  %13795 = vst [vmem:[#allocation23_spill] sm:$0xff] %v10926_v5  ;;  %v6186_v21 = vshll.u32 %v10926_v5, 16  ;;  %v6655_v28 = vrot.slane %v6176_v0, 6  ;;  %v6660_v23 = vshrl.u32 %v10926_v5, 16 }
 0x2b8   : > { %13792 = vst [vmem:[#allocation15_spill] sm:$0xff] %v10913_v50  ;;  %2477 = vrot.lane.b32.xlu1 %v2372_v42, %s13571_s12  ;;  %13796 = vst [vmem:[#allocation11_spill] sm:$0xff] %v10930_v60  ;;  %vm13799_vm4 = vcmask 322816   ;;  %v6183_v37 = vor.u32 %v6182_v14, %v10930_v60  ;;  %v9283_v14 = vld [vmem:[%s13491_s3 + $0x40] sm:$0xff]  }
 0x2b9   : > { %v2474_v16 = vpop.permute.xlu1 %2473  ;;  %v6665_v42 = vrot.slane %v6186_v21, 6  ;;  %v6188_v1 = vrot.slane %v6186_v21, 5  ;;  %v5613_v54 = vrot.slane %v6186_v21, 7  ;;  %8681 = vmatprep.subr.bf16.mxu1 %v9283_v14  ;;  %v6192_v14 = vrot.slane %v6660_v23, 4 }
 0x2ba   : > { %2520 = vst.msk [vmem:[#allocation4 + $0x28] sm:$0xf] %vm13798_vm3, %v2474_v16  ;;  %v6662_v16 = vrot.slane %v6660_v23, 5  ;;  %vm13806_vm3 = vcmask 519616  }
 0x2bb   : > { %5870 = vrot.lane.b32.xlu0 %v5825_v25, %s13571_s12  ;;  %v10933_v53 = vpop.permute.xlu0 %5986  ;;  %2698 = vst.msk [vmem:[#allocation4 + $0x28] sm:$0xf] %vm13799_vm4, %v10660_v4  ;;  %v10946_v25 = vor.u32 %v6655_v28, %v6652_v32  ;;  %v6184_v4 = vrot.slane %v6183_v37, 4  ;;  %v8132_v28 = vcombine.low %v10839_v36, %v10839_v36  ;;  %v4327_v36 = vrot.slane %v10696_v62, 7  ;;  %s13998_s12 = smov 112  }
 0x2bc   : > { %13797 = vst [vmem:[#allocation20_spill] sm:$0xff] %v10933_v53  ;;  %4651 = vrot.lane.b32.xlu1 %v10466_v47, %s9391_s21  ;;  %2878 = vst.msk [vmem:[#allocation4 + $0x28] sm:$0xf] %vm13800_vm10, %v10813_v40  ;;  %v5600_v53 = vrot.slane %v6180_v19, 6  ;;  %v10959_v32 = vor.u32 %v6665_v42, %v6662_v16  ;;  %v5610_v19 = vrot.slane %v6660_v23, 6  ;;  %vm13805_vm10 = vcmask 454016  }
 0x2bd   : > { %13801 = vst [vmem:[#allocation32_spill] sm:$0xff] %v10946_v25  ;;  %v10948_v5 = vpop.permute.xlu1 %4647  ;;  %v6658_v40 = vrot.slane %v10946_v25, 4  ;;  %v10965_v21 = vsel %vm10014_vm0, %v6184_v4, %v6188_v1  ;;  %1741 = vst.msk [vmem:[#allocation4 + $0x40] sm:$0xf] %vm1643_vm12, %v8132_v28  ;;  %v9288_v4 = vld [vmem:[%s13491_s3 + $0x8] sm:$0xff]   ;;  %v11003_v62 = vor.u32 %v6192_v14, %v6188_v1  ;;  %v9290_v28 = vld [vmem:[%s13491_s3 + $0x10] sm:$0xff]  }
 0x2be   : > { %13802 = vst [vmem:[#allocation33_spill] sm:$0xff] %v10965_v21  ;;  %v10967_v0 = vor.u32 %v5603_v11, %v5600_v53  ;;  %v10979_v16 = vor.u32 %v5613_v54, %v5610_v19  ;;  %v9287_v11 = vld [vmem:[%s13491_s3 + $0x48] sm:$0xff]   ;;  %v9279_v23 = vld [vmem:[#allocation3 + $0x1c] ss:$0 sps:$4 sm:$0xee]   ;;  %v4329_v19 = vrot.slane %v4327_v36, 4 }
 0x2bf   : > { %4947 = vrot.lane.b32.xlu0 %v10805_v13, %s9390_s20  ;;  %v10950_v50 = vpop.permute.xlu0 %4770  ;;  %v9284_v13 = vld [vmem:[%s13491_s3] sm:$0xff]   ;;  %v10976_v37 = vsel %vm9972_vm15, %v6658_v40, %v10959_v32  ;;  %13808 = vst [vmem:[#allocation37_spill] sm:$0xff] %v11003_v62  ;;  %v4256_v40 = vld [vmem:[#allocation3 + $0x30] sm:$0xff]  ;;  %vm13809_vm4 = vcmask 191616  }
 0x2c0   : > { %3120 = vrot.lane.b32.xlu1 %v10466_v47, %s9385_s13  ;;  %13803 = vst [vmem:[#allocation34_spill] sm:$0xff] %v10976_v37  ;;  %8682 = vmatpush3.bf16.msra.mxu1 %v9284_v13  ;;  %v5606_v42 = vrot.slane %v10967_v0, 4  ;;  %13804 = vst [vmem:[#allocation35_spill] sm:$0xff] %v10979_v16  ;;  %v11021_v1 = vcombine.low %v4256_v40, %v4256_v40 }
 0x2c1   : > { %v3117_v47 = vpop.permute.xlu1 %3116  ;;  %8683 = vmatprep.subr.bf16.mxu1 %v9287_v11  ;;  %v6584_v11 = vshll.u32 %v9279_v23, 16  ;;  %5268 = vst.msk [vmem:[#allocation4 + $0x4c] sm:$0xf] %vm1643_vm12, %v10976_v37 }
 0x2c2   : > { %3163 = vst.msk [vmem:[#allocation4 + $0x28] sm:$0xf] %vm13805_vm10, %v3117_v47  ;;  %v10999_v54 = vsel %vm10262_vm6, %v5606_v42, %v10979_v16  ;;  %vm13810_vm10 = vcmask 257216   ;;  %13811 = vst [vmem:[#allocation38_spill] sm:$0xff] %v11021_v1  ;;  %v6581_v42 = vshrl.u32 %v9279_v23, 16  ;;  %v11046_v14 = vshrl.u32 %v11021_v1, 16 }
 0x2c3   : > { %3711 = vrot.lane.b32.xlu0 %v10633_v8, %s9382_s29  ;;  %v10982_v53 = vpop.permute.xlu0 %3239  ;;  %3284 = vst.msk [vmem:[#allocation4 + $0x28] sm:$0xf] %vm13806_vm3, %v10415_v12  ;;  %13807 = vst [vmem:[#allocation36_spill] sm:$0xff] %v10999_v54  ;;  %vm13812_vm3 = vcmask 322816  }
 0x2c4   : > { %4949 = vrot.lane.b32.xlu1 %v10448_v24, %s9390_s20  ;;  %8684 = vmatpush3.bf16.msra.mxu1 %v9288_v4  ;;  %v9289_v24 = vld [vmem:[%s13491_s3 + $0x50] sm:$0xff]   ;;  %v9292_v4 = vld [vmem:[%s13491_s3 + $0x18] sm:$0xff]  }
 0x2c5   : > { %v11005_v13 = vpop.permute.xlu1 %5988  ;;  %8685 = vmatprep.subr.bf16.mxu1 %v9289_v24  ;;  %v11056_v24 = vshll.u32 %v11021_v1, 16 }
 0x2c7   : > { %2175 = vrot.lane.b32.xlu0 %v10633_v8, %s9379_s26  ;;  %v5687_v12 = vpop.permute.xlu0 %5686  ;;  %v13573_v8 = vrot.slane %v10700_v20, 7 }
 0x2c8   : > { %5737 = vst.msk [vmem:[#allocation4 + $0x4] sm:$0xf] %vm13809_vm4, %v5687_v12  ;;  %3890 = vrot.lane.b32.xlu1 %v10865_v46, %s9388_s16  ;;  %8686 = vmatpush3.bf16.msra.mxu1 %v9290_v28  ;;  %vm13815_vm4 = vcmask 650816  }
 0x2c9   : > { %5913 = vst.msk [vmem:[#allocation4 + $0x4] sm:$0xf] %vm13810_vm10, %v10688_v56  ;;  %v11025_v47 = vpop.permute.xlu1 %4776  ;;  %v4331_v56 = vsel %vm9834_vm9, %v4329_v19, %v13573_v8  ;;  %vm13816_vm10 = vcmask 716416   ;;  %v5136_v19 = vrot.slane %v11046_v14, 5 }
 0x2ca   : > { %6033 = vst.msk [vmem:[#allocation4 + $0x4] sm:$0xf] %vm13812_vm3, %v10513_v59  ;;  %13813 = vst [vmem:[#allocation39_spill] sm:$0xff] %v11025_v47  ;;  %v9291_v59 = vld [vmem:[%s13491_s3 + $0x58] sm:$0xff]   ;;  %vm13818_vm3 = vcmask 126016  }
 0x2cb   : > { %3888 = vrot.lane.b32.xlu0 %v10828_v43, %s9388_s16  ;;  %v11031_v43 = vcombine.high %v4256_v40, %v4256_v40  ;;  %v6586_v40 = vrot.slane %v6584_v11, 6  ;;  %8687 = vmatprep.subr.bf16.mxu1 %v9291_v59  ;;  %v5139_v11 = vrot.slane %v11056_v24, 6 }
 0x2cc   : > { %4373 = vrot.lane.b32.xlu1 %v4331_v56, %s13664_s19  ;;  %8688 = vmatpush3.bf16.msra.mxu1 %v9292_v4 }
 0x2cd   : > { %v3529_v46 = vpop.permute.xlu0 %3528  ;;  %13814 = vst [vmem:[#allocation40_spill] sm:$0xff] %v11031_v43  ;;  %v11050_v23 = vpop.permute.xlu1 %3245  ;;  %v11059_v28 = vshrl.u32 %v11031_v43, 16  ;;  %v11086_v8 = vor.u32 %v5139_v11, %v5136_v19  ;;  %v3420_v11 = vshll.u32 %v10294_v22, 16 }
 0x2ce   : > { %3578 = vst.msk [vmem:[#allocation4 + $0x10] sm:$0xf] %vm13574_vm5, %v3529_v46  ;;  %13817 = vst [vmem:[#allocation41_spill] sm:$0xff] %v11050_v23  ;;  %vm13824_vm5 = vcmask 322816  }
 0x2cf   : > { %3753 = vst.msk [vmem:[#allocation4 + $0x10] sm:$0xf] %vm13815_vm4, %v10733_v34  ;;  %2657 = vrot.lane.b32.xlu0 %v10652_v49, %s9380_s27  ;;  %v6583_v34 = vrot.slane %v6581_v42, 5  ;;  %v11052_v49 = vld [vmem:[#allocation3 + $0x30] sm:$0xff]  ;;  %v11067_v42 = vshll.u32 %v11031_v43, 16  ;;  %vm13819_vm4 = vcmask 191616  }
 0x2d0   : > { %3930 = vst.msk [vmem:[#allocation4 + $0x10] sm:$0xf] %vm13816_vm10, %v10777_v30  ;;  %v4328_v30 = vsel %vm9834_vm9, %v10903_v61, %v4327_v36  ;;  %2839 = vrot.lane.b32.xlu1 %v4331_v56, %s9381_s28  ;;  %v5146_v46 = vrot.slane %v11059_v28, 5  ;;  %v11076_v61 = vcombine.low %v11052_v49, %v11052_v49  ;;  %v9293_v36 = vld [vmem:[%s13491_s3 + $0x60] sm:$0xff]   ;;  %vm13821_vm10 = vmmov %vm13819_vm4 }
 0x2d1   : > { %v1990_v12 = vpop.permute.xlu0 %1989  ;;  %v5689_v59 = vpop.permute.xlu1 %5688  ;;  %v5149_v56 = vrot.slane %v11067_v42, 6  ;;  %8689 = vmatprep.subr.bf16.mxu1 %v9293_v36  ;;  %v1669_v36 = vld [vmem:[#allocation3 + $0x28] sm:$0xff] }
 0x2d2   : > { %2037 = vst.msk [vmem:[#allocation4 + $0x20] sm:$0xf] %vm13818_vm3, %v1990_v12  ;;  %v6587_v12 = vor.u32 %v6586_v40, %v6583_v34  ;;  %13820 = vst [vmem:[#allocation42_spill] sm:$0xff] %v11076_v61  ;;  %v5132_v34 = vrot.slane %v10755_v17, 4  ;;  %vm13822_vm3 = vcmask 257216   ;;  %v9295_v17 = vld [vmem:[%s13491_s3 + $0x68] sm:$0xff]  }
 0x2d3   : > { %2215 = vst.msk [vmem:[#allocation4 + $0x20] sm:$0xf] %vm13819_vm4, %v10746_v45  ;;  %4371 = vrot.lane.b32.xlu0 %v4328_v30, %s13664_s19  ;;  %v9294_v45 = vld [vmem:[%s13491_s3 + $0x20] sm:$0xff]   ;;  %vm13823_vm4 = vmmov %vm13822_vm3  ;;  %v13575_v40 = vrot.slane %v11086_v8, 4  ;;  %v11106_v19 = vor.u32 %v5149_v56, %v5146_v46 }
 0x2d4   : > { %5738 = vst.msk [vmem:[#allocation4 + $0xc] sm:$0xf] %vm13821_vm10, %v5689_v59  ;;  %5992 = vrot.lane.b32.xlu1 %v11076_v61, %s9380_s27  ;;  %vm13825_vm10 = vmmov %vm13824_vm5  ;;  %8690 = vmatpush3.bf16.msra.mxu1 %v9294_v45  ;;  %v3424_v59 = vshrl.u32 %v10294_v22, 16  ;;  %v9297_v45 = vld [vmem:[%s13491_s3 + $0x70] sm:$0xff]  }
 0x2d5   : > { %v2472_v4 = vpop.permute.xlu0 %2471  ;;  %5914 = vst.msk [vmem:[#allocation4 + $0xc] sm:$0xf] %vm13823_vm4, %v10686_v3  ;;  %v9296_v3 = vld [vmem:[%s13491_s3 + $0x28] sm:$0xff]   ;;  %8691 = vmatprep.subr.bf16.mxu1 %v9295_v17  ;;  %vm13829_vm4 = vcmask 519616  }
 0x2d6   : > { %2519 = vst.msk [vmem:[#allocation4 + $0x20] sm:$0xf] %vm13822_vm3, %v2472_v4  ;;  %v9300_v4 = vld [vmem:[%s13491_s3 + $0x38] sm:$0xff]   ;;  %v9364_v17 = vld [vmem:[#allocation3 + $0x28] sm:$0xff]  ;;  %vm13828_vm3 = vcmask 454016  }
 0x2d7   : > { %2697 = vst.msk [vmem:[#allocation4 + $0x20] sm:$0xf] %vm13824_vm5, %v10786_v35  ;;  %2837 = vrot.lane.b32.xlu0 %v4328_v30, %s9381_s28  ;;  %v11111_v35 = vsel %vm9972_vm15, %v5132_v34, %v11086_v8  ;;  %vm13827_vm5 = vcmask 388416   ;;  %v4189_v30 = vpop.permute.xlu1 %4188 }
 0x2d8   : > { %6034 = vst.msk [vmem:[#allocation4 + $0xc] sm:$0xf] %vm13825_vm10, %v10824_v58  ;;  %13826 = vst [vmem:[#allocation43_spill] sm:$0xff] %v11111_v35  ;;  %v6588_v58 = vrot.slane %v6587_v12, 4  ;;  %6282 = vrot.lane.b32.xlu1 %v10554_v9, %s9381_s28  ;;  %8692 = vmatpush3.bf16.msra.mxu1 %v9296_v3  ;;  %v8135_v12 = vcombine.high %v1669_v36, %v1669_v36  ;;  %v3426_v9 = vrot.slane %v3424_v59, 4  ;;  %vm13843_vm10 = vcmask 126016  }
 0x2d9   : > { %2877 = vst.msk [vmem:[#allocation4 + $0x20] sm:$0xf] %vm13827_vm5, %v10815_v33  ;;  %v4187_v46 = vpop.permute.xlu0 %4186  ;;  %v11125_v33 = vsel %vm9972_vm15, %v13575_v40, %v11106_v19  ;;  %8693 = vmatprep.subr.bf16.mxu1 %v9297_v45  ;;  %v11171_v3 = vcombine.high %v9364_v17, %v9364_v17  ;;  %v13833_v45 = vld [vmem:[#allocation16_spill] sm:$0xff]  ;;  %v13842_v40 = vld [vmem:[#allocation27_spill] sm:$0xff]  ;;  %vm13847_vm5 = vcmask 1044416  }
 0x2da   : > { %5265 = vst.msk [vmem:[#allocation4 + $0x34] sm:$0xf] %vm1643_vm12, %v11111_v35  ;;  %v6597_v22 = vsel %vm9972_vm15, %v6588_v58, %v10417_v2  ;;  %5266 = vst.msk [vmem:[#allocation4 + $0x3c] sm:$0xf] %vm1643_vm12, %v11125_v33  ;;  %v11146_v2 = vrot.slane %v3420_v11, 5 }
 0x2db   : > { %4237 = vst.msk [vmem:[#allocation4 + $0x18] sm:$0xf] %vm4233_vm14, %v4189_v30  ;;  %4236 = vst.msk [vmem:[#allocation4 + $0x10] sm:$0xf] %vm4233_vm14, %v4187_v46  ;;  %6758 = vrot.lane.b32.xlu0 %v6597_v22, %s9378_s25  ;;  %v13831_v30 = vrot.slane %v10337_v48, 7  ;;  %v3432_v48 = vrot.slane %v10723_v27, 5 }
 0x2dc   : > { %4414 = vst.msk [vmem:[#allocation4 + $0x18] sm:$0xf] %vm4410_vm2, %v10797_v31  ;;  %4413 = vst.msk [vmem:[#allocation4 + $0x10] sm:$0xf] %vm4410_vm2, %v10799_v26  ;;  %v11144_v31 = vpop.permute.xlu1 %3709  ;;  %v9298_v26 = vld [vmem:[%s13491_s3 + $0x30] sm:$0xff]   ;;  %6760 = vrot.lane.b32.xlu1 %v10541_v51, %s9378_s25  ;;  %v13879_v21 = vrot.slane %v11171_v3, 6 }
 0x2dd   : > { %4696 = vst.msk [vmem:[#allocation4 + $0x18] sm:$0xf] %vm4692_vm13, %v10948_v5  ;;  %v4646_v56 = vpop.permute.xlu0 %4645  ;;  %v8134_v5 = vcombine.low %v1669_v36, %v1669_v36  ;;  %8694 = vmatpush3.bf16.msra.mxu1 %v9298_v26  ;;  %v4524_v11 = vrot.slane %v13831_v30, 4  ;;  %v13576_v36 = vrot.slane %v11171_v3, 5 }
 0x2de   : > { %4817 = vst.msk [vmem:[#allocation4 + $0x18] sm:$0xf] %vm13644_vm11, %v10394_v18  ;;  %v9299_v18 = vld [vmem:[%s13491_s3 + $0x78] sm:$0xff]   ;;  %v2623_v23 = vrot.slane %v13879_v21, 4 }
 0x2df   : > { %1744 = vst.msk [vmem:[#allocation4 + $0x58] sm:$0xf] %vm1643_vm12, %v8135_v12  ;;  %5690 = vrot.lane.b32.xlu0 %v10530_v29, %s9379_s26  ;;  %1743 = vst.msk [vmem:[#allocation4 + $0x50] sm:$0xf] %vm1643_vm12, %v8134_v5  ;;  %8695 = vmatprep.subr.bf16.mxu1 %v9299_v18  ;;  %v13830_v29 = vld [vmem:[#allocation26_spill] sm:$0xff]  ;;  %v4106_v12 = vrot.slane %v11059_v28, 6  ;;  %v4532_v26 = vsel %vm9998_vm1, %v4524_v11, %v13833_v45 }
 0x2e0   : > { %4695 = vst.msk [vmem:[#allocation4 + $0x10] sm:$0xf] %vm4692_vm13, %v4646_v56  ;;  %v11169_v34 = vpop.permute.xlu1 %2173  ;;  %5692 = vrot.lane.b32.xlu1 %v10570_v6, %s9379_s26  ;;  %v13835_v56 = vld [vmem:[#allocation10_spill] sm:$0xff] }
 0x2e1   : > { %4816 = vst.msk [vmem:[#allocation4 + $0x10] sm:$0xf] %vm13644_vm11, %v10543_v44  ;;  %v3427_v44 = vor.u32 %v3426_v9, %v11146_v2  ;;  %v3115_v58 = vpop.permute.xlu0 %3114  ;;  %8696 = vmatpush3.bf16.msra.mxu1 %v9300_v4  ;;  %v4109_v9 = vrot.slane %v11067_v42, 7  ;;  %v3674_v5 = vsel %vm9809_vm7, %v13835_v56, %v13576_v36 }
 0x2e2   : > { %3162 = vst.msk [vmem:[#allocation4 + $0x20] sm:$0xf] %vm13828_vm3, %v3115_v58  ;;  %vm13848_vm3 = vmmov %vm13843_vm10 }
 0x2e3   : > { %3283 = vst.msk [vmem:[#allocation4 + $0x20] sm:$0xf] %vm13829_vm4, %v10559_v38  ;;  %4190 = vrot.lane.b32.xlu0 %v13830_v29, %s9392_s22  ;;  %v3428_v46 = vrot.slane %v3427_v44, 4  ;;  %v11208_v44 = vor.u32 %v4109_v9, %v4106_v12  ;;  %v13839_v29 = vld [vmem:[#allocation31_spill] sm:$0xff]  ;;  %v9358_v12 = vld [vmem:[#allocation3 + $0x40] ss:$0 sps:$4 sm:$0xff]  }
 0x2e4   : > { %v11183_v59 = vpop.permute.xlu1 %2655  ;;  %4192 = vrot.lane.b32.xlu1 %v10570_v6, %s9392_s22  ;;  %v13838_v6 = vld [vmem:[#allocation17_spill] sm:$0xff]  ;;  %v13579_v30 = vrot.slane %v13839_v29, 7  ;;  %1749 = vst.msk [vmem:[#allocation4 + $0x80] sm:$0xf] %vm1643_vm12, %v9358_v12  ;;  %vm13851_vm4 = vcmask 585216  }
 0x2e5   : > { %v11186_v22 = vpop.permute.xlu0 %5990  ;;  %v3433_v4 = vsel %vm10014_vm0, %v3428_v46, %v3432_v48  ;;  %13837 = vst [vmem:[#allocation28_spill] sm:$0xff] %v11208_v44  ;;  %v13580_v58 = vrot.slane %v13838_v6, 7  ;;  %v4112_v56 = vrot.slane %v11208_v44, 4 }
 0x2e6   : > { %13832 = vst [vmem:[#allocation26_spill] sm:$0xff] %v11186_v22  ;;  %v4558_v36 = vor.u32 %v13842_v40, %v13579_v30  ;;  %v13582_v30 = vrot.slane %v11171_v3, 6  ;;  %v13853_v22 = vld [vmem:[#allocation12_spill] sm:$0xff] }
 0x2e7   : > { %4649 = vrot.lane.b32.xlu0 %v4532_v26, %s9391_s21  ;;  %v11224_v46 = vsel %vm10262_vm6, %v4112_v56, %v10967_v0  ;;  %v13845_v0 = vld [vmem:[#allocation22_spill] sm:$0xff] }
 0x2e8   : > { %v11202_v18 = vpop.permute.xlu1 %6458  ;;  %3538 = vrot.lane.b32.xlu1 %v3433_v4, %s9387_s15  ;;  %13841 = vst [vmem:[#allocation17_spill] sm:$0xff] %v11224_v46 }
 0x2e9   : > { %v11206_v17 = vpop.permute.xlu0 %4774 }
 0x2ea   : > { %13836 = vst [vmem:[#allocation16_spill] sm:$0xff] %v11206_v17  ;;  %v13849_v17 = vld [vmem:[#allocation21_spill] sm:$0xff] }
 0x2eb   : > { %3118 = vrot.lane.b32.xlu0 %v4532_v26, %s9385_s13  ;;  %v4551_v26 = vrot.slane %v13580_v58, 4  ;;  %v6142_v58 = vrot.slane %v13838_v6, 4  ;;  %v6134_v47 = vrot.slane %v13849_v17, 4 }
 0x2ec   : > { %v11214_v11 = vpop.permute.xlu1 %6936  ;;  %1999 = vrot.lane.b32.xlu1 %v3433_v4, %s9386_s14  ;;  %v5152_v4 = vrot.slane %v11106_v19, 4 }
 0x2ed   : > { %v11216_v45 = vpop.permute.xlu0 %3243  ;;  %v4559_v12 = vsel %vm9998_vm1, %v4551_v26, %v4558_v36  ;;  %v11268_v36 = vld [vmem:[#allocation3 + $0x38] sm:$0xff]  ;;  %v6143_v26 = vor.u32 %v6142_v58, %v3432_v48  ;;  %v6139_v58 = vsel %vm10014_vm0, %v6134_v47, %v3432_v48  ;;  %v5570_v48 = vrot.slane %v13839_v29, 6 }
 0x2ee   : > { %13840 = vst [vmem:[#allocation10_spill] sm:$0xff] %v11216_v45  ;;  %v11244_v56 = vsel %vm9972_vm15, %v5152_v4, %v10946_v25  ;;  %v11265_v45 = vcombine.high %v11052_v49, %v11052_v49  ;;  %v11278_v49 = vcombine.low %v11268_v36, %v11268_v36 }
 0x2ef   : > { %3715 = vrot.lane.b32.xlu0 %v3674_v5, %s9382_s29  ;;  %13846 = vst [vmem:[#allocation31_spill] sm:$0xff] %v11244_v56  ;;  %5267 = vst.msk [vmem:[#allocation4 + $0x44] sm:$0xf] %vm1643_vm12, %v11244_v56  ;;  %v6144_v17 = vrot.slane %v6143_v26, 4 }
 0x2f0   : > { %v5391_v9 = vpop.permute.xlu1 %5390  ;;  %2481 = vrot.lane.b32.xlu1 %v13845_v0, %s13844_s30 }
 0x2f1   : > { %v11231_v16 = vpop.permute.xlu0 %6456  ;;  %5438 = vst.msk [vmem:[#allocation4 + $0x1c] sm:$0xf] %vm13843_vm10, %v5391_v9  ;;  %vm13852_vm10 = vcmask 650816  }
 0x2f3   : > { %2179 = vrot.lane.b32.xlu0 %v3674_v5, %s9379_s26  ;;  %v2622_v5 = vsel %vm9827_vm8, %v10841_v63, %v13582_v30  ;;  %v13850_v63 = vld [vmem:[#allocation9_spill] sm:$0xff] }
 0x2f4   : > { %v11247_v9 = vpop.permute.xlu1 %5868  ;;  %4655 = vrot.lane.b32.xlu1 %v4559_v12, %s9391_s21  ;;  %v3414_v30 = vshrl.u32 %v13850_v63, 16  ;;  %v13585_v63 = vrot.slane %v13842_v40, 5 }
 0x2f5   : > { %v11251_v19 = vpop.permute.xlu0 %6934 }
 0x2f6   : > { %v11299_v47 = vsel %vm10014_vm0, %v6144_v17, %v13585_v63  ;;  %v13860_v17 = vld [vmem:[#allocation29_spill] sm:$0xff] }
 0x2f7   : > { %2661 = vrot.lane.b32.xlu0 %v2622_v5, %s9380_s27 }
 0x2f8   : > { %v4946_v4 = vpop.permute.xlu1 %4945  ;;  %3124 = vrot.lane.b32.xlu1 %v4559_v12, %s9385_s13  ;;  %v3416_v12 = vrot.slane %v3414_v30, 4  ;;  %v5573_v30 = vrot.slane %v13842_v40, 7 }
 0x2f9   : > { %v5389_v25 = vpop.permute.xlu0 %5388  ;;  %4994 = vst.msk [vmem:[#allocation4 + $0x18] sm:$0xf] %vm13847_vm5, %v4946_v4  ;;  %v5560_v4 = vrot.slane %v13838_v6, 6  ;;  %vm13854_vm5 = vmmov %vm13848_vm3 }
 0x2fa   : > { %5437 = vst.msk [vmem:[#allocation4 + $0x14] sm:$0xf] %vm13848_vm3, %v5389_v25  ;;  %v5563_v25 = vrot.slane %v10723_v27, 7  ;;  %vm13855_vm3 = vcmask 1044416  }
 0x2fb   : > { %5994 = vrot.lane.b32.xlu0 %v11265_v45, %s9380_s27 }
 0x2fc   : > { %v3535_v5 = vpop.permute.xlu1 %3534  ;;  %5996 = vrot.lane.b32.xlu1 %v11278_v49, %s9380_s27  ;;  %v5564_v26 = vor.u32 %v5563_v25, %v5560_v4 }
 0x2fd   : > { %v11281_v62 = vpop.permute.xlu0 %5866  ;;  %3581 = vst.msk [vmem:[#allocation4 + $0x28] sm:$0xf] %vm13851_vm4, %v3535_v5  ;;  %v5556_v5 = vrot.slane %v13853_v22, 4  ;;  %vm13856_vm4 = vcmask 191616  }
 0x2fe   : > { %3756 = vst.msk [vmem:[#allocation4 + $0x28] sm:$0xf] %vm13852_vm10, %v11144_v31  ;;  %v13857_v31 = vld [vmem:[#allocation8_spill] sm:$0xff]  ;;  %vm13858_vm10 = vcmask 716416  }
 0x2ff   : > { %6284 = vrot.lane.b32.xlu0 %v6139_v58, %s9381_s28  ;;  %v3417_v22 = vor.u32 %v3416_v12, %v13857_v31 }
 0x300   : > { %v1996_v46 = vpop.permute.xlu1 %1995  ;;  %6286 = vrot.lane.b32.xlu1 %v11299_v47, %s9381_s28 }
 0x301   : > { %v4944_v56 = vpop.permute.xlu0 %4943  ;;  %2040 = vst.msk [vmem:[#allocation4 + $0x38] sm:$0xf] %vm13854_vm5, %v1996_v46  ;;  %vm13859_vm5 = vcmask 585216   ;;  %v3418_v25 = vrot.slane %v3417_v22, 4 }
 0x302   : > { %4993 = vst.msk [vmem:[#allocation4 + $0x10] sm:$0xf] %vm13855_vm3, %v4944_v56  ;;  %v5566_v56 = vrot.slane %v5564_v26, 4  ;;  %vm13861_vm3 = vcmask 650816  }
 0x303   : > { %2218 = vst.msk [vmem:[#allocation4 + $0x38] sm:$0xf] %vm13856_vm4, %v11169_v34  ;;  %6762 = vrot.lane.b32.xlu0 %v13845_v0, %s9378_s25  ;;  %v5565_v34 = vsel %vm10262_vm6, %v5556_v5, %v5564_v26  ;;  %v11320_v0 = vor.u32 %v5573_v30, %v5570_v48  ;;  %vm13863_vm4 = vcmask 126016   ;;  %v3423_v5 = vsel %vm10014_vm0, %v3418_v25, %v11146_v2  ;;  %v4837_v26 = vld [vmem:[#allocation3 + $0x40] sm:$0xff] }
 0x304   : > { %v3887_v46 = vpop.permute.xlu1 %3886  ;;  %6764 = vrot.lane.b32.xlu1 %v13860_v17, %s9378_s25  ;;  %v11338_v48 = vrot.slane %v11076_v61, 5  ;;  %v13867_v2 = vrot.slane %v11171_v3, 5  ;;  %v13871_v17 = vld [vmem:[#allocation15_spill] sm:$0xff] }
 0x305   : > { %v3533_v4 = vpop.permute.xlu0 %3532  ;;  %3933 = vst.msk [vmem:[#allocation4 + $0x28] sm:$0xf] %vm13858_vm10, %v3887_v46  ;;  %13862 = vst [vmem:[#allocation27_spill] sm:$0xff] %v11320_v0  ;;  %v5575_v31 = vsel %vm10262_vm6, %v5566_v56, %v11320_v0  ;;  %vm13864_vm10 = vcmask 191616   ;;  %v11345_v46 = vcombine.low %v4837_v26, %v4837_v26 }
 0x306   : > { %3580 = vst.msk [vmem:[#allocation4 + $0x20] sm:$0xf] %vm13859_vm5, %v3533_v4  ;;  %13865 = vst [vmem:[#allocation22_spill] sm:$0xff] %v11338_v48  ;;  %vm13866_vm5 = vcmask 716416   ;;  %v3675_v30 = vrot.slane %v13867_v2, 4  ;;  %v11349_v4 = vcombine.high %v4837_v26, %v4837_v26  ;;  %v1670_v2 = vld [vmem:[#allocation3 + $0x30] sm:$0xff] }
 0x307   : > { %3755 = vst.msk [vmem:[#allocation4 + $0x20] sm:$0xf] %vm13861_vm3, %v10876_v41  ;;  %5694 = vrot.lane.b32.xlu0 %v5565_v34, %s9379_s26  ;;  %13868 = vst [vmem:[#allocation21_spill] sm:$0xff] %v11345_v46  ;;  %vm13870_vm3 = vcmask 257216   ;;  %v8137_v10 = vcombine.high %v1670_v2, %v1670_v2  ;;  %v8136_v44 = vcombine.low %v1670_v2, %v1670_v2  ;;  %v11440_v2 = vcombine.high %v11268_v36, %v11268_v36 }
 0x308   : > { %v11322_v58 = vpop.permute.xlu1 %4369  ;;  %5696 = vrot.lane.b32.xlu1 %v5575_v31, %s9379_s26  ;;  %13869 = vst [vmem:[#allocation9_spill] sm:$0xff] %v11349_v4  ;;  %v3677_v25 = vsel %vm9809_vm7, %v3675_v30, %v11338_v48  ;;  %v11369_v26 = vshrl.u32 %v11349_v4, 16 }
 0x309   : > { %v1994_v12 = vpop.permute.xlu0 %1993  ;;  %1746 = vst.msk [vmem:[#allocation4 + $0x68] sm:$0xf] %vm1643_vm12, %v8137_v10  ;;  %1745 = vst.msk [vmem:[#allocation4 + $0x60] sm:$0xf] %vm1643_vm12, %v8136_v44  ;;  %v13604_v10 = vrot.slane %v11265_v45, 5 }
 0x30a   : > { %2039 = vst.msk [vmem:[#allocation4 + $0x30] sm:$0xf] %vm13863_vm4, %v1994_v12  ;;  %vm13872_vm4 = vcmask 322816   ;;  %v11361_v12 = vshrl.u32 %v11345_v46, 16  ;;  %13875 = vst [vmem:[#allocation29_spill] sm:$0xff] %v11369_v26  ;;  %v5186_v37 = vrot.slane %v11369_v26, 5 }
 0x30b   : > { %2217 = vst.msk [vmem:[#allocation4 + $0x30] sm:$0xf] %vm13864_vm10, %v10890_v52  ;;  %3536 = vrot.lane.b32.xlu0 %v3423_v5, %s9387_s15  ;;  %vm13883_vm10 = vcmask 388416  }
 0x30c   : > { %v11335_v41 = vpop.permute.xlu1 %2835  ;;  %4196 = vrot.lane.b32.xlu1 %v5575_v31, %s9392_s22  ;;  %13873 = vst [vmem:[#allocation12_spill] sm:$0xff] %v11361_v12 }
 0x30d   : > { %v3885_v22 = vpop.permute.xlu0 %3884 }
 0x30e   : > { %3932 = vst.msk [vmem:[#allocation4 + $0x20] sm:$0xf] %vm13866_vm5, %v3885_v22  ;;  %v11372_v22 = vshll.u32 %v11349_v4, 16  ;;  %vm13884_vm5 = vmmov %vm13883_vm10 }
 0x30f   : > { %1997 = vrot.lane.b32.xlu0 %v3423_v5, %s9386_s14  ;;  %v11366_v5 = vshll.u32 %v11345_v46, 16 }
 0x310   : > { %v11347_v52 = vpop.permute.xlu1 %3713  ;;  %3717 = vrot.lane.b32.xlu1 %v3677_v25, %s9382_s29  ;;  %13876 = vst [vmem:[#allocation15_spill] sm:$0xff] %v11372_v22  ;;  %v5189_v60 = vrot.slane %v11372_v22, 6 }
 0x311   : > { %v2476_v56 = vpop.permute.xlu0 %2475  ;;  %13874 = vst [vmem:[#allocation8_spill] sm:$0xff] %v11366_v5  ;;  %v5179_v54 = vrot.slane %v11366_v5, 6 }
 0x312   : > { %2521 = vst.msk [vmem:[#allocation4 + $0x30] sm:$0xf] %vm13870_vm3, %v2476_v56  ;;  %v11377_v56 = vrot.slane %v11076_v61, 6  ;;  %vm13885_vm3 = vcmask 454016  }
 0x313   : > { %2699 = vst.msk [vmem:[#allocation4 + $0x30] sm:$0xf] %vm13872_vm4, %v13871_v17  ;;  %2479 = vrot.lane.b32.xlu0 %v10541_v51, %s13844_s30  ;;  %v5176_v51 = vrot.slane %v11361_v12, 5  ;;  %v13878_v17 = vrot.slane %v13838_v6, 7  ;;  %v13880_v12 = vld [vmem:[#allocation25_spill] sm:$0xff]  ;;  %vm13888_vm4 = vcmask 126016  }
 0x314   : > { %v11363_v31 = vpop.permute.xlu1 %2177  ;;  %13877 = vst [vmem:[#allocation44_spill] sm:$0xff] %v11377_v56  ;;  %2181 = vrot.lane.b32.xlu1 %v3677_v25, %s9379_s26  ;;  %v13881_v0 = vrot.slane %v13880_v12, 7  ;;  %v11395_v25 = vrot.slane %v10959_v32, 4  ;;  %v2625_v22 = vsel %vm9827_vm8, %v2623_v23, %v11377_v56 }
 0x315   : > { %v11374_v30 = vpop.permute.xlu0 %4367  ;;  %v4549_v63 = vor.u32 %v10723_v27, %v13878_v17  ;;  %v5180_v27 = vor.u32 %v5179_v54, %v5176_v51  ;;  %v11407_v54 = vor.u32 %v5189_v60, %v5186_v37  ;;  %v13601_v37 = vrot.slane %v11377_v56, 4 }
 0x316   : > { %v4542_v6 = vrot.slane %v13881_v0, 4  ;;  %13882 = vst [vmem:[#allocation25_spill] sm:$0xff] %v11395_v25  ;;  %v13603_v0 = vrot.slane %v11265_v45, 6 }
 0x317   : > { %4194 = vrot.lane.b32.xlu0 %v5565_v34, %s9392_s22  ;;  %v13602_v34 = vrot.slane %v11338_v48, 4  ;;  %v5182_v32 = vrot.slane %v5180_v27, 4  ;;  %v5181_v23 = vsel %vm9972_vm15, %v11395_v25, %v5180_v27 }
 0x318   : > { %v11392_v35 = vpop.permute.xlu1 %2659  ;;  %v4550_v21 = vsel %vm9998_vm1, %v4542_v6, %v4549_v63  ;;  %2663 = vrot.lane.b32.xlu1 %v2625_v22, %s9380_s27  ;;  %5269 = vst.msk [vmem:[#allocation4 + $0x54] sm:$0xf] %vm1643_vm12, %v5181_v23  ;;  %v6900_v51 = vsel %vm9827_vm8, %v13601_v37, %v13603_v0  ;;  %v13886_v6 = vld [vmem:[#allocation19_spill] sm:$0xff]  ;;  %v13611_v37 = vrot.slane %v11265_v45, 7 }
 0x319   : > { %v2834_v17 = vpop.permute.xlu0 %2833  ;;  %v5191_v44 = vsel %vm9972_vm15, %v5182_v32, %v11407_v54  ;;  %v6422_v60 = vsel %vm9809_vm7, %v13602_v34, %v13604_v10  ;;  %v13887_v27 = vrot.slane %v13886_v6, 5  ;;  %v13891_v10 = vld [vmem:[#allocation30_spill] sm:$0xff] }
 0x31a   : > { %2879 = vst.msk [vmem:[#allocation4 + $0x30] sm:$0xf] %vm13883_vm10, %v2834_v17  ;;  %vm13890_vm10 = vmmov %vm13888_vm4  ;;  %v11481_v26 = vrot.slane %v13891_v10, 6 }
 0x31b   : > { %4653 = vrot.lane.b32.xlu0 %v4550_v21, %s9391_s21  ;;  %5270 = vst.msk [vmem:[#allocation4 + $0x5c] sm:$0xf] %vm1643_vm12, %v5191_v44  ;;  %v6417_v17 = vrot.slane %v13887_v27, 4  ;;  %v13889_v44 = vrot.slane %v13886_v6, 6  ;;  %v3446_v27 = vrot.slane %v13839_v29, 4 }
 0x31c   : > { %v11415_v3 = vpop.permute.xlu1 %6462  ;;  %6466 = vrot.lane.b32.xlu1 %v6422_v60, %s9385_s13  ;;  %13892 = vst [vmem:[#allocation19_spill] sm:$0xff] %v11481_v26 }
 0x31d   : > { %v6281_v63 = vpop.permute.xlu0 %6280  ;;  %v6419_v23 = vsel %vm9809_vm7, %v6417_v17, %v11338_v48 }
 0x31e   : > { %6331 = vst.msk [vmem:[#allocation4 + $0x4] sm:$0xf] %vm13884_vm5, %v6281_v63  ;;  %v6895_v63 = vrot.slane %v13889_v44, 4  ;;  %v3450_v44 = vshll.u32 %v11076_v61, 16  ;;  %vm13894_vm5 = vcmask 257216  }
 0x31f   : > { %6507 = vst.msk [vmem:[#allocation4 + $0x4] sm:$0xf] %vm13885_vm3, %v11231_v16  ;;  %3122 = vrot.lane.b32.xlu0 %v4550_v21, %s9385_s13  ;;  %v5830_v16 = vrot.slane %v11076_v61, 7  ;;  %vm13896_vm3 = vcmask 322816  }
 0x320   : > { %v11434_v12 = vpop.permute.xlu1 %6940  ;;  %6944 = vrot.lane.b32.xlu1 %v6900_v51, %s9387_s15 }
 0x321   : > { %v11436_v22 = vpop.permute.xlu0 %6460  ;;  %v5832_v32 = vrot.slane %v5830_v16, 4 }
 0x323   : > { %5998 = vrot.lane.b32.xlu0 %v11440_v2, %s9380_s27  ;;  %v5834_v17 = vsel %vm9834_vm9, %v5832_v32, %v13611_v37  ;;  %v11492_v32 = vrot.slane %v3450_v44, 5 }
 0x324   : > { %v5395_v21 = vpop.permute.xlu1 %5394  ;;  %5398 = vrot.lane.b32.xlu1 %v6900_v51, %s9386_s14 }
 0x325   : > { %v11454_v36 = vpop.permute.xlu0 %6938  ;;  %5440 = vst.msk [vmem:[#allocation4 + $0x2c] sm:$0xf] %vm13888_vm4, %v5395_v21  ;;  %v11471_v21 = vsel %vm9827_vm8, %v6895_v63, %v11377_v56  ;;  %v13893_v63 = vrot.slane %v13842_v40, 5  ;;  %13895 = vst [vmem:[#allocation45_spill] sm:$0xff] %v11492_v32  ;;  %vm13898_vm4 = vcmask 388416  }
 0x327   : > { %6464 = vrot.lane.b32.xlu0 %v6419_v23, %s9385_s13  ;;  %v11487_v5 = vor.u32 %v13893_v63, %v3446_v27 }
 0x328   : > { %v11466_v34 = vpop.permute.xlu1 %5872  ;;  %5876 = vrot.lane.b32.xlu1 %v5834_v17, %s13844_s30  ;;  %v13897_v17 = vld [vmem:[#allocation23_spill] sm:$0xff] }
 0x329   : > { %v5393_v0 = vpop.permute.xlu0 %5392  ;;  %v13612_v37 = vrot.slane %v13897_v17, 6  ;;  %v13613_v40 = vrot.slane %v11487_v5, 4  ;;  %v13628_v17 = vrot.slane %v11349_v4, 5 }
 0x32a   : > { %5439 = vst.msk [vmem:[#allocation4 + $0x24] sm:$0xf] %vm13890_vm10, %v5393_v0  ;;  %v2632_v0 = vrot.slane %v11481_v26, 4  ;;  %vm13901_vm10 = vcmask 454016  }
 0x32b   : > { %6942 = vrot.lane.b32.xlu0 %v11471_v21, %s9387_s15 }
 0x32c   : > { %v2478_v56 = vpop.permute.xlu1 %2477  ;;  %4953 = vrot.lane.b32.xlu1 %v6422_v60, %s9390_s20 }
 0x32d   : > { %v11489_v48 = vpop.permute.xlu0 %5870  ;;  %2522 = vst.msk [vmem:[#allocation4 + $0x38] sm:$0xf] %vm13894_vm5, %v2478_v56  ;;  %v13899_v56 = vrot.slane %v13886_v6, 7  ;;  %vm13903_vm5 = vcmask 519616  }
 0x32e   : > { %2700 = vst.msk [vmem:[#allocation4 + $0x38] sm:$0xf] %vm13896_vm3, %v11183_v59  ;;  %v11512_v59 = vsel %vm9827_vm8, %v2632_v0, %v13612_v37  ;;  %v4333_v0 = vrot.slane %v11021_v1, 7  ;;  %v13902_v37 = vld [vmem:[#allocation18_spill] sm:$0xff]  ;;  %v13908_v1 = vrot.slane %v11278_v49, 5  ;;  %vm13921_vm3 = vmmov %vm13898_vm4 }
 0x32f   : > { %5396 = vrot.lane.b32.xlu0 %v11471_v21, %s9386_s14  ;;  %2880 = vst.msk [vmem:[#allocation4 + $0x38] sm:$0xf] %vm13898_vm4, %v11335_v41  ;;  %v5829_v27 = vrot.slane %v13899_v56, 4  ;;  %13900 = vst [vmem:[#allocation46_spill] sm:$0xff] %v11512_v59  ;;  %v3453_v41 = vsel %vm10014_vm0, %v13613_v40, %v11492_v32  ;;  %v9365_v40 = vld [vmem:[#allocation3 + $0x28] sm:$0xff] }
 0x330   : > { %v11506_v44 = vpop.permute.xlu1 %4651  ;;  %3542 = vrot.lane.b32.xlu1 %v3453_v41, %s9387_s15  ;;  %v4335_v59 = vrot.slane %v4333_v0, 4  ;;  %v6426_v10 = vrot.slane %v13908_v1, 4  ;;  %v13912_v1 = vrot.slane %v10700_v20, 7  ;;  %vm13922_vm4 = vmmov %vm13903_vm5 }
 0x331   : > { %v11514_v60 = vpop.permute.xlu0 %4947  ;;  %v5831_v6 = vsel %vm9834_vm9, %v5829_v27, %v5830_v16  ;;  %v13620_v16 = vrot.slane %v11345_v46, 5  ;;  %v4838_v46 = vld [vmem:[#allocation3 + $0x48] sm:$0xff] }
 0x332   : > { %v11578_v4 = vcombine.high %v4838_v46, %v4838_v46 }
 0x333   : > { %5874 = vrot.lane.b32.xlu0 %v5831_v6, %s13844_s30  ;;  %v8189_v6 = vcombine.high %v9365_v40, %v9365_v40 }
 0x334   : > { %v3121_v63 = vpop.permute.xlu1 %3120  ;;  %2003 = vrot.lane.b32.xlu1 %v3453_v41, %s9386_s14  ;;  %v3690_v41 = vrot.slane %v13620_v16, 4  ;;  %v13634_v16 = vrot.slane %v11440_v2, 5 }
 0x335   : > { %v11525_v56 = vpop.permute.xlu0 %3711  ;;  %3165 = vst.msk [vmem:[#allocation4 + $0x38] sm:$0xf] %vm13901_vm10, %v3121_v63  ;;  %v2395_v63 = vshrl.u32 %v8189_v6, 16  ;;  %v2398_v32 = vshll.u32 %v8189_v6, 16 }
 0x336   : > { %3286 = vst.msk [vmem:[#allocation4 + $0x38] sm:$0xf] %vm13903_vm5, %v13902_v37  ;;  %v13625_v37 = vrot.slane %v11031_v43, 7  ;;  %v11562_v6 = vsel %vm9809_vm7, %v3690_v41, %v13628_v17  ;;  %v13910_v41 = vrot.slane %v11278_v49, 6  ;;  %v13637_v43 = vrot.slane %v11440_v2, 6 }
 0x337   : > { %4951 = vrot.lane.b32.xlu0 %v6419_v23, %s9390_s20  ;;  %13905 = vst [vmem:[#allocation47_spill] sm:$0xff] %v11562_v6  ;;  %vm13923_vm5 = vcmask 585216  }
 0x338   : > { %v11534_v27 = vpop.permute.xlu1 %4949  ;;  %3894 = vrot.lane.b32.xlu1 %v6900_v51, %s9388_s16  ;;  %v4337_v40 = vsel %vm9834_vm9, %v4335_v59, %v13625_v37  ;;  %v2397_v59 = vrot.slane %v2395_v63, 5  ;;  %v2400_v37 = vrot.slane %v2398_v32, 6  ;;  %v6904_v17 = vrot.slane %v13910_v41, 4  ;;  %v13913_v41 = vld [vmem:[#allocation13_spill] sm:$0xff] }
 0x339   : > { %v11536_v26 = vpop.permute.xlu0 %2175 }
 0x33a   : > { %13904 = vst [vmem:[#allocation18_spill] sm:$0xff] %v11536_v26  ;;  %v11580_v32 = vor.u32 %v2400_v37, %v2397_v59 }
 0x33b   : > { %3540 = vrot.lane.b32.xlu0 %v11299_v47, %s9387_s15 }
 0x33c   : > { %v11544_v23 = vpop.permute.xlu1 %3890  ;;  %4377 = vrot.lane.b32.xlu1 %v4337_v40, %s13664_s19 }
 0x33d   : > { %v11546_v61 = vpop.permute.xlu0 %3888 }
 0x33f   : > { %2001 = vrot.lane.b32.xlu0 %v11299_v47, %s9386_s14  ;;  %v11571_v47 = vcombine.low %v4838_v46, %v4838_v46  ;;  %v13914_v46 = vrot.slane %v13913_v41, 4 }
 0x340   : > { %v11564_v25 = vpop.permute.xlu1 %4373  ;;  %2843 = vrot.lane.b32.xlu1 %v4337_v40, %s9381_s28  ;;  %v4332_v40 = vrot.slane %v13912_v1, 4  ;;  %v11611_v1 = vshrl.u32 %v11578_v4, 16 }
 0x341   : > { %13906 = vst [vmem:[#allocation48_spill] sm:$0xff] %v11564_v25  ;;  %v11566_v51 = vpop.permute.xlu0 %2657  ;;  %13909 = vst [vmem:[#allocation50_spill] sm:$0xff] %v11571_v47  ;;  %v2402_v37 = vsel %vm9972_vm15, %v13914_v46, %v11580_v32  ;;  %v11600_v59 = vshrl.u32 %v11571_v47, 16  ;;  %v11603_v20 = vshll.u32 %v11571_v47, 16  ;;  %v11619_v47 = vshll.u32 %v11578_v4, 16 }
 0x342   : > { %13907 = vst [vmem:[#allocation49_spill] sm:$0xff] %v11566_v51  ;;  %13917 = vst [vmem:[#allocation53_spill] sm:$0xff] %v11611_v1 }
 0x343   : > { %3892 = vrot.lane.b32.xlu0 %v11471_v21, %s9388_s16  ;;  %v6428_v21 = vsel %vm9809_vm7, %v6426_v10, %v13634_v16  ;;  %13915 = vst [vmem:[#allocation13_spill] sm:$0xff] %v11600_v59  ;;  %13916 = vst [vmem:[#allocation52_spill] sm:$0xff] %v11603_v20  ;;  %v6906_v10 = vsel %vm9827_vm8, %v6904_v17, %v13637_v43  ;;  %v5196_v46 = vrot.slane %v11600_v59, 5  ;;  %v5199_v16 = vrot.slane %v11603_v20, 6 }
 0x344   : > { %v11582_v63 = vpop.permute.xlu1 %2839  ;;  %6470 = vrot.lane.b32.xlu1 %v6428_v21, %s9385_s13  ;;  %13918 = vst [vmem:[#allocation54_spill] sm:$0xff] %v11619_v47  ;;  %v5192_v17 = vrot.slane %v11407_v54, 4  ;;  %v4334_v43 = vsel %vm9834_vm9, %v4332_v40, %v4333_v0  ;;  %v5209_v21 = vrot.slane %v11619_v47, 6  ;;  %v13920_v59 = vrot.slane %v11278_v49, 7 }
 0x345   : > { %v11584_v6 = vpop.permute.xlu0 %4371  ;;  %v5200_v51 = vor.u32 %v5199_v16, %v5196_v46  ;;  %v6158_v0 = vrot.slane %v11056_v24, 5  ;;  %v13650_v16 = vrot.slane %v11440_v2, 7 }
 0x346   : > { %13911 = vst [vmem:[#allocation51_spill] sm:$0xff] %v11584_v6  ;;  %v5206_v6 = vrot.slane %v11611_v1, 5  ;;  %v5838_v26 = vrot.slane %v13920_v59, 4  ;;  %v4564_v59 = vrot.slane %v11046_v14, 7 }
 0x347   : > { %2483 = vrot.lane.b32.xlu0 %v2402_v37, %s13844_s30  ;;  %v5202_v25 = vrot.slane %v5200_v51, 4  ;;  %v5201_v54 = vsel %vm9972_vm15, %v5192_v17, %v5200_v51  ;;  %v13932_v17 = vrot.slane %v11278_v49, 5 }
 0x348   : > { %v11613_v41 = vpop.permute.xlu1 %5992  ;;  %6948 = vrot.lane.b32.xlu1 %v6906_v10, %s9387_s15  ;;  %5271 = vst.msk [vmem:[#allocation4 + $0x64] sm:$0xf] %vm1643_vm12, %v5201_v54  ;;  %v4569_v46 = vrot.slane %v4564_v59, 4 }
 0x349   : > { %v11621_v37 = vpop.permute.xlu0 %2837 }
 0x34a   : > { %13919 = vst [vmem:[#allocation55_spill] sm:$0xff] %v11621_v37  ;;  %v11632_v37 = vor.u32 %v5209_v21, %v5206_v6 }
 0x34b   : > { %4375 = vrot.lane.b32.xlu0 %v4334_v43, %s13664_s19 }
 0x34c   : > { %v6283_v20 = vpop.permute.xlu1 %6282  ;;  %5402 = vrot.lane.b32.xlu1 %v6906_v10, %s9386_s14  ;;  %v5211_v51 = vsel %vm9972_vm15, %v5202_v25, %v11632_v37  ;;  %v13647_v25 = vrot.slane %v11059_v28, 7  ;;  %v2403_v10 = vrot.slane %v11580_v32, 4  ;;  %v6162_v32 = vrot.slane %v11046_v14, 4 }
 0x34d   : > { %v6759_v1 = vpop.permute.xlu0 %6758  ;;  %6332 = vst.msk [vmem:[#allocation4 + $0xc] sm:$0xf] %vm13921_vm3, %v6283_v20  ;;  %vm13924_vm3 = vmmov %vm13922_vm4  ;;  %v13928_v20 = vrot.slane %v11265_v45, 5 }
 0x34e   : > { %6809 = vst.msk [vmem:[#allocation4 + $0x4] sm:$0xf] %vm13922_vm4, %v6759_v1  ;;  %vm13925_vm4 = vcmask 191616  }
 0x34f   : > { %6508 = vst.msk [vmem:[#allocation4 + $0xc] sm:$0xf] %vm13901_vm10, %v11202_v18  ;;  %2841 = vrot.lane.b32.xlu0 %v4334_v43, %s9381_s28  ;;  %v5840_v18 = vsel %vm9834_vm9, %v5838_v26, %v13650_v16  ;;  %vm13927_vm10 = vmmov %vm13923_vm5  ;;  %v11667_v26 = vrot.slane %v13928_v20, 4  ;;  %v1937_v16 = vshll.u32 %v11265_v45, 16 }
 0x350   : > { %6985 = vst.msk [vmem:[#allocation4 + $0x4] sm:$0xf] %vm13923_vm5, %v11251_v19  ;;  %v6761_v6 = vpop.permute.xlu1 %6760  ;;  %v13926_v19 = vrot.slane %v11487_v5, 4  ;;  %5880 = vrot.lane.b32.xlu1 %v5840_v18, %s13844_s30  ;;  %vm13929_vm5 = vcmask 257216   ;;  %v13930_v5 = vld [vmem:[#allocation20_spill] sm:$0xff]  ;;  %v11704_v18 = vld [vmem:[#allocation3 + $0x40] sm:$0xff] }
 0x351   : > { %5272 = vst.msk [vmem:[#allocation4 + $0x6c] sm:$0xf] %vm1643_vm12, %v5211_v51  ;;  %v5691_v40 = vpop.permute.xlu0 %5690  ;;  %v6425_v54 = vsel %vm9809_vm7, %v11667_v26, %v13932_v17  ;;  %v13934_v51 = vrot.slane %v11265_v45, 6  ;;  %v13646_v17 = vrot.slane %v11578_v4, 5 }
 0x352   : > { %6810 = vst.msk [vmem:[#allocation4 + $0xc] sm:$0xf] %vm13924_vm3, %v6761_v6  ;;  %v6159_v43 = vsel %vm10014_vm0, %v13926_v19, %v6158_v0  ;;  %vm13931_vm3 = vcmask 322816   ;;  %v11706_v19 = vld [vmem:[#allocation3 + $0x48] sm:$0x1f] }
 0x353   : > { %5739 = vst.msk [vmem:[#allocation4 + $0x14] sm:$0xf] %vm13925_vm4, %v5691_v40  ;;  %6288 = vrot.lane.b32.xlu0 %v6159_v43, %s9381_s28  ;;  %v11696_v6 = vrot.slane %v13934_v51, 4 }
 0x354   : > { %6986 = vst.msk [vmem:[#allocation4 + $0xc] sm:$0xf] %vm13927_vm10, %v11214_v11  ;;  %v5693_v1 = vpop.permute.xlu1 %5692  ;;  %v2412_v11 = vsel %vm9972_vm15, %v2403_v10, %v11086_v8  ;;  %vm13933_vm10 = vmmov %vm13929_vm5  ;;  %v9301_v10 = vld [vmem:[#allocation4] ss:$8 sps:$4 sm:$0xff]  }
 0x355   : > { %5915 = vst.msk [vmem:[#allocation4 + $0x14] sm:$0xf] %vm13929_vm5, %v11281_v62  ;;  %v4191_v21 = vpop.permute.xlu0 %4190  ;;  %v4576_v62 = vor.u32 %v11067_v42, %v13647_v25  ;;  %2485 = vrot.lane.b32.xlu1 %v2412_v11, %s13844_s30  ;;  %vm13935_vm5 = vmmov %vm13931_vm3 }
 0x356   : > { %6035 = vst.msk [vmem:[#allocation4 + $0x14] sm:$0xf] %vm13931_vm3, %v13930_v5  ;;  %v6163_v5 = vor.u32 %v6162_v32, %v6158_v0  ;;  %v11727_v0 = vcombine.low %v11704_v18, %v11704_v18  ;;  %vm13938_vm3 = vcmask 1044416   ;;  %v13939_v32 = vld [vmem:[#allocation14_spill] sm:$0xff] }
 0x357   : > { %5740 = vst.msk [vmem:[#allocation4 + $0x1c] sm:$0xf] %vm13925_vm4, %v5693_v1  ;;  %6468 = vrot.lane.b32.xlu0 %v6425_v54, %s9385_s13  ;;  %v11711_v20 = vsel %vm9998_vm1, %v4569_v46, %v4576_v62  ;;  %v5583_v46 = vrot.slane %v11056_v24, 7  ;;  %v8286_v62 = vcombine.low %v11706_v19, %v11706_v19  ;;  %vm13940_vm4 = vmmov %vm13938_vm3 }
 0x358   : > { %4238 = vst.msk [vmem:[#allocation4 + $0x20] sm:$0xf] %vm4233_vm14, %v4191_v21  ;;  %v4193_v40 = vpop.permute.xlu1 %4192  ;;  %v13937_v21 = vrot.slane %v11265_v45, 7  ;;  %v6164_v51 = vrot.slane %v6163_v5, 4 }
 0x359   : > { %5916 = vst.msk [vmem:[#allocation4 + $0x1c] sm:$0xf] %vm13933_vm10, %v11247_v9  ;;  %v4839_v9 = vld [vmem:[#allocation3 + $0x50] sm:$0xff]  ;;  %v4650_v43 = vpop.permute.xlu0 %4649  ;;  %4659 = vrot.lane.b32.xlu1 %v11711_v20, %s9391_s21  ;;  %vm13941_vm10 = vcmask 585216  }
 0x35a   : > { %4415 = vst.msk [vmem:[#allocation4 + $0x20] sm:$0xf] %vm4410_vm2, %v11374_v30  ;;  %v5835_v11 = vrot.slane %v13937_v21, 4  ;;  %v11743_v54 = vcombine.low %v4839_v9, %v4839_v9 }
 0x35b   : > { %6036 = vst.msk [vmem:[#allocation4 + $0x1c] sm:$0xf] %vm13935_vm5, %v11005_v13  ;;  %v9303_v30 = vld [vmem:[#allocation4 + $0x4] ss:$8 sps:$4 sm:$0xff]   ;;  %v13936_v13 = vrot.slane %v11278_v49, 6  ;;  %vm13942_vm5 = vcmask 454016  }
 0x35c   : > { %4239 = vst.msk [vmem:[#allocation4 + $0x28] sm:$0xf] %vm4233_vm14, %v4193_v40  ;;  %7266 = vmatprep.mubr.bf16.mxu1 %v9303_v30  ;;  %v4931_v30 = vrot.slane %v11743_v54, 5 }
 0x35d   : > { %4697 = vst.msk [vmem:[#allocation4 + $0x20] sm:$0xf] %vm4692_vm13, %v4650_v43  ;;  %v6903_v1 = vsel %vm9827_vm8, %v11696_v6, %v13936_v13  ;;  %7267 = vmatmul.mubr.bf16.vlgmr.msra.gmra.mrb[0].mxu1 %v9301_v10  ;;  %6000 = vrot.lane.b32.xlu1 %v11727_v0, %s9380_s27  ;;  %v11771_v13 = vcombine.high %v4839_v9, %v4839_v9 }
 0x35e   : > { %4416 = vst.msk [vmem:[#allocation4 + $0x28] sm:$0xf] %vm4410_vm2, %v11322_v58  ;;  %6946 = vrot.lane.b32.xlu0 %v6903_v1, %s9387_s15  ;;  %v5580_v58 = vrot.slane %v11046_v14, 6 }
 0x35f   : > { %4818 = vst.msk [vmem:[#allocation4 + $0x20] sm:$0xf] %vm13644_vm11, %v10950_v50  ;;  %v3539_v50 = vpop.permute.xlu1 %3538  ;;  %13948 = vst [vmem:[#allocation20_spill] sm:$0xff] %v11771_v13  ;;  %v13645_v9 = vrot.slane %v11771_v13, 5 }
 0x360   : > { %4698 = vst.msk [vmem:[#allocation4 + $0x28] sm:$0xf] %vm4692_vm13, %v11506_v44  ;;  %v3119_v44 = vpop.permute.xlu0 %3118  ;;  %v5584_v43 = vor.u32 %v5583_v46, %v5580_v58 }
 0x361   : > { %4995 = vst.msk [vmem:[#allocation4 + $0x20] sm:$0xf] %vm13938_vm3, %v11514_v60  ;;  %vm13943_vm3 = vcmask 650816   ;;  %v13944_v60 = vrot.slane %v11278_v49, 7  ;;  %v4930_v49 = vrot.slane %v13646_v17, 4 }
 0x362   : > { %4819 = vst.msk [vmem:[#allocation4 + $0x28] sm:$0xf] %vm13644_vm11, %v13939_v32  ;;  %vm13945_vm11 = vcmask 519616   ;;  %5400 = vrot.lane.b32.xlu0 %v6903_v1, %s9386_s14  ;;  %v8287_v1 = vcombine.high %v11706_v19, %v11706_v19  ;;  %v5586_v46 = vrot.slane %v5584_v43, 4 }
 0x363   : > { %4996 = vst.msk [vmem:[#allocation4 + $0x28] sm:$0xf] %vm13940_vm4, %v11534_v27  ;;  %v5837_v40 = vsel %vm9834_vm9, %v5835_v11, %v13944_v60  ;;  %vm13946_vm4 = vcmask 716416   ;;  %v6168_v27 = vrot.slane %v11067_v42, 5  ;;  %v2000_v10 = vpop.permute.xlu1 %1999  ;;  %v11778_v42 = vsel %vm9809_vm7, %v4930_v49, %v4931_v30  ;;  %v13956_v60 = vld [vmem:[#allocation27_spill] sm:$0xff]  ;;  %v13957_v49 = vld [vmem:[#allocation28_spill] sm:$0xff] }
 0x364   : > { %3583 = vst.msk [vmem:[#allocation4 + $0x38] sm:$0xf] %vm13941_vm10, %v3539_v50  ;;  %v11766_v5 = vpop.permute.xlu0 %3715  ;;  %vm13947_vm10 = vcmask 126016   ;;  %13950 = vst [vmem:[#allocation14_spill] sm:$0xff] %v11778_v42  ;;  %v3514_v11 = vshrl.u32 %v8286_v62, 16  ;;  %v3520_v50 = vshll.u32 %v8287_v1, 16 }
 0x365   : > { %3164 = vst.msk [vmem:[#allocation4 + $0x30] sm:$0xf] %vm13942_vm5, %v3119_v44  ;;  %vm13951_vm5 = vcmask 257216   ;;  %v13954_v44 = vld [vmem:[#allocation43_spill] sm:$0xff] }
 0x366   : > { %3758 = vst.msk [vmem:[#allocation4 + $0x38] sm:$0xf] %vm13943_vm3, %v11347_v52  ;;  %v3510_v52 = vshll.u32 %v8286_v62, 16  ;;  %5878 = vrot.lane.b32.xlu0 %v5837_v40, %s13844_s30  ;;  %v3516_v19 = vrot.slane %v3514_v11, 4  ;;  %vm13953_vm3 = vcmask 322816   ;;  %v1671_v62 = vld [vmem:[#allocation3 + $0x38] sm:$0xff] }
 0x367   : > { %3285 = vst.msk [vmem:[#allocation4 + $0x30] sm:$0xf] %vm13945_vm11, %v10982_v53  ;;  %v6169_v53 = vsel %vm10014_vm0, %v6164_v51, %v6168_v27  ;;  %vm13949_vm11 = vcmask 191616   ;;  %v2482_v58 = vpop.permute.xlu1 %2481  ;;  %v5576_v40 = vrot.slane %v13956_v60, 4  ;;  %v8139_v11 = vcombine.high %v1671_v62, %v1671_v62 }
 0x368   : > { %3935 = vst.msk [vmem:[#allocation4 + $0x38] sm:$0xf] %vm13946_vm4, %v11544_v23  ;;  %6290 = vrot.lane.b32.xlu1 %v6169_v53, %s9381_s28  ;;  %v4933_v23 = vrot.slane %v4931_v30, 4  ;;  %v11783_v21 = vrot.slane %v3510_v52, 5  ;;  %vm13955_vm4 = vcmask 388416   ;;  %v5595_v30 = vsel %vm10262_vm6, %v5586_v46, %v13957_v49 }
 0x369   : > { %2042 = vst.msk [vmem:[#allocation4 + $0x48] sm:$0xf] %vm13947_vm10, %v2000_v10  ;;  %v3522_v53 = vrot.slane %v3520_v50, 5  ;;  %v5585_v1 = vsel %vm10262_vm6, %v5576_v40, %v5584_v43  ;;  %vm13960_vm10 = vcmask 454016   ;;  %v13961_v43 = vld [vmem:[#allocation41_spill] sm:$0xff]  ;;  %v4567_v50 = vor.u32 %v11056_v24, %v4564_v59 }
 0x36a   : > { %2220 = vst.msk [vmem:[#allocation4 + $0x48] sm:$0xf] %vm13949_vm11, %v11363_v31  ;;  %v11786_v31 = vpop.permute.xlu0 %2179  ;;  %v11793_v32 = vsel %vm9809_vm7, %v4933_v23, %v13645_v9  ;;  %6766 = vrot.lane.b32.xlu0 %v13954_v44, %s9378_s25  ;;  %v3517_v51 = vor.u32 %v3516_v19, %v11783_v21  ;;  %v8138_v23 = vcombine.low %v1671_v62, %v1671_v62  ;;  %vm13962_vm11 = vcmask 519616   ;;  %v13965_v59 = vld [vmem:[#allocation33_spill] sm:$0xff] }
 0x36b   : > { %2524 = vst.msk [vmem:[#allocation4 + $0x48] sm:$0xf] %vm13951_vm5, %v2482_v58  ;;  %13952 = vst [vmem:[#allocation56_spill] sm:$0xff] %v11793_v32  ;;  %v11805_v52 = vpop.permute.xlu1 %4655  ;;  %v13963_v44 = vrot.slane %v13839_v29, 7  ;;  %v11838_v49 = vshll.u32 %v11727_v0, 16 }
 0x36c   : > { %2702 = vst.msk [vmem:[#allocation4 + $0x48] sm:$0xf] %vm13953_vm3, %v11392_v35  ;;  %6768 = vrot.lane.b32.xlu1 %v11125_v33, %s9378_s25  ;;  %v3518_v33 = vrot.slane %v3517_v51, 4  ;;  %vm13964_vm5 = vmmov %vm13955_vm4 }
 0x36d   : > { %2882 = vst.msk [vmem:[#allocation4 + $0x48] sm:$0xf] %vm13955_vm4, %v11582_v63  ;;  %v6172_v63 = vrot.slane %v11059_v28, 4  ;;  %v4560_v51 = vrot.slane %v13963_v44, 4  ;;  %vm13966_vm3 = vmmov %vm13960_vm10 }
 0x36e   : > { %v11807_v10 = vpop.permute.xlu0 %2661  ;;  %5698 = vrot.lane.b32.xlu0 %v5585_v1, %s9379_s26  ;;  %v11819_v58 = vsel %vm10014_vm0, %v3518_v33, %v3522_v53  ;;  %1747 = vst.msk [vmem:[#allocation4 + $0x70] sm:$0xf] %vm1643_vm12, %v8138_v23  ;;  %1748 = vst.msk [vmem:[#allocation4 + $0x78] sm:$0xf] %vm1643_vm12, %v8139_v11  ;;  %v11841_v33 = vshrl.u32 %v11727_v0, 16  ;;  %v5217_v53 = vshll.u32 %v11743_v54, 16 }
 0x36f   : > { %13959 = vst [vmem:[#allocation43_spill] sm:$0xff] %v11819_v58  ;;  %v3125_v46 = vpop.permute.xlu1 %3124  ;;  %v6173_v62 = vor.u32 %v6172_v63, %v6168_v27  ;;  %v11846_v14 = vsel %vm9998_vm1, %v4560_v51, %v4567_v50  ;;  %v6430_v27 = vrot.slane %v11727_v0, 5  ;;  %v9359_v23 = vld [vmem:[#allocation3 + $0x58] ss:$0 sps:$4 sm:$0x33]   ;;  %v6198_v63 = vrot.slane %v11838_v49, 5 }
 0x370   : > { %5700 = vrot.lane.b32.xlu1 %v5595_v30, %s9379_s26  ;;  %3167 = vst.msk [vmem:[#allocation4 + $0x48] sm:$0xf] %vm13960_vm10, %v3125_v46  ;;  %v6202_v11 = vrot.slane %v11841_v33, 4  ;;  %v5227_v46 = vshll.u32 %v11771_v13, 16  ;;  %vm13967_vm10 = vmmov %vm13962_vm11  ;;  %v5219_v44 = vrot.slane %v5217_v53, 6  ;;  %v11875_v51 = vcombine.high %v11704_v18, %v11704_v18  ;;  %v13975_v18 = vld [vmem:[#allocation36_spill] sm:$0xff] }
 0x371   : > { %3288 = vst.msk [vmem:[#allocation4 + $0x48] sm:$0xf] %vm13962_vm11, %v13961_v43  ;;  %v6174_v24 = vrot.slane %v6173_v62, 4  ;;  %v13968_v43 = vld [vmem:[#allocation11_spill] sm:$0xff]  ;;  %vm13969_vm11 = vmmov %vm13966_vm3  ;;  %v5234_v9 = vshrl.u32 %v9359_v23, 16  ;;  %v5237_v17 = vshll.u32 %v9359_v23, 16 }
 0x372   : > { %v11823_v19 = vpop.permute.xlu0 %5994  ;;  %4198 = vrot.lane.b32.xlu0 %v5585_v1, %s9392_s22 }
 0x373   : > { %v11835_v60 = vpop.permute.xlu1 %5996  ;;  %v6179_v50 = vsel %vm10014_vm0, %v6174_v24, %v13968_v43 }
 0x374   : > { %4200 = vrot.lane.b32.xlu1 %v5595_v30, %s9392_s22  ;;  %v5214_v30 = vshrl.u32 %v11743_v54, 16  ;;  %v13970_v54 = vld [vmem:[#allocation34_spill] sm:$0xff] }
 0x376   : > { %v6285_v40 = vpop.permute.xlu0 %6284  ;;  %4657 = vrot.lane.b32.xlu0 %v11846_v14, %s9391_s21  ;;  %v5216_v62 = vrot.slane %v5214_v30, 5  ;;  %v6203_v30 = vor.u32 %v6202_v11, %v6198_v63  ;;  %v13977_v11 = vld [vmem:[#allocation31_spill] sm:$0xff] }
 0x377   : > { %6333 = vst.msk [vmem:[#allocation4 + $0x14] sm:$0xf] %vm13964_vm5, %v6285_v40  ;;  %v6287_v29 = vpop.permute.xlu1 %6286  ;;  %vm13971_vm5 = vcmask 585216  }
 0x378   : > { %6294 = vrot.lane.b32.xlu1 %v13965_v59, %s9381_s28  ;;  %6509 = vst.msk [vmem:[#allocation4 + $0x14] sm:$0xf] %vm13966_vm3, %v11436_v22  ;;  %v5224_v22 = vshrl.u32 %v11771_v13, 16  ;;  %vm13972_vm3 = vmmov %vm13967_vm10 }
 0x379   : > { %6334 = vst.msk [vmem:[#allocation4 + $0x1c] sm:$0xf] %vm13955_vm4, %v6287_v29  ;;  %v5229_v29 = vrot.slane %v5227_v46, 6  ;;  %vm13973_vm4 = vcmask 191616   ;;  %v5239_v46 = vrot.slane %v5237_v17, 6 }
 0x37a   : > { %v6763_v1 = vpop.permute.xlu0 %6762  ;;  %6510 = vst.msk [vmem:[#allocation4 + $0x1c] sm:$0xf] %vm13969_vm11, %v11415_v3  ;;  %6292 = vrot.lane.b32.xlu0 %v6179_v50, %s9381_s28  ;;  %v5226_v40 = vrot.slane %v5224_v22, 5  ;;  %v5212_v3 = vrot.slane %v11632_v37, 4  ;;  %v5236_v22 = vrot.slane %v5234_v9, 5  ;;  %vm13976_vm11 = vcmask 257216  }
 0x37b   : > { %6811 = vst.msk [vmem:[#allocation4 + $0x14] sm:$0xf] %vm13967_vm10, %v6763_v1  ;;  %v6765_v24 = vpop.permute.xlu1 %6764  ;;  %v5220_v1 = vor.u32 %v5219_v44, %v5216_v62  ;;  %vm13974_vm10 = vmmov %vm13971_vm5  ;;  %v11896_v50 = vshll.u32 %v11875_v51, 16  ;;  %v13978_v62 = vld [vmem:[#allocation26_spill] sm:$0xff] }
 0x37c   : > { %6772 = vrot.lane.b32.xlu1 %v13970_v54, %s9378_s25  ;;  %6987 = vst.msk [vmem:[#allocation4 + $0x14] sm:$0xf] %vm13971_vm5, %v11454_v36  ;;  %v6432_v36 = vrot.slane %v6430_v27, 4  ;;  %v5230_v53 = vor.u32 %v5229_v29, %v5226_v40  ;;  %vm13979_vm5 = vcmask 322816   ;;  %v5240_v9 = vor.u32 %v5239_v46, %v5236_v22  ;;  %v13988_v46 = vld [vmem:[#allocation48_spill] sm:$0xff] }
 0x37d   : > { %6812 = vst.msk [vmem:[#allocation4 + $0x1c] sm:$0xf] %vm13972_vm3, %v6765_v24  ;;  %v5222_v37 = vrot.slane %v5220_v1, 4  ;;  %v5221_v23 = vsel %vm9972_vm15, %v5212_v3, %v5220_v1  ;;  %vm13980_vm3 = vmmov %vm13973_vm4  ;;  %v6204_v29 = vrot.slane %v6203_v30, 4  ;;  %v13984_v1 = vld [vmem:[#allocation17_spill] sm:$0xff]  ;;  %v13649_v3 = vrot.slane %v11896_v50, 5 }
 0x37e   : > { %v5695_v25 = vpop.permute.xlu0 %5694  ;;  %6988 = vst.msk [vmem:[#allocation4 + $0x1c] sm:$0xf] %vm13974_vm10, %v11434_v12  ;;  %6770 = vrot.lane.b32.xlu0 %v13977_v11, %s9378_s25  ;;  %v5232_v12 = vrot.slane %v5230_v53, 4  ;;  %v6675_v22 = vrot.slane %v11838_v49, 6  ;;  %v13989_v11 = vld [vmem:[#allocation18_spill] sm:$0xff] }
 0x37f   : > { %5741 = vst.msk [vmem:[#allocation4 + $0x24] sm:$0xf] %vm13973_vm4, %v5695_v25  ;;  %v13648_v25 = vrot.slane %v11875_v51, 5  ;;  %v5697_v44 = vpop.permute.xlu1 %5696  ;;  %v5231_v17 = vsel %vm9972_vm15, %v5222_v37, %v5230_v53  ;;  %vm13981_vm4 = vmmov %vm13974_vm10  ;;  %v6672_v53 = vrot.slane %v11841_v33, 5 }
 0x380   : > { %5704 = vrot.lane.b32.xlu1 %v13975_v18, %s9379_s26  ;;  %5917 = vst.msk [vmem:[#allocation4 + $0x24] sm:$0xf] %vm13976_vm11, %v11489_v48  ;;  %vm13982_vm10 = vmmov %vm13976_vm11  ;;  %v5241_v24 = vsel %vm9972_vm15, %v5232_v12, %v5240_v9  ;;  %vm13983_vm11 = vcmask 650816   ;;  %v11950_v12 = vshrl.u32 %v11875_v51, 16 }
 0x381   : > { %5273 = vst.msk [vmem:[#allocation4 + $0x74] sm:$0xf] %vm1643_vm12, %v5221_v23  ;;  %v6434_v40 = vsel %vm9809_vm7, %v6432_v36, %v13648_v25  ;;  %5274 = vst.msk [vmem:[#allocation4 + $0x7c] sm:$0xf] %vm1643_vm12, %v5231_v17  ;;  %v9310_v23 = vld [vmem:[#allocation4 + $0x10] ss:$8 sps:$4 sm:$0xff]  }
 0x382   : > { %6037 = vst.msk [vmem:[#allocation4 + $0x24] sm:$0xf] %vm13979_vm5, %v13978_v62  ;;  %v3537_v48 = vpop.permute.xlu0 %3536  ;;  %5702 = vrot.lane.b32.xlu0 %v13984_v1, %s9379_s26  ;;  %v13991_v62 = vrot.slane %v11440_v2, 5  ;;  %v14009_v25 = vld [vmem:[#allocation10_spill] sm:$0xff] }
 0x383   : > { %5742 = vst.msk [vmem:[#allocation4 + $0x2c] sm:$0xf] %vm13980_vm3, %v5697_v44  ;;  %vm13985_vm3 = vcmask 716416   ;;  %v4197_v30 = vpop.permute.xlu1 %4196  ;;  %v13992_v44 = vld [vmem:[#allocation39_spill] sm:$0xff] }
 0x384   : > { %3582 = vst.msk [vmem:[#allocation4 + $0x30] sm:$0xf] %vm13981_vm4, %v3537_v48  ;;  %6474 = vrot.lane.b32.xlu1 %v6434_v40, %s9385_s13  ;;  %vm13990_vm4 = vcmask 191616   ;;  %v6676_v48 = vor.u32 %v6675_v22, %v6672_v53  ;;  %v13995_v40 = vld [vmem:[#allocation49_spill] sm:$0xff] }
 0x385   : > { %5918 = vst.msk [vmem:[#allocation4 + $0x2c] sm:$0xf] %vm13982_vm10, %v11466_v34  ;;  %v13986_v34 = vld [vmem:[#allocation37_spill] sm:$0xff]  ;;  %vm13993_vm10 = vcmask 978816  }
 0x386   : > { %3757 = vst.msk [vmem:[#allocation4 + $0x30] sm:$0xf] %vm13983_vm11, %v11525_v56  ;;  %v11926_v36 = vrot.slane %v13986_v34, 4  ;;  %v1998_v56 = vpop.permute.xlu0 %1997  ;;  %v9308_v37 = vld [vmem:[#allocation4 + $0x14] ss:$8 sps:$4 sm:$0xff]   ;;  %vm13994_vm11 = vcmask 257216  }
 0x387   : > { %6038 = vst.msk [vmem:[#allocation4 + $0x2c] sm:$0xf] %vm13979_vm5, %v11613_v41  ;;  %v6209_v41 = vsel %vm10014_vm0, %v6204_v29, %v13649_v3  ;;  %7274 = vmatprep.mubr.bf16.mxu1 %v9308_v37  ;;  %v11956_v17 = vpop.permute.xlu1 %3717  ;;  %v6682_v29 = vrot.slane %v11950_v12, 5  ;;  %v13996_v34 = vld [vmem:[#allocation55_spill] sm:$0xff] }
 0x388   : > { %5275 = vst.msk [vmem:[#allocation4 + $0x84] sm:$0xf] %vm1643_vm12, %v5241_v24  ;;  %vm13987_vm12 = vcmask 126016   ;;  %6298 = vrot.lane.b32.xlu1 %v6209_v41, %s9381_s28  ;;  %7275 = vmatmul.mubr.bf16.gmra.mrb[4].mxu1 %v9310_v23  ;;  %v6685_v24 = vrot.slane %v11896_v50, 6  ;;  %v14000_v37 = vld [vmem:[#allocation51_spill] sm:$0xff] }
 0x389   : > { %3934 = vst.msk [vmem:[#allocation4 + $0x30] sm:$0xf] %vm13985_vm3, %v11546_v61  ;;  %v6199_v61 = vsel %vm10014_vm0, %v11926_v36, %v6198_v63  ;;  %v6429_v63 = vrot.slane %v13991_v62, 4  ;;  %vm13997_vm3 = vcmask 388416  }
 0x38a   : > { %4241 = vst.msk [vmem:[#allocation4 + $0x38] sm:$0xf] %vm4233_vm14, %v4197_v30  ;;  %6296 = vrot.lane.b32.xlu0 %v6199_v61, %s9381_s28  ;;  %v2480_v9 = vpop.permute.xlu0 %2479  ;;  %v11983_v23 = vor.u32 %v6685_v24, %v6682_v29  ;;  %v14001_v61 = vld [vmem:[#allocation30_spill] sm:$0xff]  ;;  %v6908_v24 = vrot.slane %v11727_v0, 6 }
 0x38b   : > { %2041 = vst.msk [vmem:[#allocation4 + $0x40] sm:$0xf] %vm13987_vm12, %v1998_v56  ;;  %v11972_v30 = vpop.permute.xlu1 %2181  ;;  %v6678_v56 = vrot.slane %v6676_v48, 4  ;;  %vm14003_vm12 = vmmov %vm13993_vm10 }
 0x38c   : > { %4418 = vst.msk [vmem:[#allocation4 + $0x38] sm:$0xf] %vm4410_vm2, %v13988_v46  ;;  %3128 = vrot.lane.b32.xlu1 %v11711_v20, %s9385_s13  ;;  %v13999_v20 = vld [vmem:[#allocation40_spill] sm:$0xff]  ;;  %v11988_v46 = vrot.slane %v14001_v61, 5 }
 0x38d   : > { %2219 = vst.msk [vmem:[#allocation4 + $0x40] sm:$0xf] %vm13990_vm4, %v13989_v11  ;;  %v6687_v62 = vsel %vm9972_vm15, %v6678_v56, %v11983_v23  ;;  %vm14005_vm4 = vcmask 454016   ;;  %v14006_v56 = vld [vmem:[#allocation25_spill] sm:$0xff] }
 0x38e   : > { %4700 = vst.msk [vmem:[#allocation4 + $0x38] sm:$0xf] %vm4692_vm13, %v11805_v52  ;;  %v6431_v52 = vsel %vm9809_vm7, %v6429_v63, %v6430_v27  ;;  %v4195_v53 = vpop.permute.xlu0 %4194  ;;  %v9366_v27 = vld [vmem:[#allocation3 + $0x30] sm:$0xff] }
 0x38f   : > { %4821 = vst.msk [vmem:[#allocation4 + $0x38] sm:$0xf] %vm13993_vm10, %v13992_v44  ;;  %6472 = vrot.lane.b32.xlu0 %v6431_v52, %s9385_s13  ;;  %v11974_v41 = vcombine.high %v9366_v27, %v9366_v27  ;;  %v11985_v22 = vpop.permute.xlu1 %2663  ;;  %v6677_v27 = vsel %vm9972_vm15, %v14006_v56, %v6676_v48  ;;  %vm14010_vm10 = vcmask 519616  }
 0x390   : > { %2523 = vst.msk [vmem:[#allocation4 + $0x40] sm:$0xf] %vm13994_vm11, %v2480_v9  ;;  %4780 = vrot.lane.b32.xlu1 %v13999_v20, %s13998_s12  ;;  %v14004_v9 = vld [vmem:[#allocation38_spill] sm:$0xff]  ;;  %vm14011_vm11 = vcmask 126016  }
 0x391   : > { %2701 = vst.msk [vmem:[#allocation4 + $0x40] sm:$0xf] %vm13979_vm5, %v13995_v40  ;;  %v3460_v63 = vshll.u32 %v11974_v41, 16  ;;  %v3464_v44 = vshrl.u32 %v11974_v41, 16  ;;  %v4915_v40 = vrot.slane %v11988_v46, 4  ;;  %vm14014_vm5 = vcmask 1044416  }
 0x392   : > { %2881 = vst.msk [vmem:[#allocation4 + $0x40] sm:$0xf] %vm13997_vm3, %v13996_v34  ;;  %v4654_v11 = vpop.permute.xlu0 %4653  ;;  %vm14015_vm3 = vmmov %vm14011_vm11 }
 0x393   : > { %4240 = vst.msk [vmem:[#allocation4 + $0x30] sm:$0xf] %vm4233_vm14, %v4195_v53  ;;  %3126 = vrot.lane.b32.xlu0 %v11846_v14, %s9385_s13  ;;  %v14002_v14 = vld [vmem:[#allocation16_spill] sm:$0xff]  ;;  %v12001_v52 = vpop.permute.xlu1 %6466  ;;  %v3462_v34 = vrot.slane %v3460_v63, 5  ;;  %v3466_v53 = vrot.slane %v3464_v44, 4 }
 0x394   : > { %4417 = vst.msk [vmem:[#allocation4 + $0x30] sm:$0xf] %vm4410_vm2, %v14000_v37  ;;  %6776 = vrot.lane.b32.xlu1 %v6687_v62, %s9378_s25  ;;  %v14007_v37 = vld [vmem:[#allocation23_spill] sm:$0xff]  ;;  %v14008_v62 = vld [vmem:[#allocation42_spill] sm:$0xff] }
 0x395   : > { %4699 = vst.msk [vmem:[#allocation4 + $0x30] sm:$0xf] %vm4692_vm13, %v4654_v11  ;;  %v13652_v11 = vrot.slane %v14007_v37, 5  ;;  %v3467_v3 = vor.u32 %v3466_v53, %v3462_v34 }
 0x396   : > { %4820 = vst.msk [vmem:[#allocation4 + $0x30] sm:$0xf] %vm14003_vm12, %v14002_v14  ;;  %v3123_v29 = vpop.permute.xlu0 %3122  ;;  %v3454_v14 = vshrl.u32 %v14008_v62, 16  ;;  %v1941_v62 = vshrl.u32 %v11265_v45, 16  ;;  %vm14016_vm12 = vcmask 585216  }
 0x397   : > { %4778 = vrot.lane.b32.xlu0 %v14004_v9, %s13998_s12  ;;  %3166 = vst.msk [vmem:[#allocation4 + $0x40] sm:$0xf] %vm14005_vm4, %v3123_v29  ;;  %v12016_v63 = vpop.permute.xlu1 %6944  ;;  %v12022_v44 = vsel %vm9809_vm7, %v4915_v40, %v13652_v11  ;;  %v6910_v29 = vrot.slane %v6908_v24, 4  ;;  %v3468_v45 = vrot.slane %v3467_v3, 4  ;;  %v1939_v11 = vrot.slane %v1937_v16, 5 }
 0x398   : > { %3249 = vrot.lane.b32.xlu1 %v13999_v20, %s9378_s25  ;;  %3287 = vst.msk [vmem:[#allocation4 + $0x40] sm:$0xf] %vm14010_vm10, %v14009_v25  ;;  %v3456_v25 = vrot.slane %v3454_v14, 4  ;;  %v1943_v32 = vrot.slane %v1941_v62, 4  ;;  %v14012_v14 = vld [vmem:[#allocation45_spill] sm:$0xff]  ;;  %vm14017_vm4 = vcmask 650816   ;;  %vm14018_vm10 = vmmov %vm14015_vm3 }
 0x399   : > { %v3473_v16 = vsel %vm10014_vm0, %v3468_v45, %v13968_v43  ;;  %v5623_v45 = vrot.slane %v11838_v49, 7 }
 0x39a   : > { %v12024_v48 = vpop.permute.xlu0 %5998  ;;  %v3457_v58 = vor.u32 %v3456_v25, %v14012_v14  ;;  %v1944_v3 = vor.u32 %v1943_v32, %v1939_v11 }
 0x39b   : > { %6774 = vrot.lane.b32.xlu0 %v6677_v27, %s9378_s25  ;;  %v13655_v27 = vrot.slane %v11875_v51, 6  ;;  %v5399_v13 = vpop.permute.xlu1 %5398 }
 0x39c   : > { %4957 = vrot.lane.b32.xlu1 %v12022_v44, %s9390_s20  ;;  %5442 = vst.msk [vmem:[#allocation4 + $0x3c] sm:$0xf] %vm14011_vm11, %v5399_v13  ;;  %v14013_v13 = vrot.slane %v11440_v2, 6  ;;  %v3458_v62 = vrot.slane %v3457_v58, 4  ;;  %v1945_v14 = vrot.slane %v1944_v3, 4  ;;  %vm14019_vm11 = vmmov %vm14014_vm5 }
 0x39d   : > { %v6912_v53 = vsel %vm9827_vm8, %v6910_v29, %v13655_v27  ;;  %v5620_v27 = vrot.slane %v11841_v33, 6 }
 0x39e   : > { %v12033_v40 = vpop.permute.xlu0 %6464  ;;  %v6907_v42 = vrot.slane %v14013_v13, 4  ;;  %v3679_v13 = vrot.slane %v11974_v41, 5  ;;  %v1950_v33 = vsel %vm10014_vm0, %v1945_v14, %v13968_v43 }
 0x39f   : > { %3247 = vrot.lane.b32.xlu0 %v14004_v9, %s9378_s25  ;;  %v4914_v9 = vsel %vm9809_vm7, %v11667_v26, %v11988_v46  ;;  %v12049_v47 = vpop.permute.xlu1 %5876  ;;  %v5624_v49 = vor.u32 %v5623_v45, %v5620_v27 }
 0x3a0   : > { %6952 = vrot.lane.b32.xlu1 %v6912_v53, %s9387_s15  ;;  %v6909_v26 = vsel %vm9827_vm8, %v6907_v42, %v6908_v24  ;;  %v3463_v42 = vsel %vm10014_vm0, %v3458_v62, %v3462_v34  ;;  %v3681_v24 = vrot.slane %v3679_v13, 4  ;;  %v5630_v34 = vrot.slane %v11950_v12, 6 }
 0x3a1   : > { %v5626_v27 = vrot.slane %v5624_v49, 4 }
 0x3a2   : > { %v12051_v29 = vpop.permute.xlu0 %6942  ;;  %v3683_v43 = vsel %vm9809_vm7, %v3681_v24, %v11988_v46 }
 0x3a3   : > { %4955 = vrot.lane.b32.xlu0 %v4914_v9, %s9390_s20  ;;  %v4954_v25 = vpop.permute.xlu1 %4953 }
 0x3a4   : > { %3546 = vrot.lane.b32.xlu1 %v3473_v16, %s9387_s15  ;;  %4998 = vst.msk [vmem:[#allocation4 + $0x38] sm:$0xf] %vm14014_vm5, %v4954_v25  ;;  %v9367_v25 = vld [vmem:[#allocation3 + $0x30] sm:$0xff]  ;;  %vm14020_vm5 = vcmask 191616  }
 0x3a6   : > { %v5397_v9 = vpop.permute.xlu0 %5396 }
 0x3a7   : > { %6950 = vrot.lane.b32.xlu0 %v6909_v26, %s9387_s15  ;;  %5441 = vst.msk [vmem:[#allocation4 + $0x34] sm:$0xf] %vm14015_vm3, %v5397_v9  ;;  %v3543_v32 = vpop.permute.xlu1 %3542  ;;  %v8191_v9 = vcombine.high %v9367_v25, %v9367_v25  ;;  %vm14021_vm3 = vcmask 716416  }
 0x3a8   : > { %5406 = vrot.lane.b32.xlu1 %v6912_v53, %s9386_s14  ;;  %3585 = vst.msk [vmem:[#allocation4 + $0x48] sm:$0xf] %vm14016_vm12, %v3543_v32  ;;  %v5633_v53 = vrot.slane %v11896_v50, 7 }
 0x3a9   : > { %3760 = vst.msk [vmem:[#allocation4 + $0x48] sm:$0xf] %vm14017_vm4, %v11956_v17  ;;  %v1940_v17 = vsel %vm10014_vm0, %v3458_v62, %v1939_v11  ;;  %v2418_v32 = vshll.u32 %v8191_v9, 16  ;;  %v14022_v11 = vld [vmem:[#allocation22_spill] sm:$0xff] }
 0x3aa   : > { %v12069_v58 = vpop.permute.xlu0 %5874 }
 0x3ab   : > { %3544 = vrot.lane.b32.xlu0 %v3463_v42, %s9387_s15  ;;  %v2004_v16 = vpop.permute.xlu1 %2003  ;;  %v2415_v42 = vshrl.u32 %v8191_v9, 16 }
 0x3ac   : > { %2007 = vrot.lane.b32.xlu1 %v1950_v33, %s9386_s14  ;;  %2044 = vst.msk [vmem:[#allocation4 + $0x58] sm:$0xf] %vm14018_vm10, %v2004_v16  ;;  %v14024_v33 = vld [vmem:[#allocation35_spill] sm:$0xff] }
 0x3ad   : > { %2222 = vst.msk [vmem:[#allocation4 + $0x58] sm:$0xf] %vm14020_vm5, %v11972_v30  ;;  %v14023_v30 = vrot.slane %v14022_v11, 4  ;;  %v13656_v24 = vrot.slane %v14024_v33, 4  ;;  %v14031_v11 = vrot.slane %v11440_v2, 7  ;;  %v2627_v2 = vrot.slane %v11974_v41, 6 }
 0x3ae   : > { %v4952_v3 = vpop.permute.xlu0 %4951 }
 0x3af   : > { %5404 = vrot.lane.b32.xlu0 %v6909_v26, %s9386_s14  ;;  %4997 = vst.msk [vmem:[#allocation4 + $0x30] sm:$0xf] %vm14019_vm11, %v4952_v3  ;;  %v12092_v26 = vor.u32 %v5633_v53, %v5630_v34  ;;  %v3895_v14 = vpop.permute.xlu1 %3894  ;;  %v3680_v62 = vsel %vm9809_vm7, %v14023_v30, %v3679_v13  ;;  %v5842_v53 = vrot.slane %v11727_v0, 7  ;;  %v2417_v3 = vrot.slane %v2415_v42, 5  ;;  %vm14025_vm11 = vmmov %vm14020_vm5 }
 0x3b0   : > { %3721 = vrot.lane.b32.xlu1 %v3683_v43, %s9382_s29  ;;  %3937 = vst.msk [vmem:[#allocation4 + $0x48] sm:$0xf] %vm14021_vm3, %v3895_v14  ;;  %v5625_v13 = vsel %vm10262_vm6, %v13656_v24, %v5624_v49  ;;  %vm14026_vm5 = vmmov %vm14021_vm3  ;;  %v13657_v49 = vrot.slane %v11875_v51, 7  ;;  %vm14028_vm3 = vcmask 257216   ;;  %v5841_v30 = vrot.slane %v14031_v11, 4 }
 0x3b1   : > { %v5635_v46 = vsel %vm10262_vm6, %v5626_v27, %v12092_v26  ;;  %v2420_v27 = vrot.slane %v2418_v32, 6  ;;  %v5844_v0 = vrot.slane %v5842_v53, 4  ;;  %v5936_v32 = vld [vmem:[#allocation3 + $0x48] sm:$0xff]  ;;  %v4339_v11 = vrot.slane %v14001_v61, 7 }
 0x3b2   : > { %v3541_v45 = vpop.permute.xlu0 %3540  ;;  %v14042_v24 = vrot.slane %v11896_v50, 5 }
 0x3b3   : > { %2005 = vrot.lane.b32.xlu0 %v1940_v17, %s9386_s14  ;;  %3584 = vst.msk [vmem:[#allocation4 + $0x40] sm:$0xf] %vm14016_vm12, %v3541_v45  ;;  %v12108_v34 = vpop.permute.xlu1 %4377  ;;  %v2421_v9 = vor.u32 %v2420_v27, %v2417_v3  ;;  %v14027_v17 = vld [vmem:[#allocation46_spill] sm:$0xff]  ;;  %vm14030_vm12 = vcmask 322816   ;;  %v14032_v3 = vld [vmem:[#allocation32_spill] sm:$0xff] }
 0x3b4   : > { %5708 = vrot.lane.b32.xlu1 %v5635_v46, %s9379_s26  ;;  %3759 = vst.msk [vmem:[#allocation4 + $0x40] sm:$0xf] %vm14017_vm4, %v11766_v5  ;;  %v14029_v46 = vld [vmem:[#allocation19_spill] sm:$0xff]  ;;  %vm14033_vm4 = vmmov %vm14018_vm10 }
 0x3b5   : > { %v2423_v45 = vrot.slane %v2421_v9, 4  ;;  %v3857_v42 = vsel %vm9827_vm8, %v11696_v6, %v14029_v46  ;;  %v12149_v6 = vcombine.low %v5936_v32, %v5936_v32 }
 0x3b6   : > { %v2002_v16 = vpop.permute.xlu0 %2001 }
 0x3b7   : > { %3719 = vrot.lane.b32.xlu0 %v3680_v62, %s9382_s29  ;;  %2043 = vst.msk [vmem:[#allocation4 + $0x50] sm:$0xf] %vm14018_vm10, %v2002_v16  ;;  %v2844_v5 = vpop.permute.xlu1 %2843  ;;  %v2432_v27 = vsel %vm9972_vm15, %v2423_v45, %v14032_v3  ;;  %vm14034_vm10 = vcmask 388416   ;;  %v2629_v45 = vrot.slane %v2627_v2, 4 }
 0x3b8   : > { %2185 = vrot.lane.b32.xlu1 %v3683_v43, %s9379_s26  ;;  %2221 = vst.msk [vmem:[#allocation4 + $0x50] sm:$0xf] %vm14025_vm11, %v11786_v31  ;;  %v5846_v31 = vsel %vm9834_vm9, %v5844_v0, %v13657_v49  ;;  %v12158_v0 = vshll.u32 %v12149_v6, 16  ;;  %vm14036_vm11 = vmmov %vm14034_vm10 }
 0x3b9   : > { %v2631_v61 = vsel %vm9827_vm8, %v2629_v45, %v14029_v46 }
 0x3ba   : > { %v3893_v25 = vpop.permute.xlu0 %3892 }
 0x3bb   : > { %5706 = vrot.lane.b32.xlu0 %v5625_v13, %s9379_s26  ;;  %3936 = vst.msk [vmem:[#allocation4 + $0x40] sm:$0xf] %vm14026_vm5, %v3893_v25  ;;  %v12125_v14 = vpop.permute.xlu1 %6470  ;;  %v5843_v13 = vsel %vm9834_vm9, %v5841_v30, %v5842_v53  ;;  %v14035_v53 = vrot.slane %v11086_v8, 4  ;;  %v6218_v30 = vrot.slane %v12158_v0, 5  ;;  %v4434_v8 = vld [vmem:[#allocation3 + $0x38] sm:$0xff]  ;;  %vm14037_vm5 = vcmask 454016  }
 0x3bc   : > { %3898 = vrot.lane.b32.xlu1 %v14027_v17, %s9388_s16 }
 0x3be   : > { %v2484_v43 = vpop.permute.xlu0 %2483 }
 0x3bf   : > { %2183 = vrot.lane.b32.xlu0 %v3680_v62, %s9379_s26  ;;  %2525 = vst.msk [vmem:[#allocation4 + $0x50] sm:$0xf] %vm14028_vm3, %v2484_v43  ;;  %v12142_v62 = vpop.permute.xlu1 %6948  ;;  %v12161_v43 = vshrl.u32 %v12149_v6, 16 }
 0x3c0   : > { %5884 = vrot.lane.b32.xlu1 %v5846_v31, %s13844_s30  ;;  %2703 = vst.msk [vmem:[#allocation4 + $0x50] sm:$0xf] %vm14030_vm12, %v11807_v10  ;;  %v2422_v31 = vsel %vm9972_vm15, %v14035_v53, %v2421_v9  ;;  %v12193_v53 = vcombine.high %v4434_v8, %v4434_v8 }
 0x3c1   : > { %v6222_v3 = vrot.slane %v12161_v43, 4 }
 0x3c2   : > { %v12144_v16 = vpop.permute.xlu0 %4375 }
 0x3c3   : > { %3896 = vrot.lane.b32.xlu0 %v3857_v42, %s9388_s16  ;;  %v5403_v10 = vpop.permute.xlu1 %5402 }
 0x3c4   : > { %2489 = vrot.lane.b32.xlu1 %v2432_v27, %s13844_s30  ;;  %5444 = vst.msk [vmem:[#allocation4 + $0x4c] sm:$0xf] %vm14033_vm4, %v5403_v10  ;;  %v6223_v10 = vor.u32 %v6222_v3, %v6218_v30  ;;  %vm14038_vm4 = vmmov %vm14034_vm10 }
 0x3c6   : > { %v2842_v25 = vpop.permute.xlu0 %2841 }
 0x3c7   : > { %5882 = vrot.lane.b32.xlu0 %v5843_v13, %s13844_s30  ;;  %2883 = vst.msk [vmem:[#allocation4 + $0x50] sm:$0xf] %vm14034_vm10, %v2842_v25  ;;  %v12171_v41 = vpop.permute.xlu1 %5880  ;;  %v4341_v13 = vrot.slane %v4339_v11, 4  ;;  %v12191_v25 = vcombine.low %v4434_v8, %v4434_v8  ;;  %vm14043_vm10 = vcmask 126016  }
 0x3c8   : > { %4204 = vrot.lane.b32.xlu1 %v13975_v18, %s9392_s22  ;;  %v12183_v18 = vcombine.high %v5936_v32, %v5936_v32 }
 0x3c9   : > { %v4580_v45 = vshrl.u32 %v12191_v25, 16 }
 0x3ca   : > { %v6289_v42 = vpop.permute.xlu0 %6288  ;;  %v12204_v46 = vshll.u32 %v12183_v18, 16 }
 0x3cb   : > { %2487 = vrot.lane.b32.xlu0 %v2422_v31, %s13844_s30  ;;  %6335 = vst.msk [vmem:[#allocation4 + $0x24] sm:$0xf] %vm14036_vm11, %v6289_v42  ;;  %v2486_v9 = vpop.permute.xlu1 %2485  ;;  %v4589_v42 = vshrl.u32 %v12193_v53, 16  ;;  %vm14044_vm11 = vmmov %vm14038_vm4 }
 0x3cc   : > { %6004 = vrot.lane.b32.xlu1 %v12149_v6, %s9380_s27  ;;  %6511 = vst.msk [vmem:[#allocation4 + $0x24] sm:$0xf] %vm14037_vm5, %v12033_v40  ;;  %v13658_v40 = vrot.slane %v14007_v37, 7 }
 0x3cd   : > { %2526 = vst.msk [vmem:[#allocation4 + $0x58] sm:$0xf] %vm14028_vm3, %v2486_v9  ;;  %v14041_v9 = vrot.slane %v13999_v20, 7  ;;  %v12233_v20 = vrot.slane %v4589_v42, 7  ;;  %v4583_v42 = vshll.u32 %v12191_v25, 16  ;;  %vm14045_vm3 = vcmask 519616  }
 0x3ce   : > { %v12188_v27 = vpop.permute.xlu0 %6468  ;;  %2704 = vst.msk [vmem:[#allocation4 + $0x58] sm:$0xf] %vm14030_vm12, %v11985_v22  ;;  %v4343_v22 = vsel %vm9834_vm9, %v4341_v13, %v13658_v40  ;;  %v6228_v13 = vrot.slane %v12204_v46, 5  ;;  %vm14046_vm12 = vmmov %vm14045_vm3 }
 0x3cf   : > { %4202 = vrot.lane.b32.xlu0 %v13984_v1, %s9392_s22  ;;  %v6212_v1 = vrot.slane %v11950_v12, 4  ;;  %2884 = vst.msk [vmem:[#allocation4 + $0x58] sm:$0xf] %vm14038_vm4, %v2844_v5  ;;  %v12206_v32 = vpop.permute.xlu1 %4659  ;;  %v6224_v12 = vrot.slane %v6223_v10, 4  ;;  %v14039_v5 = vld [vmem:[#allocation44_spill] sm:$0xff]  ;;  %vm14047_vm4 = vcmask 585216  }
 0x3d0   : > { %2667 = vrot.lane.b32.xlu1 %v2631_v61, %s9380_s27  ;;  %v14040_v3 = vrot.slane %v14039_v5, 4  ;;  %v4338_v61 = vrot.slane %v14041_v9, 4  ;;  %v4582_v5 = vrot.slane %v4580_v45, 7 }
 0x3d1   : > { %v6213_v49 = vor.u32 %v6212_v1, %v14042_v24  ;;  %v4592_v1 = vshll.u32 %v12193_v53, 16 }
 0x3d2   : > { %v12208_v31 = vpop.permute.xlu0 %6946  ;;  %v2628_v8 = vsel %vm9827_vm8, %v14040_v3, %v2627_v2  ;;  %v6229_v2 = vsel %vm10014_vm0, %v6224_v12, %v6228_v13  ;;  %v4340_v50 = vsel %vm9834_vm9, %v4338_v61, %v4339_v11  ;;  %v4587_v12 = vrot.slane %v4582_v5, 4 }
 0x3d3   : > { %6002 = vrot.lane.b32.xlu0 %v11875_v51, %s9380_s27  ;;  %v12227_v10 = vpop.permute.xlu1 %6000  ;;  %v6214_v24 = vrot.slane %v6213_v49, 4  ;;  %v4594_v45 = vor.u32 %v4592_v1, %v12233_v20 }
 0x3d4   : > { %4381 = vrot.lane.b32.xlu1 %v4343_v22, %s13664_s19 }
 0x3d5   : > { %v6219_v11 = vsel %vm10014_vm0, %v6214_v24, %v6218_v30  ;;  %v4595_v61 = vsel %vm9998_vm1, %v4587_v12, %v4594_v45  ;;  %v6439_v30 = vrot.slane %v12183_v18, 5  ;;  %v12287_v45 = vshrl.u32 %v12183_v18, 16 }
 0x3d6   : > { %v5401_v40 = vpop.permute.xlu0 %5400 }
 0x3d7   : > { %2665 = vrot.lane.b32.xlu0 %v2628_v8, %s9380_s27  ;;  %5443 = vst.msk [vmem:[#allocation4 + $0x44] sm:$0xf] %vm14043_vm10, %v5401_v40  ;;  %v6436_v40 = vrot.slane %v12149_v6, 5  ;;  %vm14048_vm10 = vmmov %vm14047_vm4 }
 0x3d8   : > { %6302 = vrot.lane.b32.xlu1 %v6229_v2, %s9381_s28 }
 0x3d9   : > { %v6438_v2 = vrot.slane %v6436_v40, 4 }
 0x3da   : > { %v6291_v3 = vpop.permute.xlu1 %6290  ;;  %v12241_v8 = vpop.permute.xlu0 %5878 }
 0x3db   : > { %4379 = vrot.lane.b32.xlu0 %v4340_v50, %s13664_s19  ;;  %6336 = vst.msk [vmem:[#allocation4 + $0x2c] sm:$0xf] %vm14044_vm11, %v6291_v3  ;;  %vm14050_vm11 = vcmask 191616  }
 0x3dc   : > { %6512 = vst.msk [vmem:[#allocation4 + $0x2c] sm:$0xf] %vm14037_vm5, %v12001_v52  ;;  %2847 = vrot.lane.b32.xlu1 %v4343_v22, %s9381_s28  ;;  %v4585_v52 = vor.u32 %v4583_v42, %v4582_v5  ;;  %v14049_v22 = vrot.slane %v11059_v28, 7  ;;  %v6692_v5 = vrot.slane %v12161_v43, 5  ;;  %vm14051_vm5 = vmmov %vm14050_vm11  ;;  %v14053_v28 = vrot.slane %v11875_v51, 5 }
 0x3de   : > { %v6769_v49 = vpop.permute.xlu1 %6768  ;;  %v6767_v9 = vpop.permute.xlu0 %6766  ;;  %v4578_v24 = vrot.slane %v14049_v22, 4  ;;  %v6435_v12 = vrot.slane %v14053_v28, 4 }
 0x3df   : > { %6300 = vrot.lane.b32.xlu0 %v6219_v11, %s9381_s28  ;;  %6814 = vst.msk [vmem:[#allocation4 + $0x2c] sm:$0xf] %vm14045_vm3, %v6769_v49  ;;  %vm14052_vm3 = vcmask 257216  }
 0x3e0   : > { %6813 = vst.msk [vmem:[#allocation4 + $0x24] sm:$0xf] %vm14046_vm12, %v6767_v9  ;;  %4663 = vrot.lane.b32.xlu1 %v4595_v61, %s9391_s21  ;;  %vm14054_vm12 = vmmov %vm14052_vm3 }
 0x3e1   : > { %6990 = vst.msk [vmem:[#allocation4 + $0x2c] sm:$0xf] %vm14047_vm4, %v12016_v63  ;;  %v6440_v63 = vsel %vm9809_vm7, %v6438_v2, %v6439_v30  ;;  %vm14055_vm4 = vcmask 322816   ;;  %v6702_v2 = vrot.slane %v12287_v45, 5 }
 0x3e2   : > { %6989 = vst.msk [vmem:[#allocation4 + $0x24] sm:$0xf] %vm14048_vm10, %v12051_v29  ;;  %v5701_v1 = vpop.permute.xlu1 %5700  ;;  %v5699_v3 = vpop.permute.xlu0 %5698  ;;  %v6695_v29 = vrot.slane %v12158_v0, 6  ;;  %vm14056_vm10 = vmmov %vm14055_vm4 }
 0x3e3   : > { %2845 = vrot.lane.b32.xlu0 %v4340_v50, %s9381_s28  ;;  %5744 = vst.msk [vmem:[#allocation4 + $0x3c] sm:$0xf] %vm14050_vm11, %v5701_v1  ;;  %v4586_v50 = vsel %vm9998_vm1, %v4578_v24, %v4585_v52  ;;  %vm14057_vm11 = vcmask 388416  }
 0x3e4   : > { %5743 = vst.msk [vmem:[#allocation4 + $0x34] sm:$0xf] %vm14051_vm5, %v5699_v3  ;;  %6478 = vrot.lane.b32.xlu1 %v6440_v63, %s9385_s13  ;;  %v6696_v42 = vor.u32 %v6695_v29, %v6692_v5  ;;  %vm14058_vm5 = vcmask 454016   ;;  %v6914_v3 = vrot.slane %v12149_v6, 6  ;;  %v14069_v29 = vld [vmem:[#allocation47_spill] sm:$0xff] }
 0x3e5   : > { %5920 = vst.msk [vmem:[#allocation4 + $0x3c] sm:$0xf] %vm14052_vm3, %v12049_v47  ;;  %vm14059_vm3 = vcmask 519616  }
 0x3e6   : > { %5919 = vst.msk [vmem:[#allocation4 + $0x34] sm:$0xf] %vm14054_vm12, %v12069_v58  ;;  %v4201_v47 = vpop.permute.xlu1 %4200  ;;  %v4199_v11 = vpop.permute.xlu0 %4198  ;;  %v6437_v58 = vsel %vm9809_vm7, %v6435_v12, %v6436_v40  ;;  %v6705_v40 = vrot.slane %v12204_v46, 6  ;;  %vm14060_vm12 = vmmov %vm14057_vm11 }
 0x3e7   : > { %4661 = vrot.lane.b32.xlu0 %v4586_v50, %s9391_s21  ;;  %6040 = vst.msk [vmem:[#allocation4 + $0x3c] sm:$0xf] %vm14055_vm4, %v11835_v60  ;;  %vm14061_vm4 = vcmask 585216  }
 0x3e8   : > { %6039 = vst.msk [vmem:[#allocation4 + $0x34] sm:$0xf] %vm14056_vm10, %v11823_v19  ;;  %v7007_v49 = vld [vmem:[#allocation4 + $0x28] sm:$0xff]  ;;  %3132 = vrot.lane.b32.xlu1 %v4595_v61, %s9385_s13  ;;  %v6698_v61 = vrot.slane %v6696_v42, 4  ;;  %vm14062_vm10 = vmmov %vm14058_vm5 }
 0x3e9   : > { %4243 = vst.msk [vmem:[#allocation4 + $0x48] sm:$0xf] %vm4233_vm14, %v4201_v47  ;;  %4242 = vst.msk [vmem:[#allocation4 + $0x40] sm:$0xf] %vm4233_vm14, %v4199_v11  ;;  %v7006_v60 = vld [vmem:[#allocation4 + $0x20] sm:$0xff] }
 0x3ea   : > { %4420 = vst.msk [vmem:[#allocation4 + $0x48] sm:$0xf] %vm4410_vm2, %v12108_v34  ;;  %v9315_v9 = vld [vmem:[#allocation4 + $0x24] ss:$8 sps:$4 sm:$0xff]   ;;  %4419 = vst.msk [vmem:[#allocation4 + $0x40] sm:$0xf] %vm4410_vm2, %v12144_v16  ;;  %v8587_v19 = vcombine.low %v7006_v60, %v7007_v49  ;;  %v6295_v52 = vpop.permute.xlu1 %6294  ;;  %v4658_v34 = vpop.permute.xlu0 %4657  ;;  %v12312_v16 = vor.u32 %v6705_v40, %v6702_v2 }
 0x3eb   : > { %6476 = vrot.lane.b32.xlu0 %v6437_v58, %s9385_s13  ;;  %4702 = vst.msk [vmem:[#allocation4 + $0x48] sm:$0xf] %vm4692_vm13, %v12206_v32  ;;  %7282 = vmatprep.mubr.bf16.mxu1 %v9315_v9  ;;  %4701 = vst.msk [vmem:[#allocation4 + $0x40] sm:$0xf] %vm4692_vm13, %v4658_v34  ;;  %v14079_v58 = vrot.slane %v11875_v51, 6  ;;  %v5643_v34 = vrot.slane %v12158_v0, 7 }
 0x3ec   : > { %6338 = vst.msk [vmem:[#allocation4 + $0x3c] sm:$0xf] %vm14057_vm11, %v6295_v52  ;;  %7283 = vmatmul.mubr.bf16.gmra.mrb[8].mxu1 %v8587_v19  ;;  %4784 = vrot.lane.b32.xlu1 %v12193_v53, %s13998_s12  ;;  %v6707_v24 = vsel %vm9972_vm15, %v6698_v61, %v12312_v16  ;;  %vm14063_vm11 = vcmask 191616   ;;  %v5640_v52 = vrot.slane %v12161_v43, 6  ;;  %v5650_v0 = vrot.slane %v12287_v45, 6 }
 0x3ed   : > { %6514 = vst.msk [vmem:[#allocation4 + $0x3c] sm:$0xf] %vm14058_vm5, %v12125_v14  ;;  %v6688_v14 = vrot.slane %v11983_v23, 4  ;;  %vm14064_vm5 = vmmov %vm14059_vm3  ;;  %v6913_v60 = vrot.slane %v14079_v58, 4  ;;  %v5653_v43 = vrot.slane %v12204_v46, 7 }
 0x3ee   : > { %v6773_v32 = vpop.permute.xlu1 %6772  ;;  %v6293_v22 = vpop.permute.xlu0 %6292 }
 0x3ef   : > { %3130 = vrot.lane.b32.xlu0 %v4586_v50, %s9385_s13  ;;  %6816 = vst.msk [vmem:[#allocation4 + $0x3c] sm:$0xf] %vm14059_vm3, %v6773_v32  ;;  %vm14065_vm3 = vcmask 257216   ;;  %v6915_v61 = vsel %vm9827_vm8, %v6913_v60, %v6914_v3 }
 0x3f0   : > { %6337 = vst.msk [vmem:[#allocation4 + $0x34] sm:$0xf] %vm14060_vm12, %v6293_v22  ;;  %6780 = vrot.lane.b32.xlu1 %v6707_v24, %s9378_s25  ;;  %vm14066_vm12 = vmmov %vm14061_vm4  ;;  %v5644_v24 = vor.u32 %v5643_v34, %v5640_v52  ;;  %v14092_v52 = vld [vmem:[#allocation29_spill] sm:$0xff] }
 0x3f1   : > { %6992 = vst.msk [vmem:[#allocation4 + $0x3c] sm:$0xf] %vm14061_vm4, %v12142_v62  ;;  %v6697_v62 = vsel %vm9972_vm15, %v6688_v14, %v6696_v42  ;;  %vm14067_vm4 = vcmask 322816   ;;  %v4146_v34 = vrot.slane %v14092_v52, 6 }
 0x3f2   : > { %6513 = vst.msk [vmem:[#allocation4 + $0x34] sm:$0xf] %vm14062_vm10, %v12188_v27  ;;  %v5705_v1 = vpop.permute.xlu1 %5704  ;;  %v6771_v63 = vpop.permute.xlu0 %6770  ;;  %v6916_v27 = vrot.slane %v6914_v3, 4  ;;  %vm14068_vm10 = vmmov %vm14063_vm11  ;;  %v5646_v3 = vrot.slane %v5644_v24, 4 }
 0x3f3   : > { %4782 = vrot.lane.b32.xlu0 %v12191_v25, %s13998_s12  ;;  %5746 = vst.msk [vmem:[#allocation4 + $0x4c] sm:$0xf] %vm14063_vm11, %v5705_v1  ;;  %vm14070_vm11 = vmmov %vm14065_vm3 }
 0x3f4   : > { %6815 = vst.msk [vmem:[#allocation4 + $0x34] sm:$0xf] %vm14064_vm5, %v6771_v63  ;;  %3253 = vrot.lane.b32.xlu1 %v12193_v53, %s9378_s25  ;;  %vm14071_vm5 = vmmov %vm14067_vm4  ;;  %v14072_v53 = vrot.slane %v14007_v37, 5 }
 0x3f5   : > { %5922 = vst.msk [vmem:[#allocation4 + $0x4c] sm:$0xf] %vm14065_vm3, %v12171_v41  ;;  %v6917_v41 = vrot.slane %v12183_v18, 6  ;;  %vm14073_vm3 = vcmask 388416  }
 0x3f6   : > { %6991 = vst.msk [vmem:[#allocation4 + $0x34] sm:$0xf] %vm14066_vm12, %v12208_v31  ;;  %v6475_v23 = vpop.permute.xlu1 %6474  ;;  %v5703_v5 = vpop.permute.xlu0 %5702  ;;  %v12353_v31 = vrot.slane %v14072_v53, 4  ;;  %vm14075_vm12 = vmmov %vm14073_vm3 }
 0x3f7   : > { %6778 = vrot.lane.b32.xlu0 %v6697_v62, %s9378_s25  ;;  %6042 = vst.msk [vmem:[#allocation4 + $0x4c] sm:$0xf] %vm14067_vm4, %v12227_v10  ;;  %v6918_v28 = vsel %vm9827_vm8, %v6916_v27, %v6917_v41  ;;  %vm14078_vm4 = vcmask 454016   ;;  %v12397_v62 = vor.u32 %v5653_v43, %v5650_v0  ;;  %v5848_v27 = vrot.slane %v12149_v6, 7  ;;  %v14089_v6 = vld [vmem:[#allocation9_spill] sm:$0xff] }
 0x3f8   : > { %5745 = vst.msk [vmem:[#allocation4 + $0x44] sm:$0xf] %vm14068_vm10, %v5703_v5  ;;  %4961 = vrot.lane.b32.xlu1 %v14069_v29, %s9390_s20  ;;  %v7009_v10 = vld [vmem:[#allocation4 + $0x38] sm:$0xff]  ;;  %vm14080_vm10 = vmmov %vm14078_vm4 }
 0x3f9   : > { %5921 = vst.msk [vmem:[#allocation4 + $0x44] sm:$0xf] %vm14070_vm11, %v12241_v8  ;;  %v14074_v8 = vld [vmem:[#allocation8_spill] sm:$0xff]  ;;  %vm14081_vm11 = vmmov %vm14078_vm4  ;;  %v5655_v53 = vsel %vm10262_vm6, %v5646_v3, %v12397_v62 }
 0x3fa   : > { %6041 = vst.msk [vmem:[#allocation4 + $0x44] sm:$0xf] %vm14071_vm5, %v12024_v48  ;;  %v6299_v50 = vpop.permute.xlu1 %6298  ;;  %v3492_v47 = vrot.slane %v14074_v8, 5  ;;  %vm14082_vm5 = vcmask 978816  }
 0x3fb   : > { %3251 = vrot.lane.b32.xlu0 %v12191_v25, %s9378_s25  ;;  %6340 = vst.msk [vmem:[#allocation4 + $0x4c] sm:$0xf] %vm14073_vm3, %v6299_v50  ;;  %v14076_v25 = vld [vmem:[#allocation21_spill] sm:$0xff]  ;;  %vm14083_vm3 = vmmov %vm14078_vm4  ;;  %v14087_v50 = vld [vmem:[#allocation12_spill] sm:$0xff] }
 0x3fc   : > { %v6297_v12 = vpop.permute.xlu0 %6296  ;;  %v14077_v48 = vrot.slane %v14076_v25, 5  ;;  %6516 = vst.msk [vmem:[#allocation4 + $0x4c] sm:$0xf] %vm14078_vm4, %v6475_v23  ;;  %6956 = vrot.lane.b32.xlu1 %v6918_v28, %s9387_s15  ;;  %v3493_v40 = vsel %vm10014_vm0, %v11926_v36, %v3492_v47  ;;  %v3862_v63 = vrot.slane %v14076_v25, 6  ;;  %vm14085_vm4 = vmmov %vm14082_vm5 }
 0x3fd   : > { %6339 = vst.msk [vmem:[#allocation4 + $0x44] sm:$0xf] %vm14075_vm12, %v6297_v12  ;;  %v7008_v49 = vld [vmem:[#allocation4 + $0x30] sm:$0xff]  ;;  %vm14084_vm12 = vcmask 519616   ;;  %v4139_v12 = vrot.slane %v14074_v8, 7 }
 0x3fe   : > { %v4920_v11 = vsel %vm9809_vm7, %v12353_v31, %v14077_v48  ;;  %v9319_v42 = vld [vmem:[#allocation4 + $0x34] ss:$8 sps:$4 sm:$0xff]   ;;  %v8589_v9 = vcombine.low %v7008_v49, %v7009_v10  ;;  %v3129_v19 = vpop.permute.xlu1 %3128  ;;  %v3864_v10 = vrot.slane %v3862_v63, 4  ;;  %v5636_v48 = vrot.slane %v12092_v26, 4 }
 0x3ff   : > { %4959 = vrot.lane.b32.xlu0 %v4920_v11, %s9390_s20  ;;  %7290 = vmatprep.mubr.bf16.mxu1 %v9319_v42  ;;  %3169 = vst.msk [vmem:[#allocation4 + $0x58] sm:$0xf] %vm14080_vm10, %v3129_v19  ;;  %vm14086_vm10 = vmmov %vm14084_vm12  ;;  %v3865_v49 = vrot.slane %v14089_v6, 6 }
 0x400   : > { %7291 = vmatmul.mubr.bf16.gmra.mrb[12].mxu1 %v8589_v9  ;;  %3550 = vrot.lane.b32.xlu1 %v3493_v40, %s9387_s15  ;;  %v5850_v9 = vrot.slane %v5848_v27, 4  ;;  %v5645_v26 = vsel %vm10262_vm6, %v5636_v48, %v5644_v24  ;;  %v13663_v40 = vrot.slane %v12183_v18, 7 }
 0x401   : > { %v6473_v2 = vpop.permute.xlu0 %6472  ;;  %v3866_v60 = vsel %vm9827_vm8, %v3864_v10, %v3865_v49 }
 0x402   : > { %6515 = vst.msk [vmem:[#allocation4 + $0x44] sm:$0xf] %vm14081_vm11, %v6473_v2  ;;  %v4781_v32 = vpop.permute.xlu1 %4780  ;;  %vm14088_vm11 = vmmov %vm14086_vm10  ;;  %v5852_v24 = vsel %vm9834_vm9, %v5850_v9, %v13663_v40 }
 0x403   : > { %6954 = vrot.lane.b32.xlu0 %v6915_v61, %s9387_s15  ;;  %4823 = vst.msk [vmem:[#allocation4 + $0x48] sm:$0xf] %vm14082_vm5, %v4781_v32  ;;  %vm14090_vm5 = vcmask 1044416  }
 0x404   : > { %5410 = vrot.lane.b32.xlu1 %v6918_v28, %s9386_s14  ;;  %v4136_v28 = vrot.slane %v14087_v50, 6 }
 0x405   : > { %v3127_v22 = vpop.permute.xlu0 %3126 }
 0x406   : > { %3168 = vst.msk [vmem:[#allocation4 + $0x50] sm:$0xf] %vm14083_vm3, %v3127_v22  ;;  %v6777_v14 = vpop.permute.xlu1 %6776  ;;  %v4140_v19 = vor.u32 %v4139_v12, %v4136_v28  ;;  %vm14091_vm3 = vmmov %vm14086_vm10  ;;  %v14094_v22 = vrot.slane %v14007_v37, 6 }
 0x407   : > { %3548 = vrot.lane.b32.xlu0 %v13965_v59, %s9387_s15  ;;  %6818 = vst.msk [vmem:[#allocation4 + $0x4c] sm:$0xf] %vm14084_vm12, %v6777_v14  ;;  %vm14095_vm12 = vcmask 585216  }
 0x408   : > { %3725 = vrot.lane.b32.xlu1 %v4920_v11, %s9382_s29  ;;  %v5937_v11 = vld [vmem:[#allocation3 + $0x50] sm:$0xff]  ;;  %v12429_v0 = vrot.slane %v14094_v22, 4 }
 0x409   : > { %v4779_v1 = vpop.permute.xlu0 %4778  ;;  %v12417_v2 = vcombine.low %v5937_v11, %v5937_v11  ;;  %v12464_v9 = vcombine.high %v5937_v11, %v5937_v11 }
 0x40a   : > { %4822 = vst.msk [vmem:[#allocation4 + $0x40] sm:$0xf] %vm14085_vm4, %v4779_v1  ;;  %v3250_v23 = vpop.permute.xlu1 %3249  ;;  %v4142_v1 = vrot.slane %v4140_v19, 4  ;;  %vm14096_vm4 = vmmov %vm14090_vm5 }
 0x40b   : > { %5408 = vrot.lane.b32.xlu0 %v6915_v61, %s9386_s14  ;;  %3290 = vst.msk [vmem:[#allocation4 + $0x58] sm:$0xf] %vm14086_vm10, %v3250_v23  ;;  %v14093_v61 = vld [vmem:[#allocation15_spill] sm:$0xff]  ;;  %v12437_v3 = vshll.u32 %v12417_v2, 16  ;;  %v12440_v23 = vshrl.u32 %v12417_v2, 16  ;;  %vm14098_vm10 = vmmov %vm14095_vm12  ;;  %v12477_v11 = vshll.u32 %v12464_v9, 16 }
 0x40c   : > { %5712 = vrot.lane.b32.xlu1 %v5655_v53, %s9379_s26  ;;  %v4149_v32 = vrot.slane %v14093_v61, 7  ;;  %v14097_v53 = vrot.slane %v11875_v51, 7 }
 0x40d   : > { %v6775_v5 = vpop.permute.xlu0 %6774 }
 0x40e   : > { %6817 = vst.msk [vmem:[#allocation4 + $0x44] sm:$0xf] %vm14088_vm11, %v6775_v5  ;;  %v4958_v42 = vpop.permute.xlu1 %4957  ;;  %v3863_v5 = vsel %vm9827_vm8, %v12429_v0, %v3862_v63  ;;  %v5847_v10 = vrot.slane %v14097_v53, 4  ;;  %v12450_v28 = vor.u32 %v4149_v32, %v4146_v34  ;;  %v6238_v63 = vrot.slane %v12437_v3, 5  ;;  %vm14099_vm11 = vmmov %vm14098_vm10 }
 0x40f   : > { %3723 = vrot.lane.b32.xlu0 %v12022_v44, %s9382_s29  ;;  %5000 = vst.msk [vmem:[#allocation4 + $0x48] sm:$0xf] %vm14090_vm5, %v4958_v42  ;;  %vm14100_vm5 = vcmask 126016  }
 0x410   : > { %3902 = vrot.lane.b32.xlu1 %v3866_v60, %s9388_s16  ;;  %v4151_v42 = vsel %vm10262_vm6, %v4142_v1, %v12450_v28  ;;  %v6242_v60 = vrot.slane %v12440_v23, 4  ;;  %v5849_v51 = vsel %vm9834_vm9, %v5847_v10, %v5848_v27  ;;  %v13662_v27 = vrot.slane %v14089_v6, 7 }
 0x411   : > { %v3248_v58 = vpop.permute.xlu0 %3247  ;;  %v6232_v1 = vrot.slane %v12287_v45, 4  ;;  %v13661_v45 = vrot.slane %v12477_v11, 5 }
 0x412   : > { %3289 = vst.msk [vmem:[#allocation4 + $0x50] sm:$0xf] %vm14091_vm3, %v3248_v58  ;;  %v6953_v43 = vpop.permute.xlu1 %6952  ;;  %v4345_v58 = vrot.slane %v14076_v25, 7  ;;  %v6243_v22 = vor.u32 %v6242_v60, %v6238_v63  ;;  %vm14101_vm3 = vmmov %vm14098_vm10 }
 0x413   : > { %5710 = vrot.lane.b32.xlu0 %v5645_v26, %s9379_s26  ;;  %6994 = vst.msk [vmem:[#allocation4 + $0x4c] sm:$0xf] %vm14095_vm12, %v6953_v43  ;;  %v14102_v43 = vrot.slane %v14024_v33, 4  ;;  %v13660_v33 = vrot.slane %v14092_v52, 7  ;;  %vm14103_vm12 = vmmov %vm14100_vm5 }
 0x414   : > { %5888 = vrot.lane.b32.xlu1 %v5852_v24, %s13844_s30  ;;  %v4347_v32 = vrot.slane %v4345_v58, 4 }
 0x415   : > { %v4956_v14 = vpop.permute.xlu0 %4955 }
 0x416   : > { %4999 = vst.msk [vmem:[#allocation4 + $0x40] sm:$0xf] %vm14096_vm4, %v4956_v14  ;;  %v3547_v12 = vpop.permute.xlu1 %3546  ;;  %v4141_v14 = vsel %vm10262_vm6, %v14102_v43, %v4140_v19  ;;  %vm14104_vm4 = vmmov %vm14100_vm5 }
 0x417   : > { %3900 = vrot.lane.b32.xlu0 %v3863_v5, %s9388_s16  ;;  %3587 = vst.msk [vmem:[#allocation4 + $0x58] sm:$0xf] %vm14098_vm10, %v3547_v12  ;;  %v4600_v5 = vrot.slane %v14087_v50, 7  ;;  %v12487_v12 = vsel %vm9834_vm9, %v4347_v32, %v13662_v27  ;;  %v6442_v32 = vrot.slane %v12417_v2, 5  ;;  %vm14106_vm10 = vcmask 650816  }
 0x418   : > { %4208 = vrot.lane.b32.xlu1 %v4151_v42, %s9392_s22  ;;  %v14105_v42 = vrot.slane %v14007_v37, 7  ;;  %v4612_v37 = vor.u32 %v14093_v61, %v13660_v33  ;;  %v14120_v27 = vrot.slane %v14089_v6, 5 }
 0x419   : > { %v6951_v48 = vpop.permute.xlu0 %6950 }
 0x41a   : > { %6993 = vst.msk [vmem:[#allocation4 + $0x44] sm:$0xf] %vm14099_vm11, %v6951_v48  ;;  %v5407_v26 = vpop.permute.xlu1 %5406  ;;  %v6244_v48 = vrot.slane %v6243_v22, 4  ;;  %v4344_v60 = vrot.slane %v14105_v42, 4  ;;  %vm14107_vm11 = vmmov %vm14104_vm4  ;;  %v13659_v42 = vrot.slane %v12464_v9, 5 }
 0x41b   : > { %5886 = vrot.lane.b32.xlu0 %v5849_v51, %s13844_s30  ;;  %5446 = vst.msk [vmem:[#allocation4 + $0x5c] sm:$0xf] %vm14100_vm5, %v5407_v26  ;;  %v6233_v26 = vor.u32 %v6232_v1, %v6228_v13  ;;  %vm14108_vm5 = vcmask 191616  }
 0x41c   : > { %6008 = vrot.lane.b32.xlu1 %v12417_v2, %s9380_s27  ;;  %v6249_v43 = vsel %vm10014_vm0, %v6244_v48, %v13661_v45  ;;  %v12511_v46 = vsel %vm9834_vm9, %v4344_v60, %v4345_v58  ;;  %v6715_v58 = vrot.slane %v12437_v3, 6  ;;  %v4603_v48 = vor.u32 %v14074_v8, %v4600_v5 }
 0x41d   : > { %v3545_v34 = vpop.permute.xlu0 %3544  ;;  %v9324_v19 = vld [vmem:[#allocation4 + $0x40] ss:$8 sps:$4 sm:$0xff]   ;;  %v6234_v13 = vrot.slane %v6233_v26, 4  ;;  %v12532_v60 = vshrl.u32 %v12464_v9, 16 }
 0x41e   : > { %3586 = vst.msk [vmem:[#allocation4 + $0x50] sm:$0xf] %vm14101_vm3, %v3545_v34  ;;  %v2008_v24 = vpop.permute.xlu1 %2007  ;;  %v4605_v34 = vrot.slane %v4600_v5, 4  ;;  %vm14109_vm3 = vmmov %vm14106_vm10 }
 0x41f   : > { %4206 = vrot.lane.b32.xlu0 %v4141_v14, %s9392_s22  ;;  %2046 = vst.msk [vmem:[#allocation4 + $0x68] sm:$0xf] %vm14103_vm12, %v2008_v24  ;;  %vm14110_vm12 = vmmov %vm14108_vm5 }
 0x420   : > { %4385 = vrot.lane.b32.xlu1 %v12487_v12, %s13664_s19  ;;  %v12519_v1 = vsel %vm9998_vm1, %v4605_v34, %v4612_v37  ;;  %v6441_v37 = vrot.slane %v6439_v30, 4 }
 0x421   : > { %v5405_v53 = vpop.permute.xlu0 %5404  ;;  %v9322_v10 = vld [vmem:[#allocation4 + $0x44] ss:$8 sps:$4 sm:$0xff]  }
 0x422   : > { %5445 = vst.msk [vmem:[#allocation4 + $0x54] sm:$0xf] %vm14104_vm4, %v5405_v53  ;;  %7298 = vmatprep.mubr.bf16.mxu1 %v9322_v10  ;;  %v3722_v51 = vpop.permute.xlu1 %3721  ;;  %v6444_v53 = vrot.slane %v6442_v32, 4  ;;  %v6712_v10 = vrot.slane %v12440_v23, 5  ;;  %vm14111_vm4 = vmmov %vm14108_vm5 }
 0x423   : > { %6006 = vrot.lane.b32.xlu0 %v12183_v18, %s9380_s27  ;;  %7299 = vmatmul.mubr.bf16.gmra.mrb[16].mxu1 %v9324_v19  ;;  %3762 = vst.msk [vmem:[#allocation4 + $0x58] sm:$0xf] %vm14106_vm10, %v3722_v51  ;;  %v6239_v19 = vsel %vm10014_vm0, %v6234_v13, %v6238_v63  ;;  %v4596_v51 = vrot.slane %v12233_v20, 4  ;;  %v6722_v20 = vrot.slane %v12532_v60, 5  ;;  %vm14112_vm10 = vcmask 716416  }
 0x424   : > { %6306 = vrot.lane.b32.xlu1 %v6249_v43, %s9381_s28  ;;  %v6446_v63 = vsel %vm9809_vm7, %v6444_v53, %v13659_v42  ;;  %v6716_v5 = vor.u32 %v6715_v58, %v6712_v10  ;;  %v6725_v43 = vrot.slane %v12477_v11, 6  ;;  %v14113_v53 = vld [vmem:[#allocation50_spill] sm:$0xff]  ;;  %v6443_v58 = vsel %vm9809_vm7, %v6441_v37, %v6442_v32 }
 0x425   : > { %v2006_v22 = vpop.permute.xlu0 %2005  ;;  %v4925_v10 = vrot.slane %v14113_v53, 5  ;;  %v6708_v37 = vrot.slane %v12312_v16, 4 }
 0x426   : > { %2045 = vst.msk [vmem:[#allocation4 + $0x60] sm:$0xf] %vm14107_vm11, %v2006_v22  ;;  %v5709_v14 = vpop.permute.xlu1 %5708  ;;  %v12543_v22 = vsel %vm9998_vm1, %v4596_v51, %v4603_v48  ;;  %vm14114_vm11 = vmmov %vm14111_vm4  ;;  %v12562_v30 = vor.u32 %v6725_v43, %v6722_v20  ;;  %v6920_v51 = vrot.slane %v12417_v2, 6  ;;  %v12575_v20 = vld [vmem:[#allocation3 + $0x40] sm:$0x3f] }
 0x427   : > { %4383 = vrot.lane.b32.xlu0 %v12511_v46, %s13664_s19  ;;  %5748 = vst.msk [vmem:[#allocation4 + $0x5c] sm:$0xf] %vm14108_vm5, %v5709_v14  ;;  %vm14115_vm5 = vcmask 257216   ;;  %v4927_v32 = vrot.slane %v4925_v10, 4  ;;  %v8194_v45 = vcombine.low %v12575_v20, %v12575_v20  ;;  %v6717_v16 = vsel %vm9972_vm15, %v6708_v37, %v6716_v5 }
 0x428   : > { %4667 = vrot.lane.b32.xlu1 %v12519_v1, %s9391_s21 }
 0x429   : > { %v3720_v24 = vpop.permute.xlu0 %3719 }
 0x42a   : > { %3761 = vst.msk [vmem:[#allocation4 + $0x50] sm:$0xf] %vm14109_vm3, %v3720_v24  ;;  %v2186_v26 = vpop.permute.xlu1 %2185  ;;  %v6718_v24 = vrot.slane %v6716_v5, 4  ;;  %vm14116_vm3 = vmmov %vm14112_vm10 }
 0x42b   : > { %6304 = vrot.lane.b32.xlu0 %v6239_v19, %s9381_s28  ;;  %2224 = vst.msk [vmem:[#allocation4 + $0x68] sm:$0xf] %vm14110_vm12, %v2186_v26  ;;  %v12559_v19 = vld [vmem:[#allocation3 + $0x40] sm:$0x1f]  ;;  %vm14117_vm12 = vmmov %vm14115_vm5 }
 0x42c   : > { %6482 = vrot.lane.b32.xlu1 %v6446_v63, %s9385_s13  ;;  %v12571_v63 = vcombine.low %v12559_v19, %v12559_v19 }
 0x42d   : > { %v5707_v34 = vpop.permute.xlu0 %5706 }
 0x42e   : > { %5747 = vst.msk [vmem:[#allocation4 + $0x54] sm:$0xf] %vm14111_vm4, %v5707_v34  ;;  %v3899_v13 = vpop.permute.xlu1 %3898  ;;  %v6727_v34 = vsel %vm9972_vm15, %v6718_v24, %v12562_v30  ;;  %v6922_v24 = vrot.slane %v6920_v51, 4  ;;  %v1967_v33 = vshll.u32 %v12571_v63, 16  ;;  %vm14119_vm4 = vmmov %vm14115_vm5 }
 0x42f   : > { %4665 = vrot.lane.b32.xlu0 %v12543_v22, %s9391_s21  ;;  %3939 = vst.msk [vmem:[#allocation4 + $0x58] sm:$0xf] %vm14112_vm10, %v3899_v13  ;;  %vm14121_vm10 = vmmov %vm14119_vm4 }
 0x430   : > { %4788 = vrot.lane.b32.xlu1 %v14089_v6, %s13998_s12  ;;  %v8697_v43 = vpop.f32.mrb[0].mxu1  ;;  %v12607_v37 = vrot.slane %v1967_v33, 5 }
 0x431   : > { %v2184_v14 = vpop.permute.xlu0 %2183 }
 0x432   : > { %2223 = vst.msk [vmem:[#allocation4 + $0x60] sm:$0xf] %vm14114_vm11, %v2184_v14  ;;  %v5885_v48 = vpop.permute.xlu1 %5884  ;;  %v8698_v14 = vpop.f32.mrb[1].mxu1  ;;  %vm14122_vm11 = vcmask 322816  }
 0x433   : > { %6480 = vrot.lane.b32.xlu0 %v6443_v58, %s9385_s13  ;;  %5924 = vst.msk [vmem:[#allocation4 + $0x5c] sm:$0xf] %vm14115_vm5, %v5885_v48  ;;  %v8699_v48 = vadd.f32 %v8698_v14, %v8697_v43  ;;  %v8700_v42 = vpop.f32.mrb[2].mxu1  ;;  %v6923_v14 = vrot.slane %v12464_v9, 6  ;;  %vm14123_vm5 = vmmov %vm14122_vm11 }
 0x434   : > { %6784 = vrot.lane.b32.xlu1 %v6727_v34, %s9378_s25  ;;  %v8701_v43 = vpop.f32.mrb[3].mxu1 }
 0x435   : > { %v3897_v26 = vpop.permute.xlu0 %3896  ;;  %7338 = vst [vmem:[#allocation5] sm:$0xff] %v8699_v48  ;;  %v12604_v5 = vsel %vm9827_vm8, %v6922_v24, %v6923_v14 }
 0x436   : > { %3938 = vst.msk [vmem:[#allocation4 + $0x50] sm:$0xf] %vm14116_vm3, %v3897_v26  ;;  %v2490_v13 = vpop.permute.xlu1 %2489  ;;  %v14118_v26 = vrot.slane %v11578_v4, 5  ;;  %vm14124_vm3 = vmmov %vm14123_vm5 }
 0x437   : > { %4786 = vrot.lane.b32.xlu0 %v14076_v25, %s13998_s12  ;;  %2528 = vst.msk [vmem:[#allocation4 + $0x68] sm:$0xf] %vm14117_vm12, %v2490_v13  ;;  %v12593_v13 = vrot.slane %v14120_v27, 4  ;;  %vm14125_vm12 = vmmov %vm14124_vm3 }
 0x438   : > { %v4929_v34 = vsel %vm9809_vm7, %v4927_v32, %v14118_v26  ;;  %v12597_v32 = vld [vmem:[#allocation3 + $0x40] sm:$0x1f]  ;;  %v8702_v26 = vadd.f32 %v8701_v43, %v8700_v42 }
 0x439   : > { %v5883_v58 = vpop.permute.xlu0 %5882  ;;  %4965 = vrot.lane.b32.xlu1 %v4929_v34, %s9390_s20  ;;  %v2445_v34 = vshrl.u32 %v8194_v45, 16  ;;  %v4926_v42 = vsel %vm9809_vm7, %v12593_v13, %v4925_v10 }
 0x43a   : > { %5923 = vst.msk [vmem:[#allocation4 + $0x54] sm:$0xf] %vm14119_vm4, %v5883_v58  ;;  %v4205_v40 = vpop.permute.xlu1 %4204  ;;  %7339 = vst [vmem:[#allocation5 + $0x8] sm:$0xff] %v8702_v26  ;;  %v8175_v58 = vcombine.low %v12597_v32, %v12597_v32  ;;  %v12627_v26 = vld [vmem:[#allocation3 + $0x40] sm:$0x3f]  ;;  %vm14126_vm4 = vcmask 388416  }
 0x43b   : > { %6782 = vrot.lane.b32.xlu0 %v6717_v16, %s9378_s25  ;;  %4245 = vst.msk [vmem:[#allocation4 + $0x58] sm:$0xf] %vm4233_vm14, %v4205_v40  ;;  %v2448_v16 = vshll.u32 %v8194_v45, 16  ;;  %v6919_v40 = vrot.slane %v6917_v41, 4  ;;  %v1970_v45 = vsel %vm10014_vm0, %v11926_v36, %v12607_v37  ;;  %v2447_v10 = vrot.slane %v2445_v34, 5 }
 0x43c   : > { %v12625_v48 = vrot.slane %v8175_v58, 5  ;;  %v8212_v36 = vcombine.low %v12627_v26, %v12627_v26 }
 0x43d   : > { %v2488_v27 = vpop.permute.xlu0 %2487  ;;  %6960 = vrot.lane.b32.xlu1 %v12604_v5, %s9387_s15  ;;  %v2450_v43 = vrot.slane %v2448_v16, 6  ;;  %v12632_v41 = vsel %vm9827_vm8, %v6919_v40, %v6920_v51 }
 0x43e   : > { %2527 = vst.msk [vmem:[#allocation4 + $0x60] sm:$0xf] %vm14121_vm10, %v2488_v27  ;;  %v6005_v33 = vpop.permute.xlu1 %6004  ;;  %v2155_v34 = vsel %vm9809_vm7, %v12353_v31, %v12625_v48  ;;  %vm14127_vm10 = vmmov %vm14126_vm4 }
 0x43f   : > { %4963 = vrot.lane.b32.xlu0 %v4926_v42, %s9390_s20  ;;  %6044 = vst.msk [vmem:[#allocation4 + $0x5c] sm:$0xf] %vm14122_vm11, %v6005_v33  ;;  %v12644_v16 = vor.u32 %v2450_v43, %v2447_v10  ;;  %v12650_v42 = vrot.slane %v8212_v36, 6  ;;  %v3506_v10 = vrot.slane %v14092_v52, 4  ;;  %vm14128_vm11 = vmmov %vm14126_vm4 }
 0x441   : > { %v4203_v24 = vpop.permute.xlu0 %4202  ;;  %2011 = vrot.lane.b32.xlu1 %v1970_v45, %s9386_s14  ;;  %v2452_v31 = vsel %vm9972_vm15, %v14006_v56, %v12644_v16 }
 0x442   : > { %4244 = vst.msk [vmem:[#allocation4 + $0x50] sm:$0xf] %vm4233_vm14, %v4203_v24  ;;  %v2668_v27 = vpop.permute.xlu1 %2667 }
 0x443   : > { %6958 = vrot.lane.b32.xlu0 %v12632_v41, %s9387_s15  ;;  %2706 = vst.msk [vmem:[#allocation4 + $0x68] sm:$0xf] %vm14123_vm5, %v2668_v27  ;;  %vm14129_vm5 = vmmov %vm14126_vm4 }
 0x445   : > { %v6003_v58 = vpop.permute.xlu0 %6002  ;;  %2189 = vrot.lane.b32.xlu1 %v2155_v34, %s9379_s26 }
 0x446   : > { %6043 = vst.msk [vmem:[#allocation4 + $0x54] sm:$0xf] %vm14124_vm3, %v6003_v58  ;;  %v4382_v51 = vpop.permute.xlu1 %4381  ;;  %vm14130_vm3 = vcmask 454016  }
 0x447   : > { %2009 = vrot.lane.b32.xlu0 %v13965_v59, %s9386_s14  ;;  %4422 = vst.msk [vmem:[#allocation4 + $0x58] sm:$0xf] %vm4410_vm2, %v4382_v51  ;;  %v2637_v59 = vsel %vm9827_vm8, %v12429_v0, %v12650_v42 }
 0x449   : > { %v2666_v40 = vpop.permute.xlu0 %2665  ;;  %2493 = vrot.lane.b32.xlu1 %v2452_v31, %s13844_s30 }
 0x44a   : > { %2705 = vst.msk [vmem:[#allocation4 + $0x60] sm:$0xf] %vm14125_vm12, %v2666_v40  ;;  %v6303_v33 = vpop.permute.xlu1 %6302  ;;  %vm14131_vm12 = vmmov %vm14130_vm3 }
 0x44b   : > { %2187 = vrot.lane.b32.xlu0 %v12022_v44, %s9379_s26  ;;  %6342 = vst.msk [vmem:[#allocation4 + $0x5c] sm:$0xf] %vm14126_vm4, %v6303_v33  ;;  %v3502_v44 = vrot.slane %v14093_v61, 5  ;;  %v3496_v61 = vrot.slane %v14087_v50, 4  ;;  %vm14132_vm4 = vmmov %vm14130_vm3  ;;  %v5660_v33 = vrot.slane %v12440_v23, 6 }
 0x44d   : > { %v4380_v24 = vpop.permute.xlu0 %4379  ;;  %2671 = vrot.lane.b32.xlu1 %v2637_v59, %s9380_s27  ;;  %v3497_v36 = vor.u32 %v3496_v61, %v3492_v47  ;;  %v5663_v59 = vrot.slane %v12437_v3, 7  ;;  %v2156_v61 = vrot.slane %v12625_v48, 4 }
 0x44e   : > { %4421 = vst.msk [vmem:[#allocation4 + $0x50] sm:$0xf] %vm4410_vm2, %v4380_v24  ;;  %v2848_v56 = vpop.permute.xlu1 %2847 }
 0x44f   : > { %2491 = vrot.lane.b32.xlu0 %v13970_v54, %s13844_s30  ;;  %2886 = vst.msk [vmem:[#allocation4 + $0x68] sm:$0xf] %vm14127_vm10, %v2848_v56  ;;  %v3507_v54 = vor.u32 %v3506_v10, %v3502_v44  ;;  %v3498_v34 = vrot.slane %v3497_v36, 4  ;;  %vm14133_vm10 = vcmask 978816   ;;  %v12713_v56 = vld [vmem:[#allocation3 + $0x48] sm:$0x1f] }
 0x451   : > { %v6301_v45 = vpop.permute.xlu0 %6300  ;;  %2851 = vrot.lane.b32.xlu1 %v12487_v12, %s9381_s28 }
 0x452   : > { %6341 = vst.msk [vmem:[#allocation4 + $0x54] sm:$0xf] %vm14128_vm11, %v6301_v45  ;;  %v4664_v0 = vpop.permute.xlu1 %4663  ;;  %vm14134_vm11 = vmmov %vm14130_vm3 }
 0x453   : > { %2669 = vrot.lane.b32.xlu0 %v14027_v17, %s9380_s27  ;;  %4704 = vst.msk [vmem:[#allocation4 + $0x58] sm:$0xf] %vm4692_vm13, %v4664_v0  ;;  %v3508_v17 = vrot.slane %v3507_v54, 4  ;;  %v5664_v0 = vor.u32 %v5663_v59, %v5660_v33 }
 0x455   : > { %v2846_v43 = vpop.permute.xlu0 %2845  ;;  %3136 = vrot.lane.b32.xlu1 %v12519_v1, %s9385_s13  ;;  %v1971_v1 = vshrl.u32 %v12571_v63, 16  ;;  %v3513_v58 = vsel %vm10014_vm0, %v3508_v17, %v11783_v21  ;;  %v7364_v17 = vld [vmem:[#allocation5 + $0x1] ss:$2 sm:$0x1f]  ;;  %v5666_v59 = vrot.slane %v5664_v0, 4 }
 0x456   : > { %2885 = vst.msk [vmem:[#allocation4 + $0x60] sm:$0xf] %vm14129_vm5, %v2846_v43  ;;  %v6479_v27 = vpop.permute.xlu1 %6478  ;;  %vm14135_vm5 = vcmask 519616   ;;  %v5656_v43 = vrot.slane %v12397_v62, 4 }
 0x457   : > { %2849 = vrot.lane.b32.xlu0 %v12511_v46, %s9381_s28  ;;  %6518 = vst.msk [vmem:[#allocation4 + $0x5c] sm:$0xf] %vm14130_vm3, %v6479_v27  ;;  %v1973_v8 = vrot.slane %v1971_v1, 4  ;;  %vm14136_vm3 = vmmov %vm14133_vm10  ;;  %v3868_v27 = vrot.slane %v14113_v53, 6 }
 0x459   : > { %v4662_v12 = vpop.permute.xlu0 %4661  ;;  %3257 = vrot.lane.b32.xlu1 %v14089_v6, %s9378_s25  ;;  %v1974_v24 = vor.u32 %v1973_v8, %v12607_v37 }
 0x45a   : > { %4703 = vst.msk [vmem:[#allocation4 + $0x50] sm:$0xf] %vm4692_vm13, %v4662_v12  ;;  %v3133_v50 = vpop.permute.xlu1 %3132  ;;  %v7362_v12 = vld [vmem:[#allocation5] ss:$2 sm:$0x1f] }
 0x45b   : > { %3134 = vrot.lane.b32.xlu0 %v12543_v22, %s9385_s13  ;;  %3171 = vst.msk [vmem:[#allocation4 + $0x68] sm:$0xf] %vm14131_vm12, %v3133_v50  ;;  %v8703_v47 = vpop.f32.mrb[4].mxu1  ;;  %v8158_v22 = vcombine.high %v12559_v19, %v12559_v19  ;;  %v1975_v37 = vrot.slane %v1974_v24, 4  ;;  %vm14137_vm12 = vmmov %vm14135_vm5 }
 0x45c   : > { %v8704_v51 = vpop.f32.mrb[5].mxu1 }
 0x45d   : > { %v6477_v46 = vpop.permute.xlu0 %6476  ;;  %3554 = vrot.lane.b32.xlu1 %v3513_v58, %s9387_s15  ;;  %v8705_v31 = vadd.f32 %v8704_v51, %v8703_v47  ;;  %v8706_v21 = vpop.f32.mrb[6].mxu1  ;;  %v1977_v23 = vshll.u32 %v8158_v22, 16  ;;  %v5670_v47 = vrot.slane %v12532_v60, 6  ;;  %v5673_v22 = vrot.slane %v12477_v11, 7  ;;  %v12748_v51 = vld [vmem:[%s13492_s4] ss:$0 sm:$0xff] }
 0x45e   : > { %6517 = vst.msk [vmem:[#allocation4 + $0x54] sm:$0xf] %vm14132_vm4, %v6477_v46  ;;  %v4785_v63 = vpop.permute.xlu1 %4784  ;;  %v8707_v19 = vpop.f32.mrb[7].mxu1  ;;  %vm14138_vm4 = vmmov %vm14135_vm5 }
 0x45f   : > { %3255 = vrot.lane.b32.xlu0 %v14076_v25, %s9378_s25  ;;  %4825 = vst.msk [vmem:[#allocation4 + $0x58] sm:$0xf] %vm14133_vm10, %v4785_v63  ;;  %v3503_v25 = vsel %vm10014_vm0, %v3498_v34, %v3502_v44  ;;  %7340 = vst [vmem:[#allocation5 + $0x10] sm:$0xff] %v8705_v31  ;;  %v8708_v45 = vadd.f32 %v8707_v19, %v8706_v21  ;;  %v8304_v44 = vcombine.low %v12713_v56, %v12713_v56  ;;  %vm14139_vm10 = vcmask 1044416  }
 0x460   : > { %v1979_v54 = vrot.slane %v1977_v23, 5  ;;  %v3870_v63 = vrot.slane %v3868_v27, 4  ;;  %v5854_v21 = vrot.slane %v12417_v2, 7  ;;  %v12761_v24 = vor.u32 %v5673_v22, %v5670_v47 }
 0x461   : > { %v3131_v40 = vpop.permute.xlu0 %3130  ;;  %5414 = vrot.lane.b32.xlu1 %v12604_v5, %s9386_s14  ;;  %7341 = vst [vmem:[#allocation5 + $0x18] sm:$0xff] %v8708_v45  ;;  %v8176_v5 = vcombine.high %v12597_v32, %v12597_v32  ;;  %v12732_v1 = vrot.slane %v8304_v44, 5  ;;  %v14143_v44 = vld [vmem:[#allocation52_spill] sm:$0xff] }
 0x462   : > { %3170 = vst.msk [vmem:[#allocation4 + $0x60] sm:$0xf] %vm14134_vm11, %v3131_v40  ;;  %v6781_v10 = vpop.permute.xlu1 %6780  ;;  %v1980_v48 = vsel %vm10014_vm0, %v1975_v37, %v1979_v54  ;;  %vm14140_vm11 = vmmov %vm14138_vm4  ;;  %v5938_v37 = vld [vmem:[#allocation3 + $0x58] sm:$0xff]  ;;  %v5675_v54 = vsel %vm10262_vm6, %v5666_v59, %v12761_v24 }
 0x463   : > { %3552 = vrot.lane.b32.xlu0 %v3503_v25, %s9387_s15  ;;  %6820 = vst.msk [vmem:[#allocation4 + $0x5c] sm:$0xf] %vm14135_vm5, %v6781_v10  ;;  %v2157_v62 = vrot.slane %v8176_v5, 5  ;;  %v3695_v33 = vsel %vm9809_vm7, %v12593_v13, %v12732_v1  ;;  %v3871_v25 = vrot.slane %v11578_v4, 6  ;;  %v8195_v13 = vcombine.high %v12575_v20, %v12575_v20 }
 0x464   : > { %vm14141_vm5 = vcmask 585216   ;;  %v5856_v10 = vrot.slane %v5854_v21, 4  ;;  %v4159_v5 = vrot.slane %v14143_v44, 7  ;;  %v3867_v20 = vrot.slane %v3865_v49, 4 }
 0x465   : > { %v4783_v3 = vpop.permute.xlu0 %4782  ;;  %3727 = vrot.lane.b32.xlu1 %v14069_v29, %s9382_s29  ;;  %v5665_v29 = vsel %vm10262_vm6, %v5656_v43, %v5664_v0  ;;  %v2158_v8 = vsel %vm9809_vm7, %v2156_v61, %v2157_v62  ;;  %v3872_v2 = vsel %vm9827_vm8, %v3870_v63, %v3871_v25  ;;  %v5857_v61 = vrot.slane %v12464_v9, 7 }
 0x466   : > { %4824 = vst.msk [vmem:[#allocation4 + $0x50] sm:$0xf] %vm14136_vm3, %v4783_v3  ;;  %v3254_v36 = vpop.permute.xlu1 %3253  ;;  %v7366_v50 = vld [vmem:[#allocation5 + $0xe] ss:$2 sm:$0x1f]  ;;  %vm14144_vm3 = vmmov %vm14139_vm10  ;;  %v4152_v49 = vrot.slane %v12450_v28, 4 }
 0x467   : > { %5412 = vrot.lane.b32.xlu0 %v12632_v41, %s9386_s14  ;;  %3292 = vst.msk [vmem:[#allocation4 + $0x68] sm:$0xf] %vm14137_vm12, %v3254_v36  ;;  %v7368_v46 = vld [vmem:[#allocation5 + $0xf] ss:$2 sm:$0x1f]  ;;  %v7369_v41 = vmax.f32 %v7362_v12, %v7364_v17  ;;  %v2455_v17 = vshrl.u32 %v8195_v13, 16  ;;  %vm14145_vm12 = vmmov %vm14141_vm5  ;;  %v5858_v62 = vsel %vm9834_vm9, %v5856_v10, %v5857_v61 }
 0x468   : > { %v7370_v58 = vmax.f32 %v7366_v50, %v7368_v46  ;;  %v14142_v3 = vld [vmem:[#allocation13_spill] sm:$0xff]  ;;  %v2458_v36 = vshll.u32 %v8195_v13, 16  ;;  %v3869_v46 = vsel %vm9827_vm8, %v3867_v20, %v3868_v27  ;;  %v2638_v13 = vrot.slane %v12650_v42, 4 }
 0x469   : > { %v6779_v32 = vpop.permute.xlu0 %6778  ;;  %5714 = vrot.lane.b32.xlu1 %v5665_v29, %s9379_s26  ;;  %v4156_v0 = vrot.slane %v14142_v3, 6 }
 0x46a   : > { %6819 = vst.msk [vmem:[#allocation4 + $0x54] sm:$0xf] %vm14138_vm4, %v6779_v32  ;;  %v4962_v34 = vpop.permute.xlu1 %4961  ;;  %v7371_v40 = vmax.f32 %v7369_v41, %v7370_v58  ;;  %v12781_v32 = vcombine.low %v5938_v37, %v5938_v37  ;;  %vm14146_vm4 = vmmov %vm14141_vm5 }
 0x46b   : > { %2013 = vrot.lane.b32.xlu0 %v1980_v48, %s9386_s14  ;;  %5002 = vst.msk [vmem:[#allocation4 + $0x58] sm:$0xf] %vm14139_vm10, %v4962_v34  ;;  %v4160_v50 = vor.u32 %v4159_v5, %v4156_v0  ;;  %v14147_v48 = vrot.slane %v12183_v18, 7  ;;  %v2457_v34 = vrot.slane %v2455_v17, 5  ;;  %vm14148_vm10 = vcmask 126016  }
 0x46c   : > { %v7372_v19 = vadd.f32 %v12748_v51, %v7371_v40  ;;  %v6256_v28 = vshll.u32 %v12781_v32, 16  ;;  %v6260_v27 = vshrl.u32 %v12781_v32, 16  ;;  %v2453_v18 = vrot.slane %v12644_v16, 4  ;;  %v14150_v40 = vld [vmem:[#allocation53_spill] sm:$0xff] }
 0x46d   : > { %v3252_v31 = vpop.permute.xlu0 %3251  ;;  %2191 = vrot.lane.b32.xlu1 %v2158_v8, %s9379_s26  ;;  %v5853_v41 = vrot.slane %v14147_v48, 4  ;;  %v2460_v8 = vrot.slane %v2458_v36, 6  ;;  %v4161_v22 = vsel %vm10262_vm6, %v4152_v49, %v4160_v50  ;;  %v4162_v42 = vrot.slane %v4160_v50, 4 }
 0x46e   : > { %3291 = vst.msk [vmem:[#allocation4 + $0x60] sm:$0xf] %vm14140_vm11, %v3252_v31  ;;  %v6957_v45 = vpop.permute.xlu1 %6956  ;;  %v7373_v43 = vmax.f32 %v7372_v19, 0.0  ;;  %vm14149_vm11 = vmmov %vm14146_vm4  ;;  %v4166_v31 = vrot.slane %v14150_v40, 6  ;;  %v8213_v19 = vcombine.high %v12627_v26, %v12627_v26  ;;  %v6262_v5 = vrot.slane %v6260_v27, 4 }
 0x46f   : > { %3729 = vrot.lane.b32.xlu0 %v3695_v33, %s9382_s29  ;;  %6996 = vst.msk [vmem:[#allocation4 + $0x5c] sm:$0xf] %vm14141_vm5, %v6957_v45  ;;  %v5855_v63 = vsel %vm9834_vm9, %v5853_v41, %v5854_v21  ;;  %v14151_v33 = vld [vmem:[#allocation54_spill] sm:$0xff]  ;;  %v2461_v45 = vor.u32 %v2460_v8, %v2457_v34  ;;  %v12817_v21 = vrot.slane %v6256_v28, 5  ;;  %vm14152_vm5 = vcmask 650816  }
 0x470   : > { %7374 = vst [vmem:[#allocation6] sm:$0x1f] %v7373_v43  ;;  %v4169_v59 = vrot.slane %v14151_v33, 7  ;;  %v2639_v43 = vrot.slane %v8213_v19, 6  ;;  %v6252_v49 = vrot.slane %v12532_v60, 4  ;;  %v4354_v50 = vrot.slane %v11578_v4, 7 }
 0x471   : > { %v4960_v23 = vpop.permute.xlu0 %4959  ;;  %3906 = vrot.lane.b32.xlu1 %v3872_v2, %s9388_s16  ;;  %v2462_v26 = vsel %vm9972_vm15, %v2453_v18, %v2461_v45  ;;  %v4618_v8 = vrot.slane %v14142_v3, 7  ;;  %v14158_v60 = vrot.slane %v14089_v6, 7 }
 0x472   : > { %5001 = vst.msk [vmem:[#allocation4 + $0x50] sm:$0xf] %vm14144_vm3, %v4960_v23  ;;  %v3551_v12 = vpop.permute.xlu1 %3550  ;;  %v4351_v23 = vrot.slane %v14113_v53, 7  ;;  %vm14153_vm3 = vmmov %vm14148_vm10  ;;  %v12830_v20 = vor.u32 %v4169_v59, %v4166_v31  ;;  %v2640_v36 = vsel %vm9827_vm8, %v2638_v13, %v2639_v43  ;;  %v9338_v13 = vld [vmem:[#allocation3 + $0x48] ss:$0 sps:$4 sm:$0x77]  }
 0x473   : > { %5716 = vrot.lane.b32.xlu0 %v5675_v54, %s9379_s26  ;;  %3589 = vst.msk [vmem:[#allocation4 + $0x68] sm:$0xf] %vm14145_vm12, %v3551_v12  ;;  %v12828_v54 = vcombine.high %v5938_v37, %v5938_v37  ;;  %vm14154_vm12 = vcmask 191616   ;;  %v4621_v6 = vor.u32 %v14143_v44, %v4618_v8  ;;  %v6448_v44 = vrot.slane %v12781_v32, 5 }
 0x474   : > { %v4171_v37 = vsel %vm10262_vm6, %v4162_v42, %v12830_v20 }
 0x475   : > { %v6955_v29 = vpop.permute.xlu0 %6954  ;;  %5892 = vrot.lane.b32.xlu1 %v5858_v62, %s13844_s30  ;;  %v6263_v62 = vor.u32 %v6262_v5, %v12817_v21  ;;  %v14163_v5 = vrot.slane %v12464_v9, 5 }
 0x476   : > { %6995 = vst.msk [vmem:[#allocation4 + $0x54] sm:$0xf] %vm14146_vm4, %v6955_v29  ;;  %v5411_v58 = vpop.permute.xlu1 %5410  ;;  %v4353_v29 = vrot.slane %v4351_v23, 4  ;;  %vm14155_vm4 = vmmov %vm14152_vm5 }
 0x477   : > { %3904 = vrot.lane.b32.xlu0 %v3869_v46, %s9388_s16  ;;  %5448 = vst.msk [vmem:[#allocation4 + $0x6c] sm:$0xf] %vm14148_vm10, %v5411_v58  ;;  %v6266_v46 = vshll.u32 %v12828_v54, 16  ;;  %vm14156_vm10 = vcmask 716416   ;;  %v6264_v34 = vrot.slane %v6263_v62, 4 }
 0x478   : > { %v4355_v58 = vsel %vm9834_vm9, %v4353_v29, %v4354_v50 }
 0x479   : > { %v3549_v47 = vpop.permute.xlu0 %3548  ;;  %4210 = vrot.lane.b32.xlu1 %v4161_v22, %s9392_s22  ;;  %v9336_v0 = vld [vmem:[#allocation4 + $0x50] ss:$8 sps:$4 sm:$0xff]   ;;  %v4350_v22 = vrot.slane %v14158_v60, 4  ;;  %v12861_v31 = vrot.slane %v6266_v46, 5 }
 0x47a   : > { %3588 = vst.msk [vmem:[#allocation4 + $0x60] sm:$0xf] %vm14149_vm11, %v3549_v47  ;;  %v3726_v2 = vpop.permute.xlu1 %3725  ;;  %v9339_v47 = vld [vmem:[#allocation3 + $0x48] ss:$0 sps:$4 sm:$0xff]   ;;  %vm14157_vm11 = vmmov %vm14154_vm12 }
 0x47b   : > { %5890 = vrot.lane.b32.xlu0 %v5855_v63, %s13844_s30  ;;  %3764 = vst.msk [vmem:[#allocation4 + $0x68] sm:$0xf] %vm14152_vm5, %v3726_v2  ;;  %v14159_v63 = vrot.slane %v12477_v11, 5  ;;  %vm14160_vm5 = vcmask 257216   ;;  %v6269_v19 = vsel %vm10014_vm0, %v6264_v34, %v12861_v31  ;;  %v3099_v45 = vshrl.u32 %v9339_v47, 16 }
 0x47c   : > { %v4352_v11 = vsel %vm9834_vm9, %v4350_v22, %v4351_v23 }
 0x47d   : > { %v5409_v16 = vpop.permute.xlu0 %5408  ;;  %v9334_v10 = vld [vmem:[#allocation4 + $0x54] ss:$8 sps:$4 sm:$0xff]   ;;  %6010 = vrot.lane.b32.xlu1 %v12464_v9, %s9380_s27  ;;  %v6253_v18 = vor.u32 %v6252_v49, %v14159_v63  ;;  %v3101_v43 = vrot.slane %v3099_v45, 7 }
 0x47e   : > { %5447 = vst.msk [vmem:[#allocation4 + $0x64] sm:$0xf] %vm14153_vm3, %v5409_v16  ;;  %7306 = vmatprep.mubr.bf16.mxu1 %v9334_v10  ;;  %v5713_v12 = vpop.permute.xlu1 %5712  ;;  %vm14161_vm3 = vmmov %vm14156_vm10  ;;  %v14162_v16 = vrot.slane %v14092_v52, 7 }
 0x47f   : > { %2495 = vrot.lane.b32.xlu0 %v2462_v26, %s13844_s30  ;;  %7307 = vmatmul.mubr.bf16.gmra.mrb[20].mxu1 %v9336_v0  ;;  %5750 = vst.msk [vmem:[#allocation4 + $0x6c] sm:$0xf] %vm14154_vm12, %v5713_v12  ;;  %v6254_v2 = vrot.slane %v6253_v18, 4  ;;  %v6447_v26 = vrot.slane %v14163_v5, 4  ;;  %vm14164_vm12 = vmmov %vm14160_vm5  ;;  %v2819_v12 = vrot.slane %v9338_v13, 7  ;;  %v6745_v18 = vrot.slane %v6266_v46, 6 }
 0x480   : > { %v4614_v10 = vrot.slane %v14162_v16, 4  ;;  %v6728_v16 = vrot.slane %v12562_v30, 4  ;;  %v6925_v5 = vrot.slane %v6923_v14, 4 }
 0x481   : > { %v3724_v17 = vpop.permute.xlu0 %3723  ;;  %2673 = vrot.lane.b32.xlu1 %v2640_v36, %s9380_s27  ;;  %v6259_v52 = vsel %vm10014_vm0, %v6254_v2, %v12817_v21  ;;  %v3102_v36 = vshll.u32 %v9339_v47, 16  ;;  %v6449_v62 = vsel %vm9809_vm7, %v6447_v26, %v6448_v44  ;;  %v6735_v21 = vrot.slane %v6256_v28, 6 }
 0x482   : > { %3763 = vst.msk [vmem:[#allocation4 + $0x60] sm:$0xf] %vm14155_vm4, %v3724_v17  ;;  %v3903_v48 = vpop.permute.xlu1 %3902  ;;  %v4622_v23 = vsel %vm9998_vm1, %v4614_v10, %v4621_v6  ;;  %v4627_v17 = vrot.slane %v14150_v40, 7  ;;  %vm14165_vm4 = vcmask 322816   ;;  %v6740_v47 = vshrl.u32 %v12828_v54, 16 }
 0x483   : > { %4212 = vrot.lane.b32.xlu0 %v4171_v37, %s9392_s22  ;;  %3941 = vst.msk [vmem:[#allocation4 + $0x68] sm:$0xf] %vm14156_vm10, %v3903_v48  ;;  %v3104_v49 = vor.u32 %v3102_v36, %v3101_v43  ;;  %v6732_v48 = vrot.slane %v6260_v27, 5  ;;  %vm14166_vm10 = vmmov %vm14165_vm4  ;;  %v6926_v26 = vrot.slane %v12781_v32, 6 }
 0x484   : > { %v4630_v34 = vor.u32 %v14151_v33, %v4627_v17  ;;  %v6450_v33 = vrot.slane %v6448_v44, 4  ;;  %v9346_v43 = vld [vmem:[#allocation3 + $0x50] ss:$0 sps:$4 sm:$0x77]  }
 0x485   : > { %v5711_v41 = vpop.permute.xlu0 %5710  ;;  %4389 = vrot.lane.b32.xlu1 %v4355_v58, %s13664_s19  ;;  %v4623_v58 = vrot.slane %v4618_v8, 4  ;;  %v3105_v28 = vsel %vm9998_vm1, %v4614_v10, %v3104_v49  ;;  %v6736_v63 = vor.u32 %v6735_v21, %v6732_v48  ;;  %v6927_v14 = vsel %vm9827_vm8, %v6925_v5, %v6926_v26  ;;  %v14175_v21 = vld [vmem:[#allocation43_spill] sm:$0xff]  ;;  %v9354_v40 = vld [vmem:[#allocation3 + $0x60] ss:$0 sps:$4 sm:$0x11]  }
 0x486   : > { %5749 = vst.msk [vmem:[#allocation4 + $0x64] sm:$0xf] %vm14157_vm11, %v5711_v41  ;;  %v5889_v59 = vpop.permute.xlu1 %5888  ;;  %v2820_v41 = vsel %vm9834_vm9, %v4350_v22, %v2819_v12  ;;  %v6742_v22 = vrot.slane %v6740_v47, 5  ;;  %vm14167_vm11 = vcmask 388416   ;;  %v6928_v36 = vrot.slane %v6926_v26, 4 }
 0x487   : > { %6012 = vrot.lane.b32.xlu0 %v12781_v32, %s9380_s27  ;;  %5926 = vst.msk [vmem:[#allocation4 + $0x6c] sm:$0xf] %vm14160_vm5, %v5889_v59  ;;  %v4631_v8 = vsel %vm9998_vm1, %v4623_v58, %v4630_v34  ;;  %v6451_v59 = vrot.slane %v12828_v54, 5  ;;  %v6738_v6 = vrot.slane %v6736_v63, 4  ;;  %vm14168_vm5 = vmmov %vm14167_vm11  ;;  %v6737_v44 = vsel %vm9972_vm15, %v6728_v16, %v6736_v63 }
 0x488   : > { %v12926_v46 = vor.u32 %v6745_v18, %v6742_v22  ;;  %v9344_v32 = vld [vmem:[#allocation3 + $0x58] ss:$0 sps:$4 sm:$0x77]   ;;  %v4174_v49 = vshrl.u32 %v9346_v43, 16  ;;  %v4177_v48 = vshll.u32 %v9346_v43, 16  ;;  %v6454_v39 = vrot.slane %v9354_v40, 5 }
 0x489   : > { %v3901_v3 = vpop.permute.xlu0 %3900  ;;  %6310 = vrot.lane.b32.xlu1 %v6269_v19, %s9381_s28  ;;  %v6452_v45 = vsel %vm9809_vm7, %v6450_v33, %v6451_v59  ;;  %v9342_v58 = vld [vmem:[#allocation3 + $0x58] ss:$0 sps:$4 sm:$0x33]   ;;  %v5678_v34 = vshrl.u32 %v9344_v32, 16 }
 0x48a   : > { %3940 = vst.msk [vmem:[#allocation4 + $0x60] sm:$0xf] %vm14161_vm3, %v3901_v3  ;;  %v4209_v0 = vpop.permute.xlu1 %4208  ;;  %v6747_v13 = vsel %vm9972_vm15, %v6738_v6, %v12926_v46  ;;  %vm14169_vm3 = vcmask 454016   ;;  %v4176_v22 = vrot.slane %v4174_v49, 6  ;;  %v4179_v18 = vrot.slane %v4177_v48, 7 }
 0x48b   : > { %4387 = vrot.lane.b32.xlu0 %v4352_v11, %s13664_s19  ;;  %4247 = vst.msk [vmem:[#allocation4 + $0x68] sm:$0xf] %vm4233_vm14, %v4209_v0  ;;  %v5680_v6 = vrot.slane %v5678_v34, 6 }
 0x48d   : > { %v5887_v42 = vpop.permute.xlu0 %5886  ;;  %4669 = vrot.lane.b32.xlu1 %v4622_v23, %s9391_s21  ;;  %v9341_v23 = vld [vmem:[#allocation3 + $0x48] ss:$0 sps:$4 sm:$0xff]  }
 0x48e   : > { %5925 = vst.msk [vmem:[#allocation4 + $0x64] sm:$0xf] %vm14164_vm12, %v5887_v42  ;;  %v6009_v29 = vpop.permute.xlu1 %6008  ;;  %v14170_v42 = vld [vmem:[#allocation14_spill] sm:$0xff]  ;;  %vm14171_vm12 = vcmask 978816  }
 0x48f   : > { %6308 = vrot.lane.b32.xlu0 %v6259_v52, %s9381_s28  ;;  %6046 = vst.msk [vmem:[#allocation4 + $0x6c] sm:$0xf] %vm14165_vm4, %v6009_v29  ;;  %vm14172_vm4 = vmmov %vm14169_vm3  ;;  %v8305_v52 = vcombine.high %v12713_v56, %v12713_v56  ;;  %v5681_v56 = vshll.u32 %v9344_v32, 16 }
 0x491   : > { %v4207_v37 = vpop.permute.xlu0 %4206  ;;  %6484 = vrot.lane.b32.xlu1 %v6449_v62, %s9385_s13  ;;  %v3696_v62 = vrot.slane %v12732_v1, 4 }
 0x492   : > { %4246 = vst.msk [vmem:[#allocation4 + $0x60] sm:$0xf] %vm4233_vm14, %v4207_v37  ;;  %v4386_v27 = vpop.permute.xlu1 %4385  ;;  %v9343_v37 = vld [vmem:[#allocation3 + $0x50] ss:$0 sps:$4 sm:$0x33]  }
 0x493   : > { %2853 = vrot.lane.b32.xlu0 %v2820_v41, %s9381_s28  ;;  %4424 = vst.msk [vmem:[#allocation4 + $0x68] sm:$0xf] %vm4410_vm2, %v4386_v27  ;;  %v6929_v41 = vrot.slane %v12828_v54, 6  ;;  %v14176_v27 = vld [vmem:[#allocation56_spill] sm:$0xff]  ;;  %v3874_v33 = vrot.slane %v9343_v37, 6 }
 0x494   : > { %v9352_v37 = vld [vmem:[#allocation3 + $0x60] ss:$0 sps:$4 sm:$0x11]  }
 0x495   : > { %v6007_v60 = vpop.permute.xlu0 %6006  ;;  %3138 = vrot.lane.b32.xlu1 %v3105_v28, %s9385_s13  ;;  %v6930_v1 = vsel %vm9827_vm8, %v6928_v36, %v6929_v41  ;;  %v4356_v36 = vrot.slane %v4354_v50, 4  ;;  %v6931_v7 = vrot.slane %v6929_v41, 4 }
 0x496   : > { %6045 = vst.msk [vmem:[#allocation4 + $0x64] sm:$0xf] %vm14166_vm10, %v6007_v60  ;;  %v6307_v3 = vpop.permute.xlu1 %6306  ;;  %vm14173_vm10 = vcmask 519616   ;;  %v3697_v60 = vrot.slane %v8305_v52, 5 }
 0x497   : > { %4671 = vrot.lane.b32.xlu0 %v4631_v8, %s9391_s21  ;;  %6344 = vst.msk [vmem:[#allocation4 + $0x6c] sm:$0xf] %vm14167_vm11, %v6307_v3  ;;  %vm14174_vm11 = vmmov %vm14171_vm12  ;;  %v9351_v3 = vld [vmem:[#allocation3 + $0x50] ss:$0 sps:$4 sm:$0xff]  }
 0x498   : > { %v3698_v8 = vsel %vm9809_vm7, %v3696_v62, %v3697_v60  ;;  %v4634_v26 = vshrl.u32 %v9351_v3, 16  ;;  %v9356_v60 = vld [vmem:[#allocation3 + $0x58] ss:$0 sps:$4 sm:$0x11]  }
 0x499   : > { %v4384_v19 = vpop.permute.xlu0 %4383  ;;  %4792 = vrot.lane.b32.xlu1 %v11578_v4, %s13998_s12 }
 0x49a   : > { %4423 = vst.msk [vmem:[#allocation4 + $0x60] sm:$0xf] %vm4410_vm2, %v4384_v19  ;;  %v4668_v11 = vpop.permute.xlu1 %4667  ;;  %v5382_v19 = vrot.slane %v9342_v58, 6  ;;  %v4636_v52 = vrot.slane %v4634_v26, 7  ;;  %v9393_v26 = vmov 0.0  }
 0x49b   : > { %6486 = vrot.lane.b32.xlu0 %v6452_v45, %s9385_s13  ;;  %4706 = vst.msk [vmem:[#allocation4 + $0x68] sm:$0xf] %vm4692_vm13, %v4668_v11  ;;  %v5683_v45 = vrot.slane %v5681_v56, 7  ;;  %v3873_v11 = vrot.slane %v3871_v25, 4  ;;  %7431 = vst [vmem:[#allocation7] sm:$0xff] %v9393_v26 }
 0x49c   : > { %v9355_v58 = vld [vmem:[#allocation3 + $0x60] ss:$0 sps:$4 sm:$0x33]   ;;  %7434 = vst [vmem:[#allocation7 + $0x18] sm:$0xff] %v9393_v26  ;;  %7432 = vst [vmem:[#allocation7 + $0x8] sm:$0xff] %v9393_v26 }
 0x49d   : > { %v6305_v2 = vpop.permute.xlu0 %6304  ;;  %6788 = vrot.lane.b32.xlu1 %v6747_v13, %s9378_s25  ;;  %v3875_v16 = vsel %vm9827_vm8, %v3873_v11, %v3874_v33  ;;  %v5684_v25 = vor.u32 %v5683_v45, %v5680_v6  ;;  %v6750_v33 = vshrl.u32 %v9355_v58, 16  ;;  %v6753_v38 = vshll.u32 %v9355_v58, 16  ;;  %7433 = vst [vmem:[#allocation7 + $0x10] sm:$0xff] %v9393_v26 }
 0x49e   : > { %6343 = vst.msk [vmem:[#allocation4 + $0x64] sm:$0xf] %vm14168_vm5, %v6305_v2  ;;  %v6483_v10 = vpop.permute.xlu1 %6482  ;;  %vm14177_vm5 = vcmask 1044416   ;;  %v4937_v11 = vrot.slane %v9356_v60, 5 }
 0x49f   : > { %4790 = vrot.lane.b32.xlu0 %v14113_v53, %s13998_s12  ;;  %6520 = vst.msk [vmem:[#allocation4 + $0x6c] sm:$0xf] %vm14169_vm3, %v6483_v10  ;;  %vm14178_vm3 = vmmov %vm14173_vm10  ;;  %v4180_v10 = vor.u32 %v4179_v18, %v4176_v22 }
 0x4a1   : > { %v4666_v0 = vpop.permute.xlu0 %4665  ;;  %4967 = vrot.lane.b32.xlu1 %v14170_v42, %s9390_s20  ;;  %v5676_v42 = vrot.slane %v12761_v24, 4 }
 0x4a2   : > { %4705 = vst.msk [vmem:[#allocation4 + $0x60] sm:$0xf] %vm4692_vm13, %v4666_v0  ;;  %v4789_v53 = vpop.permute.xlu1 %4788  ;;  %v9348_v0 = vld [vmem:[#allocation3 + $0x50] ss:$0 sps:$4 sm:$0x77]  }
 0x4a3   : > { %6786 = vrot.lane.b32.xlu0 %v6737_v44, %s9378_s25  ;;  %4827 = vst.msk [vmem:[#allocation4 + $0x68] sm:$0xf] %vm14171_vm12, %v4789_v53  ;;  %vm14179_vm12 = vcmask 585216   ;;  %v5383_v44 = vsel %vm9827_vm8, %v6925_v5, %v5382_v19  ;;  %v9347_v53 = vld [vmem:[#allocation3 + $0x58] ss:$0 sps:$4 sm:$0x77]   ;;  %v5685_v24 = vsel %vm10262_vm6, %v5676_v42, %v5684_v25 }
 0x4a4   : > { %v4357_v32 = vrot.slane %v9348_v0, 7  ;;  %v5859_v5 = vrot.slane %v5857_v61, 4  ;;  %v14188_v19 = vld [vmem:[#allocation20_spill] sm:$0xff]  ;;  %v6752_v42 = vrot.slane %v6750_v33, 5  ;;  %v6755_v25 = vrot.slane %v6753_v38, 6 }
 0x4a5   : > { %v6481_v30 = vpop.permute.xlu0 %6480  ;;  %6962 = vrot.lane.b32.xlu1 %v6927_v14, %s9387_s15  ;;  %v14189_v6 = vrot.slane %v14188_v19, 5 }
 0x4a6   : > { %6519 = vst.msk [vmem:[#allocation4 + $0x64] sm:$0xf] %vm14172_vm4, %v6481_v30  ;;  %v6785_v12 = vpop.permute.xlu1 %6784  ;;  %vm14180_vm4 = vmmov %vm14177_vm5  ;;  %v4172_v30 = vrot.slane %v12830_v20, 4  ;;  %v5860_v20 = vrot.slane %v9347_v53, 7  ;;  %v4358_v35 = vsel %vm9834_vm9, %v4356_v36, %v4357_v32 }
 0x4a7   : > { %3259 = vrot.lane.b32.xlu0 %v9341_v23, %s9378_s25  ;;  %6822 = vst.msk [vmem:[#allocation4 + $0x6c] sm:$0xf] %vm14173_vm10, %v6785_v12  ;;  %vm14181_vm10 = vcmask 126016   ;;  %v6272_v12 = vrot.slane %v6740_v47, 4  ;;  %v4632_v47 = vrot.slane %v4627_v17, 4  ;;  %v4936_v45 = vrot.slane %v14189_v6, 4 }
 0x4a8   : > { %v4181_v43 = vsel %vm10262_vm6, %v4172_v30, %v4180_v10  ;;  %vm14184_vm6 = vmmov %vm14181_vm10  ;;  %v5861_v61 = vsel %vm9834_vm9, %v5859_v5, %v5860_v20  ;;  %v7435_v10 = vld [vmem:[#allocation6] ss:$32 sm:$0x1] }
 0x4a9   : > { %v4787_v29 = vpop.permute.xlu0 %4786  ;;  %3556 = vrot.lane.b32.xlu1 %v14175_v21, %s9387_s15  ;;  %v6273_v4 = vor.u32 %v6272_v12, %v12861_v31  ;;  %v6276_v21 = vshll.u32 %v9352_v37, 16  ;;  %v4938_v30 = vsel %vm9809_vm7, %v4936_v45, %v4937_v11 }
 0x4aa   : > { %4826 = vst.msk [vmem:[#allocation4 + $0x60] sm:$0xf] %vm14174_vm11, %v4787_v29  ;;  %vm14182_vm11 = vmmov %vm14179_vm12  ;;  %v4637_v29 = vshll.u32 %v9351_v3, 16  ;;  %v6453_v3 = vrot.slane %v6451_v59, 4 }
 0x4ab   : > { %4969 = vrot.lane.b32.xlu0 %v14176_v27, %s9390_s20  ;;  %v4966_v28 = vpop.permute.xlu1 %4965  ;;  %v6278_v17 = vrot.slane %v6276_v21, 5 }
 0x4ac   : > { %5004 = vst.msk [vmem:[#allocation4 + $0x68] sm:$0xf] %vm14177_vm5, %v4966_v28  ;;  %vm14183_vm5 = vcmask 191616   ;;  %v4639_v9 = vor.u32 %v4637_v29, %v4636_v52  ;;  %v9357_v52 = vld [vmem:[#allocation3 + $0x60] ss:$0 sps:$4 sm:$0x33]  }
 0x4ad   : > { %v6783_v63 = vpop.permute.xlu0 %6782  ;;  %3731 = vrot.lane.b32.xlu1 %v3698_v8, %s9382_s29  ;;  %vm14186_vm9 = vmmov %vm14183_vm5  ;;  %v9353_v8 = vld [vmem:[#allocation3 + $0x50] ss:$0 sps:$4 sm:$0xff]  }
 0x4ae   : > { %6821 = vst.msk [vmem:[#allocation4 + $0x64] sm:$0xf] %vm14178_vm3, %v6783_v63  ;;  %vm14185_vm3 = vcmask 257216   ;;  %v4640_v57 = vsel %vm9998_vm1, %v4632_v47, %v4639_v9  ;;  %vm14187_vm1 = vcmask 322816  }
 0x4af   : > { %6964 = vrot.lane.b32.xlu0 %v6930_v1, %s9387_s15  ;;  %v6961_v2 = vpop.permute.xlu1 %6960  ;;  %v6274_v1 = vrot.slane %v6273_v4, 4  ;;  %v7447_v9 = vld [vmem:[#allocation6 + $0x2] ss:$32 sm:$0x1] }
 0x4b0   : > { %6998 = vst.msk [vmem:[#allocation4 + $0x6c] sm:$0xf] %vm14179_vm12, %v6961_v2  ;;  %vm14190_vm12 = vmmov %vm14185_vm3 }
 0x4b1   : > { %v4964_v13 = vpop.permute.xlu0 %4963  ;;  %3908 = vrot.lane.b32.xlu1 %v3875_v16, %s9388_s16  ;;  %v6279_v2 = vsel %vm10014_vm0, %v6274_v1, %v6278_v17  ;;  %vm14191_vm0 = vcmask 388416  }
 0x4b2   : > { %5003 = vst.msk [vmem:[#allocation4 + $0x60] sm:$0xf] %vm14180_vm4, %v4964_v13  ;;  %vm7436_vm4 = vcmask 122880  }
 0x4b3   : > { %5416 = vrot.lane.b32.xlu0 %v5383_v44, %s9386_s14  ;;  %v2012_v23 = vpop.permute.xlu1 %2011  ;;  %7437 = vst.msk [vmem:[#allocation7] sm:$0x1] %vm7436_vm4, %v7435_v10  ;;  %s8064_s14 = sshll.u32 %s14248_s18, 3 }
 0x4b4   : > { %2048 = vst.msk [vmem:[#allocation4 + $0x78] sm:$0xf] %vm14181_vm10, %v2012_v23  ;;  %vm14192_vm10 = vmmov %vm14187_vm1  ;;  %v6455_v23 = vsel %vm9809_vm7, %v6453_v3, %v6454_v39  ;;  %vm14195_vm7 = vcmask 519616  }
 0x4b5   : > { %v6959_v14 = vpop.permute.xlu0 %6958  ;;  %4214 = vrot.lane.b32.xlu1 %v4181_v43, %s9392_s22  ;;  %v6756_v43 = vor.u32 %v6755_v25, %v6752_v42 }
 0x4b6   : > { %6997 = vst.msk [vmem:[#allocation4 + $0x64] sm:$0xf] %vm14182_vm11, %v6959_v14  ;;  %v6748_v14 = vrot.slane %v12926_v46, 4  ;;  %vm14193_vm11 = vcmask 454016   ;;  %v6932_v46 = vrot.slane %v9357_v52, 6 }
 0x4b7   : > { %5718 = vrot.lane.b32.xlu0 %v5685_v24, %s9379_s26  ;;  %v2190_v62 = vpop.permute.xlu1 %2189  ;;  %v7015_v50 = vld [vmem:[#allocation4 + $0x68] sm:$0xff] }
 0x4b8   : > { %2226 = vst.msk [vmem:[#allocation4 + $0x78] sm:$0xf] %vm14183_vm5, %v2190_v62  ;;  %vm14194_vm5 = vmmov %vm14191_vm0  ;;  %v6757_v5 = vsel %vm9972_vm15, %v6748_v14, %v6756_v43  ;;  %v6933_v36 = vsel %vm9827_vm8, %v6931_v7, %v6932_v46  ;;  %vm14197_vm15 = vcmask 585216   ;;  %vm14201_vm8 = vcmask 650816  }
 0x4b9   : > { %v2010_v49 = vpop.permute.xlu0 %2009  ;;  %4391 = vrot.lane.b32.xlu1 %v4358_v35, %s13664_s19 }
 0x4ba   : > { %2047 = vst.msk [vmem:[#allocation4 + $0x70] sm:$0xf] %vm14184_vm6, %v2010_v49  ;;  %vm14196_vm6 = vmmov %vm14193_vm11 }
 0x4bb   : > { %5894 = vrot.lane.b32.xlu0 %v5861_v61, %s13844_s30  ;;  %v2494_v48 = vpop.permute.xlu1 %2493 }
 0x4bc   : > { %2530 = vst.msk [vmem:[#allocation4 + $0x78] sm:$0xf] %vm14185_vm3, %v2494_v48  ;;  %vm14198_vm3 = vmmov %vm14195_vm7  ;;  %v7455_v48 = vld [vmem:[#allocation6 + $0x3] ss:$32 sm:$0x1] }
 0x4bd   : > { %v2188_v34 = vpop.permute.xlu0 %2187  ;;  %v7014_v56 = vld [vmem:[#allocation4 + $0x60] sm:$0xff]  ;;  %4673 = vrot.lane.b32.xlu1 %v4640_v57, %s9391_s21 }
 0x4be   : > { %v9349_v27 = vld [vmem:[#allocation4 + $0x64] ss:$8 sps:$4 sm:$0xff]   ;;  %2225 = vst.msk [vmem:[#allocation4 + $0x70] sm:$0xf] %vm14186_vm9, %v2188_v34  ;;  %v8595_v31 = vcombine.low %v7014_v56, %v7015_v50  ;;  %vm14199_vm9 = vcmask 126016  }
 0x4bf   : > { %6014 = vrot.lane.b32.xlu0 %v12828_v54, %s9380_s27  ;;  %7314 = vmatprep.mubr.bf16.mxu1 %v9349_v27  ;;  %v8709_v28 = vpop.f32.mrb[8].mxu1  ;;  %v2672_v63 = vpop.permute.xlu1 %2671  ;;  %v7439_v54 = vld [vmem:[#allocation6 + $0x1] ss:$32 sm:$0x1] }
 0x4c0   : > { %7315 = vmatmul.mubr.bf16.gmra.mrb[24].mxu1 %v8595_v31  ;;  %2708 = vst.msk [vmem:[#allocation4 + $0x78] sm:$0xf] %vm14187_vm1, %v2672_v63  ;;  %v8710_v18 = vpop.f32.mrb[9].mxu1  ;;  %vm14200_vm1 = vmmov %vm14197_vm15  ;;  %v7463_v27 = vld [vmem:[#allocation6 + $0x4] ss:$32 sm:$0x1] }
 0x4c1   : > { %v2492_v22 = vpop.permute.xlu0 %2491  ;;  %v8711_v13 = vadd.f32 %v8710_v18, %v8709_v28  ;;  %v8712_v16 = vpop.f32.mrb[10].mxu1  ;;  %4794 = vrot.lane.b32.xlu1 %v9353_v8, %s13998_s12 }
 0x4c2   : > { %2529 = vst.msk [vmem:[#allocation4 + $0x70] sm:$0xf] %vm14190_vm12, %v2492_v22  ;;  %v8713_v0 = vpop.f32.mrb[11].mxu1  ;;  %vm14202_vm12 = vmmov %vm14199_vm9 }
 0x4c3   : > { %6312 = vrot.lane.b32.xlu0 %v6279_v2, %s9381_s28  ;;  %7342 = vst [vmem:[#allocation5 + $0x20] sm:$0xff] %v8711_v13  ;;  %v8714_v59 = vadd.f32 %v8713_v0, %v8712_v16  ;;  %v2852_v44 = vpop.permute.xlu1 %2851 }
 0x4c4   : > { %2888 = vst.msk [vmem:[#allocation4 + $0x78] sm:$0xf] %vm14191_vm0, %v2852_v44  ;;  %vm14203_vm0 = vcmask 191616  }
 0x4c5   : > { %v2670_v53 = vpop.permute.xlu0 %2669  ;;  %7343 = vst [vmem:[#allocation5 + $0x28] sm:$0xff] %v8714_v59  ;;  %4971 = vrot.lane.b32.xlu1 %v4938_v30, %s9390_s20 }
 0x4c6   : > { %2707 = vst.msk [vmem:[#allocation4 + $0x70] sm:$0xf] %vm14192_vm10, %v2670_v53  ;;  %vm14204_vm10 = vmmov %vm14199_vm9 }
 0x4c7   : > { %6488 = vrot.lane.b32.xlu0 %v6455_v23, %s9385_s13  ;;  %v3137_v32 = vpop.permute.xlu1 %3136 }
 0x4c8   : > { %3173 = vst.msk [vmem:[#allocation4 + $0x78] sm:$0xf] %vm14193_vm11, %v3137_v32  ;;  %vm14205_vm11 = vmmov %vm14203_vm0 }
 0x4c9   : > { %v2850_v24 = vpop.permute.xlu0 %2849 }
 0x4ca   : > { %2887 = vst.msk [vmem:[#allocation4 + $0x70] sm:$0xf] %vm14194_vm5, %v2850_v24  ;;  %v7376_v58 = vld [vmem:[#allocation5 + $0x1c] ss:$2 sm:$0x1f]  ;;  %vm14206_vm5 = vmmov %vm14201_vm8 }
 0x4cb   : > { %6790 = vrot.lane.b32.xlu0 %v6757_v5, %s9378_s25  ;;  %v3258_v20 = vpop.permute.xlu1 %3257  ;;  %v7378_v34 = vld [vmem:[#allocation5 + $0x1d] ss:$2 sm:$0x1f] }
 0x4cc   : > { %3294 = vst.msk [vmem:[#allocation4 + $0x78] sm:$0xf] %vm14195_vm7, %v3258_v20  ;;  %v7383_v31 = vmax.f32 %v7376_v58, %v7378_v34  ;;  %vm14207_vm7 = vcmask 716416  }
 0x4cd   : > { %v3135_v12 = vpop.permute.xlu0 %3134 }
 0x4ce   : > { %3172 = vst.msk [vmem:[#allocation4 + $0x70] sm:$0xf] %vm14196_vm6, %v3135_v12  ;;  %vm14208_vm6 = vmmov %vm14203_vm0 }
 0x4cf   : > { %6966 = vrot.lane.b32.xlu0 %v6933_v36, %s9387_s15  ;;  %v3555_v29 = vpop.permute.xlu1 %3554 }
 0x4d0   : > { %3591 = vst.msk [vmem:[#allocation4 + $0x78] sm:$0xf] %vm14197_vm15, %v3555_v29  ;;  %vm14209_vm15 = vcmask 257216  }
 0x4d1   : > { %v3256_v55 = vpop.permute.xlu0 %3255 }
 0x4d2   : > { %3293 = vst.msk [vmem:[#allocation4 + $0x70] sm:$0xf] %vm14198_vm3, %v3256_v55  ;;  %vm14210_vm3 = vmmov %vm14207_vm7 }
 0x4d3   : > { %7441 = vrot.lane.b32.xlu0 %v7439_v54, %s9379_s26  ;;  %v8715_v41 = vpop.f32.mrb[12].mxu1  ;;  %v5415_v62 = vpop.permute.xlu1 %5414 }
 0x4d4   : > { %v8716_v49 = vpop.f32.mrb[13].mxu1  ;;  %5450 = vst.msk [vmem:[#allocation4 + $0x7c] sm:$0xf] %vm14199_vm9, %v5415_v62  ;;  %vm14211_vm9 = vmmov %vm14209_vm15 }
 0x4d5   : > { %v3553_v37 = vpop.permute.xlu0 %3552  ;;  %v8717_v15 = vadd.f32 %v8716_v49, %v8715_v41  ;;  %v8718_v35 = vpop.f32.mrb[14].mxu1 }
 0x4d6   : > { %3590 = vst.msk [vmem:[#allocation4 + $0x70] sm:$0xf] %vm14200_vm1, %v3553_v37  ;;  %v8719_v61 = vpop.f32.mrb[15].mxu1  ;;  %vm14212_vm1 = vcmask 322816  }
 0x4d7   : > { %7449 = vrot.lane.b32.xlu0 %v7447_v9, %s9380_s27  ;;  %7344 = vst [vmem:[#allocation5 + $0x30] sm:$0xff] %v8717_v15  ;;  %v8720_v4 = vadd.f32 %v8719_v61, %v8718_v35  ;;  %v3728_v50 = vpop.permute.xlu1 %3727 }
 0x4d8   : > { %3765 = vst.msk [vmem:[#allocation4 + $0x70] sm:$0xf] %vm14201_vm8, %v3728_v50  ;;  %vm14213_vm8 = vmmov %vm14211_vm9 }
 0x4d9   : > { %v5413_v47 = vpop.permute.xlu0 %5412  ;;  %7345 = vst [vmem:[#allocation5 + $0x38] sm:$0xff] %v8720_v4 }
 0x4da   : > { %5449 = vst.msk [vmem:[#allocation4 + $0x74] sm:$0xf] %vm14202_vm12, %v5413_v47  ;;  %vm14214_vm12 = vmmov %vm14212_vm1 }
 0x4db   : > { %7457 = vrot.lane.b32.xlu0 %v7455_v48, %s9385_s13  ;;  %v5715_v21 = vpop.permute.xlu1 %5714 }
 0x4dc   : > { %5751 = vst.msk [vmem:[#allocation4 + $0x74] sm:$0xf] %vm14203_vm0, %v5715_v21  ;;  %vm14215_vm0 = vmmov %vm14212_vm1 }
 0x4dd   : > { %v2014_v56 = vpop.permute.xlu0 %2013 }
 0x4de   : > { %2049 = vst.msk [vmem:[#allocation4 + $0x80] sm:$0xf] %vm14204_vm10, %v2014_v56  ;;  %v7380_v57 = vld [vmem:[#allocation5 + $0x2a] ss:$2 sm:$0x1f]  ;;  %vm14216_vm10 = vcmask 388416  }
 0x4df   : > { %v7382_v60 = vld [vmem:[#allocation5 + $0x2b] ss:$2 sm:$0x1f]  ;;  %7465 = vrot.lane.b32.xlu0 %v7463_v27, %s9387_s15  ;;  %v2192_v40 = vpop.permute.xlu1 %2191 }
 0x4e0   : > { %v7384_v1 = vmax.f32 %v7380_v57, %v7382_v60  ;;  %2227 = vst.msk [vmem:[#allocation4 + $0x80] sm:$0xf] %vm14205_vm11, %v2192_v40  ;;  %vm14217_vm11 = vmmov %vm14216_vm10 }
 0x4e1   : > { %v3730_v17 = vpop.permute.xlu0 %3729 }
 0x4e2   : > { %v7385_v28 = vmax.f32 %v7383_v31, %v7384_v1  ;;  %3766 = vst.msk [vmem:[#allocation4 + $0x78] sm:$0xf] %vm14206_vm5, %v3730_v17  ;;  %vm14218_vm5 = vcmask 454016  }
 0x4e3   : > { %v3907_v63 = vpop.permute.xlu1 %3906 }
 0x4e4   : > { %v7386_v8 = vadd.f32 %v12748_v51, %v7385_v28  ;;  %3943 = vst.msk [vmem:[#allocation4 + $0x78] sm:$0xf] %vm14207_vm7, %v3907_v63  ;;  %vm14219_vm7 = vmmov %vm14216_vm10 }
 0x4e5   : > { %v5717_v33 = vpop.permute.xlu0 %5716 }
 0x4e6   : > { %5752 = vst.msk [vmem:[#allocation4 + $0x7c] sm:$0xf] %vm14208_vm6, %v5717_v33  ;;  %v7387_v38 = vmax.f32 %v7386_v8, 0.0  ;;  %vm14220_vm6 = vmmov %vm14218_vm5 }
 0x4e7   : > { %v5893_v22 = vpop.permute.xlu1 %5892 }
 0x4e8   : > { %7388 = vst [vmem:[#allocation6 + $0x5] sm:$0x1f] %v7387_v38  ;;  %5928 = vst.msk [vmem:[#allocation4 + $0x7c] sm:$0xf] %vm14209_vm15, %v5893_v22  ;;  %vm14221_vm15 = vcmask 978816  }
 0x4e9   : > { %v3905_v18 = vpop.permute.xlu0 %3904 }
 0x4ea   : > { %3942 = vst.msk [vmem:[#allocation4 + $0x70] sm:$0xf] %vm14210_vm3, %v3905_v18  ;;  %vm14222_vm3 = vmmov %vm14218_vm5 }
 0x4eb   : > { %v4211_v3 = vpop.permute.xlu1 %4210 }
 0x4ec   : > { %4248 = vst.msk [vmem:[#allocation4 + $0x70] sm:$0xf] %vm4233_vm14, %v4211_v3 }
 0x4ed   : > { %v5891_v19 = vpop.permute.xlu0 %5890 }
 0x4ee   : > { %5927 = vst.msk [vmem:[#allocation4 + $0x74] sm:$0xf] %vm14211_vm9, %v5891_v19  ;;  %vm14223_vm9 = vcmask 519616  }
 0x4ef   : > { %v7471_v6 = vld [vmem:[#allocation6 + $0x5] ss:$32 sm:$0x1]  ;;  %v7498_v45 = vld [vmem:[#allocation6 + $0x9] ss:$32 sm:$0x1]  ;;  %v6011_v11 = vpop.permute.xlu1 %6010 }
 0x4f0   : > { %7473 = vrot.lane.b32.xlu0 %v7471_v6, %s9388_s16  ;;  %7500 = vrot.lane.b32.xlu1 %v7498_v45, %s9379_s26  ;;  %6047 = vst.msk [vmem:[#allocation4 + $0x74] sm:$0xf] %vm14212_vm1, %v6011_v11  ;;  %v7495_v13 = vld [vmem:[#allocation6 + $0x8] ss:$32 sm:$0x1]  ;;  %vm14224_vm1 = vmmov %vm14221_vm15 }
 0x4f1   : > { %v2496_v2 = vpop.permute.xlu0 %2495  ;;  %7496 = vst.msk [vmem:[#allocation7 + $0x8] sm:$0x1] %vm7436_vm4, %v7495_v13  ;;  %v7479_v16 = vld [vmem:[#allocation6 + $0x6] ss:$32 sm:$0x1] }
 0x4f2   : > { %2531 = vst.msk [vmem:[#allocation4 + $0x80] sm:$0xf] %vm14213_vm8, %v2496_v2  ;;  %v7487_v59 = vld [vmem:[#allocation6 + $0x7] ss:$32 sm:$0x1]  ;;  %vm14225_vm8 = vcmask 1044416  }
 0x4f3   : > { %v2674_v10 = vpop.permute.xlu1 %2673 }
 0x4f4   : > { %7481 = vrot.lane.b32.xlu0 %v7479_v16, %s13664_s19  ;;  %2709 = vst.msk [vmem:[#allocation4 + $0x80] sm:$0xf] %vm14214_vm12, %v2674_v10  ;;  %vm14226_vm12 = vmmov %vm14223_vm9 }
 0x4f5   : > { %v4213_v0 = vpop.permute.xlu0 %4212 }
 0x4f6   : > { %4249 = vst.msk [vmem:[#allocation4 + $0x78] sm:$0xf] %vm4233_vm14, %v4213_v0  ;;  %v8721_v39 = vpop.f32.mrb[16].mxu1 }
 0x4f7   : > { %v8722_v44 = vpop.f32.mrb[17].mxu1  ;;  %v4390_v42 = vpop.permute.xlu1 %4389 }
 0x4f8   : > { %7489 = vrot.lane.b32.xlu0 %v7487_v59, %s13998_s12  ;;  %v8723_v25 = vadd.f32 %v8722_v44, %v8721_v39  ;;  %v8724_v30 = vpop.f32.mrb[18].mxu1  ;;  %4426 = vst.msk [vmem:[#allocation4 + $0x78] sm:$0xf] %vm4410_vm2, %v4390_v42 }
 0x4f9   : > { %v6013_v53 = vpop.permute.xlu0 %6012  ;;  %v8725_v23 = vpop.f32.mrb[19].mxu1 }
 0x4fa   : > { %6048 = vst.msk [vmem:[#allocation4 + $0x7c] sm:$0xf] %vm14215_vm0, %v6013_v53  ;;  %7346 = vst [vmem:[#allocation5 + $0x40] sm:$0xff] %v8723_v25  ;;  %v8726_v14 = vadd.f32 %v8725_v23, %v8724_v30  ;;  %vm14227_vm0 = vcmask 585216  }
 0x4fb   : > { %v6311_v43 = vpop.permute.xlu1 %6310 }
 0x4fc   : > { %7347 = vst [vmem:[#allocation5 + $0x48] sm:$0xff] %v8726_v14  ;;  %6346 = vst.msk [vmem:[#allocation4 + $0x7c] sm:$0xf] %vm14216_vm10, %v6311_v43 }
 0x4fd   : > { %v4388_v32 = vpop.permute.xlu0 %4387  ;;  %vm14228_vm10 = vmmov %vm14223_vm9 }
 0x4fe   : > { %4425 = vst.msk [vmem:[#allocation4 + $0x70] sm:$0xf] %vm4410_vm2, %v4388_v32 }
 0x4ff   : > { %v4670_v52 = vpop.permute.xlu1 %4669 }
 0x500   : > { %4707 = vst.msk [vmem:[#allocation4 + $0x70] sm:$0xf] %vm4692_vm13, %v4670_v52 }
 0x501   : > { %v6309_v24 = vpop.permute.xlu0 %6308  ;;  %v7390_v5 = vld [vmem:[#allocation5 + $0x38] ss:$2 sm:$0x1f]  ;;  %v7392_v7 = vld [vmem:[#allocation5 + $0x39] ss:$2 sm:$0x1f] }
 0x502   : > { %6345 = vst.msk [vmem:[#allocation4 + $0x74] sm:$0xf] %vm14217_vm11, %v6309_v24  ;;  %v7397_v36 = vmax.f32 %v7390_v5, %v7392_v7  ;;  %vm14229_vm11 = vmmov %vm14227_vm0 }
 0x503   : > { %v7394_v46 = vld [vmem:[#allocation5 + $0x46] ss:$2 sm:$0x1f]  ;;  %v7396_v20 = vld [vmem:[#allocation5 + $0x47] ss:$2 sm:$0x1f]  ;;  %v6485_v12 = vpop.permute.xlu1 %6484 }
 0x504   : > { %v7398_v29 = vmax.f32 %v7394_v46, %v7396_v20  ;;  %6521 = vst.msk [vmem:[#allocation4 + $0x74] sm:$0xf] %vm14218_vm5, %v6485_v12  ;;  %vm14230_vm5 = vmmov %vm14225_vm8  ;;  %v7621_v12 = vld [vmem:[%s13493_s5 + $0x80] sm:$0xff] }
 0x505   : > { %v2854_v55 = vpop.permute.xlu0 %2853 }
 0x506   : > { %2889 = vst.msk [vmem:[#allocation4 + $0x80] sm:$0xf] %vm14219_vm7, %v2854_v55  ;;  %v7399_v54 = vmax.f32 %v7397_v36, %v7398_v29  ;;  %vm14231_vm7 = vcmask 650816   ;;  %v7622_v36 = vld [vmem:[%s13493_s5 + $0x88] sm:$0xff]  ;;  %v7605_v29 = vld [vmem:[%s13493_s5] sm:$0xff] }
 0x507   : > { %v3139_v41 = vpop.permute.xlu1 %3138  ;;  %v9041_v55 = vpack.c.bf16 %v7622_v36, %v7621_v12  ;;  %v7635_v36 = vld [vmem:[%s13493_s5 + $0xf0] sm:$0xff] }
 0x508   : > { %3174 = vst.msk [vmem:[#allocation4 + $0x80] sm:$0xf] %vm14220_vm6, %v3139_v41  ;;  %v7400_v37 = vadd.f32 %v12748_v51, %v7399_v54  ;;  %vm14232_vm6 = vmmov %vm14227_vm0  ;;  %v7606_v54 = vld [vmem:[%s13493_s5 + $0x8] sm:$0xff]  ;;  %v7623_v41 = vld [vmem:[%s13493_s5 + $0x90] sm:$0xff] }
 0x509   : > { %v4672_v62 = vpop.permute.xlu0 %4671  ;;  %9042 = vmatprep.subr.bf16.mxu1 %v9041_v55 }
 0x50a   : > { %4708 = vst.msk [vmem:[#allocation4 + $0x78] sm:$0xf] %vm4692_vm13, %v4672_v62  ;;  %v7401_v49 = vmax.f32 %v7400_v37, 0.0  ;;  %v7624_v62 = vld [vmem:[%s13493_s5 + $0x98] sm:$0xff] }
 0x50b   : > { %v4793_v15 = vpop.permute.xlu1 %4792 }
 0x50c   : > { %4829 = vst.msk [vmem:[#allocation4 + $0x78] sm:$0xf] %vm14221_vm15, %v4793_v15  ;;  %7402 = vst [vmem:[#allocation6 + $0xa] sm:$0x1f] %v7401_v49  ;;  %vm14233_vm15 = vcmask 716416   ;;  %v9043_v49 = vpack.c.bf16 %v7606_v54, %v7605_v29  ;;  %v9045_v15 = vpack.c.bf16 %v7624_v62, %v7623_v41  ;;  %v7636_v29 = vld [vmem:[%s13493_s5 + $0xf8] sm:$0xff] }
 0x50d   : > { %v6487_v35 = vpop.permute.xlu0 %6486  ;;  %v9069_v54 = vpack.c.bf16 %v7636_v29, %v7635_v36  ;;  %v7619_v41 = vld [vmem:[%s13493_s5 + $0x70] sm:$0xff]  ;;  %v7620_v62 = vld [vmem:[%s13493_s5 + $0x78] sm:$0xff] }
 0x50e   : > { %6522 = vst.msk [vmem:[#allocation4 + $0x7c] sm:$0xf] %vm14222_vm3, %v6487_v35  ;;  %vm14234_vm3 = vcmask 126016   ;;  %v7607_v35 = vld [vmem:[%s13493_s5 + $0x10] sm:$0xff]  ;;  %9044 = vmatpush3.bf16.msra.mxu1 %v9043_v49  ;;  %v7664_v29 = vld [vmem:[%s13493_s5 + $0x1d8] sm:$0xff] }
 0x50f   : > { %v6789_v9 = vpop.permute.xlu1 %6788  ;;  %9046 = vmatprep.subr.bf16.mxu1 %v9045_v15  ;;  %v7653_v15 = vld [vmem:[%s13493_s5 + $0x180] sm:$0xff]  ;;  %v7663_v36 = vld [vmem:[%s13493_s5 + $0x1d0] sm:$0xff] }
 0x510   : > { %6824 = vst.msk [vmem:[#allocation4 + $0x7c] sm:$0xf] %vm14223_vm9, %v6789_v9  ;;  %vm14235_vm9 = vcmask 191616   ;;  %v7608_v9 = vld [vmem:[%s13493_s5 + $0x18] sm:$0xff] }
 0x511   : > { %v4791_v61 = vpop.permute.xlu0 %4790 }
 0x512   : > { %4828 = vst.msk [vmem:[#allocation4 + $0x70] sm:$0xf] %vm14224_vm1, %v4791_v61  ;;  %vm14236_vm1 = vcmask 257216   ;;  %v7625_v61 = vld [vmem:[%s13493_s5 + $0xa0] sm:$0xff] }
 0x513   : > { %v7505_v4 = vld [vmem:[#allocation6 + $0xa] ss:$32 sm:$0x1]  ;;  %v4968_v50 = vpop.permute.xlu1 %4967  ;;  %v7512_v51 = vld [vmem:[#allocation6 + $0xb] ss:$32 sm:$0x1] }
 0x514   : > { %7507 = vrot.lane.b32.xlu1 %v7505_v4, %s9380_s27  ;;  %5005 = vst.msk [vmem:[#allocation4 + $0x70] sm:$0xf] %vm14225_vm8, %v4968_v50  ;;  %v7519_v58 = vld [vmem:[#allocation6 + $0xc] ss:$32 sm:$0x1]  ;;  %vm14237_vm8 = vcmask 322816   ;;  %v9047_v50 = vpack.c.bf16 %v7608_v9, %v7607_v35 }
 0x515   : > { %v6787_v47 = vpop.permute.xlu0 %6786  ;;  %v7526_v27 = vld [vmem:[#allocation6 + $0xd] ss:$32 sm:$0x1]  ;;  %v7533_v31 = vld [vmem:[#allocation6 + $0xe] ss:$32 sm:$0x1] }
 0x516   : > { %6823 = vst.msk [vmem:[#allocation4 + $0x74] sm:$0xf] %vm14226_vm12, %v6787_v47  ;;  %vm14239_vm12 = vcmask 388416   ;;  %v7626_v4 = vld [vmem:[%s13493_s5 + $0xa8] sm:$0xff]  ;;  %9048 = vmatpush3.bf16.msra.mxu1 %v9047_v50 }
 0x517   : > { %v6963_v48 = vpop.permute.xlu1 %6962  ;;  %v9049_v47 = vpack.c.bf16 %v7626_v4, %v7625_v61  ;;  %v7654_v35 = vld [vmem:[%s13493_s5 + $0x188] sm:$0xff] }
 0x518   : > { %7514 = vrot.lane.b32.xlu1 %v7512_v51, %s9385_s13  ;;  %6999 = vst.msk [vmem:[#allocation4 + $0x74] sm:$0xf] %vm14227_vm0, %v6963_v48  ;;  %vm14240_vm0 = vmmov %vm14230_vm5  ;;  %v7609_v51 = vld [vmem:[%s13493_s5 + $0x20] sm:$0xff]  ;;  %v7610_v48 = vld [vmem:[%s13493_s5 + $0x28] sm:$0xff]  ;;  %v9073_v9 = vpack.c.bf16 %v7654_v35, %v7653_v15  ;;  %v9093_v15 = vpack.c.bf16 %v7664_v29, %v7663_v36 }
 0x519   : > { %v3260_v21 = vpop.permute.xlu0 %3259  ;;  %9050 = vmatprep.subr.bf16.mxu1 %v9049_v47  ;;  %v7665_v35 = vld [vmem:[%s13493_s5 + $0x1e0] sm:$0xff]  ;;  %v7912_v29 = vld [vmem:[%s13497_s9 + $0x8] sm:$0xff] }
 0x51a   : > { %3295 = vst.msk [vmem:[#allocation4 + $0x80] sm:$0xf] %vm14228_vm10, %v3260_v21  ;;  %vm14241_vm10 = vcmask 454016   ;;  %v7911_v36 = vld [vmem:[%s13497_s9] sm:$0xff] }
 0x51b   : > { %v3557_v34 = vpop.permute.xlu1 %3556 }
 0x51c   : > { %7521 = vrot.lane.b32.xlu1 %v7519_v58, %s9387_s15  ;;  %3592 = vst.msk [vmem:[#allocation4 + $0x80] sm:$0xf] %vm14229_vm11, %v3557_v34  ;;  %vm14243_vm11 = vmmov %vm14232_vm6  ;;  %v7627_v34 = vld [vmem:[%s13493_s5 + $0xb0] sm:$0xff] }
 0x51d   : > { %v4970_v56 = vpop.permute.xlu0 %4969 }
 0x51e   : > { %5006 = vst.msk [vmem:[#allocation4 + $0x78] sm:$0xf] %vm14230_vm5, %v4970_v56  ;;  %vm7452_vm5 = vcmask 385280   ;;  %v7628_v56 = vld [vmem:[%s13493_s5 + $0xb8] sm:$0xff] }
 0x51f   : > { %v3732_v57 = vpop.permute.xlu1 %3731  ;;  %v7016_v63 = vld [vmem:[#allocation4 + $0x70] sm:$0xff] }
 0x520   : > { %7528 = vrot.lane.b32.xlu1 %v7526_v27, %s9388_s16  ;;  %3767 = vst.msk [vmem:[#allocation4 + $0x80] sm:$0xf] %vm14231_vm7, %v3732_v57  ;;  %vm7460_vm7 = vcmask 516480  }
 0x521   : > { %v6965_v60 = vpop.permute.xlu0 %6964 }
 0x522   : > { %7000 = vst.msk [vmem:[#allocation4 + $0x7c] sm:$0xf] %vm14232_vm6, %v6965_v60  ;;  %vm7468_vm6 = vcmask 647680  }
 0x523   : > { %v3909_v1 = vpop.permute.xlu1 %3908 }
 0x524   : > { %7535 = vrot.lane.b32.xlu1 %v7533_v31, %s13664_s19  ;;  %3944 = vst.msk [vmem:[#allocation4 + $0x80] sm:$0xf] %vm14233_vm15, %v3909_v1  ;;  %vm7476_vm15 = vcmask 778880   ;;  %v9051_v31 = vpack.c.bf16 %v7610_v48, %v7609_v51 }
 0x525   : > { %v5417_v40 = vpop.permute.xlu0 %5416 }
 0x526   : > { %5451 = vst.msk [vmem:[#allocation4 + $0x84] sm:$0xf] %vm14234_vm3, %v5417_v40  ;;  %vm7484_vm3 = vcmask 910080   ;;  %v9053_v40 = vpack.c.bf16 %v7628_v56, %v7627_v34  ;;  %9052 = vmatpush3.bf16.msra.mxu1 %v9051_v31 }
 0x527   : > { %v4215_v17 = vpop.permute.xlu1 %4214 }
 0x528   : > { %4250 = vst.msk [vmem:[#allocation4 + $0x80] sm:$0xf] %vm4233_vm14, %v4215_v17  ;;  %vm14238_vm14 = vcmask 978816   ;;  %v7611_v17 = vld [vmem:[%s13493_s5 + $0x30] sm:$0xff]  ;;  %9054 = vmatprep.subr.bf16.mxu1 %v9053_v40 }
 0x529   : > { %v5719_v28 = vpop.permute.xlu0 %5718  ;;  %v7017_v8 = vld [vmem:[#allocation4 + $0x78] sm:$0xff]  ;;  %v7655_v40 = vld [vmem:[%s13493_s5 + $0x190] sm:$0xff] }
 0x52a   : > { %v9360_v33 = vld [vmem:[#allocation4 + $0x74] ss:$8 sps:$4 sm:$0xff]   ;;  %5753 = vst.msk [vmem:[#allocation4 + $0x84] sm:$0xf] %vm14235_vm9, %v5719_v28  ;;  %v8597_v38 = vcombine.low %v7016_v63, %v7017_v8  ;;  %vm7492_vm9 = vcmask 1041280  }
 0x52b   : > { %7322 = vmatprep.mubr.bf16.mxu1 %v9360_v33  ;;  %v4392_v22 = vpop.permute.xlu1 %4391  ;;  %v7612_v28 = vld [vmem:[%s13493_s5 + $0x38] sm:$0xff]  ;;  %v7629_v33 = vld [vmem:[%s13493_s5 + $0xc0] sm:$0xff] }
 0x52c   : > { %7323 = vmatmul.mubr.bf16.gmra.mrb[28].mxu1 %v8597_v38  ;;  %4427 = vst.msk [vmem:[#allocation4 + $0x80] sm:$0xf] %vm4410_vm2, %v4392_v22  ;;  %vm14242_vm2 = vcmask 519616   ;;  %v7630_v38 = vld [vmem:[%s13493_s5 + $0xc8] sm:$0xff]  ;;  %v9055_v22 = vpack.c.bf16 %v7612_v28, %v7611_v17  ;;  %v7656_v17 = vld [vmem:[%s13493_s5 + $0x198] sm:$0xff] }
 0x52d   : > { %v5895_v18 = vpop.permute.xlu0 %5894 }
 0x52e   : > { %5929 = vst.msk [vmem:[#allocation4 + $0x84] sm:$0xf] %vm14236_vm1, %v5895_v18  ;;  %v9057_v18 = vpack.c.bf16 %v7630_v38, %v7629_v33  ;;  %9056 = vmatpush3.bf16.msra.mxu1 %v9055_v22 }
 0x52f   : > { %v4674_v3 = vpop.permute.xlu1 %4673 }
 0x530   : > { %4709 = vst.msk [vmem:[#allocation4 + $0x80] sm:$0xf] %vm4692_vm13, %v4674_v3  ;;  %vm7444_vm13 = vcmask 254080   ;;  %v7613_v3 = vld [vmem:[%s13493_s5 + $0x40] sm:$0xff]  ;;  %9058 = vmatprep.subr.bf16.mxu1 %v9057_v18 }
 0x531   : > { %v6015_v19 = vpop.permute.xlu0 %6014 }
 0x532   : > { %6049 = vst.msk [vmem:[#allocation4 + $0x84] sm:$0xf] %vm14237_vm8, %v6015_v19  ;;  %v7614_v19 = vld [vmem:[%s13493_s5 + $0x48] sm:$0xff] }
 0x533   : > { %v4795_v6 = vpop.permute.xlu1 %4794 }
 0x534   : > { %4830 = vst.msk [vmem:[#allocation4 + $0x80] sm:$0xf] %vm14238_vm14, %v4795_v6  ;;  %v9059_v6 = vpack.c.bf16 %v7614_v19, %v7613_v3 }
 0x535   : > { %v6313_v45 = vpop.permute.xlu0 %6312 }
 0x536   : > { %6347 = vst.msk [vmem:[#allocation4 + $0x84] sm:$0xf] %vm14239_vm12, %v6313_v45  ;;  %9060 = vmatpush3.bf16.msra.mxu1 %v9059_v6 }
 0x537   : > { %v4972_v11 = vpop.permute.xlu1 %4971 }
 0x538   : > { %5007 = vst.msk [vmem:[#allocation4 + $0x80] sm:$0xf] %vm14240_vm0, %v4972_v11 }
 0x539   : > { %v6489_v2 = vpop.permute.xlu0 %6488 }
 0x53a   : > { %6523 = vst.msk [vmem:[#allocation4 + $0x84] sm:$0xf] %vm14241_vm10, %v6489_v2 }
 0x53d   : > { %v6791_v13 = vpop.permute.xlu0 %6790 }
 0x53e   : > { %6825 = vst.msk [vmem:[#allocation4 + $0x84] sm:$0xf] %vm14242_vm2, %v6791_v13 }
 0x541   : > { %v6967_v16 = vpop.permute.xlu0 %6966 }
 0x542   : > { %7001 = vst.msk [vmem:[#allocation4 + $0x84] sm:$0xf] %vm14243_vm11, %v6967_v16 }
 0x545   : > { %v7442_v10 = vpop.permute.xlu0 %7441 }
 0x546   : > { %7445 = vst.msk [vmem:[#allocation7] sm:$0x1] %vm7444_vm13, %v7442_v10 }
 0x549   : > { %v7450_v0 = vpop.permute.xlu0 %7449  ;;  %v7018_v39 = vld [vmem:[#allocation4 + $0x80] sm:$0xff] }
 0x54a   : > { %7453 = vst.msk [vmem:[#allocation7] sm:$0x1] %vm7452_vm5, %v7450_v0  ;;  %v8600_v59 = vcombine.high %v7018_v39, %v7018_v39  ;;  %v8599_v44 = vcombine.low %v7018_v39, %v7018_v39  ;;  %v13201_v39 = vld [vmem:[%s13492_s4] ss:$0 sm:$0xff] }
 0x54c   : > { %7330 = vmatprep.mubr.bf16.mxu1 %v8600_v59 }
 0x54d   : > { %v7458_v42 = vpop.permute.xlu0 %7457  ;;  %7331 = vmatmul.mubr.bf16.gmra.mrb[32].mxu1 %v8599_v44 }
 0x54e   : > { %7461 = vst.msk [vmem:[#allocation7] sm:$0x1] %vm7460_vm7, %v7458_v42  ;;  %v7631_v42 = vld [vmem:[%s13493_s5 + $0xd0] sm:$0xff] }
 0x551   : > { %v7466_v25 = vpop.permute.xlu0 %7465 }
 0x552   : > { %7469 = vst.msk [vmem:[#allocation7] sm:$0x1] %vm7468_vm6, %v7466_v25  ;;  %v8727_v53 = vpop.f32.mrb[20].mxu1  ;;  %v7632_v25 = vld [vmem:[%s13493_s5 + $0xd8] sm:$0xff] }
 0x553   : > { %v8728_v30 = vpop.f32.mrb[21].mxu1 }
 0x554   : > { %v8729_v23 = vadd.f32 %v8728_v30, %v8727_v53  ;;  %v8730_v14 = vpop.f32.mrb[22].mxu1  ;;  %v7615_v53 = vld [vmem:[%s13493_s5 + $0x50] sm:$0xff]  ;;  %v9061_v30 = vpack.c.bf16 %v7632_v25, %v7631_v42  ;;  %v7641_v25 = vld [vmem:[%s13493_s5 + $0x120] sm:$0xff] }
 0x555   : > { %v8731_v43 = vpop.f32.mrb[23].mxu1 }
 0x556   : > { %7348 = vst [vmem:[#allocation5 + $0x50] sm:$0xff] %v8729_v23  ;;  %v8732_v32 = vadd.f32 %v8731_v43, %v8730_v14  ;;  %v7616_v23 = vld [vmem:[%s13493_s5 + $0x58] sm:$0xff]  ;;  %v7633_v14 = vld [vmem:[%s13493_s5 + $0xe0] sm:$0xff]  ;;  %v7634_v43 = vld [vmem:[%s13493_s5 + $0xe8] sm:$0xff]  ;;  %9062 = vmatprep.subr.bf16.mxu1 %v9061_v30 }
 0x557   : > { %v7659_v30 = vld [vmem:[%s13493_s5 + $0x1b0] sm:$0xff] }
 0x558   : > { %7349 = vst [vmem:[#allocation5 + $0x58] sm:$0xff] %v8732_v32 }
 0x55f   : > { %v7404_v45 = vld [vmem:[#allocation5 + $0x54] ss:$2 sm:$0x1f]  ;;  %v7406_v11 = vld [vmem:[#allocation5 + $0x55] ss:$2 sm:$0x1f] }
 0x560   : > { %v7411_v16 = vmax.f32 %v7404_v45, %v7406_v11  ;;  %v9077_v45 = vpack.c.bf16 %v7656_v17, %v7655_v40  ;;  %v7639_v11 = vld [vmem:[%s13493_s5 + $0x110] sm:$0xff] }
 0x562   : > { %v7474_v52 = vpop.permute.xlu0 %7473  ;;  %v7501_v24 = vpop.permute.xlu1 %7500 }
 0x563   : > { %7477 = vst.msk [vmem:[#allocation7] sm:$0x1] %vm7476_vm15, %v7474_v52 }
 0x564   : > { %7503 = vst.msk [vmem:[#allocation7 + $0x8] sm:$0x1] %vm7444_vm13, %v7501_v24  ;;  %v9063_v24 = vpack.c.bf16 %v7616_v23, %v7615_v53  ;;  %v7642_v53 = vld [vmem:[%s13493_s5 + $0x128] sm:$0xff]  ;;  %v7660_v23 = vld [vmem:[%s13493_s5 + $0x1b8] sm:$0xff] }
 0x566   : > { %v7482_v5 = vpop.permute.xlu0 %7481  ;;  %9064 = vmatpush3.bf16.msra.mxu1 %v9063_v24  ;;  %v7661_v24 = vld [vmem:[%s13493_s5 + $0x1c0] sm:$0xff] }
 0x567   : > { %7485 = vst.msk [vmem:[#allocation7] sm:$0x1] %vm7484_vm3, %v7482_v5  ;;  %v9065_v5 = vpack.c.bf16 %v7634_v43, %v7633_v14  ;;  %v9085_v43 = vpack.c.bf16 %v7660_v23, %v7659_v30 }
 0x569   : > { %9066 = vmatprep.subr.bf16.mxu1 %v9065_v5  ;;  %v7662_v5 = vld [vmem:[%s13493_s5 + $0x1c8] sm:$0xff] }
 0x56a   : > { %v7490_v7 = vpop.permute.xlu0 %7489 }
 0x56b   : > { %7493 = vst.msk [vmem:[#allocation7] sm:$0x1] %vm7492_vm9, %v7490_v7  ;;  %v7617_v7 = vld [vmem:[%s13493_s5 + $0x60] sm:$0xff] }
 0x586   : > { %v7508_v46 = vpop.permute.xlu1 %7507 }
 0x587   : > { %7510 = vst.msk [vmem:[#allocation7 + $0x8] sm:$0x1] %vm7452_vm5, %v7508_v46  ;;  %v7618_v46 = vld [vmem:[%s13493_s5 + $0x68] sm:$0xff] }
 0x588   : > { %v9067_v12 = vpack.c.bf16 %v7618_v46, %v7617_v7  ;;  %v7645_v46 = vld [vmem:[%s13493_s5 + $0x140] sm:$0xff] }
 0x58a   : > { %v7515_v20 = vpop.permute.xlu1 %7514  ;;  %9068 = vmatpush3.bf16.msra.mxu1 %v9067_v12  ;;  %v9089_v12 = vpack.c.bf16 %v7662_v5, %v7661_v24  ;;  %v8618_v5 = vld [vmem:[%s13494_s6] ss:$0 sm:$0xff] }
 0x58b   : > { %7517 = vst.msk [vmem:[#allocation7 + $0x8] sm:$0x1] %vm7460_vm7, %v7515_v20  ;;  %9070 = vmatprep.subr.bf16.mxu1 %v9069_v54 }
 0x58e   : > { %v7522_v37 = vpop.permute.xlu1 %7521 }
 0x58f   : > { %7524 = vst.msk [vmem:[#allocation7 + $0x8] sm:$0x1] %vm7468_vm6, %v7522_v37  ;;  %v9071_v37 = vpack.c.bf16 %v7620_v62, %v7619_v41  ;;  %v7647_v62 = vld [vmem:[%s13493_s5 + $0x150] sm:$0xff] }
 0x591   : > { %9072 = vmatpush3.bf16.msra.mxu1 %v9071_v37  ;;  %v7648_v37 = vld [vmem:[%s13493_s5 + $0x158] sm:$0xff] }
 0x592   : > { %v7529_v58 = vpop.permute.xlu1 %7528  ;;  %9074 = vmatprep.subr.bf16.mxu1 %v9073_v9  ;;  %v7666_v9 = vld [vmem:[%s13493_s5 + $0x1e8] sm:$0xff] }
 0x593   : > { %v8733_v21 = vpop.f32.mrb[24].mxu1  ;;  %7531 = vst.msk [vmem:[#allocation7 + $0x8] sm:$0x1] %vm7476_vm15, %v7529_v58 }
 0x594   : > { %v8734_v27 = vpop.f32.mrb[25].mxu1 }
 0x595   : > { %v8735_v57 = vadd.f32 %v8734_v27, %v8733_v21  ;;  %v8736_v60 = vpop.f32.mrb[26].mxu1 }
 0x596   : > { %v8737_v1 = vpop.f32.mrb[27].mxu1  ;;  %v7536_v8 = vpop.permute.xlu1 %7535 }
 0x597   : > { %7350 = vst [vmem:[#allocation5 + $0x60] sm:$0xff] %v8735_v57  ;;  %v8738_v63 = vadd.f32 %v8737_v1, %v8736_v60  ;;  %7538 = vst.msk [vmem:[#allocation7 + $0x8] sm:$0x1] %vm7484_vm3, %v7536_v8  ;;  %v7637_v60 = vld [vmem:[%s13493_s5 + $0x100] sm:$0xff]  ;;  %v7638_v1 = vld [vmem:[%s13493_s5 + $0x108] sm:$0xff] }
 0x598   : > { %v9075_v22 = vpack.c.bf16 %v7638_v1, %v7637_v60  ;;  %v9394_v1 = vmov 0.0|0.0  }
 0x599   : > { %7351 = vst [vmem:[#allocation5 + $0x68] sm:$0xff] %v8738_v63 }
 0x5a0   : > { %v7408_v2 = vld [vmem:[#allocation5 + $0x62] ss:$2 sm:$0x1f]  ;;  %v7410_v13 = vld [vmem:[#allocation5 + $0x63] ss:$2 sm:$0x1f] }
 0x5a1   : > { %v7412_v10 = vmax.f32 %v7408_v2, %v7410_v13  ;;  %v7640_v2 = vld [vmem:[%s13493_s5 + $0x118] sm:$0xff] }
 0x5a2   : > { %v7601_v13 = vld [vmem:[#allocation7] sm:$0xff] }
 0x5a3   : > { %v7413_v0 = vmax.f32 %v7411_v16, %v7412_v10  ;;  %v7657_v16 = vld [vmem:[%s13493_s5 + $0x1a0] sm:$0xff]  ;;  %v7658_v10 = vld [vmem:[%s13493_s5 + $0x1a8] sm:$0xff] }
 0x5a4   : > { %v9081_v42 = vpack.c.bf16 %v7658_v10, %v7657_v16  ;;  %v7825_v10 = vld [vmem:[%s13495_s7 + $0x40] sm:$0xff] }
 0x5a5   : > { %v7414_v59 = vadd.f32 %v13201_v39, %v7413_v0 }
 0x5a7   : > { %v7415_v44 = vmax.f32 %v7414_v59, 0.0  ;;  %v9079_v59 = vpack.c.bf16 %v7640_v2, %v7639_v11  ;;  %v7823_v2 = vld [vmem:[%s13495_s7 + $0x30] sm:$0xff] }
 0x5a9   : > { %7416 = vst [vmem:[#allocation6 + $0xf] sm:$0x1f] %v7415_v44 }
 0x5b0   : > { %v7557_v32 = vld [vmem:[#allocation6 + $0x12] ss:$32 sm:$0x1]  ;;  %v7540_v52 = vld [vmem:[#allocation6 + $0xf] ss:$32 sm:$0x1] }
 0x5b1   : > { %7559 = vrot.lane.b32.xlu0 %v7557_v32, %s9380_s27  ;;  %7542 = vrot.lane.b32.xlu1 %v7540_v52, %s13998_s12  ;;  %v7547_v20 = vld [vmem:[#allocation6 + $0x10] ss:$32 sm:$0x1]  ;;  %v7550_v55 = vld [vmem:[#allocation6 + $0x11] ss:$32 sm:$0x1] }
 0x5b2   : > { %7548 = vst.msk [vmem:[#allocation7 + $0x10] sm:$0x1] %vm7436_vm4, %v7547_v20  ;;  %v7564_v49 = vld [vmem:[#allocation6 + $0x13] ss:$32 sm:$0x1]  ;;  %v7643_v32 = vld [vmem:[%s13493_s5 + $0x130] sm:$0xff] }
 0x5b3   : > { %v7644_v52 = vld [vmem:[%s13493_s5 + $0x138] sm:$0xff]  ;;  %v7646_v20 = vld [vmem:[%s13493_s5 + $0x148] sm:$0xff] }
 0x5b4   : > { %v9087_v7 = vpack.c.bf16 %v7644_v52, %v7643_v32  ;;  %v9091_v41 = vpack.c.bf16 %v7646_v20, %v7645_v46  ;;  %v7832_v52 = vld [vmem:[%s13495_s7 + $0x78] sm:$0xff] }
 0x5b5   : > { %7552 = vrot.lane.b32.xlu1 %v7550_v55, %s9379_s26 }
 0x5b9   : > { %7566 = vrot.lane.b32.xlu1 %v7564_v49, %s9385_s13 }
 0x5ff   : > { %v8739_v61 = vpop.f32.mrb[28].mxu1 }
 0x600   : > { %v8740_v4 = vpop.f32.mrb[29].mxu1 }
 0x601   : > { %v8741_v50 = vadd.f32 %v8740_v4, %v8739_v61  ;;  %v8742_v47 = vpop.f32.mrb[30].mxu1 }
 0x602   : > { %v8743_v51 = vpop.f32.mrb[31].mxu1 }
 0x603   : > { %7352 = vst [vmem:[#allocation5 + $0x70] sm:$0xff] %v8741_v50  ;;  %v8744_v48 = vadd.f32 %v8743_v51, %v8742_v47  ;;  %v9095_v50 = vpack.c.bf16 %v7648_v37, %v7647_v62  ;;  %v9097_v47 = vpack.c.bf16 %v7666_v9, %v7665_v35  ;;  %v7649_v51 = vld [vmem:[%s13493_s5 + $0x160] sm:$0xff]  ;;  %v7913_v62 = vld [vmem:[%s13497_s9 + $0x10] sm:$0xff]  ;;  %v7914_v37 = vld [vmem:[%s13497_s9 + $0x18] sm:$0xff] }
 0x604   : > { %v7916_v35 = vld [vmem:[%s13497_s9 + $0x28] sm:$0xff] }
 0x605   : > { %7353 = vst [vmem:[#allocation5 + $0x78] sm:$0xff] %v8744_v48  ;;  %v7650_v48 = vld [vmem:[%s13493_s5 + $0x168] sm:$0xff] }
 0x60c   : > { %v7418_v28 = vld [vmem:[#allocation5 + $0x70] ss:$2 sm:$0x1f]  ;;  %v7420_v63 = vld [vmem:[#allocation5 + $0x71] ss:$2 sm:$0x1f] }
 0x60d   : > { %v7425_v18 = vmax.f32 %v7418_v28, %v7420_v63 }
 0x620   : > { %v8745_v21 = vpop.f32.mrb[32].mxu1 }
 0x621   : > { %v8746_v58 = vpop.f32.mrb[33].mxu1 }
 0x622   : > { %v8747_v34 = vadd.f32 %v8746_v58, %v8745_v21  ;;  %v8748_v56 = vpop.f32.mrb[34].mxu1  ;;  %v7667_v21 = vld [vmem:[%s13493_s5 + $0x1f0] sm:$0xff]  ;;  %v7668_v58 = vld [vmem:[%s13493_s5 + $0x1f8] sm:$0xff] }
 0x623   : > { %v8749_v27 = vpop.f32.mrb[35].mxu1  ;;  %v7543_v57 = vpop.permute.xlu1 %7542  ;;  %v9101_v56 = vpack.c.bf16 %v7668_v58, %v7667_v21  ;;  %v7922_v21 = vld [vmem:[%s13497_s9 + $0x58] sm:$0xff] }
 0x624   : > { %7354 = vst [vmem:[#allocation5 + $0x80] sm:$0xff] %v8747_v34  ;;  %7545 = vst.msk [vmem:[#allocation7 + $0x8] sm:$0x1] %vm7492_vm9, %v7543_v57  ;;  %v7560_v8 = vpop.permute.xlu0 %7559  ;;  %v9099_v34 = vpack.c.bf16 %v7650_v48, %v7649_v51  ;;  %v7651_v27 = vld [vmem:[%s13493_s5 + $0x170] sm:$0xff]  ;;  %v7652_v57 = vld [vmem:[%s13493_s5 + $0x178] sm:$0xff] }
 0x625   : > { %v7921_v48 = vld [vmem:[%s13497_s9 + $0x50] sm:$0xff] }
 0x626   : > { %v9145_v58 = vpack.c.bf16 %v7922_v21, %v7921_v48 }
 0x627   : > { %v7553_v31 = vpop.permute.xlu1 %7552 }
 0x628   : > { %7555 = vst.msk [vmem:[#allocation7 + $0x10] sm:$0x1] %vm7444_vm13, %v7553_v31  ;;  %v9103_v31 = vpack.c.bf16 %v7652_v57, %v7651_v27  ;;  %v7925_v57 = vld [vmem:[%s13497_s9 + $0x70] sm:$0xff] }
 0x629   : > { %7562 = vst.msk [vmem:[#allocation7 + $0x10] sm:$0x1] %vm7452_vm5, %v7560_v8  ;;  %v7817_v8 = vld [vmem:[%s13495_s7] sm:$0xff] }
 0x62b   : > { %v7422_v33 = vld [vmem:[#allocation5 + $0x7e] ss:$2 sm:$0x1f]  ;;  %v7424_v38 = vld [vmem:[#allocation5 + $0x7f] ss:$2 sm:$0x1f]  ;;  %v7567_v19 = vpop.permute.xlu1 %7566 }
 0x62c   : > { %v7426_v3 = vmax.f32 %v7422_v33, %v7424_v38  ;;  %v7602_v6 = vld [vmem:[#allocation7 + $0x8] sm:$0xff]  ;;  %7569 = vst.msk [vmem:[#allocation7 + $0x10] sm:$0x1] %vm7460_vm7, %v7567_v19  ;;  %v7818_v33 = vld [vmem:[%s13495_s7 + $0x8] sm:$0xff] }
 0x62d   : > { %7740 = vmatprep.mubr.f32.mxu1 %v7602_v6  ;;  %v9106_v38 = vpack.c.bf16 %v7818_v33, %v7817_v8  ;;  %v7821_v6 = vld [vmem:[%s13495_s7 + $0x20] sm:$0xff] }
 0x62e   : > { %v7427_v0 = vmax.f32 %v7425_v18, %v7426_v3  ;;  %7741 = vmatmul.mubr.f32.vlgmr.msra.gmra.mrb[36].mxu1 %v7601_v13  ;;  %v7820_v18 = vld [vmem:[%s13495_s7 + $0x18] sm:$0xff] }
 0x62f   : > { %9076 = vmatpush3.bf16.msra.mxu1 %v9075_v22  ;;  %v7819_v22 = vld [vmem:[%s13495_s7 + $0x10] sm:$0xff]  ;;  %v7824_v13 = vld [vmem:[%s13495_s7 + $0x38] sm:$0xff] }
 0x630   : > { %v7428_v44 = vadd.f32 %v13201_v39, %v7427_v0  ;;  %9078 = vmatprep.subr.bf16.mxu1 %v9077_v45  ;;  %v9083_v39 = vpack.c.bf16 %v7642_v53, %v7641_v25  ;;  %v9109_v19 = vpack.c.bf16 %v7820_v18, %v7819_v22  ;;  %v7822_v45 = vld [vmem:[%s13495_s7 + $0x28] sm:$0xff]  ;;  %v9115_v16 = vpack.c.bf16 %v7824_v13, %v7823_v2 }
 0x631   : > { %v9112_v11 = vpack.c.bf16 %v7822_v45, %v7821_v6  ;;  %v7826_v0 = vld [vmem:[%s13495_s7 + $0x48] sm:$0xff] }
 0x632   : > { %v7429_v14 = vmax.f32 %v7428_v44, 0.0  ;;  %v7827_v44 = vld [vmem:[%s13495_s7 + $0x50] sm:$0xff] }
 0x633   : > { %9080 = vmatpush3.bf16.msra.mxu1 %v9079_v59  ;;  %v9118_v59 = vpack.c.bf16 %v7826_v0, %v7825_v10 }
 0x634   : > { %7430 = vst [vmem:[#allocation6 + $0x14] sm:$0x1f] %v7429_v14  ;;  %9082 = vmatprep.subr.bf16.mxu1 %v9081_v42  ;;  %v7828_v42 = vld [vmem:[%s13495_s7 + $0x58] sm:$0xff]  ;;  %v7829_v14 = vld [vmem:[%s13495_s7 + $0x60] sm:$0xff] }
 0x635   : > { %v9121_v25 = vpack.c.bf16 %v7828_v42, %v7827_v44 }
 0x637   : > { %9084 = vmatpush3.bf16.msra.mxu1 %v9083_v39  ;;  %v7830_v39 = vld [vmem:[%s13495_s7 + $0x68] sm:$0xff] }
 0x638   : > { %9086 = vmatprep.subr.bf16.mxu1 %v9085_v43  ;;  %v7831_v43 = vld [vmem:[%s13495_s7 + $0x70] sm:$0xff]  ;;  %v9124_v32 = vpack.c.bf16 %v7830_v39, %v7829_v14 }
 0x639   : > { %v9127_v24 = vpack.c.bf16 %v7832_v52, %v7831_v43 }
 0x63b   : > { %v7578_v55 = vld [vmem:[#allocation6 + $0x15] ss:$32 sm:$0x1]  ;;  %v7571_v54 = vld [vmem:[#allocation6 + $0x14] ss:$32 sm:$0x1]  ;;  %9088 = vmatpush3.bf16.msra.mxu1 %v9087_v7 }
 0x63c   : > { %7580 = vrot.lane.b32.xlu1 %v7578_v55, %s9388_s16  ;;  %7573 = vrot.lane.b32.xlu0 %v7571_v54, %s9387_s15  ;;  %v7599_v49 = vld [vmem:[#allocation6 + $0x18] ss:$32 sm:$0x1]  ;;  %v7592_v61 = vld [vmem:[#allocation6 + $0x17] ss:$32 sm:$0x1]  ;;  %v9130_v54 = vpack.c.bf16 %v7912_v29, %v7911_v36  ;;  %s386_s16 = scalar_lea.vmem %s13499_s11, %s8064_s14 }
 0x63d   : > { %9090 = vmatprep.subr.bf16.mxu1 %v9089_v12  ;;  %7600 = vst.msk [vmem:[#allocation7 + $0x18] sm:$0x1] %vm7436_vm4, %v7599_v49  ;;  %v7585_v4 = vld [vmem:[#allocation6 + $0x16] ss:$32 sm:$0x1]  ;;  %s14244_s15 = smov 96   ;;  %v9133_v49 = vpack.c.bf16 %v7914_v37, %v7913_v62 }
 0x63e   : > { %vm9395_vm4 = vmmov 0  }
 0x63f   : > { %9092 = vmatpush3.bf16.msra.mxu1 %v9091_v41 }
 0x640   : > { %7594 = vrot.lane.b32.xlu1 %v7592_v61, %s13998_s12  ;;  %7587 = vrot.lane.b32.xlu0 %v7585_v4, %s14244_s15  ;;  %v7917_v61 = vld [vmem:[%s13497_s9 + $0x30] sm:$0xff] }
 0x641   : > { %9094 = vmatprep.subr.bf16.mxu1 %v9093_v15  ;;  %v7915_v15 = vld [vmem:[%s13497_s9 + $0x20] sm:$0xff] }
 0x642   : > { %v9136_v9 = vpack.c.bf16 %v7916_v35, %v7915_v15 }
 0x643   : > { %9096 = vmatpush3.bf16.msra.mxu1 %v9095_v50  ;;  %v7919_v50 = vld [vmem:[%s13497_s9 + $0x40] sm:$0xff] }
 0x644   : > { %9098 = vmatprep.subr.bf16.mxu1 %v9097_v47  ;;  %v7604_v60 = vld [vmem:[#allocation7 + $0x18] sm:$0xff]  ;;  %v7920_v47 = vld [vmem:[%s13497_s9 + $0x48] sm:$0xff] }
 0x645   : > { %7810 = vmatprep.mubr.f32.mxu1 %v7604_v60  ;;  %v9142_v51 = vpack.c.bf16 %v7920_v47, %v7919_v50  ;;  %v7926_v60 = vld [vmem:[%s13497_s9 + $0x78] sm:$0xff] }
 0x647   : > { %9100 = vmatpush3.bf16.msra.mxu1 %v9099_v34  ;;  %v7923_v34 = vld [vmem:[%s13497_s9 + $0x60] sm:$0xff] }
 0x648   : > { %9102 = vmatprep.subr.bf16.mxu1 %v9101_v56  ;;  %v7924_v56 = vld [vmem:[%s13497_s9 + $0x68] sm:$0xff] }
 0x649   : > { %v9148_v27 = vpack.c.bf16 %v7924_v56, %v7923_v34 }
 0x64b   : > { %9104 = vmatpush3.bf16.msra.mxu1 %v9103_v31  ;;  %v9151_v31 = vpack.c.bf16 %v7926_v60, %v7925_v57 }
 0x64c   : > { %9105 = vmatprep.subr.bf16.mxu1 %v9394_v1 }
 0x6ae   : > { %v7574_v40 = vpop.permute.xlu0 %7573  ;;  %v7581_v17 = vpop.permute.xlu1 %7580 }
 0x6af   : > { %7576 = vst.msk [vmem:[#allocation7 + $0x10] sm:$0x1] %vm7468_vm6, %v7574_v40  ;;  %v8619_v40 = vld [vmem:[%s13496_s8] ss:$0 sm:$0xff] }
 0x6b0   : > { %7583 = vst.msk [vmem:[#allocation7 + $0x10] sm:$0x1] %vm7476_vm15, %v7581_v17 }
 0x6b2   : > { %v7588_v28 = vpop.permute.xlu0 %7587  ;;  %v7595_v63 = vpop.permute.xlu1 %7594 }
 0x6b3   : > { %7590 = vst.msk [vmem:[#allocation7 + $0x10] sm:$0x1] %vm7484_vm3, %v7588_v28 }
 0x6b4   : > { %7597 = vst.msk [vmem:[#allocation7 + $0x10] sm:$0x1] %vm7492_vm9, %v7595_v63 }
 0x6bb   : > { %v7603_v3 = vld [vmem:[#allocation7 + $0x10] sm:$0xff] }
 0x6bc   : > { %7811 = vmatmul.mubr.f32.vlgmr.msra.gmra.mrb[38].mxu1 %v7603_v3 }
 0x6bd   : > { %9107 = vmatpush3.bf16.msra.mxu1 %v9106_v38  ;;  %9003 = vmatprep.mubr.msk.f32.mxu1 %vm9395_vm4, %v9393_v26 }
 0x6be   : > { %9108 = vmatprep.subr.bf16.mxu1 %v9394_v1 }
 0x6c1   : > { %9110 = vmatpush3.bf16.msra.mxu1 %v9109_v19 }
 0x6c2   : > { %9111 = vmatprep.subr.bf16.mxu1 %v9394_v1 }
 0x6c5   : > { %9113 = vmatpush3.bf16.msra.mxu1 %v9112_v11 }
 0x6c6   : > { %9114 = vmatprep.subr.bf16.mxu1 %v9394_v1 }
 0x6c9   : > { %9116 = vmatpush3.bf16.msra.mxu1 %v9115_v16 }
 0x6ca   : > { %9117 = vmatprep.subr.bf16.mxu1 %v9394_v1 }
 0x6cd   : > { %9119 = vmatpush3.bf16.msra.mxu1 %v9118_v59 }
 0x6ce   : > { %9120 = vmatprep.subr.bf16.mxu1 %v9394_v1 }
 0x6d1   : > { %9122 = vmatpush3.bf16.msra.mxu1 %v9121_v25 }
 0x6d2   : > { %9123 = vmatprep.subr.bf16.mxu1 %v9394_v1 }
 0x6d5   : > { %9125 = vmatpush3.bf16.msra.mxu1 %v9124_v32 }
 0x6d6   : > { %9126 = vmatprep.subr.bf16.mxu1 %v9394_v1 }
 0x6d9   : > { %9128 = vmatpush3.bf16.msra.mxu1 %v9127_v24 }
 0x6da   : > { %9129 = vmatprep.subr.bf16.mxu1 %v9394_v1 }
 0x701   : > { %v8783_v53 = vpop.f32.mrb[36].mxu1 }
 0x702   : > { %v8784_v30 = vpop.f32.mrb[37].mxu1 }
 0x703   : > { %v8785_v23 = vadd.f32 %v8784_v30, %v8783_v53 }
 0x705   : > { %v7743_v20 = vadd.f32 %v8785_v23, %v8618_v5 }
 0x78f   : > { %v8818_v7 = vpop.f32.mrb[38].mxu1 }
 0x790   : > { %v8819_v46 = vpop.f32.mrb[39].mxu1 }
 0x791   : > { %v8820_v12 = vadd.f32 %v8819_v46, %v8818_v7 }
 0x793   : > { %v7813_v55 = vadd.f32 %v8820_v12, %v7743_v20 }
 0x795   : > { %v7816_v41 = vmax.f32 %v7813_v55, 0.0 }
 0x797   : > { %9004 = vmatmul.mubr.f32.vlgmr.msra.gmra.mrb[40].mxu1 %v7816_v41 }
 0x798   : > { %9131 = vmatpush3.bf16.msra.mxu1 %v9130_v54  ;;  %9038 = vmatprep.mubr.msk.f32.mxu1 %vm9395_vm4, %v9393_v26  ;;  %v7918_v26 = vld [vmem:[%s13497_s9 + $0x38] sm:$0xff] }
 0x799   : > { %9132 = vmatprep.subr.bf16.mxu1 %v9394_v1  ;;  %v9139_v4 = vpack.c.bf16 %v7918_v26, %v7917_v61 }
 0x79c   : > { %9134 = vmatpush3.bf16.msra.mxu1 %v9133_v49 }
 0x79d   : > { %9135 = vmatprep.subr.bf16.mxu1 %v9394_v1 }
 0x7a0   : > { %9137 = vmatpush3.bf16.msra.mxu1 %v9136_v9 }
 0x7a1   : > { %9138 = vmatprep.subr.bf16.mxu1 %v9394_v1 }
 0x7a4   : > { %9140 = vmatpush3.bf16.msra.mxu1 %v9139_v4 }
 0x7a5   : > { %9141 = vmatprep.subr.bf16.mxu1 %v9394_v1 }
 0x7a8   : > { %9143 = vmatpush3.bf16.msra.mxu1 %v9142_v51 }
 0x7a9   : > { %9144 = vmatprep.subr.bf16.mxu1 %v9394_v1 }
 0x7ac   : > { %9146 = vmatpush3.bf16.msra.mxu1 %v9145_v58 }
 0x7ad   : > { %9147 = vmatprep.subr.bf16.mxu1 %v9394_v1 }
 0x7b0   : > { %9149 = vmatpush3.bf16.msra.mxu1 %v9148_v27 }
 0x7b1   : > { %9150 = vmatprep.subr.bf16.mxu1 %v9394_v1  ;;  %v8620_v1 = vld [vmem:[%s13498_s10] ss:$0 sm:$0xff] }
 0x7b4   : > { %9152 = vmatpush3.bf16.msra.mxu1 %v9151_v31 }
 0x86a   : > { %v7906_v17 = vpop.f32.mrb[40].mxu1 }
 0x86b   : > { %v7907_v28 = vadd.f32 %v8619_v40, %v7906_v17  ;;  %v9005_v63 = vpop.f32.mrb[41].mxu1 }
 0x86d   : > { %v7910_v8 = vmax.f32 %v7907_v28, 0.0 }
 0x86f   : > { %9039 = vmatmul.mubr.f32.vlgmr.msra.gmra.mrb[42].mxu1 %v7910_v8 }
 0x942   : > { %v8000_v33 = vpop.f32.mrb[42].mxu1 }
 0x943   : > { %v8001_v38 = vadd.f32 %v8620_v1, %v8000_v33  ;;  %v9040_v22 = vpop.f32.mrb[43].mxu1 }
 0x945   : > { %8004 = vst [vmem:[%s386_s16] sm:$0xff] %v8001_v38 }
 0x946 PF: > { %s21_s17 = sadd.s32 1, %s9375_s17  }
 0x947   : > { %p18_p5 = scmp.ge.s32.totalorder %s21_s17, 4  }
 0x949   :  { %20 = sbr.rel (!%p18_p5) target bundleno = 1 (0x1), region = 137 }

</bundles_post_ra>
